<compile_context>
chip_gen: v5e
topology: v5e:2x2
jax: 0.10.0
libtpu: 0.0.40
codegen_flags: <defaults>
</compile_context>

<pallas_src>
import jax
import jax.numpy as jnp
import numpy as np
from jax.experimental import pallas as pl
from jax.experimental.pallas import tpu as pltpu

WIDTH = 12     # channel width inside the network
KERW = 128     # DenseNet hidden width (ker_width)
RANK = 4
FC1 = 128      # fc1 hidden width
BN_EPS = 1e-5


# ----------------------------------------------------------------------------
# In-kernel layer body (single batch element)
# ----------------------------------------------------------------------------
def _lowrank_block(v, wpp, bpp, wphi2, bphi2, wpsi2, bpsi2, imask, gsel, ww, bw):
    """z = LowRank2d(v) + w_l(v) for one batch element.  v: (n, C) f32 -> (n, C)."""
    f32 = jnp.float32
    # phi / psi hidden layers in ONE matmul (concatenated weights), then ReLU.
    h = jnp.dot(v, wpp, preferred_element_type=f32) + bpp            # (n, 2*KERW)
    h = jnp.maximum(h, 0.0)
    phi_h = h[:, :KERW]                                              # (n, KERW)
    psi_h = h[:, KERW:]                                              # (n, KERW)

    # coeff[k] = sum_n psi_e[n, k] * v[n, i_k]   (psi_e = psi_h @ W_psi2 + b_psi2,
    #                                             never materialized)
    g = jax.lax.dot_general(v, psi_h, (((0,), (0,)), ((), ())),
                            preferred_element_type=f32)              # (C, KERW) = v^T psi_h
    a = jnp.dot(g, wpsi2, preferred_element_type=f32)                # (C, OIRp)
    sv = jnp.sum(v, axis=0, keepdims=True)                           # (1, C)
    coeff = (jnp.sum(a * imask, axis=0, keepdims=True)
             + bpsi2 * jnp.dot(sv, imask, preferred_element_type=f32))   # (1, OIRp)

    # out[m, o] = sum_k phi_e[m, k] * coeff[k] * gsel[k, o]   (phi_e never materialized)
    w_eff = jnp.dot(wphi2 * coeff, gsel, preferred_element_type=f32)     # (KERW, C)
    b_eff = jnp.dot(bphi2 * coeff, gsel, preferred_element_type=f32)     # (1, C)
    x1 = jnp.dot(phi_h, w_eff, preferred_element_type=f32) + b_eff       # (n, C)
    x2 = jnp.dot(v, ww, preferred_element_type=f32) + bw                 # (n, C)
    return x1 + x2


def _stats(z):
    """Per-batch BN partials: rows [sum, sum of squares] -> (2, C)."""
    return jnp.concatenate([jnp.sum(z, axis=0, keepdims=True),
                            jnp.sum(z * z, axis=0, keepdims=True)], axis=0)


# ----------------------------------------------------------------------------
# Pallas kernels
# ----------------------------------------------------------------------------
def _first_layer_kernel(x_ref, wfc0_ref, bfc0_ref,
                        wpp_ref, bpp_ref, wphi2_ref, bphi2_ref,
                        wpsi2_ref, bpsi2_ref, imask_ref, gsel_ref,
                        ww_ref, bw_ref,
                        z_ref, stats_ref):
    # fc0 fused in front of layer 0
    v = jnp.dot(x_ref[...], wfc0_ref[...],
                preferred_element_type=jnp.float32) + bfc0_ref[...]
    z = _lowrank_block(v, wpp_ref[...], bpp_ref[...], wphi2_ref[...], bphi2_ref[...],
                       wpsi2_ref[...], bpsi2_ref[...], imask_ref[...], gsel_ref[...],
                       ww_ref[...], bw_ref[...])
    z_ref[...] = z
    stats_ref[...] = _stats(z)


def _mid_layer_kernel(z_in_ref, scale_ref, shift_ref,
                      wpp_ref, bpp_ref, wphi2_ref, bphi2_ref,
                      wpsi2_ref, bpsi2_ref, imask_ref, gsel_ref,
                      ww_ref, bw_ref,
                      z_ref, stats_ref):
    # BN (training-mode stats of the *previous* layer, pre-folded to scale/shift) + ReLU.
    v = jnp.maximum(z_in_ref[...] * scale_ref[...] + shift_ref[...], 0.0)
    z = _lowrank_block(v, wpp_ref[...], bpp_ref[...], wphi2_ref[...], bphi2_ref[...],
                       wpsi2_ref[...], bpsi2_ref[...], imask_ref[...], gsel_ref[...],
                       ww_ref[...], bw_ref[...])
    z_ref[...] = z
    stats_ref[...] = _stats(z)


def _head_kernel(z_in_ref, scale_ref, shift_ref,
                 wfc1_ref, bfc1_ref, wfc2_ref, bfc2_ref, out_ref):
    # bn3 (no ReLU) -> fc1 -> ReLU -> fc2
    v = z_in_ref[...] * scale_ref[...] + shift_ref[...]
    h = jnp.maximum(jnp.dot(v, wfc1_ref[...],
                            preferred_element_type=jnp.float32) + bfc1_ref[...], 0.0)
    out_ref[...] = (jnp.dot(h, wfc2_ref[...], preferred_element_type=jnp.float32)
                    + bfc2_ref[...])


# ----------------------------------------------------------------------------
# Host-side glue
# ----------------------------------------------------------------------------
def _make_masks(C, rank, OIRp):
    """Selection masks for the flattened (o, i, r) axis, zero in the lane-padding region."""
    OIR = C * C * rank
    k = np.arange(OIRp)
    i_of_k = np.where(k < OIR, (k // rank) % C, C)            # sentinel C -> never matches
    o_of_k = np.where(k < OIR, k // (C * rank), C)
    imask = (i_of_k[None, :] == np.arange(C)[:, None]).astype(np.float32)   # (C, OIRp)
    gsel = (o_of_k[:, None] == np.arange(C)[None, :]).astype(np.float32)    # (OIRp, C)
    return jnp.asarray(imask), jnp.asarray(gsel)


def _layer_weight_args(params, l, C, OIRp):
    wphi1, bphi1 = params[f"phi{l}_1"]
    wphi2, bphi2 = params[f"phi{l}_2"]
    wpsi1, bpsi1 = params[f"psi{l}_1"]
    wpsi2, bpsi2 = params[f"psi{l}_2"]
    ww, bw = params[f"w{l}"]
    pad = OIRp - wphi2.shape[-1]
    wpp = jnp.concatenate([wphi1, wpsi1], axis=1)                       # (C, 2*KERW)
    bpp = jnp.concatenate([bphi1, bpsi1], axis=0).reshape(1, 2 * KERW)
    wphi2 = jnp.pad(wphi2, ((0, 0), (0, pad)))                          # (KERW, OIRp)
    wpsi2 = jnp.pad(wpsi2, ((0, 0), (0, pad)))
    bphi2 = jnp.pad(bphi2, (0, pad)).reshape(1, OIRp)
    bpsi2 = jnp.pad(bpsi2, (0, pad)).reshape(1, OIRp)
    return (wpp, bpp, wphi2, bphi2, wpsi2, bpsi2), (ww, bw.reshape(1, C))


def _weight_specs(C, OIRp):
    full = lambda shape: pl.BlockSpec(shape, lambda b: (0, 0))
    return [
        full((C, 2 * KERW)), full((1, 2 * KERW)),     # wpp, bpp
        full((KERW, OIRp)), full((1, OIRp)),          # wphi2, bphi2
        full((KERW, OIRp)), full((1, OIRp)),          # wpsi2, bpsi2
        full((C, OIRp)), full((OIRp, C)),             # imask, gsel
        full((C, C)), full((1, C)),                   # ww, bw
    ]


def _bn_scale_shift(stats, gamma, beta, inv_m):
    """Fold per-batch [sum, sumsq] partials + affine params into one (scale, shift) pair.
    Training-mode BatchNorm1d: batch mean, biased batch variance, eps=1e-5."""
    s = jnp.sum(stats, axis=0)                       # (2, C)
    mean = s[0:1, :] * inv_m                         # (1, C)
    var = s[1:2, :] * inv_m - mean * mean            # (1, C)
    scale = gamma.reshape(1, -1) * jax.lax.rsqrt(var + BN_EPS)
    shift = beta.reshape(1, -1) - mean * scale
    return scale, shift


def net2d_forward(x, params):
    C = WIDTH
    B, Sx, Sy, Cin = x.shape
    n = Sx * Sy
    inv_m = 1.0 / float(B * n)
    OIR = C * C * RANK
    OIRp = ((OIR + 127) // 128) * 128                # 576 -> 640 (lane-dense)
    imask, gsel = _make_masks(C, RANK, OIRp)

    x = x.reshape(B, n, Cin)
    wspecs = _weight_specs(C, OIRp)
    cparams = pltpu.CompilerParams(dimension_semantics=("parallel",))

    z_spec = pl.BlockSpec((None, n, C), lambda b: (b, 0, 0))
    stats_spec = pl.BlockSpec((None, 2, C), lambda b: (b, 0, 0))
    vec_spec = pl.BlockSpec((1, C), lambda b: (0, 0))

    layer_out_shape = (jax.ShapeDtypeStruct((B, n, C), jnp.float32),
                       jax.ShapeDtypeStruct((B, 2, C), jnp.float32))
    layer_out_specs = (z_spec, stats_spec)

    # ---- layer 0 (fc0 fused in) ----
    wfc0, bfc0 = params["fc0"]
    core, (ww, bw) = _layer_weight_args(params, 0, C, OIRp)
    z, stats = pl.pallas_call(
        _first_layer_kernel,
        out_shape=layer_out_shape,
        grid=(B,),
        in_specs=[pl.BlockSpec((None, n, Cin), lambda b: (b, 0, 0)),
                  pl.BlockSpec((Cin, C), lambda b: (0, 0)),
                  vec_spec] + wspecs,
        out_specs=layer_out_specs,
        compiler_params=cparams,
    )(x, wfc0, bfc0.reshape(1, C), *core, imask, gsel, ww, bw)

    # ---- layers 1..3 (BN_{l-1} + ReLU fused in) ----
    for l in range(1, 4):
        gma, bta = params[f"bn{l-1}"]
        scale, shift = _bn_scale_shift(stats, gma, bta, inv_m)
        core, (ww, bw) = _layer_weight_args(params, l, C, OIRp)
        z, stats = pl.pallas_call(
            _mid_layer_kernel,
            out_shape=layer_out_shape,
            grid=(B,),
            in_specs=[z_spec, vec_spec, vec_spec] + wspecs,
            out_specs=layer_out_specs,
            compiler_params=cparams,
        )(z, scale, shift, *core, imask, gsel, ww, bw)

    # ---- head: bn3 (no ReLU) -> fc1 -> ReLU -> fc2 ----
    gma, bta = params["bn3"]
    scale, shift = _bn_scale_shift(stats, gma, bta, inv_m)
    wfc1, bfc1 = params["fc1"]
    wfc2, bfc2 = params["fc2"]
    out = pl.pallas_call(
        _head_kernel,
        out_shape=jax.ShapeDtypeStruct((B, n, 1), jnp.float32),
        grid=(B,),
        in_specs=[z_spec, vec_spec, vec_spec,
                  pl.BlockSpec((C, FC1), lambda b: (0, 0)),
                  pl.BlockSpec((1, FC1), lambda b: (0, 0)),
                  pl.BlockSpec((FC1, 1), lambda b: (0, 0)),
                  pl.BlockSpec((1, 1), lambda b: (0, 0))],
        out_specs=pl.BlockSpec((None, n, 1), lambda b: (b, 0, 0)),
        compiler_params=cparams,
    )(z, scale, shift, wfc1, bfc1.reshape(1, FC1), wfc2, bfc2.reshape(1, 1))

    return out.reshape(B, Sx, Sy, 1)


# ----------------------------------------------------------------------------
# Deterministic synthetic parameters (PyTorch-shaped)
# ----------------------------------------------------------------------------
def init_params(key, width=WIDTH, ker_width=KERW, rank=RANK):
    OIR = width * width * rank

    def dense(k, fan_in, fan_out):
        k1, k2 = jax.random.split(k)
        bound = 1.0 / np.sqrt(float(fan_in))
        w = jax.random.uniform(k1, (fan_in, fan_out), jnp.float32, -bound, bound)
        b = jax.random.uniform(k2, (fan_out,), jnp.float32, -bound, bound)
        return w, b

    keys = iter(jax.random.split(key, 32))
    p = {"fc0": dense(next(keys), 12, width)}
    for l in range(4):
        p[f"phi{l}_1"] = dense(next(keys), width, ker_width)
        p[f"phi{l}_2"] = dense(next(keys), ker_width, OIR)
        p[f"psi{l}_1"] = dense(next(keys), width, ker_width)
        p[f"psi{l}_2"] = dense(next(keys), ker_width, OIR)
        p[f"w{l}"] = dense(next(keys), width, width)
        p[f"bn{l}"] = (jnp.ones((width,), jnp.float32), jnp.zeros((width,), jnp.float32))
    p["fc1"] = dense(next(keys), width, FC1)
    p["fc2"] = dense(next(keys), FC1, 1)
    return p


if __name__ == "__main__":
    key = jax.random.PRNGKey(0)
    kx, kp = jax.random.split(key)

    B, S = 2, 16
    x = jax.random.normal(kx, (B, S, S, 12), jnp.float32)
    params = init_params(kp)

    fwd = jax.jit(net2d_forward)
    out = jax.block_until_ready(fwd(x, params))
    assert out.shape == (B, S, S, 1), out.shape
    assert bool(jnp.all(jnp.isfinite(out)))
    print("KERNEL_OK")
</pallas_src>

<mosaic_0001>
module attributes {stable_mosaic.version = 11 : i64} {
  func.func @_mid_layer_kernel(%arg0: i32, %arg1: memref<1x256x12xf32, #tpu.memory_space<vmem>>, %arg2: memref<1x12xf32, #tpu.memory_space<vmem>>, %arg3: memref<1x12xf32, #tpu.memory_space<vmem>>, %arg4: memref<12x256xf32, #tpu.memory_space<vmem>>, %arg5: memref<1x256xf32, #tpu.memory_space<vmem>>, %arg6: memref<128x640xf32, #tpu.memory_space<vmem>>, %arg7: memref<1x640xf32, #tpu.memory_space<vmem>>, %arg8: memref<128x640xf32, #tpu.memory_space<vmem>>, %arg9: memref<1x640xf32, #tpu.memory_space<vmem>>, %arg10: memref<12x640xf32, #tpu.memory_space<vmem>>, %arg11: memref<640x12xf32, #tpu.memory_space<vmem>>, %arg12: memref<12x12xf32, #tpu.memory_space<vmem>>, %arg13: memref<1x12xf32, #tpu.memory_space<vmem>>, %arg14: memref<1x256x12xf32, #tpu.memory_space<vmem>>, %arg15: memref<1x2x12xf32, #tpu.memory_space<vmem>>) attributes {dimension_semantics = [#tpu.dimension_semantics<parallel>], iteration_bounds = array<i64: 2>, scalar_prefetch = 0 : i64, scratch_operands = 0 : i64, tpu.core_type = #tpu.core_type<tc>, window_params = [{transform_indices = @transform_0, window_bounds = array<i64: 1, 256, 12>}, {pipeline_mode = #tpu.pipeline_mode<synchronous>, transform_indices = @transform_1, window_bounds = array<i64: 1, 12>}, {pipeline_mode = #tpu.pipeline_mode<synchronous>, transform_indices = @transform_2, window_bounds = array<i64: 1, 12>}, {pipeline_mode = #tpu.pipeline_mode<synchronous>, transform_indices = @transform_3, window_bounds = array<i64: 12, 256>}, {pipeline_mode = #tpu.pipeline_mode<synchronous>, transform_indices = @transform_4, window_bounds = array<i64: 1, 256>}, {pipeline_mode = #tpu.pipeline_mode<synchronous>, transform_indices = @transform_5, window_bounds = array<i64: 128, 640>}, {pipeline_mode = #tpu.pipeline_mode<synchronous>, transform_indices = @transform_6, window_bounds = array<i64: 1, 640>}, {pipeline_mode = #tpu.pipeline_mode<synchronous>, transform_indices = @transform_7, window_bounds = array<i64: 128, 640>}, {pipeline_mode = #tpu.pipeline_mode<synchronous>, transform_indices = @transform_8, window_bounds = array<i64: 1, 640>}, {pipeline_mode = #tpu.pipeline_mode<synchronous>, transform_indices = @transform_9, window_bounds = array<i64: 12, 640>}, {pipeline_mode = #tpu.pipeline_mode<synchronous>, transform_indices = @transform_10, window_bounds = array<i64: 640, 12>}, {pipeline_mode = #tpu.pipeline_mode<synchronous>, transform_indices = @transform_11, window_bounds = array<i64: 12, 12>}, {pipeline_mode = #tpu.pipeline_mode<synchronous>, transform_indices = @transform_12, window_bounds = array<i64: 1, 12>}, {transform_indices = @transform_13, window_bounds = array<i64: 1, 256, 12>}, {transform_indices = @transform_14, window_bounds = array<i64: 1, 2, 12>}]} {
    %c0 = arith.constant 0 : index
    %c0_0 = arith.constant 0 : index
    %c0_1 = arith.constant 0 : index
    %0 = vector.load %arg1[%c0, %c0_0, %c0_1] : memref<1x256x12xf32, #tpu.memory_space<vmem>>, vector<1x256x12xf32>
    %1 = vector.shape_cast %0 : vector<1x256x12xf32> to vector<256x12xf32>
    %c0_2 = arith.constant 0 : index
    %c0_3 = arith.constant 0 : index
    %2 = vector.load %arg2[%c0_2, %c0_3] : memref<1x12xf32, #tpu.memory_space<vmem>>, vector<1x12xf32>
    %3 = vector.broadcast %2 : vector<1x12xf32> to vector<256x12xf32>
    %4 = arith.mulf %1, %3 : vector<256x12xf32>
    %c0_4 = arith.constant 0 : index
    %c0_5 = arith.constant 0 : index
    %5 = vector.load %arg3[%c0_4, %c0_5] : memref<1x12xf32, #tpu.memory_space<vmem>>, vector<1x12xf32>
    %6 = vector.broadcast %5 : vector<1x12xf32> to vector<256x12xf32>
    %7 = arith.addf %4, %6 : vector<256x12xf32>
    %cst = arith.constant 0.000000e+00 : f32
    %8 = vector.broadcast %cst : f32 to vector<256x12xf32>
    %9 = arith.maximumf %7, %8 : vector<256x12xf32>
    %c0_6 = arith.constant 0 : index
    %c0_7 = arith.constant 0 : index
    %10 = vector.load %arg4[%c0_6, %c0_7] : memref<12x256xf32, #tpu.memory_space<vmem>>, vector<12x256xf32>
    %c0_8 = arith.constant 0 : index
    %c0_9 = arith.constant 0 : index
    %11 = vector.load %arg5[%c0_8, %c0_9] : memref<1x256xf32, #tpu.memory_space<vmem>>, vector<1x256xf32>
    %c0_10 = arith.constant 0 : index
    %c0_11 = arith.constant 0 : index
    %12 = vector.load %arg6[%c0_10, %c0_11] : memref<128x640xf32, #tpu.memory_space<vmem>>, vector<128x640xf32>
    %c0_12 = arith.constant 0 : index
    %c0_13 = arith.constant 0 : index
    %13 = vector.load %arg7[%c0_12, %c0_13] : memref<1x640xf32, #tpu.memory_space<vmem>>, vector<1x640xf32>
    %c0_14 = arith.constant 0 : index
    %c0_15 = arith.constant 0 : index
    %14 = vector.load %arg8[%c0_14, %c0_15] : memref<128x640xf32, #tpu.memory_space<vmem>>, vector<128x640xf32>
    %c0_16 = arith.constant 0 : index
    %c0_17 = arith.constant 0 : index
    %15 = vector.load %arg9[%c0_16, %c0_17] : memref<1x640xf32, #tpu.memory_space<vmem>>, vector<1x640xf32>
    %c0_18 = arith.constant 0 : index
    %c0_19 = arith.constant 0 : index
    %16 = vector.load %arg10[%c0_18, %c0_19] : memref<12x640xf32, #tpu.memory_space<vmem>>, vector<12x640xf32>
    %c0_20 = arith.constant 0 : index
    %c0_21 = arith.constant 0 : index
    %17 = vector.load %arg11[%c0_20, %c0_21] : memref<640x12xf32, #tpu.memory_space<vmem>>, vector<640x12xf32>
    %c0_22 = arith.constant 0 : index
    %c0_23 = arith.constant 0 : index
    %18 = vector.load %arg12[%c0_22, %c0_23] : memref<12x12xf32, #tpu.memory_space<vmem>>, vector<12x12xf32>
    %c0_24 = arith.constant 0 : index
    %c0_25 = arith.constant 0 : index
    %19 = vector.load %arg13[%c0_24, %c0_25] : memref<1x12xf32, #tpu.memory_space<vmem>>, vector<1x12xf32>
    %cst_26 = arith.constant dense<0.000000e+00> : vector<256x256xf32>
    %20 = tpu.matmul %9, %10, %cst_26 {dimension_numbers = #tpu.dot_dimension_numbers<[1], [0], [0], [1], [0, 0, 1, 1], [], []>} : vector<256x12xf32>, vector<12x256xf32>, vector<256x256xf32> -> vector<256x256xf32>
    %21 = vector.broadcast %11 : vector<1x256xf32> to vector<256x256xf32>
    %22 = arith.addf %20, %21 : vector<256x256xf32>
    %cst_27 = arith.constant 0.000000e+00 : f32
    %23 = vector.broadcast %cst_27 : f32 to vector<256x256xf32>
    %24 = arith.maximumf %22, %23 : vector<256x256xf32>
    %25 = vector.extract_strided_slice %24 {offsets = [0, 0], sizes = [256, 128], strides = [1, 1]} : vector<256x256xf32> to vector<256x128xf32>
    %26 = vector.extract_strided_slice %24 {offsets = [0, 128], sizes = [256, 128], strides = [1, 1]} : vector<256x256xf32> to vector<256x128xf32>
    %cst_28 = arith.constant dense<0.000000e+00> : vector<12x128xf32>
    %27 = tpu.matmul %9, %26, %cst_28 {dimension_numbers = #tpu.dot_dimension_numbers<[0], [0], [1], [1], [0, 1, 1, 1], [], []>} : vector<256x12xf32>, vector<256x128xf32>, vector<12x128xf32> -> vector<12x128xf32>
    %cst_29 = arith.constant dense<0.000000e+00> : vector<12x640xf32>
    %28 = tpu.matmul %27, %14, %cst_29 {dimension_numbers = #tpu.dot_dimension_numbers<[1], [0], [0], [1], [0, 0, 1, 1], [], []>} : vector<12x128xf32>, vector<128x640xf32>, vector<12x640xf32> -> vector<12x640xf32>
    %cst_30 = arith.constant dense<0.000000e+00> : vector<12xf32>
    %29 = vector.multi_reduction <add>, %9, %cst_30 [0] : vector<256x12xf32> to vector<12xf32>
    %30 = vector.shape_cast %29 : vector<12xf32> to vector<1x12xf32>
    %31 = arith.mulf %28, %16 : vector<12x640xf32>
    %cst_31 = arith.constant dense<0.000000e+00> : vector<640xf32>
    %32 = vector.multi_reduction <add>, %31, %cst_31 [0] : vector<12x640xf32> to vector<640xf32>
    %33 = vector.shape_cast %32 : vector<640xf32> to vector<1x640xf32>
    %cst_32 = arith.constant dense<0.000000e+00> : vector<1x640xf32>
    %34 = tpu.matmul %30, %16, %cst_32 {dimension_numbers = #tpu.dot_dimension_numbers<[1], [0], [0], [1], [0, 0, 1, 1], [], []>} : vector<1x12xf32>, vector<12x640xf32>, vector<1x640xf32> -> vector<1x640xf32>
    %35 = arith.mulf %15, %34 : vector<1x640xf32>
    %36 = arith.addf %33, %35 : vector<1x640xf32>
    %37 = vector.broadcast %36 : vector<1x640xf32> to vector<128x640xf32>
    %38 = arith.mulf %12, %37 : vector<128x640xf32>
    %cst_33 = arith.constant dense<0.000000e+00> : vector<128x12xf32>
    %39 = tpu.matmul %38, %17, %cst_33 {dimension_numbers = #tpu.dot_dimension_numbers<[1], [0], [0], [1], [0, 0, 1, 1], [], []>} : vector<128x640xf32>, vector<640x12xf32>, vector<128x12xf32> -> vector<128x12xf32>
    %40 = arith.mulf %13, %36 : vector<1x640xf32>
    %cst_34 = arith.constant dense<0.000000e+00> : vector<1x12xf32>
    %41 = tpu.matmul %40, %17, %cst_34 {dimension_numbers = #tpu.dot_dimension_numbers<[1], [0], [0], [1], [0, 0, 1, 1], [], []>} : vector<1x640xf32>, vector<640x12xf32>, vector<1x12xf32> -> vector<1x12xf32>
    %cst_35 = arith.constant dense<0.000000e+00> : vector<256x12xf32>
    %42 = tpu.matmul %25, %39, %cst_35 {dimension_numbers = #tpu.dot_dimension_numbers<[1], [0], [0], [1], [0, 0, 1, 1], [], []>} : vector<256x128xf32>, vector<128x12xf32>, vector<256x12xf32> -> vector<256x12xf32>
    %43 = vector.broadcast %41 : vector<1x12xf32> to vector<256x12xf32>
    %44 = arith.addf %42, %43 : vector<256x12xf32>
    %cst_36 = arith.constant dense<0.000000e+00> : vector<256x12xf32>
    %45 = tpu.matmul %9, %18, %cst_36 {dimension_numbers = #tpu.dot_dimension_numbers<[1], [0], [0], [1], [0, 0, 1, 1], [], []>} : vector<256x12xf32>, vector<12x12xf32>, vector<256x12xf32> -> vector<256x12xf32>
    %46 = vector.broadcast %19 : vector<1x12xf32> to vector<256x12xf32>
    %47 = arith.addf %45, %46 : vector<256x12xf32>
    %48 = arith.addf %44, %47 : vector<256x12xf32>
    %c0_37 = arith.constant 0 : index
    %c0_38 = arith.constant 0 : index
    %c0_39 = arith.constant 0 : index
    %49 = vector.load %arg14[%c0_37, %c0_38, %c0_39] : memref<1x256x12xf32, #tpu.memory_space<vmem>>, vector<1x256x12xf32>
    %50 = vector.shape_cast %49 : vector<1x256x12xf32> to vector<256x12xf32>
    %51 = vector.shape_cast %48 : vector<256x12xf32> to vector<1x256x12xf32>
    tpu.vector_store %arg14[%c0_37, %c0_38, %c0_39], %51 {strides = array<i32>} : memref<1x256x12xf32, #tpu.memory_space<vmem>>, vector<1x256x12xf32>,
    %cst_40 = arith.constant dense<0.000000e+00> : vector<12xf32>
    %52 = vector.multi_reduction <add>, %48, %cst_40 [0] : vector<256x12xf32> to vector<12xf32>
    %53 = vector.shape_cast %52 : vector<12xf32> to vector<1x12xf32>
    %54 = arith.mulf %48, %48 : vector<256x12xf32>
    %cst_41 = arith.constant dense<0.000000e+00> : vector<12xf32>
    %55 = vector.multi_reduction <add>, %54, %cst_41 [0] : vector<256x12xf32> to vector<12xf32>
    %56 = vector.shape_cast %55 : vector<12xf32> to vector<1x12xf32>
    %57 = tpu.concatenate %53, %56 in 0 : vector<1x12xf32>, vector<1x12xf32> -> vector<2x12xf32>
    %c0_42 = arith.constant 0 : index
    %c0_43 = arith.constant 0 : index
    %c0_44 = arith.constant 0 : index
    %58 = vector.load %arg15[%c0_42, %c0_43, %c0_44] : memref<1x2x12xf32, #tpu.memory_space<vmem>>, vector<1x2x12xf32>
    %59 = vector.shape_cast %58 : vector<1x2x12xf32> to vector<2x12xf32>
    %60 = vector.shape_cast %57 : vector<2x12xf32> to vector<1x2x12xf32>
    tpu.vector_store %arg15[%c0_42, %c0_43, %c0_44], %60 {strides = array<i32>} : memref<1x2x12xf32, #tpu.memory_space<vmem>>, vector<1x2x12xf32>,
    return
  }
  func.func @transform_0(%arg0: i32) -> (i32, i32, i32) {
    %c0_i32 = arith.constant 0 : i32
    %c0_i32_0 = arith.constant 0 : i32
    %c0_i32_1 = arith.constant 0 : i32
    return %arg0, %c0_i32, %c0_i32_0 : i32, i32, i32
  }
  func.func @transform_1(%arg0: i32) -> (i32, i32) {
    %c0_i32 = arith.constant 0 : i32
    %c0_i32_0 = arith.constant 0 : i32
    %c0_i32_1 = arith.constant 0 : i32
    return %c0_i32, %c0_i32_0 : i32, i32
  }
  func.func @transform_2(%arg0: i32) -> (i32, i32) {
    %c0_i32 = arith.constant 0 : i32
    %c0_i32_0 = arith.constant 0 : i32
    %c0_i32_1 = arith.constant 0 : i32
    return %c0_i32, %c0_i32_0 : i32, i32
  }
  func.func @transform_3(%arg0: i32) -> (i32, i32) {
    %c0_i32 = arith.constant 0 : i32
    %c0_i32_0 = arith.constant 0 : i32
    %c0_i32_1 = arith.constant 0 : i32
    return %c0_i32, %c0_i32_0 : i32, i32
  }
  func.func @transform_4(%arg0: i32) -> (i32, i32) {
    %c0_i32 = arith.constant 0 : i32
    %c0_i32_0 = arith.constant 0 : i32
    %c0_i32_1 = arith.constant 0 : i32
    return %c0_i32, %c0_i32_0 : i32, i32
  }
  func.func @transform_5(%arg0: i32) -> (i32, i32) {
    %c0_i32 = arith.constant 0 : i32
    %c0_i32_0 = arith.constant 0 : i32
    %c0_i32_1 = arith.constant 0 : i32
    return %c0_i32, %c0_i32_0 : i32, i32
  }
  func.func @transform_6(%arg0: i32) -> (i32, i32) {
    %c0_i32 = arith.constant 0 : i32
    %c0_i32_0 = arith.constant 0 : i32
    %c0_i32_1 = arith.constant 0 : i32
    return %c0_i32, %c0_i32_0 : i32, i32
  }
  func.func @transform_7(%arg0: i32) -> (i32, i32) {
    %c0_i32 = arith.constant 0 : i32
    %c0_i32_0 = arith.constant 0 : i32
    %c0_i32_1 = arith.constant 0 : i32
    return %c0_i32, %c0_i32_0 : i32, i32
  }
  func.func @transform_8(%arg0: i32) -> (i32, i32) {
    %c0_i32 = arith.constant 0 : i32
    %c0_i32_0 = arith.constant 0 : i32
    %c0_i32_1 = arith.constant 0 : i32
    return %c0_i32, %c0_i32_0 : i32, i32
  }
  func.func @transform_9(%arg0: i32) -> (i32, i32) {
    %c0_i32 = arith.constant 0 : i32
    %c0_i32_0 = arith.constant 0 : i32
    %c0_i32_1 = arith.constant 0 : i32
    return %c0_i32, %c0_i32_0 : i32, i32
  }
  func.func @transform_10(%arg0: i32) -> (i32, i32) {
    %c0_i32 = arith.constant 0 : i32
    %c0_i32_0 = arith.constant 0 : i32
    %c0_i32_1 = arith.constant 0 : i32
    return %c0_i32, %c0_i32_0 : i32, i32
  }
  func.func @transform_11(%arg0: i32) -> (i32, i32) {
    %c0_i32 = arith.constant 0 : i32
    %c0_i32_0 = arith.constant 0 : i32
    %c0_i32_1 = arith.constant 0 : i32
    return %c0_i32, %c0_i32_0 : i32, i32
  }
  func.func @transform_12(%arg0: i32) -> (i32, i32) {
    %c0_i32 = arith.constant 0 : i32
    %c0_i32_0 = arith.constant 0 : i32
    %c0_i32_1 = arith.constant 0 : i32
    return %c0_i32, %c0_i32_0 : i32, i32
  }
  func.func @transform_13(%arg0: i32) -> (i32, i32, i32) {
    %c0_i32 = arith.constant 0 : i32
    %c0_i32_0 = arith.constant 0 : i32
    %c0_i32_1 = arith.constant 0 : i32
    return %arg0, %c0_i32, %c0_i32_0 : i32, i32, i32
  }
  func.func @transform_14(%arg0: i32) -> (i32, i32, i32) {
    %c0_i32 = arith.constant 0 : i32
    %c0_i32_0 = arith.constant 0 : i32
    %c0_i32_1 = arith.constant 0 : i32
    return %arg0, %c0_i32, %c0_i32_0 : i32, i32, i32
  }
}

module attributes {stable_mosaic.version = 11 : i64} {
  func.func @_first_layer_kernel(%arg0: i32, %arg1: memref<1x256x12xf32, #tpu.memory_space<vmem>>, %arg2: memref<12x12xf32, #tpu.memory_space<vmem>>, %arg3: memref<1x12xf32, #tpu.memory_space<vmem>>, %arg4: memref<12x256xf32, #tpu.memory_space<vmem>>, %arg5: memref<1x256xf32, #tpu.memory_space<vmem>>, %arg6: memref<128x640xf32, #tpu.memory_space<vmem>>, %arg7: memref<1x640xf32, #tpu.memory_space<vmem>>, %arg8: memref<128x640xf32, #tpu.memory_space<vmem>>, %arg9: memref<1x640xf32, #tpu.memory_space<vmem>>, %arg10: memref<12x640xf32, #tpu.memory_space<vmem>>, %arg11: memref<640x12xf32, #tpu.memory_space<vmem>>, %arg12: memref<12x12xf32, #tpu.memory_space<vmem>>, %arg13: memref<1x12xf32, #tpu.memory_space<vmem>>, %arg14: memref<1x256x12xf32, #tpu.memory_space<vmem>>, %arg15: memref<1x2x12xf32, #tpu.memory_space<vmem>>) attributes {dimension_semantics = [#tpu.dimension_semantics<parallel>], iteration_bounds = array<i64: 2>, scalar_prefetch = 0 : i64, scratch_operands = 0 : i64, tpu.core_type = #tpu.core_type<tc>, window_params = [{transform_indices = @transform_0, window_bounds = array<i64: 1, 256, 12>}, {pipeline_mode = #tpu.pipeline_mode<synchronous>, transform_indices = @transform_1, window_bounds = array<i64: 12, 12>}, {pipeline_mode = #tpu.pipeline_mode<synchronous>, transform_indices = @transform_2, window_bounds = array<i64: 1, 12>}, {pipeline_mode = #tpu.pipeline_mode<synchronous>, transform_indices = @transform_3, window_bounds = array<i64: 12, 256>}, {pipeline_mode = #tpu.pipeline_mode<synchronous>, transform_indices = @transform_4, window_bounds = array<i64: 1, 256>}, {pipeline_mode = #tpu.pipeline_mode<synchronous>, transform_indices = @transform_5, window_bounds = array<i64: 128, 640>}, {pipeline_mode = #tpu.pipeline_mode<synchronous>, transform_indices = @transform_6, window_bounds = array<i64: 1, 640>}, {pipeline_mode = #tpu.pipeline_mode<synchronous>, transform_indices = @transform_7, window_bounds = array<i64: 128, 640>}, {pipeline_mode = #tpu.pipeline_mode<synchronous>, transform_indices = @transform_8, window_bounds = array<i64: 1, 640>}, {pipeline_mode = #tpu.pipeline_mode<synchronous>, transform_indices = @transform_9, window_bounds = array<i64: 12, 640>}, {pipeline_mode = #tpu.pipeline_mode<synchronous>, transform_indices = @transform_10, window_bounds = array<i64: 640, 12>}, {pipeline_mode = #tpu.pipeline_mode<synchronous>, transform_indices = @transform_11, window_bounds = array<i64: 12, 12>}, {pipeline_mode = #tpu.pipeline_mode<synchronous>, transform_indices = @transform_12, window_bounds = array<i64: 1, 12>}, {transform_indices = @transform_13, window_bounds = array<i64: 1, 256, 12>}, {transform_indices = @transform_14, window_bounds = array<i64: 1, 2, 12>}]} {
    %c0 = arith.constant 0 : index
    %c0_0 = arith.constant 0 : index
    %c0_1 = arith.constant 0 : index
    %0 = vector.load %arg1[%c0, %c0_0, %c0_1] : memref<1x256x12xf32, #tpu.memory_space<vmem>>, vector<1x256x12xf32>
    %1 = vector.shape_cast %0 : vector<1x256x12xf32> to vector<256x12xf32>
    %c0_2 = arith.constant 0 : index
    %c0_3 = arith.constant 0 : index
    %2 = vector.load %arg2[%c0_2, %c0_3] : memref<12x12xf32, #tpu.memory_space<vmem>>, vector<12x12xf32>
    %cst = arith.constant dense<0.000000e+00> : vector<256x12xf32>
    %3 = tpu.matmul %1, %2, %cst {dimension_numbers = #tpu.dot_dimension_numbers<[1], [0], [0], [1], [0, 0, 1, 1], [], []>} : vector<256x12xf32>, vector<12x12xf32>, vector<256x12xf32> -> vector<256x12xf32>
    %c0_4 = arith.constant 0 : index
    %c0_5 = arith.constant 0 : index
    %4 = vector.load %arg3[%c0_4, %c0_5] : memref<1x12xf32, #tpu.memory_space<vmem>>, vector<1x12xf32>
    %5 = vector.broadcast %4 : vector<1x12xf32> to vector<256x12xf32>
    %6 = arith.addf %3, %5 : vector<256x12xf32>
    %c0_6 = arith.constant 0 : index
    %c0_7 = arith.constant 0 : index
    %7 = vector.load %arg4[%c0_6, %c0_7] : memref<12x256xf32, #tpu.memory_space<vmem>>, vector<12x256xf32>
    %c0_8 = arith.constant 0 : index
    %c0_9 = arith.constant 0 : index
    %8 = vector.load %arg5[%c0_8, %c0_9] : memref<1x256xf32, #tpu.memory_space<vmem>>, vector<1x256xf32>
    %c0_10 = arith.constant 0 : index
    %c0_11 = arith.constant 0 : index
    %9 = vector.load %arg6[%c0_10, %c0_11] : memref<128x640xf32, #tpu.memory_space<vmem>>, vector<128x640xf32>
    %c0_12 = arith.constant 0 : index
    %c0_13 = arith.constant 0 : index
    %10 = vector.load %arg7[%c0_12, %c0_13] : memref<1x640xf32, #tpu.memory_space<vmem>>, vector<1x640xf32>
    %c0_14 = arith.constant 0 : index
    %c0_15 = arith.constant 0 : index
    %11 = vector.load %arg8[%c0_14, %c0_15] : memref<128x640xf32, #tpu.memory_space<vmem>>, vector<128x640xf32>
    %c0_16 = arith.constant 0 : index
    %c0_17 = arith.constant 0 : index
    %12 = vector.load %arg9[%c0_16, %c0_17] : memref<1x640xf32, #tpu.memory_space<vmem>>, vector<1x640xf32>
    %c0_18 = arith.constant 0 : index
    %c0_19 = arith.constant 0 : index
    %13 = vector.load %arg10[%c0_18, %c0_19] : memref<12x640xf32, #tpu.memory_space<vmem>>, vector<12x640xf32>
    %c0_20 = arith.constant 0 : index
    %c0_21 = arith.constant 0 : index
    %14 = vector.load %arg11[%c0_20, %c0_21] : memref<640x12xf32, #tpu.memory_space<vmem>>, vector<640x12xf32>
    %c0_22 = arith.constant 0 : index
    %c0_23 = arith.constant 0 : index
    %15 = vector.load %arg12[%c0_22, %c0_23] : memref<12x12xf32, #tpu.memory_space<vmem>>, vector<12x12xf32>
    %c0_24 = arith.constant 0 : index
    %c0_25 = arith.constant 0 : index
    %16 = vector.load %arg13[%c0_24, %c0_25] : memref<1x12xf32, #tpu.memory_space<vmem>>, vector<1x12xf32>
    %cst_26 = arith.constant dense<0.000000e+00> : vector<256x256xf32>
    %17 = tpu.matmul %6, %7, %cst_26 {dimension_numbers = #tpu.dot_dimension_numbers<[1], [0], [0], [1], [0, 0, 1, 1], [], []>} : vector<256x12xf32>, vector<12x256xf32>, vector<256x256xf32> -> vector<256x256xf32>
    %18 = vector.broadcast %8 : vector<1x256xf32> to vector<256x256xf32>
    %19 = arith.addf %17, %18 : vector<256x256xf32>
    %cst_27 = arith.constant 0.000000e+00 : f32
    %20 = vector.broadcast %cst_27 : f32 to vector<256x256xf32>
    %21 = arith.maximumf %19, %20 : vector<256x256xf32>
    %22 = vector.extract_strided_slice %21 {offsets = [0, 0], sizes = [256, 128], strides = [1, 1]} : vector<256x256xf32> to vector<256x128xf32>
    %23 = vector.extract_strided_slice %21 {offsets = [0, 128], sizes = [256, 128], strides = [1, 1]} : vector<256x256xf32> to vector<256x128xf32>
    %cst_28 = arith.constant dense<0.000000e+00> : vector<12x128xf32>
    %24 = tpu.matmul %6, %23, %cst_28 {dimension_numbers = #tpu.dot_dimension_numbers<[0], [0], [1], [1], [0, 1, 1, 1], [], []>} : vector<256x12xf32>, vector<256x128xf32>, vector<12x128xf32> -> vector<12x128xf32>
    %cst_29 = arith.constant dense<0.000000e+00> : vector<12x640xf32>
    %25 = tpu.matmul %24, %11, %cst_29 {dimension_numbers = #tpu.dot_dimension_numbers<[1], [0], [0], [1], [0, 0, 1, 1], [], []>} : vector<12x128xf32>, vector<128x640xf32>, vector<12x640xf32> -> vector<12x640xf32>
    %cst_30 = arith.constant dense<0.000000e+00> : vector<12xf32>
    %26 = vector.multi_reduction <add>, %6, %cst_30 [0] : vector<256x12xf32> to vector<12xf32>
    %27 = vector.shape_cast %26 : vector<12xf32> to vector<1x12xf32>
    %28 = arith.mulf %25, %13 : vector<12x640xf32>
    %cst_31 = arith.constant dense<0.000000e+00> : vector<640xf32>
    %29 = vector.multi_reduction <add>, %28, %cst_31 [0] : vector<12x640xf32> to vector<640xf32>
    %30 = vector.shape_cast %29 : vector<640xf32> to vector<1x640xf32>
    %cst_32 = arith.constant dense<0.000000e+00> : vector<1x640xf32>
    %31 = tpu.matmul %27, %13, %cst_32 {dimension_numbers = #tpu.dot_dimension_numbers<[1], [0], [0], [1], [0, 0, 1, 1], [], []>} : vector<1x12xf32>, vector<12x640xf32>, vector<1x640xf32> -> vector<1x640xf32>
    %32 = arith.mulf %12, %31 : vector<1x640xf32>
    %33 = arith.addf %30, %32 : vector<1x640xf32>
    %34 = vector.broadcast %33 : vector<1x640xf32> to vector<128x640xf32>
    %35 = arith.mulf %9, %34 : vector<128x640xf32>
    %cst_33 = arith.constant dense<0.000000e+00> : vector<128x12xf32>
    %36 = tpu.matmul %35, %14, %cst_33 {dimension_numbers = #tpu.dot_dimension_numbers<[1], [0], [0], [1], [0, 0, 1, 1], [], []>} : vector<128x640xf32>, vector<640x12xf32>, vector<128x12xf32> -> vector<128x12xf32>
    %37 = arith.mulf %10, %33 : vector<1x640xf32>
    %cst_34 = arith.constant dense<0.000000e+00> : vector<1x12xf32>
    %38 = tpu.matmul %37, %14, %cst_34 {dimension_numbers = #tpu.dot_dimension_numbers<[1], [0], [0], [1], [0, 0, 1, 1], [], []>} : vector<1x640xf32>, vector<640x12xf32>, vector<1x12xf32> -> vector<1x12xf32>
    %cst_35 = arith.constant dense<0.000000e+00> : vector<256x12xf32>
    %39 = tpu.matmul %22, %36, %cst_35 {dimension_numbers = #tpu.dot_dimension_numbers<[1], [0], [0], [1], [0, 0, 1, 1], [], []>} : vector<256x128xf32>, vector<128x12xf32>, vector<256x12xf32> -> vector<256x12xf32>
    %40 = vector.broadcast %38 : vector<1x12xf32> to vector<256x12xf32>
    %41 = arith.addf %39, %40 : vector<256x12xf32>
    %cst_36 = arith.constant dense<0.000000e+00> : vector<256x12xf32>
    %42 = tpu.matmul %6, %15, %cst_36 {dimension_numbers = #tpu.dot_dimension_numbers<[1], [0], [0], [1], [0, 0, 1, 1], [], []>} : vector<256x12xf32>, vector<12x12xf32>, vector<256x12xf32> -> vector<256x12xf32>
    %43 = vector.broadcast %16 : vector<1x12xf32> to vector<256x12xf32>
    %44 = arith.addf %42, %43 : vector<256x12xf32>
    %45 = arith.addf %41, %44 : vector<256x12xf32>
    %c0_37 = arith.constant 0 : index
    %c0_38 = arith.constant 0 : index
    %c0_39 = arith.constant 0 : index
    %46 = vector.load %arg14[%c0_37, %c0_38, %c0_39] : memref<1x256x12xf32, #tpu.memory_space<vmem>>, vector<1x256x12xf32>
    %47 = vector.shape_cast %46 : vector<1x256x12xf32> to vector<256x12xf32>
    %48 = vector.shape_cast %45 : vector<256x12xf32> to vector<1x256x12xf32>
    tpu.vector_store %arg14[%c0_37, %c0_38, %c0_39], %48 {strides = array<i32>} : memref<1x256x12xf32, #tpu.memory_space<vmem>>, vector<1x256x12xf32>,
    %cst_40 = arith.constant dense<0.000000e+00> : vector<12xf32>
    %49 = vector.multi_reduction <add>, %45, %cst_40 [0] : vector<256x12xf32> to vector<12xf32>
    %50 = vector.shape_cast %49 : vector<12xf32> to vector<1x12xf32>
    %51 = arith.mulf %45, %45 : vector<256x12xf32>
    %cst_41 = arith.constant dense<0.000000e+00> : vector<12xf32>
    %52 = vector.multi_reduction <add>, %51, %cst_41 [0] : vector<256x12xf32> to vector<12xf32>
    %53 = vector.shape_cast %52 : vector<12xf32> to vector<1x12xf32>
    %54 = tpu.concatenate %50, %53 in 0 : vector<1x12xf32>, vector<1x12xf32> -> vector<2x12xf32>
    %c0_42 = arith.constant 0 : index
    %c0_43 = arith.constant 0 : index
    %c0_44 = arith.constant 0 : index
    %55 = vector.load %arg15[%c0_42, %c0_43, %c0_44] : memref<1x2x12xf32, #tpu.memory_space<vmem>>, vector<1x2x12xf32>
    %56 = vector.shape_cast %55 : vector<1x2x12xf32> to vector<2x12xf32>
    %57 = vector.shape_cast %54 : vector<2x12xf32> to vector<1x2x12xf32>
    tpu.vector_store %arg15[%c0_42, %c0_43, %c0_44], %57 {strides = array<i32>} : memref<1x2x12xf32, #tpu.memory_space<vmem>>, vector<1x2x12xf32>,
    return
  }
  func.func @transform_0(%arg0: i32) -> (i32, i32, i32) {
    %c0_i32 = arith.constant 0 : i32
    %c0_i32_0 = arith.constant 0 : i32
    %c0_i32_1 = arith.constant 0 : i32
    return %arg0, %c0_i32, %c0_i32_0 : i32, i32, i32
  }
  func.func @transform_1(%arg0: i32) -> (i32, i32) {
    %c0_i32 = arith.constant 0 : i32
    %c0_i32_0 = arith.constant 0 : i32
    %c0_i32_1 = arith.constant 0 : i32
    return %c0_i32, %c0_i32_0 : i32, i32
  }
  func.func @transform_2(%arg0: i32) -> (i32, i32) {
    %c0_i32 = arith.constant 0 : i32
    %c0_i32_0 = arith.constant 0 : i32
    %c0_i32_1 = arith.constant 0 : i32
    return %c0_i32, %c0_i32_0 : i32, i32
  }
  func.func @transform_3(%arg0: i32) -> (i32, i32) {
    %c0_i32 = arith.constant 0 : i32
    %c0_i32_0 = arith.constant 0 : i32
    %c0_i32_1 = arith.constant 0 : i32
    return %c0_i32, %c0_i32_0 : i32, i32
  }
  func.func @transform_4(%arg0: i32) -> (i32, i32) {
    %c0_i32 = arith.constant 0 : i32
    %c0_i32_0 = arith.constant 0 : i32
    %c0_i32_1 = arith.constant 0 : i32
    return %c0_i32, %c0_i32_0 : i32, i32
  }
  func.func @transform_5(%arg0: i32) -> (i32, i32) {
    %c0_i32 = arith.constant 0 : i32
    %c0_i32_0 = arith.constant 0 : i32
    %c0_i32_1 = arith.constant 0 : i32
    return %c0_i32, %c0_i32_0 : i32, i32
  }
  func.func @transform_6(%arg0: i32) -> (i32, i32) {
    %c0_i32 = arith.constant 0 : i32
    %c0_i32_0 = arith.constant 0 : i32
    %c0_i32_1 = arith.constant 0 : i32
    return %c0_i32, %c0_i32_0 : i32, i32
  }
  func.func @transform_7(%arg0: i32) -> (i32, i32) {
    %c0_i32 = arith.constant 0 : i32
    %c0_i32_0 = arith.constant 0 : i32
    %c0_i32_1 = arith.constant 0 : i32
    return %c0_i32, %c0_i32_0 : i32, i32
  }
  func.func @transform_8(%arg0: i32) -> (i32, i32) {
    %c0_i32 = arith.constant 0 : i32
    %c0_i32_0 = arith.constant 0 : i32
    %c0_i32_1 = arith.constant 0 : i32
    return %c0_i32, %c0_i32_0 : i32, i32
  }
  func.func @transform_9(%arg0: i32) -> (i32, i32) {
    %c0_i32 = arith.constant 0 : i32
    %c0_i32_0 = arith.constant 0 : i32
    %c0_i32_1 = arith.constant 0 : i32
    return %c0_i32, %c0_i32_0 : i32, i32
  }
  func.func @transform_10(%arg0: i32) -> (i32, i32) {
    %c0_i32 = arith.constant 0 : i32
    %c0_i32_0 = arith.constant 0 : i32
    %c0_i32_1 = arith.constant 0 : i32
    return %c0_i32, %c0_i32_0 : i32, i32
  }
  func.func @transform_11(%arg0: i32) -> (i32, i32) {
    %c0_i32 = arith.constant 0 : i32
    %c0_i32_0 = arith.constant 0 : i32
    %c0_i32_1 = arith.constant 0 : i32
    return %c0_i32, %c0_i32_0 : i32, i32
  }
  func.func @transform_12(%arg0: i32) -> (i32, i32) {
    %c0_i32 = arith.constant 0 : i32
    %c0_i32_0 = arith.constant 0 : i32
    %c0_i32_1 = arith.constant 0 : i32
    return %c0_i32, %c0_i32_0 : i32, i32
  }
  func.func @transform_13(%arg0: i32) -> (i32, i32, i32) {
    %c0_i32 = arith.constant 0 : i32
    %c0_i32_0 = arith.constant 0 : i32
    %c0_i32_1 = arith.constant 0 : i32
    return %arg0, %c0_i32, %c0_i32_0 : i32, i32, i32
  }
  func.func @transform_14(%arg0: i32) -> (i32, i32, i32) {
    %c0_i32 = arith.constant 0 : i32
    %c0_i32_0 = arith.constant 0 : i32
    %c0_i32_1 = arith.constant 0 : i32
    return %arg0, %c0_i32, %c0_i32_0 : i32, i32, i32
  }
}

module attributes {stable_mosaic.version = 11 : i64} {
  func.func @_head_kernel(%arg0: i32, %arg1: memref<1x256x12xf32, #tpu.memory_space<vmem>>, %arg2: memref<1x12xf32, #tpu.memory_space<vmem>>, %arg3: memref<1x12xf32, #tpu.memory_space<vmem>>, %arg4: memref<12x128xf32, #tpu.memory_space<vmem>>, %arg5: memref<1x128xf32, #tpu.memory_space<vmem>>, %arg6: memref<128x1xf32, #tpu.memory_space<vmem>>, %arg7: memref<1x1xf32, #tpu.memory_space<vmem>>, %arg8: memref<1x256x1xf32, #tpu.memory_space<vmem>>) attributes {dimension_semantics = [#tpu.dimension_semantics<parallel>], iteration_bounds = array<i64: 2>, scalar_prefetch = 0 : i64, scratch_operands = 0 : i64, tpu.core_type = #tpu.core_type<tc>, window_params = [{transform_indices = @transform_0, window_bounds = array<i64: 1, 256, 12>}, {pipeline_mode = #tpu.pipeline_mode<synchronous>, transform_indices = @transform_1, window_bounds = array<i64: 1, 12>}, {pipeline_mode = #tpu.pipeline_mode<synchronous>, transform_indices = @transform_2, window_bounds = array<i64: 1, 12>}, {pipeline_mode = #tpu.pipeline_mode<synchronous>, transform_indices = @transform_3, window_bounds = array<i64: 12, 128>}, {pipeline_mode = #tpu.pipeline_mode<synchronous>, transform_indices = @transform_4, window_bounds = array<i64: 1, 128>}, {pipeline_mode = #tpu.pipeline_mode<synchronous>, transform_indices = @transform_5, window_bounds = array<i64: 128, 1>}, {pipeline_mode = #tpu.pipeline_mode<synchronous>, transform_indices = @transform_6, window_bounds = array<i64: 1, 1>}, {transform_indices = @transform_7, window_bounds = array<i64: 1, 256, 1>}]} {
    %c0 = arith.constant 0 : index
    %c0_0 = arith.constant 0 : index
    %c0_1 = arith.constant 0 : index
    %0 = vector.load %arg1[%c0, %c0_0, %c0_1] : memref<1x256x12xf32, #tpu.memory_space<vmem>>, vector<1x256x12xf32>
    %1 = vector.shape_cast %0 : vector<1x256x12xf32> to vector<256x12xf32>
    %c0_2 = arith.constant 0 : index
    %c0_3 = arith.constant 0 : index
    %2 = vector.load %arg2[%c0_2, %c0_3] : memref<1x12xf32, #tpu.memory_space<vmem>>, vector<1x12xf32>
    %3 = vector.broadcast %2 : vector<1x12xf32> to vector<256x12xf32>
    %4 = arith.mulf %1, %3 : vector<256x12xf32>
    %c0_4 = arith.constant 0 : index
    %c0_5 = arith.constant 0 : index
    %5 = vector.load %arg3[%c0_4, %c0_5] : memref<1x12xf32, #tpu.memory_space<vmem>>, vector<1x12xf32>
    %6 = vector.broadcast %5 : vector<1x12xf32> to vector<256x12xf32>
    %7 = arith.addf %4, %6 : vector<256x12xf32>
    %c0_6 = arith.constant 0 : index
    %c0_7 = arith.constant 0 : index
    %8 = vector.load %arg4[%c0_6, %c0_7] : memref<12x128xf32, #tpu.memory_space<vmem>>, vector<12x128xf32>
    %cst = arith.constant dense<0.000000e+00> : vector<256x128xf32>
    %9 = tpu.matmul %7, %8, %cst {dimension_numbers = #tpu.dot_dimension_numbers<[1], [0], [0], [1], [0, 0, 1, 1], [], []>} : vector<256x12xf32>, vector<12x128xf32>, vector<256x128xf32> -> vector<256x128xf32>
    %c0_8 = arith.constant 0 : index
    %c0_9 = arith.constant 0 : index
    %10 = vector.load %arg5[%c0_8, %c0_9] : memref<1x128xf32, #tpu.memory_space<vmem>>, vector<1x128xf32>
    %11 = vector.broadcast %10 : vector<1x128xf32> to vector<256x128xf32>
    %12 = arith.addf %9, %11 : vector<256x128xf32>
    %cst_10 = arith.constant 0.000000e+00 : f32
    %13 = vector.broadcast %cst_10 : f32 to vector<256x128xf32>
    %14 = arith.maximumf %12, %13 : vector<256x128xf32>
    %c0_11 = arith.constant 0 : index
    %c0_12 = arith.constant 0 : index
    %15 = vector.load %arg6[%c0_11, %c0_12] : memref<128x1xf32, #tpu.memory_space<vmem>>, vector<128x1xf32>
    %cst_13 = arith.constant dense<0.000000e+00> : vector<256x1xf32>
    %16 = tpu.matmul %14, %15, %cst_13 {dimension_numbers = #tpu.dot_dimension_numbers<[1], [0], [0], [1], [0, 0, 1, 1], [], []>} : vector<256x128xf32>, vector<128x1xf32>, vector<256x1xf32> -> vector<256x1xf32>
    %c0_14 = arith.constant 0 : index
    %c0_15 = arith.constant 0 : index
    %17 = vector.load %arg7[%c0_14, %c0_15] : memref<1x1xf32, #tpu.memory_space<vmem>>, vector<1x1xf32>
    %18 = vector.broadcast %17 : vector<1x1xf32> to vector<256x1xf32>
    %19 = arith.addf %16, %18 : vector<256x1xf32>
    %c0_16 = arith.constant 0 : index
    %c0_17 = arith.constant 0 : index
    %c0_18 = arith.constant 0 : index
    %20 = vector.load %arg8[%c0_16, %c0_17, %c0_18] : memref<1x256x1xf32, #tpu.memory_space<vmem>>, vector<1x256x1xf32>
    %21 = vector.shape_cast %20 : vector<1x256x1xf32> to vector<256x1xf32>
    %22 = vector.shape_cast %19 : vector<256x1xf32> to vector<1x256x1xf32>
    tpu.vector_store %arg8[%c0_16, %c0_17, %c0_18], %22 {strides = array<i32>} : memref<1x256x1xf32, #tpu.memory_space<vmem>>, vector<1x256x1xf32>,
    return
  }
  func.func @transform_0(%arg0: i32) -> (i32, i32, i32) {
    %c0_i32 = arith.constant 0 : i32
    %c0_i32_0 = arith.constant 0 : i32
    %c0_i32_1 = arith.constant 0 : i32
    return %arg0, %c0_i32, %c0_i32_0 : i32, i32, i32
  }
  func.func @transform_1(%arg0: i32) -> (i32, i32) {
    %c0_i32 = arith.constant 0 : i32
    %c0_i32_0 = arith.constant 0 : i32
    %c0_i32_1 = arith.constant 0 : i32
    return %c0_i32, %c0_i32_0 : i32, i32
  }
  func.func @transform_2(%arg0: i32) -> (i32, i32) {
    %c0_i32 = arith.constant 0 : i32
    %c0_i32_0 = arith.constant 0 : i32
    %c0_i32_1 = arith.constant 0 : i32
    return %c0_i32, %c0_i32_0 : i32, i32
  }
  func.func @transform_3(%arg0: i32) -> (i32, i32) {
    %c0_i32 = arith.constant 0 : i32
    %c0_i32_0 = arith.constant 0 : i32
    %c0_i32_1 = arith.constant 0 : i32
    return %c0_i32, %c0_i32_0 : i32, i32
  }
  func.func @transform_4(%arg0: i32) -> (i32, i32) {
    %c0_i32 = arith.constant 0 : i32
    %c0_i32_0 = arith.constant 0 : i32
    %c0_i32_1 = arith.constant 0 : i32
    return %c0_i32, %c0_i32_0 : i32, i32
  }
  func.func @transform_5(%arg0: i32) -> (i32, i32) {
    %c0_i32 = arith.constant 0 : i32
    %c0_i32_0 = arith.constant 0 : i32
    %c0_i32_1 = arith.constant 0 : i32
    return %c0_i32, %c0_i32_0 : i32, i32
  }
  func.func @transform_6(%arg0: i32) -> (i32, i32) {
    %c0_i32 = arith.constant 0 : i32
    %c0_i32_0 = arith.constant 0 : i32
    %c0_i32_1 = arith.constant 0 : i32
    return %c0_i32, %c0_i32_0 : i32, i32
  }
  func.func @transform_7(%arg0: i32) -> (i32, i32, i32) {
    %c0_i32 = arith.constant 0 : i32
    %c0_i32_0 = arith.constant 0 : i32
    %c0_i32_1 = arith.constant 0 : i32
    return %arg0, %c0_i32, %c0_i32_0 : i32, i32, i32
  }
}

</mosaic_0001>

<bundles_post_ra>
// kernel: net2d_forward.9
= control target key start
LH: loop header
LB: loop body
LE: loop exit
PB: predicated region body
PF: predicated region fallthrough
CT: control target
= control target key end

     0   :  { %s1001_s26 = smov 0   ;;  %s1356_s0 = inlined_call_operand.vmem [shape: f32[2,256,12], index: 0, kind: input, shape index: {}]   ;;  %s1357_s1 = inlined_call_operand.vmem [shape: f32[1,12], index: 1, kind: input, shape index: {}]   ;;  %s1358_s2 = inlined_call_operand.vmem [shape: f32[1,12], index: 2, kind: input, shape index: {}]   ;;  %s1359_s3 = inlined_call_operand.vmem [shape: f32[12,128], index: 3, kind: input, shape index: {}]   ;;  %s1360_s4 = inlined_call_operand.vmem [shape: f32[1,128], index: 4, kind: input, shape index: {}]   ;;  %s1361_s5 = inlined_call_operand.vmem [shape: f32[128,1], index: 5, kind: input, shape index: {}]   ;;  %s1362_s6 = inlined_call_operand.<no memory space> [shape: f32[1,1], index: 6, kind: input, shape index: {}]   ;;  %s1363_s7 = inlined_call_operand.vmem [shape: f32[2,256,1], index: 7, kind: output, shape index: {}]  }
   0x1   :  { %v12_v0 = vstv %s1362_s6 }
   0x2   :  { %13 = vst [vmem:[#allocation2] sm:$0x1] %v12_v0 }
   0x3 LB: > { %s858_s27 = sadd.s32 4294967295, %s956_s26   ;;  %p862_p0 = scmp.ge.s32.totalorder %s956_s26, 1  ;;  %s956_s26 = sphi %s1001_s26, %s19_s26  }
   0x4   : > { %p239_p1 = scmp.lt.s32.totalorder %s956_s26, 3 }
   0x6   : > { %p240_p2 = pnand %p862_p0, %p239_p1 }
   0x7   : > { %p271_p3 = scmp.lt.s32.totalorder (!%p240_p2), %s858_s27, 1 }
   0x8   : > { %243 = sbr.rel (%p240_p2) target bundleno = 518 (0x206), region = 48 }
   0xd   : > { %v386_v1 = vld [vmem:[%s1359_s3 + $0x8] sm:$0xf]  ;;  %vm488_vm0 = vcmask 1043456   ;;  %v385_v2 = vld [vmem:[%s1359_s3] sm:$0xff]  ;;  %s1365_s27 = smov (!%p271_p3, %s858_s27), 1  ;;  %vm391_vm1 = vcmask 97280  }
   0xe   : > { %867 = vmatpush.msk.msra.mxu0 %vm488_vm0, %v386_v1  ;;  %904 = vmatpush.msk.msra.mxu3 %vm488_vm0, %v386_v1  ;;  %v1020_v3 = vld [vmem:[%s1357_s1] ss:$0 sm:$0xff]  ;;  %s902_s10 = sshll.u32 %s1365_s27, 8  ;;  %v652_v34 = vld [vmem:[%s1361_s5 + $0x78] sm:$0xff]  ;;  %v651_v35 = vld [vmem:[%s1361_s5 + $0x70] sm:$0xff]  ;;  %vm770_vm2 = vcmask 7168  }
   0xf   : > { %s1028_s13 = scalar_lea.vmem %s1356_s0, %s902_s10  ;;  %v1033_v4 = vld [vmem:[%s1358_s2] ss:$0 sm:$0xff]  ;;  %657 = vmatpush.msra.mxu1 %v652_v34  ;;  %906 = vmatpush.msra.mxu2 %v652_v34  ;;  %v650_v36 = vld [vmem:[%s1361_s5 + $0x68] sm:$0xff]  ;;  %v648_v41 = vld [vmem:[%s1361_s5 + $0x58] sm:$0xff]  ;;  %s1240_s9 = scalar_lea.vmem %s1363_s7, %s902_s10 }
  0x10   : > { %507 = vmatpush.msra.mxu0 %v385_v2  ;;  %905 = vmatpush.msra.mxu3 %v385_v2  ;;  %v281_v5 = vld [vmem:[%s1028_s13] sm:$0xff]  ;;  %v282_v7 = vld [vmem:[%s1028_s13 + $0x8] sm:$0xff]  ;;  %v283_v11 = vld [vmem:[%s1028_s13 + $0x10] sm:$0xff] }
  0x11   : > { %v317_v6 = vmul.f32 %v1020_v3, %v281_v5  ;;  %v318_v9 = vmul.f32 %v1020_v3, %v282_v7  ;;  %v319_v12 = vmul.f32 %v1020_v3, %v283_v11  ;;  %v284_v14 = vld [vmem:[%s1028_s13 + $0x18] sm:$0xff]  ;;  %v285_v17 = vld [vmem:[%s1028_s13 + $0x20] sm:$0xff]  ;;  %v286_v20 = vld [vmem:[%s1028_s13 + $0x28] sm:$0xff]  ;;  %658 = vmatpush.msra.mxu1 %v651_v35  ;;  %908 = vmatpush.msra.mxu2 %v651_v35 }
  0x12   : > { %v320_v15 = vmul.f32 %v1020_v3, %v284_v14  ;;  %v321_v18 = vmul.f32 %v1020_v3, %v285_v17  ;;  %v322_v21 = vmul.f32 %v1020_v3, %v286_v20  ;;  %v287_v23 = vld [vmem:[%s1028_s13 + $0x30] sm:$0xff]  ;;  %v288_v26 = vld [vmem:[%s1028_s13 + $0x38] sm:$0xff]  ;;  %v289_v29 = vld [vmem:[%s1028_s13 + $0x40] sm:$0xff]  ;;  %907 = vmatpush.msrb.mxu3 %v652_v34 }
  0x13   : > { %v353_v8 = vadd.f32 %v1033_v4, %v317_v6  ;;  %v354_v10 = vadd.f32 %v1033_v4, %v318_v9  ;;  %v355_v13 = vadd.f32 %v1033_v4, %v319_v12  ;;  %v323_v24 = vmul.f32 %v1020_v3, %v287_v23  ;;  %v290_v32 = vld [vmem:[%s1028_s13 + $0x48] sm:$0xff]  ;;  %v291_v38 = vld [vmem:[%s1028_s13 + $0x50] sm:$0xff]  ;;  %659 = vmatpush.msra.mxu1 %v650_v36  ;;  %v649_v40 = vld [vmem:[%s1361_s5 + $0x60] sm:$0xff] }
  0x14   : > { %v356_v16 = vadd.f32 %v1033_v4, %v320_v15  ;;  %v357_v19 = vadd.f32 %v1033_v4, %v321_v18  ;;  %v358_v22 = vadd.f32 %v1033_v4, %v322_v21  ;;  %v324_v27 = vmul.f32 %v1020_v3, %v288_v26  ;;  %909 = vmatpush.msrb.mxu3 %v651_v35  ;;  %v647_v42 = vld [vmem:[%s1361_s5 + $0x50] sm:$0xff]  ;;  %v646_v44 = vld [vmem:[%s1361_s5 + $0x48] sm:$0xff]  ;;  %v292_v45 = vld [vmem:[%s1028_s13 + $0x58] sm:$0xff] }
  0x15   : > { %868 = vmatmul.msk.f32.vlgmr.msra.gmra.mxu0 %vm391_vm1, %v353_v8  ;;  %v359_v25 = vadd.f32 %v1033_v4, %v323_v24  ;;  %v325_v30 = vmul.f32 %v1020_v3, %v289_v29  ;;  %v326_v33 = vmul.f32 %v1020_v3, %v290_v32  ;;  %910 = vmatpush.msra.mxu2 %v650_v36  ;;  %v645_v47 = vld [vmem:[%s1361_s5 + $0x40] sm:$0xff]  ;;  %v644_v48 = vld [vmem:[%s1361_s5 + $0x38] sm:$0xff]  ;;  %v643_v49 = vld [vmem:[%s1361_s5 + $0x30] sm:$0xff] }
  0x16   : > { %v360_v28 = vadd.f32 %v1033_v4, %v324_v27  ;;  %911 = vmatpush.msrb.mxu3 %v650_v36  ;;  %v327_v39 = vmul.f32 %v1020_v3, %v291_v38  ;;  %660 = vmatpush.msra.mxu1 %v649_v40  ;;  %v328_v46 = vmul.f32 %v1020_v3, %v292_v45  ;;  %v642_v51 = vld [vmem:[%s1361_s5 + $0x28] sm:$0xff]  ;;  %v293_v52 = vld [vmem:[%s1028_s13 + $0x60] sm:$0xff]  ;;  %v299_v53 = vld [vmem:[%s1028_s13 + $0x90] sm:$0xff] }
  0x17   : > { %v361_v31 = vadd.f32 %v1033_v4, %v325_v30  ;;  %v362_v37 = vadd.f32 %v1033_v4, %v326_v33  ;;  %912 = vmatpush.msra.mxu2 %v649_v40  ;;  %v335_v54 = vmul.f32 %v1020_v3, %v299_v53  ;;  %v329_v55 = vmul.f32 %v1020_v3, %v293_v52  ;;  %v641_v56 = vld [vmem:[%s1361_s5 + $0x20] sm:$0xff]  ;;  %v640_v58 = vld [vmem:[%s1361_s5 + $0x18] sm:$0xff]  ;;  %v639_v60 = vld [vmem:[%s1361_s5 + $0x10] sm:$0xff] }
  0x18   : > { %913 = vmatpush.msrb.mxu3 %v649_v40  ;;  %661 = vmatpush.msra.mxu1 %v648_v41  ;;  %v363_v43 = vadd.f32 %v1033_v4, %v327_v39  ;;  %v364_v50 = vadd.f32 %v1033_v4, %v328_v46  ;;  %v294_v61 = vld [vmem:[%s1028_s13 + $0x68] sm:$0xff]  ;;  %v300_v62 = vld [vmem:[%s1028_s13 + $0x98] sm:$0xff]  ;;  %v637_v2 = vld [vmem:[%s1361_s5] sm:$0xff] }
  0x19   : > { %914 = vmatpush.msra.mxu2 %v648_v41  ;;  %v371_v57 = vadd.f32 %v1033_v4, %v335_v54  ;;  %v365_v59 = vadd.f32 %v1033_v4, %v329_v55  ;;  %v638_v63 = vld [vmem:[%s1361_s5 + $0x8] sm:$0xff]  ;;  %v336_v0 = vmul.f32 %v1020_v3, %v300_v62  ;;  %v330_v1 = vmul.f32 %v1020_v3, %v294_v61  ;;  %v295_v7 = vld [vmem:[%s1028_s13 + $0x70] sm:$0xff]  ;;  %v301_v8 = vld [vmem:[%s1028_s13 + $0xa0] sm:$0xff] }
  0x1a   : > { %915 = vmatpush.msrb.mxu3 %v648_v41  ;;  %662 = vmatpush.msra.mxu1 %v647_v42  ;;  %v337_v9 = vmul.f32 %v1020_v3, %v301_v8  ;;  %v302_v14 = vld [vmem:[%s1028_s13 + $0xa8] sm:$0xff]  ;;  %v303_v20 = vld [vmem:[%s1028_s13 + $0xb0] sm:$0xff]  ;;  %v1171_v24 = vld [vmem:[%s1360_s4] ss:$0 sm:$0xff] }
  0x1b   : > { %916 = vmatpush.msra.mxu2 %v647_v42  ;;  %886 = vmatmul.msk.f32.vlgmr.msra.gmra.mxu3 %vm391_vm1, %v371_v57  ;;  %v372_v5 = vadd.f32 %v1033_v4, %v336_v0  ;;  %v366_v6 = vadd.f32 %v1033_v4, %v330_v1  ;;  %v338_v15 = vmul.f32 %v1020_v3, %v302_v14  ;;  %v298_v27 = vld [vmem:[%s1028_s13 + $0x88] sm:$0xff]  ;;  %v305_v36 = vld [vmem:[%s1028_s13 + $0xc0] sm:$0xff]  ;;  %v308_v54 = vld [vmem:[%s1028_s13 + $0xd8] sm:$0xff] }
  0x1c   : > { %917 = vmatpush.msrb.mxu3 %v647_v42  ;;  %663 = vmatpush.msra.mxu1 %v646_v44  ;;  %v373_v11 = vadd.f32 %v1033_v4, %v337_v9  ;;  %v339_v21 = vmul.f32 %v1020_v3, %v303_v20  ;;  %v334_v32 = vmul.f32 %v1020_v3, %v298_v27  ;;  %v306_v42 = vld [vmem:[%s1028_s13 + $0xc8] sm:$0xff] }
  0x1d   : > { %869 = vmatmul.msk.f32.gmra.mxu0 %vm391_vm1, %v354_v10  ;;  %918 = vmatpush.msra.mxu2 %v646_v44  ;;  %v331_v10 = vmul.f32 %v1020_v3, %v295_v7  ;;  %v374_v17 = vadd.f32 %v1033_v4, %v338_v15  ;;  %v341_v38 = vmul.f32 %v1020_v3, %v305_v36 }
  0x1e   : > { %919 = vmatpush.msrb.mxu3 %v646_v44  ;;  %664 = vmatpush.msra.mxu1 %v645_v47  ;;  %v375_v23 = vadd.f32 %v1033_v4, %v339_v21  ;;  %v370_v34 = vadd.f32 %v1033_v4, %v334_v32  ;;  %v342_v44 = vmul.f32 %v1020_v3, %v306_v42 }
  0x1f   : > { %920 = vmatpush.msra.mxu2 %v645_v47  ;;  %v367_v12 = vadd.f32 %v1033_v4, %v331_v10  ;;  %v377_v40 = vadd.f32 %v1033_v4, %v341_v38  ;;  %v311_v10 = vld [vmem:[%s1028_s13 + $0xf0] sm:$0xff] }
  0x20   : > { %921 = vmatpush.msrb.mxu3 %v645_v47  ;;  %665 = vmatpush.msra.mxu1 %v644_v48  ;;  %v378_v46 = vadd.f32 %v1033_v4, %v342_v44 }
  0x21   : > { %922 = vmatpush.msra.mxu2 %v644_v48 }
  0x22   : > { %923 = vmatpush.msrb.mxu3 %v644_v48  ;;  %666 = vmatpush.msra.mxu1 %v643_v49  ;;  %v307_v48 = vld [vmem:[%s1028_s13 + $0xd0] sm:$0xff] }
  0x23   : > { %924 = vmatpush.msra.mxu2 %v643_v49  ;;  %887 = vmatmul.msk.f32.gmra.mxu3 %vm391_vm1, %v372_v5 }
  0x24   : > { %925 = vmatpush.msrb.mxu3 %v643_v49  ;;  %667 = vmatpush.msra.mxu1 %v642_v51 }
  0x25   : > { %870 = vmatmul.msk.f32.gmra.mxu0 %vm391_vm1, %v355_v13  ;;  %926 = vmatpush.msra.mxu2 %v642_v51  ;;  %v296_v13 = vld [vmem:[%s1028_s13 + $0x78] sm:$0xff] }
  0x26   : > { %927 = vmatpush.msrb.mxu3 %v642_v51  ;;  %668 = vmatpush.msra.mxu1 %v641_v56 }
  0x27   : > { %928 = vmatpush.msra.mxu2 %v641_v56 }
  0x28   : > { %669 = vmatpush.msra.mxu1 %v640_v58  ;;  %929 = vmatpush.msrb.mxu3 %v641_v56  ;;  %v344_v56 = vmul.f32 %v1020_v3, %v308_v54 }
  0x29   : > { %930 = vmatpush.msra.mxu2 %v640_v58 }
  0x2a   : > { %670 = vmatpush.msra.mxu1 %v639_v60  ;;  %931 = vmatpush.msrb.mxu3 %v640_v58  ;;  %v380_v58 = vadd.f32 %v1033_v4, %v344_v56 }
  0x2b   : > { %932 = vmatpush.msra.mxu2 %v639_v60  ;;  %888 = vmatmul.msk.f32.gmra.mxu3 %vm391_vm1, %v373_v11 }
  0x2c   : > { %671 = vmatpush.msra.mxu1 %v638_v63  ;;  %933 = vmatpush.msrb.mxu3 %v639_v60  ;;  %v309_v60 = vld [vmem:[%s1028_s13 + $0xe0] sm:$0xff] }
  0x2d   : > { %871 = vmatmul.msk.f32.gmra.mxu0 %vm391_vm1, %v356_v16  ;;  %934 = vmatpush.msra.mxu2 %v638_v63  ;;  %v332_v16 = vmul.f32 %v1020_v3, %v296_v13  ;;  %v345_v62 = vmul.f32 %v1020_v3, %v309_v60 }
  0x2e   : > { %672 = vmatpush.msra.mxu1 %v637_v2  ;;  %935 = vmatpush.msrb.mxu3 %v638_v63 }
  0x2f   : > { %936 = vmatpush.msra.mxu2 %v637_v2  ;;  %v368_v18 = vadd.f32 %v1033_v4, %v332_v16  ;;  %v381_v0 = vadd.f32 %v1033_v4, %v345_v62  ;;  %v312_v16 = vld [vmem:[%s1028_s13 + $0xf8] sm:$0xff] }
  0x30   : > { %937 = vmatpush.msrb.mxu3 %v637_v2  ;;  %v310_v2 = vld [vmem:[%s1028_s13 + $0xe8] sm:$0xff] }
  0x33   : > { %889 = vmatmul.msk.f32.gmra.mxu3 %vm391_vm1, %v374_v17 }
  0x35   : > { %872 = vmatmul.msk.f32.gmra.mxu0 %vm391_vm1, %v357_v19  ;;  %v297_v19 = vld [vmem:[%s1028_s13 + $0x80] sm:$0xff] }
  0x3b   : > { %890 = vmatmul.msk.f32.gmra.mxu3 %vm391_vm1, %v375_v23 }
  0x3d   : > { %873 = vmatmul.msk.f32.gmra.mxu0 %vm391_vm1, %v358_v22  ;;  %v333_v22 = vmul.f32 %v1020_v3, %v297_v19 }
  0x45   : > { %874 = vmatmul.msk.f32.gmra.mxu0 %vm391_vm1, %v359_v25  ;;  %v369_v25 = vadd.f32 %v1033_v4, %v333_v22 }
  0x4d   : > { %875 = vmatmul.msk.f32.gmra.mxu0 %vm391_vm1, %v360_v28  ;;  %v304_v28 = vld [vmem:[%s1028_s13 + $0xb8] sm:$0xff] }
  0x4e   : > { %v340_v30 = vmul.f32 %v1020_v3, %v304_v28 }
  0x50   : > { %v376_v33 = vadd.f32 %v1033_v4, %v340_v30 }
  0x52   : > { %891 = vmatmul.msk.f32.gmra.mxu3 %vm391_vm1, %v376_v33 }
  0x55   : > { %876 = vmatmul.msk.f32.gmra.mxu0 %vm391_vm1, %v361_v31 }
  0x5a   : > { %892 = vmatmul.msk.f32.gmra.mxu3 %vm391_vm1, %v377_v40 }
  0x5d   : > { %877 = vmatmul.msk.f32.gmra.mxu0 %vm391_vm1, %v362_v37 }
  0x62   : > { %893 = vmatmul.msk.f32.gmra.mxu3 %vm391_vm1, %v378_v46 }
  0x65   : > { %878 = vmatmul.msk.f32.gmra.mxu0 %vm391_vm1, %v363_v43 }
  0x6d   : > { %879 = vmatmul.msk.f32.gmra.mxu0 %vm391_vm1, %v364_v50  ;;  %v343_v50 = vmul.f32 %v1020_v3, %v307_v48 }
  0x6f   : > { %v379_v52 = vadd.f32 %v1033_v4, %v343_v50 }
  0x71   : > { %894 = vmatmul.msk.f32.gmra.mxu3 %vm391_vm1, %v379_v52 }
  0x75   : > { %880 = vmatmul.msk.f32.gmra.mxu0 %vm391_vm1, %v365_v59 }
  0x79   : > { %895 = vmatmul.msk.f32.gmra.mxu3 %vm391_vm1, %v380_v58 }
  0x7d   : > { %881 = vmatmul.msk.f32.gmra.mxu0 %vm391_vm1, %v366_v6  ;;  %v346_v6 = vmul.f32 %v1020_v3, %v310_v2 }
  0x7f   : > { %v382_v8 = vadd.f32 %v1033_v4, %v346_v6 }
  0x81   : > { %896 = vmatmul.msk.f32.gmra.mxu3 %vm391_vm1, %v381_v0 }
  0x85   : > { %882 = vmatmul.msk.f32.gmra.mxu0 %vm391_vm1, %v367_v12  ;;  %v347_v12 = vmul.f32 %v1020_v3, %v311_v10 }
  0x87   : > { %v383_v14 = vadd.f32 %v1033_v4, %v347_v12 }
  0x89   : > { %897 = vmatmul.msk.f32.gmra.mxu3 %vm391_vm1, %v382_v8 }
  0x8d   : > { %883 = vmatmul.msk.f32.gmra.mxu0 %vm391_vm1, %v368_v18  ;;  %v348_v18 = vmul.f32 %v1020_v3, %v312_v16 }
  0x8f   : > { %v384_v20 = vadd.f32 %v1033_v4, %v348_v18 }
  0x91   : > { %898 = vmatmul.msk.f32.gmra.mxu3 %vm391_vm1, %v383_v14 }
  0x92   : > { %v509_v26 = vpop.f32.mrf.mxu0 }
  0x93   : > { %v510_v29 = vadd.f32 %v1171_v24, %v509_v26 }
  0x95   : > { %v605_v31 = vmax.f32 %v510_v29, 0.0  ;;  %884 = vmatmul.msk.f32.gmra.mxu0 %vm391_vm1, %v369_v25 }
  0x97   : > { %673 = vmatmul.f32.vlgmr.msra.gmra.mxu1 %v605_v31 }
  0x99   : > { %899 = vmatmul.msk.f32.gmra.mxu3 %vm391_vm1, %v384_v20 }
  0x9a   : > { %v512_v35 = vpop.f32.mrf.mxu0 }
  0x9b   : > { %v513_v37 = vadd.f32 %v1171_v24, %v512_v35 }
  0x9d   : > { %v606_v39 = vmax.f32 %v513_v37, 0.0  ;;  %885 = vmatmul.msk.f32.gmra.mxu0 %vm391_vm1, %v370_v34 }
  0x9e   : > { %v563_v4 = vpop.f32.mrf.mxu3 }
  0x9f   : > { %676 = vmatmul.f32.gmra.mxu1 %v606_v39  ;;  %v564_v58 = vadd.f32 %v1171_v24, %v563_v4 }
  0xa2   : > { %v515_v41 = vpop.f32.mrf.mxu0 }
  0xa3   : > { %v516_v43 = vadd.f32 %v1171_v24, %v515_v41 }
  0xa5   : > { %v607_v45 = vmax.f32 %v516_v43, 0.0 }
  0xa6   : > { %v566_v34 = vpop.f32.mrf.mxu3 }
  0xa7   : > { %679 = vmatmul.f32.gmra.mxu1 %v607_v45  ;;  %v1232_v45 = vld [vmem:[#allocation2] ss:$0 sm:$0xff] }
  0xaa   : > { %v518_v47 = vpop.f32.mrf.mxu0 }
  0xab   : > { %v519_v49 = vadd.f32 %v1171_v24, %v518_v47 }
  0xad   : > { %v608_v51 = vmax.f32 %v519_v49, 0.0 }
  0xae   : > { %v569_v38 = vpop.f32.mrf.mxu3 }
  0xaf   : > { %682 = vmatmul.f32.gmra.mxu1 %v608_v51  ;;  %v570_v6 = vadd.f32 %v1171_v24, %v569_v38 }
  0xb2   : > { %v521_v53 = vpop.f32.mrf.mxu0 }
  0xb3   : > { %v522_v55 = vadd.f32 %v1171_v24, %v521_v53 }
  0xb5   : > { %v609_v57 = vmax.f32 %v522_v55, 0.0 }
  0xb6   : > { %v572_v42 = vpop.f32.mrf.mxu3 }
  0xb7   : > { %685 = vmatmul.f32.gmra.mxu1 %v609_v57 }
  0xba   : > { %v524_v59 = vpop.f32.mrf.mxu0 }
  0xbb   : > { %v525_v61 = vadd.f32 %v1171_v24, %v524_v59 }
  0xbd   : > { %v610_v63 = vmax.f32 %v525_v61, 0.0  ;;  %v623_v61 = vmax.f32 %v564_v58, 0.0 }
  0xbe   : > { %v575_v47 = vpop.f32.mrf.mxu3 }
  0xbf   : > { %688 = vmatmul.f32.gmra.mxu1 %v610_v63  ;;  %v567_v63 = vadd.f32 %v1171_v24, %v566_v34  ;;  %v576_v16 = vadd.f32 %v1171_v24, %v575_v47 }
  0xc1   : > { %v624_v2 = vmax.f32 %v567_v63, 0.0 }
  0xc2   : > { %v527_v1 = vpop.f32.mrf.mxu0 }
  0xc3   : > { %v528_v5 = vadd.f32 %v1171_v24, %v527_v1 }
  0xc5   : > { %v611_v7 = vmax.f32 %v528_v5, 0.0 }
  0xc7   : > { %691 = vmatmul.f32.gmra.mxu1 %v611_v7 }
  0xca   : > { %v530_v9 = vpop.f32.mrf.mxu0 }
  0xcb   : > { %v531_v11 = vadd.f32 %v1171_v24, %v530_v9  ;;  %v625_v9 = vmax.f32 %v570_v6, 0.0 }
  0xcd   : > { %v612_v13 = vmax.f32 %v531_v11, 0.0  ;;  %v573_v11 = vadd.f32 %v1171_v24, %v572_v42 }
  0xcf   : > { %694 = vmatmul.f32.gmra.mxu1 %v612_v13  ;;  %v626_v14 = vmax.f32 %v573_v11, 0.0 }
  0xd2   : > { %v533_v15 = vpop.f32.mrf.mxu0 }
  0xd3   : > { %v534_v17 = vadd.f32 %v1171_v24, %v533_v15 }
  0xd5   : > { %v613_v19 = vmax.f32 %v534_v17, 0.0  ;;  %v578_v53 = vpop.f32.mrf.mxu3 }
  0xd7   : > { %697 = vmatmul.f32.gmra.mxu1 %v613_v19  ;;  %v627_v19 = vmax.f32 %v576_v16, 0.0 }
  0xda   : > { %v536_v21 = vpop.f32.mrf.mxu0 }
  0xdb   : > { %v537_v22 = vadd.f32 %v1171_v24, %v536_v21  ;;  %v579_v21 = vadd.f32 %v1171_v24, %v578_v53 }
  0xdd   : > { %v614_v23 = vmax.f32 %v537_v22, 0.0  ;;  %v581_v59 = vpop.f32.mrf.mxu3 }
  0xdf   : > { %700 = vmatmul.f32.gmra.mxu1 %v614_v23 }
  0xe2   : > { %v539_v25 = vpop.f32.mrf.mxu0 }
  0xe3   : > { %v540_v26 = vadd.f32 %v1171_v24, %v539_v25  ;;  %v628_v25 = vmax.f32 %v579_v21, 0.0 }
  0xe5   : > { %v615_v27 = vmax.f32 %v540_v26, 0.0  ;;  %v584_v0 = vpop.f32.mrf.mxu3 }
  0xe7   : > { %703 = vmatmul.f32.gmra.mxu1 %v615_v27  ;;  %v582_v27 = vadd.f32 %v1171_v24, %v581_v59 }
  0xea   : > { %v542_v28 = vpop.f32.mrf.mxu0 }
  0xeb   : > { %v543_v29 = vadd.f32 %v1171_v24, %v542_v28 }
  0xed   : > { %v616_v3 = vmax.f32 %v543_v29, 0.0 }
  0xef   : > { %706 = vmatmul.f32.gmra.mxu1 %v616_v3 }
  0xf2   : > { %v545_v30 = vpop.f32.mrf.mxu0 }
  0xf3   : > { %v546_v31 = vadd.f32 %v1171_v24, %v545_v30  ;;  %v629_v30 = vmax.f32 %v582_v27, 0.0 }
  0xf4   : > { %v587_v7 = vpop.f32.mrf.mxu3 }
  0xf5   : > { %v617_v32 = vmax.f32 %v546_v31, 0.0 }
  0xf7   : > { %709 = vmatmul.f32.gmra.mxu1 %v617_v32  ;;  %v585_v32 = vadd.f32 %v1171_v24, %v584_v0 }
  0xfa   : > { %v548_v33 = vpop.f32.mrf.mxu0 }
  0xfb   : > { %v549_v35 = vadd.f32 %v1171_v24, %v548_v33 }
  0xfc   : > { %v590_v12 = vpop.f32.mrf.mxu3 }
  0xfd   : > { %v618_v36 = vmax.f32 %v549_v35, 0.0 }
  0xff   : > { %712 = vmatmul.f32.gmra.mxu1 %v618_v36  ;;  %v630_v36 = vmax.f32 %v585_v32, 0.0 }
 0x102   : > { %v551_v37 = vpop.f32.mrf.mxu0 }
 0x103   : > { %v552_v39 = vadd.f32 %v1171_v24, %v551_v37 }
 0x104   : > { %v593_v17 = vpop.f32.mrf.mxu3 }
 0x105   : > { %v619_v40 = vmax.f32 %v552_v39, 0.0  ;;  %v588_v39 = vadd.f32 %v1171_v24, %v587_v7 }
 0x107   : > { %715 = vmatmul.f32.gmra.mxu1 %v619_v40 }
 0x10a   : > { %v554_v41 = vpop.f32.mrf.mxu0 }
 0x10b   : > { %v555_v43 = vadd.f32 %v1171_v24, %v554_v41  ;;  %v631_v41 = vmax.f32 %v588_v39, 0.0 }
 0x10c   : > { %v596_v22 = vpop.f32.mrf.mxu3 }
 0x10d   : > { %v620_v44 = vmax.f32 %v555_v43, 0.0  ;;  %v591_v43 = vadd.f32 %v1171_v24, %v590_v12 }
 0x10f   : > { %718 = vmatmul.f32.vlgmr.msra.gmra.mxu2 %v620_v44 }
 0x112   : > { %v557_v46 = vpop.f32.mrf.mxu0 }
 0x113   : > { %v558_v48 = vadd.f32 %v1171_v24, %v557_v46  ;;  %v632_v46 = vmax.f32 %v591_v43, 0.0 }
 0x114   : > { %v674_v49 = vpop.f32.mrf.mxu1  ;;  %v599_v28 = vpop.f32.mrf.mxu3 }
 0x115   : > { %v621_v50 = vmax.f32 %v558_v48, 0.0  ;;  %v675_v51 = vadd.f32 %v1232_v45, %v674_v49  ;;  %v600_v29 = vadd.f32 %v1171_v24, %v599_v28  ;;  %v594_v48 = vadd.f32 %v1171_v24, %v593_v17 }
 0x117   : > { %771 = vst.msk [vmem:[%s1240_s9] sm:$0xff] %vm770_vm2, %v675_v51  ;;  %721 = vmatmul.f32.gmra.mxu2 %v621_v50  ;;  %v635_v31 = vmax.f32 %v600_v29, 0.0  ;;  %v633_v50 = vmax.f32 %v594_v48, 0.0 }
 0x119   : > { %763 = vmatmul.f32.vlgmr.msrb.gmra.mxu3 %v635_v31 }
 0x11a   : > { %v560_v52 = vpop.f32.mrf.mxu0 }
 0x11b   : > { %v561_v54 = vadd.f32 %v1171_v24, %v560_v52  ;;  %v597_v52 = vadd.f32 %v1171_v24, %v596_v22 }
 0x11c   : > { %v677_v55 = vpop.f32.mrf.mxu1  ;;  %v602_v33 = vpop.f32.mrf.mxu3 }
 0x11d   : > { %v622_v56 = vmax.f32 %v561_v54, 0.0  ;;  %v678_v57 = vadd.f32 %v1232_v45, %v677_v55  ;;  %v603_v34 = vadd.f32 %v1171_v24, %v602_v33  ;;  %v634_v54 = vmax.f32 %v597_v52, 0.0 }
 0x11f   : > { %772 = vst.msk [vmem:[%s1240_s9 + $0x8] sm:$0xff] %vm770_vm2, %v678_v57  ;;  %724 = vmatmul.f32.gmra.mxu2 %v622_v56  ;;  %v636_v38 = vmax.f32 %v603_v34, 0.0 }
 0x121   : > { %766 = vmatmul.f32.gmra.mxu3 %v636_v38 }
 0x124   : > { %v680_v60 = vpop.f32.mrf.mxu1 }
 0x125   : > { %v681_v62 = vadd.f32 %v1232_v45, %v680_v60 }
 0x127   : > { %773 = vst.msk [vmem:[%s1240_s9 + $0x10] sm:$0xff] %vm770_vm2, %v681_v62  ;;  %727 = vmatmul.f32.gmra.mxu2 %v623_v61 }
 0x12c   : > { %v683_v1 = vpop.f32.mrf.mxu1 }
 0x12d   : > { %v684_v5 = vadd.f32 %v1232_v45, %v683_v1 }
 0x12f   : > { %774 = vst.msk [vmem:[%s1240_s9 + $0x18] sm:$0xff] %vm770_vm2, %v684_v5  ;;  %730 = vmatmul.f32.gmra.mxu2 %v624_v2 }
 0x134   : > { %v686_v8 = vpop.f32.mrf.mxu1 }
 0x135   : > { %v687_v10 = vadd.f32 %v1232_v45, %v686_v8 }
 0x137   : > { %775 = vst.msk [vmem:[%s1240_s9 + $0x20] sm:$0xff] %vm770_vm2, %v687_v10  ;;  %733 = vmatmul.f32.gmra.mxu2 %v625_v9 }
 0x13c   : > { %v689_v13 = vpop.f32.mrf.mxu1 }
 0x13d   : > { %v690_v15 = vadd.f32 %v1232_v45, %v689_v13 }
 0x13f   : > { %776 = vst.msk [vmem:[%s1240_s9 + $0x28] sm:$0xff] %vm770_vm2, %v690_v15  ;;  %736 = vmatmul.f32.gmra.mxu2 %v626_v14 }
 0x144   : > { %v692_v18 = vpop.f32.mrf.mxu1 }
 0x145   : > { %v693_v20 = vadd.f32 %v1232_v45, %v692_v18 }
 0x147   : > { %777 = vst.msk [vmem:[%s1240_s9 + $0x30] sm:$0xff] %vm770_vm2, %v693_v20  ;;  %739 = vmatmul.f32.gmra.mxu2 %v627_v19 }
 0x14c   : > { %v695_v23 = vpop.f32.mrf.mxu1 }
 0x14d   : > { %v696_v26 = vadd.f32 %v1232_v45, %v695_v23 }
 0x14f   : > { %778 = vst.msk [vmem:[%s1240_s9 + $0x38] sm:$0xff] %vm770_vm2, %v696_v26  ;;  %742 = vmatmul.f32.gmra.mxu2 %v628_v25 }
 0x154   : > { %v698_v3 = vpop.f32.mrf.mxu1 }
 0x155   : > { %v699_v4 = vadd.f32 %v1232_v45, %v698_v3 }
 0x157   : > { %779 = vst.msk [vmem:[%s1240_s9 + $0x40] sm:$0xff] %vm770_vm2, %v699_v4  ;;  %745 = vmatmul.f32.gmra.mxu2 %v629_v30 }
 0x15c   : > { %v701_v35 = vpop.f32.mrf.mxu1 }
 0x15d   : > { %v702_v37 = vadd.f32 %v1232_v45, %v701_v35 }
 0x15f   : > { %780 = vst.msk [vmem:[%s1240_s9 + $0x48] sm:$0xff] %vm770_vm2, %v702_v37  ;;  %748 = vmatmul.f32.gmra.mxu2 %v630_v36 }
 0x164   : > { %v704_v40 = vpop.f32.mrf.mxu1 }
 0x165   : > { %v705_v42 = vadd.f32 %v1232_v45, %v704_v40 }
 0x167   : > { %781 = vst.msk [vmem:[%s1240_s9 + $0x50] sm:$0xff] %vm770_vm2, %v705_v42  ;;  %751 = vmatmul.f32.gmra.mxu2 %v631_v41 }
 0x16c   : > { %v707_v44 = vpop.f32.mrf.mxu1 }
 0x16d   : > { %v708_v47 = vadd.f32 %v1232_v45, %v707_v44 }
 0x16f   : > { %782 = vst.msk [vmem:[%s1240_s9 + $0x58] sm:$0xff] %vm770_vm2, %v708_v47  ;;  %754 = vmatmul.f32.gmra.mxu2 %v632_v46 }
 0x174   : > { %v710_v49 = vpop.f32.mrf.mxu1 }
 0x175   : > { %v711_v51 = vadd.f32 %v1232_v45, %v710_v49 }
 0x177   : > { %783 = vst.msk [vmem:[%s1240_s9 + $0x60] sm:$0xff] %vm770_vm2, %v711_v51  ;;  %757 = vmatmul.f32.gmra.mxu2 %v633_v50 }
 0x17c   : > { %v713_v53 = vpop.f32.mrf.mxu1 }
 0x17d   : > { %v714_v55 = vadd.f32 %v1232_v45, %v713_v53 }
 0x17f   : > { %784 = vst.msk [vmem:[%s1240_s9 + $0x68] sm:$0xff] %vm770_vm2, %v714_v55  ;;  %760 = vmatmul.f32.gmra.mxu2 %v634_v54 }
 0x184   : > { %v716_v56 = vpop.f32.mrf.mxu1 }
 0x185   : > { %v717_v57 = vadd.f32 %v1232_v45, %v716_v56 }
 0x187   : > { %785 = vst.msk [vmem:[%s1240_s9 + $0x70] sm:$0xff] %vm770_vm2, %v717_v57 }
 0x192   : > { %v719_v58 = vpop.f32.mrf.mxu2 }
 0x193   : > { %v720_v59 = vadd.f32 %v1232_v45, %v719_v58 }
 0x195   : > { %786 = vst.msk [vmem:[%s1240_s9 + $0x78] sm:$0xff] %vm770_vm2, %v720_v59 }
 0x19a   : > { %v722_v24 = vpop.f32.mrf.mxu2 }
 0x19b   : > { %v723_v60 = vadd.f32 %v1232_v45, %v722_v24 }
 0x19c   : > { %v764_v14 = vpop.f32.mrf.mxu3 }
 0x19d   : > { %787 = vst.msk [vmem:[%s1240_s9 + $0x80] sm:$0xff] %vm770_vm2, %v723_v60  ;;  %v765_v16 = vadd.f32 %v1232_v45, %v764_v14 }
 0x19f   : > { %801 = vst.msk [vmem:[%s1240_s9 + $0xf0] sm:$0xff] %vm770_vm2, %v765_v16 }
 0x1a2   : > { %v725_v61 = vpop.f32.mrf.mxu2 }
 0x1a3   : > { %v726_v62 = vadd.f32 %v1232_v45, %v725_v61 }
 0x1a4   : > { %v767_v18 = vpop.f32.mrf.mxu3 }
 0x1a5   : > { %788 = vst.msk [vmem:[%s1240_s9 + $0x88] sm:$0xff] %vm770_vm2, %v726_v62  ;;  %v768_v20 = vadd.f32 %v1232_v45, %v767_v18 }
 0x1a7   : > { %802 = vst.msk [vmem:[%s1240_s9 + $0xf8] sm:$0xff] %vm770_vm2, %v768_v20 }
 0x1aa   : > { %v728_v63 = vpop.f32.mrf.mxu2 }
 0x1ab   : > { %v729_v0 = vadd.f32 %v1232_v45, %v728_v63 }
 0x1ad   : > { %789 = vst.msk [vmem:[%s1240_s9 + $0x90] sm:$0xff] %vm770_vm2, %v729_v0 }
 0x1b2   : > { %v731_v1 = vpop.f32.mrf.mxu2 }
 0x1b3   : > { %v732_v2 = vadd.f32 %v1232_v45, %v731_v1 }
 0x1b5   : > { %790 = vst.msk [vmem:[%s1240_s9 + $0x98] sm:$0xff] %vm770_vm2, %v732_v2 }
 0x1ba   : > { %v734_v5 = vpop.f32.mrf.mxu2 }
 0x1bb   : > { %v735_v6 = vadd.f32 %v1232_v45, %v734_v5 }
 0x1bd   : > { %791 = vst.msk [vmem:[%s1240_s9 + $0xa0] sm:$0xff] %vm770_vm2, %v735_v6 }
 0x1c2   : > { %v737_v7 = vpop.f32.mrf.mxu2 }
 0x1c3   : > { %v738_v8 = vadd.f32 %v1232_v45, %v737_v7 }
 0x1c5   : > { %792 = vst.msk [vmem:[%s1240_s9 + $0xa8] sm:$0xff] %vm770_vm2, %v738_v8 }
 0x1ca   : > { %v740_v9 = vpop.f32.mrf.mxu2 }
 0x1cb   : > { %v741_v10 = vadd.f32 %v1232_v45, %v740_v9 }
 0x1cd   : > { %793 = vst.msk [vmem:[%s1240_s9 + $0xb0] sm:$0xff] %vm770_vm2, %v741_v10 }
 0x1d2   : > { %v743_v11 = vpop.f32.mrf.mxu2 }
 0x1d3   : > { %v744_v12 = vadd.f32 %v1232_v45, %v743_v11 }
 0x1d5   : > { %794 = vst.msk [vmem:[%s1240_s9 + $0xb8] sm:$0xff] %vm770_vm2, %v744_v12 }
 0x1da   : > { %v746_v13 = vpop.f32.mrf.mxu2 }
 0x1db   : > { %v747_v15 = vadd.f32 %v1232_v45, %v746_v13 }
 0x1dd   : > { %795 = vst.msk [vmem:[%s1240_s9 + $0xc0] sm:$0xff] %vm770_vm2, %v747_v15 }
 0x1e2   : > { %v749_v17 = vpop.f32.mrf.mxu2 }
 0x1e3   : > { %v750_v19 = vadd.f32 %v1232_v45, %v749_v17 }
 0x1e5   : > { %796 = vst.msk [vmem:[%s1240_s9 + $0xc8] sm:$0xff] %vm770_vm2, %v750_v19 }
 0x1ea   : > { %v752_v21 = vpop.f32.mrf.mxu2 }
 0x1eb   : > { %v753_v22 = vadd.f32 %v1232_v45, %v752_v21 }
 0x1ed   : > { %797 = vst.msk [vmem:[%s1240_s9 + $0xd0] sm:$0xff] %vm770_vm2, %v753_v22 }
 0x1f2   : > { %v755_v23 = vpop.f32.mrf.mxu2 }
 0x1f3   : > { %v756_v25 = vadd.f32 %v1232_v45, %v755_v23 }
 0x1f5   : > { %798 = vst.msk [vmem:[%s1240_s9 + $0xd8] sm:$0xff] %vm770_vm2, %v756_v25 }
 0x1fa   : > { %v758_v26 = vpop.f32.mrf.mxu2 }
 0x1fb   : > { %v759_v27 = vadd.f32 %v1232_v45, %v758_v26 }
 0x1fd   : > { %799 = vst.msk [vmem:[%s1240_s9 + $0xe0] sm:$0xff] %vm770_vm2, %v759_v27 }
 0x202   : > { %v761_v28 = vpop.f32.mrf.mxu2 }
 0x203   : > { %v762_v29 = vadd.f32 %v1232_v45, %v761_v28 }
 0x205   : > { %800 = vst.msk [vmem:[%s1240_s9 + $0xe8] sm:$0xff] %vm770_vm2, %v762_v29 }
 0x206 PF: > { %s19_s26 = sadd.s32 1, %s956_s26  }
 0x207   : > { %p16_p4 = scmp.ge.s32.totalorder %s19_s26, 4  }
 0x209   :  { %18 = sbr.rel (!%p16_p4) target bundleno = 3 (0x3), region = 78 }

// kernel: net2d_forward.6
= control target key start
LH: loop header
LB: loop body
LE: loop exit
PB: predicated region body
PF: predicated region fallthrough
CT: control target
= control target key end

     0   :  { %s3109_s29 = smov 0   ;;  %s5281_s0 = inlined_call_operand.vmem [shape: f32[2,256,12], index: 0, kind: input, shape index: {}]   ;;  %s5282_s1 = inlined_call_operand.vmem [shape: f32[1,12], index: 1, kind: input, shape index: {}]   ;;  %s5283_s2 = inlined_call_operand.vmem [shape: f32[1,12], index: 2, kind: input, shape index: {}]   ;;  %s5284_s3 = inlined_call_operand.vmem [shape: f32[12,256], index: 3, kind: input, shape index: {}]   ;;  %s5285_s4 = inlined_call_operand.vmem [shape: f32[1,256], index: 4, kind: input, shape index: {}]   ;;  %s5286_s5 = inlined_call_operand.vmem [shape: f32[128,640], index: 5, kind: input, shape index: {}]   ;;  %s5287_s6 = inlined_call_operand.vmem [shape: f32[1,640], index: 6, kind: input, shape index: {}]   ;;  %s5288_s7 = inlined_call_operand.vmem [shape: f32[128,640], index: 7, kind: input, shape index: {}]   ;;  %s5289_s8 = inlined_call_operand.vmem [shape: f32[1,640], index: 8, kind: input, shape index: {}]   ;;  %s5290_s9 = inlined_call_operand.vmem [shape: f32[12,640], index: 9, kind: input, shape index: {}]   ;;  %s5291_s10 = inlined_call_operand.vmem [shape: f32[640,12], index: 10, kind: input, shape index: {}]   ;;  %s5292_s11 = inlined_call_operand.vmem [shape: f32[12,12], index: 11, kind: input, shape index: {}]   ;;  %s5293_s12 = inlined_call_operand.vmem [shape: f32[1,12], index: 12, kind: input, shape index: {}]   ;;  %s5294_s13 = inlined_call_operand.vmem [shape: f32[2,256,12], index: 13, kind: output, shape index: {0}]   ;;  %s5295_s14 = inlined_call_operand.vmem [shape: f32[2,2,12], index: 14, kind: output, shape index: {1}]  }
   0x1 LB: > { %s2863_s30 = sadd.s32 4294967295, %s3031_s29   ;;  %p2867_p0 = scmp.ge.s32.totalorder %s3031_s29, 1  ;;  %s3031_s29 = sphi %s3109_s29, %s25_s29  }
   0x2   : > { %p415_p1 = scmp.lt.s32.totalorder %s3031_s29, 3 }
   0x4   : > { %p416_p2 = pnand %p2867_p0, %p415_p1 }
   0x6   : > { %419 = sbr.rel (%p416_p2) target bundleno = 1600 (0x640), region = 72 }
   0xb   : > { %v618_v0 = vld [vmem:[%s5284_s3 + $0x18] sm:$0xf]  ;;  %vm977_vm0 = vcmask 1043456   ;;  %v616_v1 = vld [vmem:[%s5284_s3 + $0x8] sm:$0xff]  ;;  %p465_p3 = scmp.lt.s32.totalorder %s2863_s30, 1  ;;  %vm880_vm1 = vcmask 97280  }
   0xc   : > { %2906 = vmatpush.msk.msra.mxu1 %vm977_vm0, %v618_v0  ;;  %v3129_v2 = vld [vmem:[%s5282_s1] ss:$0 sm:$0xff]  ;;  %vm1745_vm2 = vcmask 1040384   ;;  %vm1747_vm3 = vcmask 1041408   ;;  %vm1749_vm4 = vcmask 1043459   ;;  %vm1751_vm5 = vcmask 1042432  }
   0xd   : > { %s5413_s30 = smov (!%p465_p3, %s2863_s30), 1  ;;  %v3142_v3 = vld [vmem:[%s5283_s2] ss:$0 sm:$0xff]  ;;  %vm2775_vm6 = vcmask 91136  }
   0xe   : > { %1112 = vmatpush.msra.mxu1 %v616_v1  ;;  %s2984_s21 = sshll.u32 %s5413_s30, 8 }
   0xf   : > { %s3137_s24 = scalar_lea.vmem %s5281_s0, %s2984_s21  ;;  %s5031_s27 = scalar_lea.vmem %s5294_s13, %s2984_s21 }
  0x10   : > { %v479_v4 = vld [vmem:[%s3137_s24] sm:$0xff]  ;;  %v480_v5 = vld [vmem:[%s3137_s24 + $0x8] sm:$0xff]  ;;  %v481_v11 = vld [vmem:[%s3137_s24 + $0x10] sm:$0xff]  ;;  %s2872_s21 = sshll.u32 %s5413_s30, 1 }
  0x11   : > { %v515_v6 = vmul.f32 %v3129_v2, %v479_v4  ;;  %v516_v8 = vmul.f32 %v3129_v2, %v480_v5  ;;  %v517_v13 = vmul.f32 %v3129_v2, %v481_v11  ;;  %v482_v15 = vld [vmem:[%s3137_s24 + $0x18] sm:$0xff]  ;;  %v483_v19 = vld [vmem:[%s3137_s24 + $0x20] sm:$0xff]  ;;  %v484_v23 = vld [vmem:[%s3137_s24 + $0x28] sm:$0xff]  ;;  %s478_s16 = scalar_lea.vmem %s5295_s14, %s2872_s21 }
  0x12   : > { %v518_v17 = vmul.f32 %v3129_v2, %v482_v15  ;;  %v519_v21 = vmul.f32 %v3129_v2, %v483_v19  ;;  %v520_v25 = vmul.f32 %v3129_v2, %v484_v23  ;;  %v485_v27 = vld [vmem:[%s3137_s24 + $0x30] sm:$0xff]  ;;  %v486_v31 = vld [vmem:[%s3137_s24 + $0x38] sm:$0xff]  ;;  %v487_v35 = vld [vmem:[%s3137_s24 + $0x40] sm:$0xff] }
  0x13   : > { %v551_v7 = vadd.f32 %v3142_v3, %v515_v6  ;;  %v552_v10 = vadd.f32 %v3142_v3, %v516_v8  ;;  %v553_v14 = vadd.f32 %v3142_v3, %v517_v13  ;;  %v521_v29 = vmul.f32 %v3129_v2, %v485_v27  ;;  %v488_v39 = vld [vmem:[%s3137_s24 + $0x48] sm:$0xff]  ;;  %v489_v43 = vld [vmem:[%s3137_s24 + $0x50] sm:$0xff]  ;;  %v490_v47 = vld [vmem:[%s3137_s24 + $0x58] sm:$0xff] }
  0x14   : > { %v554_v18 = vadd.f32 %v3142_v3, %v518_v17  ;;  %v555_v22 = vadd.f32 %v3142_v3, %v519_v21  ;;  %v556_v26 = vadd.f32 %v3142_v3, %v520_v25  ;;  %v522_v33 = vmul.f32 %v3129_v2, %v486_v31  ;;  %v491_v51 = vld [vmem:[%s3137_s24 + $0x60] sm:$0xff]  ;;  %v492_v55 = vld [vmem:[%s3137_s24 + $0x68] sm:$0xff]  ;;  %v493_v59 = vld [vmem:[%s3137_s24 + $0x70] sm:$0xff] }
  0x15   : > { %v3149_v9 = vmax.f32 %v551_v7, 0.0  ;;  %v3156_v12 = vmax.f32 %v552_v10, 0.0  ;;  %v3164_v16 = vmax.f32 %v553_v14, 0.0  ;;  %v557_v30 = vadd.f32 %v3142_v3, %v521_v29  ;;  %v494_v63 = vld [vmem:[%s3137_s24 + $0x78] sm:$0xff]  ;;  %v495_v5 = vld [vmem:[%s3137_s24 + $0x80] sm:$0xff]  ;;  %v496_v10 = vld [vmem:[%s3137_s24 + $0x88] sm:$0xff] }
  0x16   : > { %v3172_v20 = vmax.f32 %v554_v18, 0.0  ;;  %v3180_v24 = vmax.f32 %v555_v22, 0.0  ;;  %v3188_v28 = vmax.f32 %v556_v26, 0.0  ;;  %v558_v34 = vadd.f32 %v3142_v3, %v522_v33  ;;  %v497_v17 = vld [vmem:[%s3137_s24 + $0x90] sm:$0xff]  ;;  %v498_v23 = vld [vmem:[%s3137_s24 + $0x98] sm:$0xff] }
  0x17   : > { %2907 = vmatmul.msk.f32.vlgmr.msra.gmra.mxu1 %vm880_vm1, %v3149_v9  ;;  %1274 = vxpose.xlu0.b32.start [1/16] (narrow) %v3149_v9, 16  ;;  %v3196_v32 = vmax.f32 %v557_v30, 0.0  ;;  %v523_v37 = vmul.f32 %v3129_v2, %v487_v35  ;;  %v524_v41 = vmul.f32 %v3129_v2, %v488_v39  ;;  %v525_v45 = vmul.f32 %v3129_v2, %v489_v43  ;;  %v499_v30 = vld [vmem:[%s3137_s24 + $0xa0] sm:$0xff]  ;;  %v501_v43 = vld [vmem:[%s3137_s24 + $0xb0] sm:$0xff] }
  0x18   : > { %v3204_v36 = vmax.f32 %v558_v34, 0.0  ;;  %v526_v49 = vmul.f32 %v3129_v2, %v490_v47  ;;  %v527_v53 = vmul.f32 %v3129_v2, %v491_v51  ;;  %v528_v57 = vmul.f32 %v3129_v2, %v492_v55 }
  0x19   : > { %v559_v38 = vadd.f32 %v3142_v3, %v523_v37  ;;  %v560_v42 = vadd.f32 %v3142_v3, %v524_v41  ;;  %v561_v46 = vadd.f32 %v3142_v3, %v525_v45  ;;  %v529_v61 = vmul.f32 %v3129_v2, %v493_v59  ;;  %v500_v37 = vld [vmem:[%s3137_s24 + $0xa8] sm:$0xff] }
  0x1a   : > { %v562_v50 = vadd.f32 %v3142_v3, %v526_v49  ;;  %v563_v54 = vadd.f32 %v3142_v3, %v527_v53  ;;  %v564_v58 = vadd.f32 %v3142_v3, %v528_v57  ;;  %v530_v1 = vmul.f32 %v3129_v2, %v494_v63  ;;  %v503_v57 = vld [vmem:[%s3137_s24 + $0xc0] sm:$0xff]  ;;  %v504_v63 = vld [vmem:[%s3137_s24 + $0xc8] sm:$0xff] }
  0x1b   : > { %v3212_v40 = vmax.f32 %v559_v38, 0.0  ;;  %v3220_v44 = vmax.f32 %v560_v42, 0.0  ;;  %v3228_v48 = vmax.f32 %v561_v46, 0.0  ;;  %v565_v62 = vadd.f32 %v3142_v3, %v529_v61 }
  0x1c   : > { %v3236_v52 = vmax.f32 %v562_v50, 0.0  ;;  %v3244_v56 = vmax.f32 %v563_v54, 0.0  ;;  %v3252_v60 = vmax.f32 %v564_v58, 0.0  ;;  %v566_v4 = vadd.f32 %v3142_v3, %v530_v1  ;;  %v502_v50 = vld [vmem:[%s3137_s24 + $0xb8] sm:$0xff] }
  0x1d   : > { %5318 = vst [vmem:[#allocation2_spill] sm:$0xff] %v3228_v48  ;;  %v3260_v0 = vmax.f32 %v565_v62, 0.0  ;;  %v531_v7 = vmul.f32 %v3129_v2, %v495_v5  ;;  %v532_v13 = vmul.f32 %v3129_v2, %v496_v10  ;;  %v533_v19 = vmul.f32 %v3129_v2, %v497_v17 }
  0x1e   : > { %5319 = vst [vmem:[#allocation3_spill] sm:$0xff] %v3236_v52  ;;  %v3268_v6 = vmax.f32 %v566_v4, 0.0  ;;  %v534_v26 = vmul.f32 %v3129_v2, %v498_v23  ;;  %v535_v33 = vmul.f32 %v3129_v2, %v499_v30  ;;  %v536_v39 = vmul.f32 %v3129_v2, %v500_v37  ;;  %v508_v30 = vld [vmem:[%s3137_s24 + $0xe8] sm:$0xff]  ;;  %v507_v37 = vld [vmem:[%s3137_s24 + $0xe0] sm:$0xff] }
  0x1f   : > { %2908 = vmatmul.msk.f32.gmra.mxu1 %vm880_vm1, %v3156_v12  ;;  %1275 = vxpose.xlu0.b32.cont [2/16] (narrow) %v3156_v12, 16  ;;  %5320 = vst [vmem:[#allocation4_spill] sm:$0xff] %v3244_v56  ;;  %v567_v8 = vadd.f32 %v3142_v3, %v531_v7  ;;  %v568_v15 = vadd.f32 %v3142_v3, %v532_v13 }
  0x20   : > { %5321 = vst [vmem:[#allocation5_spill] sm:$0xff] %v3252_v60  ;;  %v569_v22 = vadd.f32 %v3142_v3, %v533_v19  ;;  %v570_v29 = vadd.f32 %v3142_v3, %v534_v26  ;;  %v571_v35 = vadd.f32 %v3142_v3, %v535_v33  ;;  %v572_v42 = vadd.f32 %v3142_v3, %v536_v39  ;;  %v506_v19 = vld [vmem:[%s3137_s24 + $0xd8] sm:$0xff] }
  0x21   : > { %5322 = vst [vmem:[#allocation6_spill] sm:$0xff] %v3260_v0  ;;  %v3276_v11 = vmax.f32 %v567_v8, 0.0  ;;  %v3285_v18 = vmax.f32 %v568_v15, 0.0  ;;  %v537_v46 = vmul.f32 %v3129_v2, %v501_v43  ;;  %v538_v53 = vmul.f32 %v3129_v2, %v502_v50  ;;  %v505_v8 = vld [vmem:[%s3137_s24 + $0xd0] sm:$0xff]  ;;  %v510_v39 = vld [vmem:[%s3137_s24 + $0xf8] sm:$0xff] }
  0x22   : > { %5323 = vst [vmem:[#allocation7_spill] sm:$0xff] %v3268_v6  ;;  %v3294_v25 = vmax.f32 %v569_v22, 0.0  ;;  %v3303_v31 = vmax.f32 %v570_v29, 0.0  ;;  %v3312_v38 = vmax.f32 %v571_v35, 0.0  ;;  %v3321_v45 = vmax.f32 %v572_v42, 0.0  ;;  %v509_v29 = vld [vmem:[%s3137_s24 + $0xf0] sm:$0xff] }
  0x23   : > { %5324 = vst [vmem:[#allocation8_spill] sm:$0xff] %v3276_v11  ;;  %v573_v49 = vadd.f32 %v3142_v3, %v537_v46  ;;  %v574_v55 = vadd.f32 %v3142_v3, %v538_v53  ;;  %v539_v59 = vmul.f32 %v3129_v2, %v503_v57  ;;  %v540_v4 = vmul.f32 %v3129_v2, %v504_v63 }
  0x24   : > { %5325 = vst [vmem:[#allocation9_spill] sm:$0xff] %v3285_v18  ;;  %v541_v13 = vmul.f32 %v3129_v2, %v505_v8  ;;  %v542_v23 = vmul.f32 %v3129_v2, %v506_v19  ;;  %v545_v35 = vmul.f32 %v3129_v2, %v509_v29  ;;  %v544_v42 = vmul.f32 %v3129_v2, %v508_v30 }
  0x25   : > { %5326 = vst [vmem:[#allocation10_spill] sm:$0xff] %v3294_v25  ;;  %v3330_v51 = vmax.f32 %v573_v49, 0.0  ;;  %v3339_v58 = vmax.f32 %v574_v55, 0.0  ;;  %v575_v62 = vadd.f32 %v3142_v3, %v539_v59  ;;  %v576_v7 = vadd.f32 %v3142_v3, %v540_v4 }
  0x26   : > { %5327 = vst [vmem:[#allocation11_spill] sm:$0xff] %v3303_v31  ;;  %v577_v17 = vadd.f32 %v3142_v3, %v541_v13  ;;  %v578_v33 = vadd.f32 %v3142_v3, %v542_v23  ;;  %v546_v43 = vmul.f32 %v3129_v2, %v510_v39  ;;  %v543_v49 = vmul.f32 %v3129_v2, %v507_v37  ;;  %v619_v13 = vld [vmem:[%s5285_s4] sm:$0x3] }
  0x27   : > { %2909 = vmatmul.msk.f32.gmra.mxu1 %vm880_vm1, %v3164_v16  ;;  %1276 = vxpose.xlu0.b32.cont [3/16] (narrow) %v3164_v16, 16  ;;  %5328 = vst [vmem:[#allocation12_spill] sm:$0xff] %v3312_v38  ;;  %v3348_v1 = vmax.f32 %v575_v62, 0.0  ;;  %v3357_v10 = vmax.f32 %v576_v7, 0.0  ;;  %v581_v50 = vadd.f32 %v3142_v3, %v545_v35  ;;  %v580_v57 = vadd.f32 %v3142_v3, %v544_v42 }
  0x28   : > { %5329 = vst [vmem:[#allocation13_spill] sm:$0xff] %v3321_v45  ;;  %v3366_v22 = vmax.f32 %v577_v17, 0.0  ;;  %v3379_v46 = vmax.f32 %v578_v33, 0.0  ;;  %v582_v53 = vadd.f32 %v3142_v3, %v546_v43  ;;  %v579_v62 = vadd.f32 %v3142_v3, %v543_v49  ;;  %v617_v49 = vld [vmem:[%s5284_s3 + $0x10] sm:$0xf] }
  0x29   : > { %5330 = vst [vmem:[#allocation14_spill] sm:$0xff] %v3330_v51  ;;  %v3390_v63 = vmax.f32 %v581_v50, 0.0  ;;  %v3393_v4 = vmax.f32 %v580_v57, 0.0  ;;  %v3419_v17 = vperm.slane %v619_v13, 1  ;;  %v615_v57 = vld [vmem:[%s5284_s3] sm:$0xff]  ;;  %2873 = vmatpush.msk.msra.mxu0 %vm977_vm0, %v617_v49 }
  0x2a   : > { %5331 = vst [vmem:[#allocation15_spill] sm:$0xff] %v3339_v58  ;;  %v3385_v59 = vmax.f32 %v582_v53, 0.0  ;;  %v3396_v2 = vmax.f32 %v579_v62, 0.0 }
  0x2b   : > { %5332 = vst [vmem:[#allocation16_spill] sm:$0xff] %v3348_v1  ;;  %999 = vmatpush.msra.mxu0 %v615_v57 }
  0x2c   : > { %5333 = vst [vmem:[#allocation17_spill] sm:$0xff] %v3357_v10  ;;  %2994 = vmatpush.lsf.msrb.mxu3 %v3385_v59  ;;  %2874 = vmatmul.msk.f32.vlgmr.msra.gmra.mxu0 %vm880_vm1, %v3149_v9 }
  0x2d   : > { %5334 = vst [vmem:[#allocation18_spill] sm:$0xff] %v3366_v22 }
  0x2e   : > { %5335 = vst [vmem:[#allocation19_spill] sm:$0xff] %v3379_v46  ;;  %2995 = vmatpush.lsf.msrb.mxu3 %v3390_v63 }
  0x2f   : > { %2910 = vmatmul.msk.f32.gmra.mxu1 %vm880_vm1, %v3172_v20  ;;  %1277 = vxpose.xlu0.b32.cont [4/16] (narrow) %v3172_v20, 16  ;;  %5336 = vst [vmem:[#allocation20_spill] sm:$0xff] %v3385_v59 }
  0x30   : > { %5337 = vst [vmem:[#allocation21_spill] sm:$0xff] %v3390_v63  ;;  %2996 = vmatpush.lsf.msrb.mxu3 %v3393_v4 }
  0x31   : > { %5338 = vst [vmem:[#allocation22_spill] sm:$0xff] %v3393_v4 }
  0x32   : > { %5339 = vst [vmem:[#allocation23_spill] sm:$0xff] %v3396_v2  ;;  %2997 = vmatpush.lsf.msrb.mxu3 %v3396_v2 }
  0x34   : > { %2998 = vmatpush.lsf.msrb.mxu3 %v3379_v46  ;;  %2875 = vmatmul.msk.f32.gmra.mxu0 %vm880_vm1, %v3156_v12 }
  0x36   : > { %2999 = vmatpush.lsf.msrb.mxu3 %v3366_v22 }
  0x37   : > { %2911 = vmatmul.msk.f32.gmra.mxu1 %vm880_vm1, %v3180_v24  ;;  %1278 = vxpose.xlu0.b32.cont [5/16] (narrow) %v3180_v24, 16 }
  0x38   : > { %3000 = vmatpush.lsf.msrb.mxu3 %v3357_v10 }
  0x3a   : > { %3001 = vmatpush.lsf.msrb.mxu3 %v3348_v1 }
  0x3c   : > { %3002 = vmatpush.lsf.msrb.mxu3 %v3339_v58  ;;  %2876 = vmatmul.msk.f32.gmra.mxu0 %vm880_vm1, %v3164_v16 }
  0x3e   : > { %3003 = vmatpush.lsf.msrb.mxu3 %v3330_v51 }
  0x3f   : > { %2912 = vmatmul.msk.f32.gmra.mxu1 %vm880_vm1, %v3188_v28  ;;  %1279 = vxpose.xlu0.b32.cont [6/16] (narrow) %v3188_v28, 16 }
  0x40   : > { %3004 = vmatpush.lsf.msrb.mxu3 %v3321_v45 }
  0x42   : > { %3005 = vmatpush.lsf.msrb.mxu3 %v3312_v38 }
  0x44   : > { %3006 = vmatpush.lsf.msrb.mxu3 %v3303_v31  ;;  %2877 = vmatmul.msk.f32.gmra.mxu0 %vm880_vm1, %v3172_v20 }
  0x46   : > { %3007 = vmatpush.lsf.msrb.mxu3 %v3294_v25 }
  0x47   : > { %2913 = vmatmul.msk.f32.gmra.mxu1 %vm880_vm1, %v3196_v32  ;;  %1280 = vxpose.xlu0.b32.cont [7/16] (narrow) %v3196_v32, 16 }
  0x48   : > { %3008 = vmatpush.lsf.msrb.mxu3 %v3285_v18 }
  0x4a   : > { %3009 = vmatpush.lsf.msrb.mxu3 %v3276_v11 }
  0x4b   : > { %3010 = vllmr.2.mxu3 }
  0x4c   : > { %2986 = vmatpush.msk.msra.mxu3 %vm977_vm0, %v617_v49  ;;  %2878 = vmatmul.msk.f32.gmra.mxu0 %vm880_vm1, %v3180_v24 }
  0x4e   : > { %2987 = vmatpush.msra.mxu3 %v615_v57 }
  0x4f   : > { %2914 = vmatmul.msk.f32.gmra.mxu1 %vm880_vm1, %v3204_v36  ;;  %1281 = vxpose.xlu0.b32.cont [8/16] (narrow) %v3204_v36, 16 }
  0x50   : > { %2891 = vmatmul.msk.f32.vlgmr.msra.gmra.mxu3 %vm880_vm1, %v3285_v18 }
  0x54   : > { %2879 = vmatmul.msk.f32.gmra.mxu0 %vm880_vm1, %v3188_v28 }
  0x57   : > { %2915 = vmatmul.msk.f32.gmra.mxu1 %vm880_vm1, %v3212_v40  ;;  %1282 = vxpose.xlu0.b32.cont [9/16] (narrow) %v3212_v40, 16 }
  0x58   : > { %2892 = vmatmul.msk.f32.gmra.mxu3 %vm880_vm1, %v3294_v25 }
  0x5c   : > { %2880 = vmatmul.msk.f32.gmra.mxu0 %vm880_vm1, %v3196_v32 }
  0x5f   : > { %2916 = vmatmul.msk.f32.gmra.mxu1 %vm880_vm1, %v3220_v44  ;;  %1283 = vxpose.xlu0.b32.cont [10/16] (narrow) %v3220_v44, 16 }
  0x60   : > { %2893 = vmatmul.msk.f32.gmra.mxu3 %vm880_vm1, %v3303_v31 }
  0x64   : > { %2881 = vmatmul.msk.f32.gmra.mxu0 %vm880_vm1, %v3204_v36 }
  0x67   : > { %2917 = vmatmul.msk.f32.gmra.mxu1 %vm880_vm1, %v3228_v48  ;;  %1284 = vxpose.xlu0.b32.cont [11/16] (narrow) %v3228_v48, 16 }
  0x68   : > { %2894 = vmatmul.msk.f32.gmra.mxu3 %vm880_vm1, %v3312_v38 }
  0x6c   : > { %2882 = vmatmul.msk.f32.gmra.mxu0 %vm880_vm1, %v3212_v40 }
  0x6f   : > { %2918 = vmatmul.msk.f32.gmra.mxu1 %vm880_vm1, %v3236_v52  ;;  %1285 = vxpose.xlu0.b32.cont [12/16] (narrow) %v3236_v52, 16 }
  0x70   : > { %2895 = vmatmul.msk.f32.gmra.mxu3 %vm880_vm1, %v3321_v45 }
  0x74   : > { %2883 = vmatmul.msk.f32.gmra.mxu0 %vm880_vm1, %v3220_v44 }
  0x77   : > { %2919 = vmatmul.msk.f32.gmra.mxu1 %vm880_vm1, %v3244_v56  ;;  %1286 = vxpose.xlu0.b32.cont [13/16] (narrow) %v3244_v56, 16 }
  0x78   : > { %2896 = vmatmul.msk.f32.gmra.mxu3 %vm880_vm1, %v3330_v51 }
  0x7c   : > { %2884 = vmatmul.msk.f32.gmra.mxu0 %vm880_vm1, %v3228_v48 }
  0x7f   : > { %2920 = vmatmul.msk.f32.gmra.mxu1 %vm880_vm1, %v3252_v60  ;;  %1287 = vxpose.xlu0.b32.cont [14/16] (narrow) %v3252_v60, 16 }
  0x80   : > { %2897 = vmatmul.msk.f32.gmra.mxu3 %vm880_vm1, %v3339_v58 }
  0x84   : > { %2885 = vmatmul.msk.f32.gmra.mxu0 %vm880_vm1, %v3236_v52 }
  0x87   : > { %2921 = vmatmul.msk.f32.gmra.mxu1 %vm880_vm1, %v3260_v0  ;;  %1288 = vxpose.xlu0.b32.cont [15/16] (narrow) %v3260_v0, 16 }
  0x88   : > { %2898 = vmatmul.msk.f32.gmra.mxu3 %vm880_vm1, %v3348_v1 }
  0x8c   : > { %2886 = vmatmul.msk.f32.gmra.mxu0 %vm880_vm1, %v3244_v56 }
  0x8f   : > { %2922 = vmatmul.msk.f32.gmra.mxu1 %vm880_vm1, %v3268_v6  ;;  %1289 = vxpose.xlu0.b32.end [16/16] (narrow) %v3268_v6, 16 }
  0x90   : > { %2899 = vmatmul.msk.f32.gmra.mxu3 %vm880_vm1, %v3357_v10 }
  0x94   : > { %v3279_v14 = vpop.f32.mrf.mxu1  ;;  %2887 = vmatmul.msk.f32.gmra.mxu0 %vm880_vm1, %v3252_v60 }
  0x97   : > { %2923 = vmatmul.msk.f32.gmra.mxu1 %vm880_vm1, %v3276_v11 }
  0x98   : > { %2900 = vmatmul.msk.f32.gmra.mxu3 %vm880_vm1, %v3366_v22 }
  0x9c   : > { %v3288_v21 = vpop.f32.mrf.mxu1  ;;  %2888 = vmatmul.msk.f32.gmra.mxu0 %vm880_vm1, %v3260_v0 }
  0x9f   : > { %2924 = vmatmul.msk.f32.gmra.mxu1 %vm880_vm1, %v3285_v18 }
  0xa0   : > { %2901 = vmatmul.msk.f32.gmra.mxu3 %vm880_vm1, %v3379_v46 }
  0xa4   : > { %v3297_v27 = vpop.f32.mrf.mxu1  ;;  %2889 = vmatmul.msk.f32.gmra.mxu0 %vm880_vm1, %v3268_v6 }
  0xa7   : > { %2925 = vmatmul.msk.f32.gmra.mxu1 %vm880_vm1, %v3294_v25 }
  0xa8   : > { %2902 = vmatmul.msk.f32.gmra.mxu3 %vm880_vm1, %v3396_v2 }
  0xac   : > { %v3306_v34 = vpop.f32.mrf.mxu1  ;;  %2890 = vmatmul.msk.f32.gmra.mxu0 %vm880_vm1, %v3276_v11 }
  0xaf   : > { %2926 = vmatmul.msk.f32.gmra.mxu1 %vm880_vm1, %v3303_v31 }
  0xb0   : > { %2903 = vmatmul.msk.f32.gmra.mxu3 %vm880_vm1, %v3393_v4 }
  0xb4   : > { %v3315_v41 = vpop.f32.mrf.mxu1 }
  0xb7   : > { %2927 = vmatmul.msk.f32.gmra.mxu1 %vm880_vm1, %v3312_v38 }
  0xb8   : > { %2904 = vmatmul.msk.f32.gmra.mxu3 %vm880_vm1, %v3390_v63 }
  0xbc   : > { %v3324_v47 = vpop.f32.mrf.mxu1 }
  0xbf   : > { %2928 = vmatmul.msk.f32.gmra.mxu1 %vm880_vm1, %v3321_v45 }
  0xc0   : > { %2905 = vmatmul.msk.f32.gmra.mxu3 %vm880_vm1, %v3385_v59 }
  0xc4   : > { %v3333_v54 = vpop.f32.mrf.mxu1 }
  0xc5   : > { %v1133_v13 = vadd.f32 %v3333_v54, %v3419_v17  ;;  %v1124_v54 = vadd.f32 %v3306_v34, %v3419_v17  ;;  %v1115_v34 = vadd.f32 %v3279_v14, %v3419_v17 }
  0xc7   : > { %2929 = vmatmul.msk.f32.gmra.mxu1 %vm880_vm1, %v3330_v51  ;;  %v1211_v49 = vmax.f32 %v1115_v34, 0.0 }
  0xcc   : > { %v3342_v61 = vpop.f32.mrf.mxu1 }
  0xcf   : > { %2930 = vmatmul.msk.f32.gmra.mxu1 %vm880_vm1, %v3339_v58 }
  0xd4   : > { %v3351_v5 = vpop.f32.mrf.mxu1 }
  0xd7   : > { %2931 = vmatmul.msk.f32.gmra.mxu1 %vm880_vm1, %v3348_v1 }
  0xdc   : > { %v3360_v15 = vpop.f32.mrf.mxu1 }
  0xdf   : > { %2932 = vmatmul.msk.f32.gmra.mxu1 %vm880_vm1, %v3357_v10 }
  0xe4   : > { %v1144_v26 = vpop.f32.mrf.mxu1 }
  0xe5   : > { %v1145_v50 = vadd.f32 %v1144_v26, %v3419_v17  ;;  %v1139_v26 = vadd.f32 %v3351_v5, %v3419_v17  ;;  %v1130_v5 = vadd.f32 %v3324_v47, %v3419_v17  ;;  %v1121_v47 = vadd.f32 %v3297_v27, %v3419_v17 }
  0xe7   : > { %2933 = vmatmul.msk.f32.gmra.mxu1 %vm880_vm1, %v3366_v22 }
  0xec   : > { %v1147_v55 = vpop.f32.mrf.mxu1 }
  0xed   : > { %v1148_v39 = vadd.f32 %v1147_v55, %v3419_v17  ;;  %v1142_v55 = vadd.f32 %v3360_v15, %v3419_v17 }
  0xef   : > { %2934 = vmatmul.msk.f32.gmra.mxu1 %vm880_vm1, %v3379_v46  ;;  %v1233_v62 = vmax.f32 %v1148_v39, 0.0  ;;  %v1229_v15 = vmax.f32 %v1142_v55, 0.0  ;;  %v1215_v39 = vmax.f32 %v1121_v47, 0.0 }
  0xf4   : > { %v1150_v7 = vpop.f32.mrf.mxu1 }
  0xf5   : > { %v1151_v35 = vadd.f32 %v1150_v7, %v3419_v17  ;;  %v1231_v7 = vmax.f32 %v1145_v50, 0.0 }
  0xf7   : > { %2935 = vmatmul.msk.f32.gmra.mxu1 %vm880_vm1, %v3396_v2  ;;  %v1235_v53 = vmax.f32 %v1151_v35, 0.0 }
  0xfc   : > { %v1153_v3 = vpop.f32.mrf.mxu1 }
  0xfd   : > { %v1154_v30 = vadd.f32 %v1153_v3, %v3419_v17  ;;  %v1136_v3 = vadd.f32 %v3342_v61, %v3419_v17  ;;  %v1127_v61 = vadd.f32 %v3315_v41, %v3419_v17  ;;  %v1118_v41 = vadd.f32 %v3288_v21, %v3419_v17 }
  0xff   : > { %2936 = vmatmul.msk.f32.gmra.mxu1 %vm880_vm1, %v3393_v4  ;;  %v1237_v42 = vmax.f32 %v1154_v30, 0.0  ;;  %v1221_v30 = vmax.f32 %v1130_v5, 0.0  ;;  %v1219_v35 = vmax.f32 %v1127_v61, 0.0  ;;  %v1213_v27 = vmax.f32 %v1118_v41, 0.0 }
 0x104   : > { %v1156_v8 = vpop.f32.mrf.mxu1 }
 0x105   : > { %v1157_v23 = vadd.f32 %v1156_v8, %v3419_v17 }
 0x107   : > { %2937 = vmatmul.msk.f32.gmra.mxu1 %vm880_vm1, %v3390_v63  ;;  %v1239_v37 = vmax.f32 %v1157_v23, 0.0  ;;  %v1225_v23 = vmax.f32 %v1136_v3, 0.0 }
 0x10c   : > { %v1159_v19 = vpop.f32.mrf.mxu1 }
 0x10d   : > { %v1160_v29 = vadd.f32 %v1159_v19, %v3419_v17  ;;  %v1227_v19 = vmax.f32 %v1139_v26, 0.0 }
 0x10f   : > { %2938 = vmatmul.msk.f32.gmra.mxu1 %vm880_vm1, %v3385_v59  ;;  %v1241_v33 = vmax.f32 %v1160_v29, 0.0  ;;  %v1223_v29 = vmax.f32 %v1133_v13, 0.0 }
 0x111   : > { %1338 = vmatpush.msra.mxu2 %v1241_v33 }
 0x113   : > { %1339 = vmatpush.msra.mxu2 %v1239_v37  ;;  %v1217_v37 = vmax.f32 %v1124_v54, 0.0 }
 0x114   : > { %v3430_v43 = vpop.f32.mrf.mxu1 }
 0x115   : > { %1340 = vmatpush.msra.mxu2 %v1237_v42 }
 0x117   : > { %1341 = vmatpush.msra.mxu2 %v1235_v53 }
 0x119   : > { %1342 = vmatpush.msra.mxu2 %v1233_v62 }
 0x11b   : > { %1343 = vmatpush.msra.mxu2 %v1231_v7 }
 0x11c   : > { %v3451_v8 = vpop.f32.mrf.mxu1 }
 0x11d   : > { %1344 = vmatpush.msra.mxu2 %v1229_v15 }
 0x11f   : > { %1345 = vmatpush.msra.mxu2 %v1227_v19 }
 0x121   : > { %1346 = vmatpush.msra.mxu2 %v1225_v23  ;;  %v1290_v23 = vpop.trf.xlu0 }
 0x123   : > { %1347 = vmatpush.msra.mxu2 %v1223_v29 }
 0x124   : > { %v3465_v33 = vpop.f32.mrf.mxu1 }
 0x125   : > { %1348 = vmatpush.msra.mxu2 %v1221_v30 }
 0x127   : > { %1349 = vmatpush.msra.mxu2 %v1219_v35 }
 0x129   : > { %1350 = vmatpush.msra.mxu2 %v1217_v37  ;;  %v1291_v34 = vpop.trf.xlu0 }
 0x12b   : > { %1351 = vmatpush.msra.mxu2 %v1215_v39 }
 0x12c   : > { %v3477_v42 = vpop.f32.mrf.mxu1 }
 0x12d   : > { %1352 = vmatpush.msra.mxu2 %v1213_v27 }
 0x12f   : > { %1353 = vmatpush.msra.mxu2 %v1211_v49 }
 0x130   : > { %1354 = vmatmul.f32.vlgmr.msra.gmra.mxu2 %v1290_v23 }
 0x134   : > { %v3483_v21 = vpop.f32.mrf.mxu1 }
 0x138   : > { %1357 = vmatmul.f32.gmra.mxu2 %v1291_v34 }
 0x13c   : > { %v3489_v14 = vpop.f32.mrf.mxu1 }
 0x144   : > { %v1180_v50 = vpop.f32.mrf.mxu1 }
 0x14c   : > { %v1183_v53 = vpop.f32.mrf.mxu1 }
 0x154   : > { %v1186_v57 = vpop.f32.mrf.mxu1 }
 0x155   : > { %v1187_v49 = vadd.f32 %v1186_v57, %v3419_v17  ;;  %v1175_v57 = vadd.f32 %v3483_v21, %v3419_v17  ;;  %v1163_v21 = vadd.f32 %v3430_v43, %v3419_v17  ;;  %v1499_v43 = vsel %vm880_vm1, %v3149_v9, 0.0 }
 0x15c   : > { %v1189_v55 = vpop.f32.mrf.mxu1 }
 0x15d   : > { %v1190_v39 = vadd.f32 %v1189_v55, %v3419_v17  ;;  %v1178_v55 = vadd.f32 %v3489_v14, %v3419_v17  ;;  %v1166_v14 = vadd.f32 %v3451_v8, %v3419_v17 }
 0x15f   : > { %v1253_v23 = vmax.f32 %v1178_v55, 0.0  ;;  %v756_v55 = vld [vmem:[%s5288_s7 + $0x1b8] sm:$0xff] }
 0x164   : > { %v1192_v62 = vpop.f32.mrf.mxu1 }
 0x165   : > { %v1193_v41 = vadd.f32 %v1192_v62, %v3419_v17  ;;  %v1181_v62 = vadd.f32 %v1180_v50, %v3419_v17  ;;  %v1169_v50 = vadd.f32 %v3465_v33, %v3419_v17 }
 0x16c   : > { %v1195_v26 = vpop.f32.mrf.mxu1 }
 0x16d   : > { %v1196_v47 = vadd.f32 %v1195_v26, %v3419_v17  ;;  %v1184_v26 = vadd.f32 %v1183_v53, %v3419_v17  ;;  %v1172_v53 = vadd.f32 %v3477_v42, %v3419_v17  ;;  %v1245_v42 = vmax.f32 %v1166_v14, 0.0  ;;  %v762_v14 = vld [vmem:[%s5288_s7 + $0x1e8] sm:$0xff] }
 0x16f   : > { %v1265_v27 = vmax.f32 %v1196_v47, 0.0  ;;  %v1243_v47 = vmax.f32 %v1163_v21, 0.0  ;;  %v1508_v21 = vsel %vm880_vm1, %v3188_v28, 0.0 }
 0x174   : > { %v1198_v7 = vpop.f32.mrf.mxu1 }
 0x175   : > { %v1199_v54 = vadd.f32 %v1198_v7, %v3419_v17  ;;  %v1263_v7 = vmax.f32 %v1193_v41, 0.0  ;;  %v776_v41 = vld [vmem:[%s5288_s7 + $0x258] sm:$0xff] }
 0x176   : > { %1384 = vmatpush.msrb.mxu2 %v776_v41 }
 0x177   : > { %v1267_v37 = vmax.f32 %v1199_v54, 0.0 }
 0x17c   : > { %v1201_v3 = vpop.f32.mrf.mxu1 }
 0x17d   : > { %v1202_v61 = vadd.f32 %v1201_v3, %v3419_v17  ;;  %v1261_v3 = vmax.f32 %v1190_v39, 0.0 }
 0x17f   : > { %v1269_v35 = vmax.f32 %v1202_v61, 0.0  ;;  %v1251_v61 = vmax.f32 %v1175_v57, 0.0 }
 0x184   : > { %v1204_v15 = vpop.f32.mrf.mxu1 }
 0x185   : > { %v1205_v19 = vadd.f32 %v1204_v15, %v3419_v17  ;;  %v1259_v15 = vmax.f32 %v1187_v49, 0.0 }
 0x187   : > { %v1271_v30 = vmax.f32 %v1205_v19, 0.0  ;;  %v1257_v19 = vmax.f32 %v1184_v26, 0.0  ;;  %v761_v26 = vld [vmem:[%s5288_s7 + $0x1e0] sm:$0xff] }
 0x18c   : > { %v1207_v13 = vpop.f32.mrf.mxu1 }
 0x18d   : > { %v1208_v5 = vadd.f32 %v1207_v13, %v3419_v17  ;;  %v3545_v13 = vpop.f32.mrf.mxu3  ;;  %v771_v17 = vld [vmem:[%s5288_s7 + $0x230] sm:$0xff] }
 0x18e   : > { %5340 = vst [vmem:[#allocation24_spill] sm:$0xff] %v3545_v13  ;;  %1385 = vmatpush.msrb.mxu2 %v771_v17  ;;  %v731_v17 = vld [vmem:[%s5288_s7 + $0xf0] sm:$0xff] }
 0x18f   : > { %v1273_v29 = vmax.f32 %v1208_v5, 0.0  ;;  %v1255_v5 = vmax.f32 %v1181_v62, 0.0  ;;  %v1504_v62 = vsel %vm880_vm1, %v3172_v20, 0.0 }
 0x191   : > { %1361 = vmatpush.msra.mxu3 %v1273_v29  ;;  %v1249_v29 = vmax.f32 %v1172_v53, 0.0  ;;  %v751_v53 = vld [vmem:[%s5288_s7 + $0x190] sm:$0xff] }
 0x193   : > { %1362 = vmatpush.msra.mxu3 %v1271_v30  ;;  %v1247_v30 = vmax.f32 %v1169_v50, 0.0 }
 0x195   : > { %1363 = vmatpush.msra.mxu3 %v1269_v35  ;;  %v3557_v54 = vpop.f32.mrf.mxu3 }
 0x196   : > { %5341 = vst [vmem:[#allocation25_spill] sm:$0xff] %v3557_v54 }
 0x197   : > { %1364 = vmatpush.msra.mxu3 %v1267_v37  ;;  %v1500_v37 = vsel %vm880_vm1, %v3156_v12, 0.0 }
 0x198   : > { %v1501_v39 = vadd.f32 %v1500_v37, %v1499_v43  ;;  %v747_v43 = vld [vmem:[%s5288_s7 + $0x170] sm:$0xff]  ;;  %v1510_v37 = vsel %vm880_vm1, %v3196_v32, 0.0 }
 0x199   : > { %1365 = vmatpush.msra.mxu3 %v1265_v27  ;;  %v1502_v27 = vsel %vm880_vm1, %v3164_v16, 0.0 }
 0x19a   : > { %v1503_v49 = vadd.f32 %v1502_v27, %v1501_v39 }
 0x19b   : > { %1366 = vmatpush.msra.mxu3 %v1263_v7  ;;  %v766_v7 = vld [vmem:[%s5288_s7 + $0x208] sm:$0xff] }
 0x19c   : > { %1386 = vmatpush.msrb.mxu2 %v766_v7  ;;  %v742_v7 = vld [vmem:[%s5288_s7 + $0x148] sm:$0xff] }
 0x19d   : > { %1367 = vmatpush.msra.mxu3 %v1261_v3  ;;  %v3561_v33 = vpop.f32.mrf.mxu3  ;;  %v777_v3 = vld [vmem:[%s5288_s7 + $0x260] sm:$0xff] }
 0x19e   : > { %5342 = vst [vmem:[#allocation26_spill] sm:$0xff] %v3561_v33  ;;  %1387 = vmatpush.msrb.mxu2 %v761_v26  ;;  %v721_v26 = vld [vmem:[%s5288_s7 + $0xa0] sm:$0xff] }
 0x19f   : > { %1368 = vmatpush.msra.mxu3 %v1259_v15  ;;  %v772_v15 = vld [vmem:[%s5288_s7 + $0x238] sm:$0xff] }
 0x1a0   : > { %1388 = vmatpush.msrb.mxu2 %v756_v55  ;;  %v732_v55 = vld [vmem:[%s5288_s7 + $0xf8] sm:$0xff] }
 0x1a1   : > { %1369 = vmatpush.msra.mxu3 %v1257_v19  ;;  %v767_v19 = vld [vmem:[%s5288_s7 + $0x210] sm:$0xff] }
 0x1a2   : > { %1389 = vmatpush.msrb.mxu2 %v751_v53  ;;  %v727_v53 = vld [vmem:[%s5288_s7 + $0xd0] sm:$0xff] }
 0x1a3   : > { %1370 = vmatpush.msra.mxu3 %v1255_v5  ;;  %v1505_v5 = vadd.f32 %v1504_v62, %v1503_v49  ;;  %v726_v49 = vld [vmem:[%s5288_s7 + $0xc8] sm:$0xff]  ;;  %v737_v62 = vld [vmem:[%s5288_s7 + $0x120] sm:$0xff] }
 0x1a5   : > { %1371 = vmatpush.msra.mxu3 %v1253_v23  ;;  %v3563_v35 = vpop.f32.mrf.mxu3  ;;  %v1506_v23 = vsel %vm880_vm1, %v3180_v24, 0.0 }
 0x1a6   : > { %5343 = vst [vmem:[#allocation27_spill] sm:$0xff] %v3563_v35  ;;  %v1507_v50 = vadd.f32 %v1506_v23, %v1505_v5  ;;  %v711_v5 = vld [vmem:[%s5288_s7 + $0x50] sm:$0xff]  ;;  %v1514_v23 = vsel %vm880_vm1, %v3212_v40, 0.0 }
 0x1a7   : > { %1372 = vmatpush.msra.mxu3 %v1251_v61  ;;  %v746_v61 = vld [vmem:[%s5288_s7 + $0x168] sm:$0xff] }
 0x1a8   : > { %1390 = vmatpush.msrb.mxu2 %v746_v61  ;;  %v1509_v41 = vadd.f32 %v1508_v21, %v1507_v50  ;;  %v701_v21 = vld [vmem:[%s5288_s7] sm:$0xff] }
 0x1a9   : > { %1373 = vmatpush.msra.mxu3 %v1249_v29  ;;  %v741_v29 = vld [vmem:[%s5288_s7 + $0x140] sm:$0xff] }
 0x1aa   : > { %1391 = vmatpush.msrb.mxu2 %v741_v29  ;;  %v1511_v27 = vadd.f32 %v1510_v37, %v1509_v41  ;;  %v722_v29 = vld [vmem:[%s5288_s7 + $0xa8] sm:$0xff]  ;;  %v712_v41 = vld [vmem:[%s5288_s7 + $0x58] sm:$0xff]  ;;  %v707_v37 = vld [vmem:[%s5288_s7 + $0x30] sm:$0xff] }
 0x1ab   : > { %1374 = vmatpush.msra.mxu3 %v1247_v30  ;;  %v757_v30 = vld [vmem:[%s5288_s7 + $0x1c0] sm:$0xff] }
 0x1ad   : > { %1375 = vmatpush.msra.mxu3 %v1245_v42  ;;  %v3565_v8 = vpop.f32.mrf.mxu3  ;;  %v736_v42 = vld [vmem:[%s5288_s7 + $0x118] sm:$0xff] }
 0x1ae   : > { %5344 = vst [vmem:[#allocation28_spill] sm:$0xff] %v3565_v8  ;;  %1392 = vmatpush.msrb.mxu2 %v736_v42  ;;  %v717_v42 = vld [vmem:[%s5288_s7 + $0x80] sm:$0xff] }
 0x1af   : > { %1376 = vmatpush.msra.mxu3 %v1243_v47  ;;  %v752_v47 = vld [vmem:[%s5288_s7 + $0x198] sm:$0xff] }
 0x1b0   : > { %3011 = vmatmul.lmr.bf16.vlgmr.msra.gmra.2.mxu3  ;;  %1393 = vmatpush.msrb.mxu2 %v731_v17  ;;  %v773_v17 = vld [vmem:[%s5288_s7 + $0x240] sm:$0xff] }
 0x1b1   : > { %1407 = vmatpush.msra.mxu3 %v777_v3  ;;  %v1512_v3 = vsel %vm880_vm1, %v3204_v36, 0.0 }
 0x1b2   : > { %1394 = vmatpush.msrb.mxu2 %v726_v49 }
 0x1b3   : > { %1408 = vmatpush.msra.mxu3 %v772_v15  ;;  %v716_v15 = vld [vmem:[%s5288_s7 + $0x78] sm:$0xff] }
 0x1b4   : > { %1395 = vmatpush.msrb.mxu2 %v721_v26 }
 0x1b5   : > { %v3577_v34 = vpop.f32.mrf.mxu3  ;;  %1409 = vmatpush.msra.mxu3 %v767_v19  ;;  %v1513_v19 = vadd.f32 %v1512_v3, %v1511_v27  ;;  %v1518_v27 = vsel %vm880_vm1, %v3228_v48, 0.0 }
 0x1b6   : > { %5345 = vst [vmem:[#allocation29_spill] sm:$0xff] %v3577_v34  ;;  %1396 = vmatpush.msrb.mxu2 %v716_v15  ;;  %v768_v15 = vld [vmem:[%s5288_s7 + $0x218] sm:$0xff] }
 0x1b7   : > { %1410 = vmatpush.msra.mxu3 %v762_v14  ;;  %v1515_v61 = vadd.f32 %v1514_v23, %v1513_v19  ;;  %v706_v14 = vld [vmem:[%s5288_s7 + $0x28] sm:$0xff]  ;;  %v4142_v34 = vld [vmem:[%s5291_s10 + $0x138] sm:$0xff] }
 0x1b8   : > { %3012 = vmatmul.lmr.bf16.gmra.2.mxu3  ;;  %1397 = vmatpush.msrb.mxu2 %v711_v5  ;;  %v1524_v5 = vsel %vm880_vm1, %v3252_v60, 0.0 }
 0x1b9   : > { %1411 = vmatpush.msra.mxu3 %v757_v30  ;;  %v1516_v30 = vsel %vm880_vm1, %v3220_v44, 0.0 }
 0x1ba   : > { %1398 = vmatpush.msrb.mxu2 %v706_v14  ;;  %v753_v14 = vld [vmem:[%s5288_s7 + $0x1a0] sm:$0xff] }
 0x1bb   : > { %1412 = vmatpush.msra.mxu3 %v752_v47  ;;  %v778_v47 = vld [vmem:[%s5288_s7 + $0x268] sm:$0xff] }
 0x1bc   : > { %1399 = vmatpush.msrb.mxu2 %v701_v21  ;;  %v748_v21 = vld [vmem:[%s5288_s7 + $0x178] sm:$0xff] }
 0x1bd   : > { %v3601_v57 = vpop.f32.mrf.mxu3  ;;  %1413 = vmatpush.msra.mxu3 %v747_v43  ;;  %v1517_v43 = vadd.f32 %v1516_v30, %v1515_v61 }
 0x1be   : > { %5346 = vst [vmem:[#allocation30_spill] sm:$0xff] %v3601_v57  ;;  %1430 = vmatpush.msra.mxu2 %v778_v47  ;;  %v1528_v47 = vsel %vm880_vm1, %v3268_v6, 0.0  ;;  %v4102_v57 = vld [vmem:[%s5291_s10 + $0x160] sm:$0xff] }
 0x1bf   : > { %1414 = vmatpush.msra.mxu3 %v742_v7  ;;  %v1519_v49 = vadd.f32 %v1518_v27, %v1517_v43  ;;  %v1520_v7 = vsel %vm880_vm1, %v3236_v52, 0.0  ;;  %v733_v43 = vld [vmem:[%s5288_s7 + $0x100] sm:$0xff] }
 0x1c0   : > { %1431 = vmatpush.msra.mxu2 %v773_v17 }
 0x1c1   : > { %1415 = vmatpush.msra.mxu3 %v737_v62  ;;  %v1521_v3 = vadd.f32 %v1520_v7, %v1519_v49  ;;  %v1522_v62 = vsel %vm880_vm1, %v3244_v56, 0.0  ;;  %v728_v49 = vld [vmem:[%s5288_s7 + $0xd8] sm:$0xff]  ;;  %v690_v56 = vld [vmem:[%s5286_s5 + $0x230] sm:$0xff] }
 0x1c2   : > { %1432 = vmatpush.msra.mxu2 %v768_v15  ;;  %v718_v15 = vld [vmem:[%s5288_s7 + $0x88] sm:$0xff] }
 0x1c3   : > { %1416 = vmatpush.msra.mxu3 %v732_v55  ;;  %v763_v55 = vld [vmem:[%s5288_s7 + $0x1f0] sm:$0xff]  ;;  %v1523_v19 = vadd.f32 %v1522_v62, %v1521_v3  ;;  %v1532_v62 = vsel %vm880_vm1, %v3285_v18, 0.0 }
 0x1c4   : > { %1433 = vmatpush.msra.mxu2 %v763_v55  ;;  %v723_v3 = vld [vmem:[%s5288_s7 + $0xb0] sm:$0xff] }
 0x1c5   : > { %v3636_v39 = vpop.f32.mrf.mxu3  ;;  %1417 = vmatpush.msra.mxu3 %v727_v53  ;;  %v758_v53 = vld [vmem:[%s5288_s7 + $0x1c8] sm:$0xff]  ;;  %v1525_v61 = vadd.f32 %v1524_v5, %v1523_v19  ;;  %v713_v19 = vld [vmem:[%s5288_s7 + $0x60] sm:$0xff]  ;;  %v1534_v5 = vsel %vm880_vm1, %v3294_v25, 0.0 }
 0x1c6   : > { %5347 = vst [vmem:[#allocation31_spill] sm:$0xff] %v3636_v39  ;;  %1434 = vmatpush.msra.mxu2 %v758_v53  ;;  %v702_v53 = vld [vmem:[%s5288_s7 + $0x8] sm:$0xff] }
 0x1c7   : > { %1418 = vmatpush.msra.mxu3 %v722_v29  ;;  %v1526_v29 = vsel %vm880_vm1, %v3260_v0, 0.0  ;;  %v4094_v39 = vld [vmem:[%s5291_s10 + $0x168] sm:$0xff] }
 0x1c8   : > { %1435 = vmatpush.msra.mxu2 %v753_v14  ;;  %v1527_v30 = vadd.f32 %v1526_v29, %v1525_v61  ;;  %v708_v61 = vld [vmem:[%s5288_s7 + $0x38] sm:$0xff] }
 0x1c9   : > { %1419 = vmatpush.msra.mxu3 %v717_v42  ;;  %v743_v42 = vld [vmem:[%s5288_s7 + $0x150] sm:$0xff] }
 0x1ca   : > { %1436 = vmatpush.msra.mxu2 %v748_v21  ;;  %v1529_v17 = vadd.f32 %v1528_v47, %v1527_v30  ;;  %v703_v21 = vld [vmem:[%s5288_s7 + $0x10] sm:$0xff]  ;;  %v1536_v30 = vsel %vm880_vm1, %v3303_v31, 0.0  ;;  %v1538_v47 = vsel %vm880_vm1, %v3312_v38, 0.0 }
 0x1cb   : > { %1420 = vmatpush.msra.mxu3 %v712_v41  ;;  %v738_v41 = vld [vmem:[%s5288_s7 + $0x128] sm:$0xff] }
 0x1cc   : > { %1437 = vmatpush.msra.mxu2 %v743_v42 }
 0x1cd   : > { %v3666_v50 = vpop.f32.mrf.mxu3  ;;  %1421 = vmatpush.msra.mxu3 %v707_v37  ;;  %v1530_v37 = vsel %vm880_vm1, %v3276_v11, 0.0 }
 0x1ce   : > { %5348 = vst [vmem:[#allocation32_spill] sm:$0xff] %v3666_v50  ;;  %1438 = vmatpush.msra.mxu2 %v738_v41  ;;  %v1531_v7 = vadd.f32 %v1530_v37, %v1529_v17  ;;  %v1540_v17 = vsel %vm880_vm1, %v3321_v45, 0.0 }
 0x1cf   : > { %1422 = vmatpush.msra.mxu3 %v702_v53  ;;  %v1355_v53 = vpop.f32.mrf.mxu2 }
 0x1d0   : > { %1439 = vmatpush.msra.mxu2 %v733_v43  ;;  %v1533_v55 = vadd.f32 %v1532_v62, %v1531_v7 }
 0x1d2   : > { %1440 = vmatpush.msra.mxu2 %v728_v49  ;;  %v1535_v29 = vadd.f32 %v1534_v5, %v1533_v55  ;;  %v1542_v49 = vsel %vm880_vm1, %v3330_v51, 0.0  ;;  %v1546_v55 = vsel %vm880_vm1, %v3348_v1, 0.0  ;;  %v1548_v5 = vsel %vm880_vm1, %v3357_v10, 0.0  ;;  %v4149_v1 = vld [vmem:[%s5291_s10 + $0x130] sm:$0xff]  ;;  %v812_v51 = vld [vmem:[%s5291_s10 + $0xa0] sm:$0xff] }
 0x1d4   : > { %1441 = vmatpush.msra.mxu2 %v723_v3  ;;  %v1537_v42 = vadd.f32 %v1536_v30, %v1535_v29  ;;  %v1544_v3 = vsel %vm880_vm1, %v3339_v58, 0.0  ;;  %v1550_v29 = vsel %vm880_vm1, %v3366_v22, 0.0  ;;  %v792_v22 = vld [vmem:[%s5291_s10] sm:$0xff] }
 0x1d5   : > { %v3698_v26 = vpop.f32.mrf.mxu3 }
 0x1d6   : > { %5349 = vst [vmem:[#allocation33_spill] sm:$0xff] %v3698_v26  ;;  %1442 = vmatpush.msra.mxu2 %v718_v15  ;;  %v1539_v41 = vadd.f32 %v1538_v47, %v1537_v42  ;;  %v779_v42 = vld [vmem:[%s5288_s7 + $0x270] sm:$0xff]  ;;  %v780_v47 = vld [vmem:[%s5288_s7 + $0x278] sm:$0xff] }
 0x1d7   : > { %v798_v26 = vld [vmem:[%s5291_s10 + $0x30] sm:$0xff] }
 0x1d8   : > { %1443 = vmatpush.msra.mxu2 %v713_v19  ;;  %v1541_v37 = vadd.f32 %v1540_v17, %v1539_v41  ;;  %v774_v17 = vld [vmem:[%s5288_s7 + $0x248] sm:$0xff] }
 0x1da   : > { %1444 = vmatpush.msra.mxu2 %v708_v61  ;;  %v1543_v7 = vadd.f32 %v1542_v49, %v1541_v37  ;;  %v775_v37 = vld [vmem:[%s5288_s7 + $0x250] sm:$0xff]  ;;  %v1552_v49 = vsel %vm880_vm1, %v3379_v46, 0.0  ;;  %v793_v46 = vld [vmem:[%s5291_s10 + $0x8] sm:$0xff] }
 0x1dc   : > { %1445 = vmatpush.msra.mxu2 %v703_v21  ;;  %v1545_v15 = vadd.f32 %v1544_v3, %v1543_v7  ;;  %v769_v7 = vld [vmem:[%s5288_s7 + $0x220] sm:$0xff]  ;;  %v770_v3 = vld [vmem:[%s5288_s7 + $0x228] sm:$0xff] }
 0x1dd   : > { %v3713_v23 = vpop.f32.mrf.mxu3 }
 0x1de   : > { %5350 = vst [vmem:[#allocation34_spill] sm:$0xff] %v3713_v23  ;;  %v1547_v19 = vadd.f32 %v1546_v55, %v1545_v15  ;;  %v1358_v15 = vpop.f32.mrf.mxu2 }
 0x1e0   : > { %v1549_v61 = vadd.f32 %v1548_v5, %v1547_v19  ;;  %v764_v19 = vld [vmem:[%s5288_s7 + $0x1f8] sm:$0xff]  ;;  %v765_v5 = vld [vmem:[%s5288_s7 + $0x200] sm:$0xff] }
 0x1e2   : > { %v1551_v41 = vadd.f32 %v1550_v29, %v1549_v61  ;;  %v759_v29 = vld [vmem:[%s5288_s7 + $0x1d0] sm:$0xff] }
 0x1e4   : > { %v1553_v55 = vadd.f32 %v1552_v49, %v1551_v41  ;;  %v755_v41 = vld [vmem:[%s5288_s7 + $0x1b0] sm:$0xff]  ;;  %v749_v49 = vld [vmem:[%s5288_s7 + $0x180] sm:$0xff] }
 0x1e5   : > { %v3736_v27 = vpop.f32.mrf.mxu3 }
 0x1e6   : > { %5351 = vst [vmem:[#allocation35_spill] sm:$0xff] %v3736_v27  ;;  %v4031_v27 = vld [vmem:[%s5291_s10 + $0xc0] sm:$0xff] }
 0x1ed   : > { %v3760_v14 = vpop.f32.mrf.mxu3 }
 0x1ee   : > { %5352 = vst [vmem:[#allocation36_spill] sm:$0xff] %v3760_v14  ;;  %v806_v14 = vld [vmem:[%s5291_s10 + $0x70] sm:$0xff] }
 0x1f5   : > { %v3771_v43 = vpop.f32.mrf.mxu3 }
 0x1f6   : > { %5353 = vst [vmem:[#allocation37_spill] sm:$0xff] %v3771_v43  ;;  %v807_v43 = vld [vmem:[%s5291_s10 + $0x78] sm:$0xff] }
 0x1fd   : > { %v3777_v62 = vpop.f32.mrf.mxu3 }
 0x1fe   : > { %5354 = vst [vmem:[#allocation38_spill] sm:$0xff] %v3777_v62  ;;  %v4014_v62 = vld [vmem:[%s5291_s10 + $0xc8] sm:$0xff] }
 0x233   : > { %v1378_v21 = vpop.f32.mrf.mxu3 }
 0x234   : > { %v3785_v30 = vadd.f32 %v1378_v21, %v1355_v53  ;;  %v1554_v53 = vsel %vm880_vm1, %v3396_v2, 0.0  ;;  %v795_v2 = vld [vmem:[%s5291_s10 + $0x18] sm:$0xff] }
 0x236   : > { %1423 = vmatmul.f32.vlgmr.msra.gmra.mxu3 %v3785_v30  ;;  %1400 = vmatmul.f32.vlgmr.msrb.gmra.mxu2 %v3785_v30 }
 0x237   : > { %1453 = vmatpush.msra.mxu3 %v779_v42  ;;  %1476 = vmatpush.msrb.mxu2 %v780_v47  ;;  %v760_v42 = vld [vmem:[%s5288_s7 + $0x1d8] sm:$0xff]  ;;  %v754_v47 = vld [vmem:[%s5288_s7 + $0x1a8] sm:$0xff] }
 0x239   : > { %1454 = vmatpush.msra.mxu3 %v774_v17  ;;  %1477 = vmatpush.msrb.mxu2 %v775_v37  ;;  %v1555_v17 = vadd.f32 %v1554_v53, %v1553_v55  ;;  %v1556_v37 = vsel %vm880_vm1, %v3393_v4, 0.0  ;;  %v740_v53 = vld [vmem:[%s5288_s7 + $0x138] sm:$0xff]  ;;  %v801_v4 = vld [vmem:[%s5291_s10 + $0x48] sm:$0xff] }
 0x23b   : > { %1455 = vmatpush.msra.mxu3 %v769_v7  ;;  %v1381_v61 = vpop.f32.mrf.mxu3  ;;  %1478 = vmatpush.msrb.mxu2 %v770_v3  ;;  %v750_v7 = vld [vmem:[%s5288_s7 + $0x188] sm:$0xff]  ;;  %v744_v3 = vld [vmem:[%s5288_s7 + $0x158] sm:$0xff]  ;;  %v1557_v55 = vadd.f32 %v1556_v37, %v1555_v17 }
 0x23c   : > { %v3820_v21 = vadd.f32 %v1381_v61, %v1358_v15  ;;  %v745_v15 = vld [vmem:[%s5288_s7 + $0x160] sm:$0xff]  ;;  %v734_v61 = vld [vmem:[%s5288_s7 + $0x108] sm:$0xff]  ;;  %v3873_v37 = vld [vmem:[%s5291_s10 + $0xf8] sm:$0xff] }
 0x23d   : > { %1456 = vmatpush.msra.mxu3 %v764_v19  ;;  %1479 = vmatpush.msrb.mxu2 %v765_v5  ;;  %v1558_v19 = vsel %vm880_vm1, %v3390_v63, 0.0  ;;  %v739_v5 = vld [vmem:[%s5288_s7 + $0x130] sm:$0xff]  ;;  %v730_v17 = vld [vmem:[%s5288_s7 + $0xe8] sm:$0xff] }
 0x23e   : > { %1426 = vmatmul.f32.gmra.mxu3 %v3820_v21  ;;  %1403 = vmatmul.f32.gmra.mxu2 %v3820_v21  ;;  %v802_v63 = vld [vmem:[%s5291_s10 + $0x50] sm:$0xff] }
 0x23f   : > { %1457 = vmatpush.msra.mxu3 %v759_v29  ;;  %1480 = vmatpush.msrb.mxu2 %v760_v42  ;;  %v735_v29 = vld [vmem:[%s5288_s7 + $0x110] sm:$0xff]  ;;  %v1559_v42 = vadd.f32 %v1558_v19, %v1557_v55  ;;  %v720_v55 = vld [vmem:[%s5288_s7 + $0x98] sm:$0xff]  ;;  %v714_v19 = vld [vmem:[%s5288_s7 + $0x68] sm:$0xff] }
 0x240   : > { %1921 = vmatpush.msrb.mxu1 %v3873_v37 }
 0x241   : > { %1458 = vmatpush.msra.mxu3 %v754_v47  ;;  %1481 = vmatpush.msrb.mxu2 %v755_v41  ;;  %v1560_v47 = vsel %vm880_vm1, %v3385_v59, 0.0  ;;  %v729_v41 = vld [vmem:[%s5288_s7 + $0xe0] sm:$0xff] }
 0x243   : > { %1459 = vmatpush.msra.mxu3 %v749_v49  ;;  %1482 = vmatpush.msrb.mxu2 %v750_v7  ;;  %v724_v49 = vld [vmem:[%s5288_s7 + $0xb8] sm:$0xff]  ;;  %v725_v7 = vld [vmem:[%s5288_s7 + $0xc0] sm:$0xff] }
 0x245   : > { %1460 = vmatpush.msra.mxu3 %v744_v3  ;;  %1483 = vmatpush.msrb.mxu2 %v745_v15  ;;  %v1561_v3 = vadd.f32 %v1560_v47, %v1559_v42  ;;  %v719_v15 = vld [vmem:[%s5288_s7 + $0x90] sm:$0xff]  ;;  %v704_v42 = vld [vmem:[%s5288_s7 + $0x18] sm:$0xff] }
 0x246   : > { %1446 = vmatmul.f32.vlgmr.msra.gmra.mxu2 %v3785_v30 }
 0x247   : > { %1461 = vmatpush.msra.mxu3 %v739_v5  ;;  %1484 = vmatpush.msrb.mxu2 %v740_v53  ;;  %v1562_v5 = vrot.slane %v1561_v3, 4  ;;  %v715_v53 = vld [vmem:[%s5288_s7 + $0x70] sm:$0xff] }
 0x249   : > { %1462 = vmatpush.msra.mxu3 %v734_v61  ;;  %1485 = vmatpush.msrb.mxu2 %v735_v29  ;;  %v709_v61 = vld [vmem:[%s5288_s7 + $0x40] sm:$0xff]  ;;  %v710_v29 = vld [vmem:[%s5288_s7 + $0x48] sm:$0xff]  ;;  %v1563_v47 = vadd.f32 %v1562_v5, %v1561_v3 }
 0x24a   : > { %v3924_v3 = vld [vmem:[%s5290_s9 + $0x48] sm:$0xf] }
 0x24b   : > { %1463 = vmatpush.msra.mxu3 %v729_v41  ;;  %1486 = vmatpush.msrb.mxu2 %v730_v17  ;;  %v705_v41 = vld [vmem:[%s5288_s7 + $0x20] sm:$0xff]  ;;  %v3910_v17 = vld [vmem:[%s5290_s9 + $0x28] sm:$0xf] }
 0x24c   : > { %v3946_v5 = vld [vmem:[%s5291_s10 + $0xe8] sm:$0xff] }
 0x24d   : > { %1464 = vmatpush.msra.mxu3 %v724_v49  ;;  %1487 = vmatpush.msrb.mxu2 %v725_v7  ;;  %v3916_v49 = vld [vmem:[%s5290_s9] sm:$0xff]  ;;  %v1564_v7 = vrot.slane %v1563_v47, 2 }
 0x24e   : > { %1449 = vmatmul.f32.gmra.mxu2 %v3820_v21 }
 0x24f   : > { %1465 = vmatpush.msra.mxu3 %v719_v15  ;;  %1488 = vmatpush.msrb.mxu2 %v720_v55  ;;  %v3932_v15 = vld [vmem:[%s5290_s9 + $0x20] sm:$0xff]  ;;  %v1565_v55 = vadd.f32 %v1564_v7, %v1563_v47  ;;  %v3976_v47 = vld [vmem:[%s5290_s9 + $0x8] sm:$0xff]  ;;  %v3991_v7 = vld [vmem:[%s5290_s9 + $0x10] sm:$0xff] }
 0x251   : > { %1466 = vmatpush.msra.mxu3 %v714_v19  ;;  %1489 = vmatpush.msrb.mxu2 %v715_v53  ;;  %v1566_v19 = vrot.slane %v1565_v55, 1  ;;  %v3951_v53 = vld [vmem:[%s5291_s10 + $0xe0] sm:$0xff] }
 0x253   : > { %1467 = vmatpush.msra.mxu3 %v709_v61  ;;  %1490 = vmatpush.msrb.mxu2 %v710_v29  ;;  %v3957_v61 = vld [vmem:[%s5291_s10 + $0xd8] sm:$0xff]  ;;  %v3963_v29 = vld [vmem:[%s5291_s10 + $0xd0] sm:$0xff] }
 0x255   : > { %1468 = vmatpush.msra.mxu3 %v704_v42  ;;  %1491 = vmatpush.msrb.mxu2 %v705_v41  ;;  %v3969_v42 = vld [vmem:[%s5290_s9 + $0x30] sm:$0xf]  ;;  %v3985_v41 = vld [vmem:[%s5290_s9 + $0x38] sm:$0xf] }
 0x256   : > { %1469 = vmatmul.f32.vlgmr.msra.gmra.mxu3 %v3785_v30  ;;  %1492 = vmatmul.f32.vlgmr.msrb.gmra.mxu2 %v3785_v30  ;;  %v3937_v30 = vld [vmem:[%s5291_s10 + $0xf0] sm:$0xff] }
 0x257   : > { %2939 = vmatpush.msk.msra.mxu3 %vm977_vm0, %v3910_v17  ;;  %2947 = vmatpush.msk.msra.mxu2 %vm977_vm0, %v3924_v3 }
 0x258   : > { %1922 = vmatpush.msrb.mxu1 %v3937_v30 }
 0x259   : > { %1651 = vmatpush.msra.mxu3 %v3916_v49  ;;  %1731 = vmatpush.msra.mxu2 %v3932_v15 }
 0x25a   : > { %1923 = vmatpush.msrb.mxu1 %v3946_v5 }
 0x25b   : > { %2207 = vmatpush.msrb.mxu2 %v807_v43 }
 0x25c   : > { %1924 = vmatpush.msrb.mxu1 %v3951_v53 }
 0x25d   : > { %2208 = vmatpush.msrb.mxu2 %v806_v14 }
 0x25e   : > { %1472 = vmatmul.f32.gmra.mxu3 %v3820_v21  ;;  %1495 = vmatmul.f32.gmra.mxu2 %v3820_v21  ;;  %v1567_v21 = vadd.f32 %v1566_v19, %v1565_v55  ;;  %v3999_v55 = vld [vmem:[%s5290_s9 + $0x40] sm:$0xf]  ;;  %v4005_v19 = vld [vmem:[%s5290_s9 + $0x18] sm:$0xff] }
 0x25f   : > { %1925 = vmatpush.msrb.mxu1 %v3957_v61 }
 0x261   : > { %1926 = vmatpush.msrb.mxu1 %v3963_v29 }
 0x263   : > { %1927 = vmatpush.msrb.mxu1 %v4014_v62 }
 0x265   : > { %1928 = vmatpush.msrb.mxu1 %v4031_v27 }
 0x266   : > { %2940 = vmatmul.msk.f32.vlgmr.msra.gmra.mxu3 %vm880_vm1, %v1567_v21  ;;  %2948 = vmatmul.msk.f32.vlgmr.msra.gmra.mxu2 %vm880_vm1, %v1567_v21 }
 0x267   : > { %2941 = vmatpush.msk.msra.mxu3 %vm977_vm0, %v3969_v42 }
 0x269   : > { %1671 = vmatpush.msra.mxu3 %v3976_v47 }
 0x26e   : > { %2942 = vmatmul.msk.f32.vlgmr.msra.gmra.mxu3 %vm880_vm1, %v1567_v21 }
 0x26f   : > { %2943 = vmatpush.msk.msra.mxu3 %vm977_vm0, %v3985_v41 }
 0x271   : > { %1691 = vmatpush.msra.mxu3 %v3991_v7 }
 0x276   : > { %2944 = vmatmul.msk.f32.vlgmr.msra.gmra.mxu3 %vm880_vm1, %v1567_v21 }
 0x277   : > { %2945 = vmatpush.msk.msra.mxu3 %vm977_vm0, %v3999_v55 }
 0x279   : > { %1711 = vmatpush.msra.mxu3 %v4005_v19 }
 0x27e   : > { %2946 = vmatmul.msk.f32.vlgmr.msra.gmra.mxu3 %vm880_vm1, %v1567_v21  ;;  %v805_v21 = vld [vmem:[%s5291_s10 + $0x68] sm:$0xff] }
 0x27f   : > { %1856 = vmatpush.msra.mxu3 %v807_v43  ;;  %v804_v43 = vld [vmem:[%s5291_s10 + $0x60] sm:$0xff]  ;;  %2209 = vmatpush.msrb.mxu2 %v805_v21 }
 0x281   : > { %1857 = vmatpush.msra.mxu3 %v806_v14  ;;  %v803_v14 = vld [vmem:[%s5291_s10 + $0x58] sm:$0xff]  ;;  %2210 = vmatpush.msrb.mxu2 %v804_v43 }
 0x283   : > { %1858 = vmatpush.msra.mxu3 %v805_v21  ;;  %2211 = vmatpush.msrb.mxu2 %v803_v14  ;;  %v800_v21 = vld [vmem:[%s5291_s10 + $0x40] sm:$0xff] }
 0x285   : > { %1859 = vmatpush.msra.mxu3 %v804_v43  ;;  %2212 = vmatpush.msrb.mxu2 %v802_v63  ;;  %v799_v43 = vld [vmem:[%s5291_s10 + $0x38] sm:$0xff] }
 0x287   : > { %1860 = vmatpush.msra.mxu3 %v803_v14  ;;  %2213 = vmatpush.msrb.mxu2 %v801_v4 }
 0x289   : > { %1861 = vmatpush.msra.mxu3 %v802_v63  ;;  %2214 = vmatpush.msrb.mxu2 %v800_v21 }
 0x28b   : > { %1862 = vmatpush.msra.mxu3 %v801_v4  ;;  %2215 = vmatpush.msrb.mxu2 %v799_v43  ;;  %v797_v4 = vld [vmem:[%s5291_s10 + $0x28] sm:$0xff] }
 0x28d   : > { %1863 = vmatpush.msra.mxu3 %v800_v21  ;;  %2216 = vmatpush.msrb.mxu2 %v798_v26  ;;  %v796_v21 = vld [vmem:[%s5291_s10 + $0x20] sm:$0xff] }
 0x28f   : > { %1864 = vmatpush.msra.mxu3 %v799_v43  ;;  %2217 = vmatpush.msrb.mxu2 %v797_v4  ;;  %v4073_v43 = vld [vmem:[%s5291_s10 + $0x178] sm:$0xff] }
 0x290   : > { %1986 = vmatpush.msrb.mxu0 %v4073_v43 }
 0x291   : > { %1865 = vmatpush.msra.mxu3 %v798_v26  ;;  %2218 = vmatpush.msrb.mxu2 %v796_v21  ;;  %v794_v26 = vld [vmem:[%s5291_s10 + $0x10] sm:$0xff] }
 0x293   : > { %1866 = vmatpush.msra.mxu3 %v797_v4  ;;  %2219 = vmatpush.msrb.mxu2 %v795_v2  ;;  %v815_v4 = vld [vmem:[%s5291_s10 + $0xb8] sm:$0xff] }
 0x294   : > { %1929 = vmatpush.msrb.mxu1 %v815_v4 }
 0x295   : > { %1867 = vmatpush.msra.mxu3 %v796_v21  ;;  %2220 = vmatpush.msrb.mxu2 %v794_v26  ;;  %v4085_v21 = vld [vmem:[%s5291_s10 + $0x170] sm:$0xff] }
 0x296   : > { %1987 = vmatpush.msrb.mxu0 %v4085_v21 }
 0x297   : > { %1868 = vmatpush.msra.mxu3 %v795_v2  ;;  %2221 = vmatpush.msrb.mxu2 %v793_v46 }
 0x298   : > { %1988 = vmatpush.msrb.mxu0 %v4094_v39 }
 0x299   : > { %1869 = vmatpush.msra.mxu3 %v794_v26  ;;  %2222 = vmatpush.msrb.mxu2 %v792_v22  ;;  %v4111_v26 = vld [vmem:[%s5291_s10 + $0x158] sm:$0xff] }
 0x29a   : > { %1989 = vmatpush.msrb.mxu0 %v4102_v57 }
 0x29b   : > { %1870 = vmatpush.msra.mxu3 %v793_v46  ;;  %2227 = vmatpush.msra.mxu2 %v3873_v37  ;;  %v4118_v46 = vld [vmem:[%s5291_s10 + $0x150] sm:$0xff]  ;;  %v4128_v37 = vld [vmem:[%s5291_s10 + $0x148] sm:$0xff] }
 0x29c   : > { %1990 = vmatpush.msrb.mxu0 %v4111_v26 }
 0x29d   : > { %1871 = vmatpush.msra.mxu3 %v792_v22  ;;  %2228 = vmatpush.msra.mxu2 %v3937_v30  ;;  %v814_v22 = vld [vmem:[%s5291_s10 + $0xb0] sm:$0xff]  ;;  %v4133_v30 = vld [vmem:[%s5291_s10 + $0x140] sm:$0xff] }
 0x29e   : > { %1991 = vmatpush.msrb.mxu0 %v4118_v46  ;;  %1930 = vmatpush.msrb.mxu1 %v814_v22 }
 0x29f   : > { %2229 = vmatpush.msra.mxu2 %v3946_v5 }
 0x2a0   : > { %1992 = vmatpush.msrb.mxu0 %v4128_v37 }
 0x2a1   : > { %2230 = vmatpush.msra.mxu2 %v3951_v53 }
 0x2a2   : > { %1993 = vmatpush.msrb.mxu0 %v4133_v30 }
 0x2a3   : > { %2231 = vmatpush.msra.mxu2 %v3957_v61  ;;  %v813_v61 = vld [vmem:[%s5291_s10 + $0xa8] sm:$0xff] }
 0x2a4   : > { %1994 = vmatpush.msrb.mxu0 %v4142_v34  ;;  %1931 = vmatpush.msrb.mxu1 %v813_v61 }
 0x2a5   : > { %2232 = vmatpush.msra.mxu2 %v3963_v29  ;;  %v4159_v29 = vld [vmem:[%s5291_s10 + $0x128] sm:$0xff] }
 0x2a6   : > { %1995 = vmatpush.msrb.mxu0 %v4149_v1  ;;  %1932 = vmatpush.msrb.mxu1 %v812_v51 }
 0x2a7   : > { %2233 = vmatpush.msra.mxu2 %v4014_v62 }
 0x2a8   : > { %1996 = vmatpush.msrb.mxu0 %v4159_v29 }
 0x2a9   : > { %2234 = vmatpush.msra.mxu2 %v4031_v27 }
 0x2ab   : > { %2235 = vmatpush.msra.mxu2 %v815_v4  ;;  %v4173_v4 = vld [vmem:[%s5291_s10 + $0x120] sm:$0xff] }
 0x2ac   : > { %1997 = vmatpush.msrb.mxu0 %v4173_v4 }
 0x2ad   : > { %2236 = vmatpush.msra.mxu2 %v814_v22 }
 0x2af   : > { %2237 = vmatpush.msra.mxu2 %v813_v61 }
 0x2b1   : > { %2238 = vmatpush.msra.mxu2 %v812_v51  ;;  %v4215_v51 = vld [vmem:[%s5291_s10 + $0x108] sm:$0xff] }
 0x2b9   : > { %v4023_v59 = vpop.f32.mrf.mxu2  ;;  %v4054_v14 = vpop.f32.mrf.mxu3 }
 0x2c1   : > { %v4043_v23 = vpop.f32.mrf.mxu2  ;;  %v1427_v50 = vpop.f32.mrf.mxu3 }
 0x2c2   : > { %v1574_v62 = vmul.f32 %v1427_v50, %v3969_v42  ;;  %v1573_v8 = vmul.f32 %v4043_v23, %v3910_v17  ;;  %v811_v17 = vld [vmem:[%s5291_s10 + $0x98] sm:$0xff] }
 0x2c3   : > { %v4185_v42 = vld [vmem:[%s5291_s10 + $0x118] sm:$0xff]  ;;  %1933 = vmatpush.msrb.mxu1 %v811_v17  ;;  %2239 = vmatpush.msra.mxu2 %v811_v17 }
 0x2c4   : > { %1998 = vmatpush.msrb.mxu0 %v4185_v42 }
 0x2c9   : > { %v4059_v63 = vpop.f32.mrf.mxu2 }
 0x2d1   : > { %v1450_v2 = vpop.f32.mrf.mxu2 }
 0x2d2   : > { %v1575_v35 = vmul.f32 %v1450_v2, %v3985_v41  ;;  %v1586_v41 = vsel %vm977_vm0, %v1574_v62, 0.0  ;;  %v4225_v62 = vld [vmem:[%s5291_s10 + $0x100] sm:$0xff] }
 0x2d4   : > { %v1594_v22 = vsel %vm977_vm0, %v1575_v35, 0.0 }
 0x2d9   : > { %v1470_v10 = vpop.f32.mrf.mxu3  ;;  %v1493_v5 = vpop.f32.mrf.mxu2 }
 0x2da   : > { %v1571_v61 = vmul.f32 %v1470_v10, %v4005_v19 }
 0x2e1   : > { %v1473_v53 = vpop.f32.mrf.mxu3  ;;  %v1496_v58 = vpop.f32.mrf.mxu2 }
 0x2e2   : > { %v1576_v27 = vmul.f32 %v1473_v53, %v3999_v55  ;;  %v1577_v23 = vmul.f32 %v1496_v58, %v3924_v3  ;;  %v1578_v55 = vsel %vm977_vm0, %v1573_v8, 0.0  ;;  %v1569_v58 = vmul.f32 %v4054_v14, %v3976_v47  ;;  %v810_v53 = vld [vmem:[%s5291_s10 + $0x90] sm:$0xff]  ;;  %v809_v14 = vld [vmem:[%s5291_s10 + $0x88] sm:$0xff] }
 0x2e3   : > { %v1568_v3 = vmul.f32 %v4023_v59, %v3916_v49  ;;  %v4202_v8 = vld [vmem:[%s5291_s10 + $0x110] sm:$0xff]  ;;  %v1570_v47 = vmul.f32 %v4059_v63, %v3991_v7  ;;  %1934 = vmatpush.msrb.mxu1 %v810_v53  ;;  %v1572_v7 = vmul.f32 %v1493_v5, %v3932_v15  ;;  %v808_v63 = vld [vmem:[%s5291_s10 + $0x80] sm:$0xff]  ;;  %2240 = vmatpush.msra.mxu2 %v810_v53 }
 0x2e4   : > { %v1602_v2 = vsel %vm977_vm0, %v1576_v27, 0.0  ;;  %1999 = vmatpush.msrb.mxu0 %v4202_v8  ;;  %v1587_v59 = vadd.f32 %v1586_v41, %v1569_v58  ;;  %v1610_v49 = vsel %vm977_vm0, %v1577_v23, 0.0 }
 0x2e5   : > { %v1579_v35 = vadd.f32 %v1578_v55, %v1568_v3  ;;  %v1603_v10 = vadd.f32 %v1602_v2, %v1571_v61  ;;  %v1595_v19 = vadd.f32 %v1594_v22, %v1570_v47  ;;  %1935 = vmatpush.msrb.mxu1 %v809_v14  ;;  %v1611_v23 = vadd.f32 %v1610_v49, %v1572_v7 }
 0x2e6   : > { %2000 = vmatpush.msrb.mxu0 %v4215_v51  ;;  %v1588_v17 = vrot.slane %v1587_v59, 4  ;;  %2241 = vmatpush.msra.mxu2 %v809_v14 }
 0x2e7   : > { %1936 = vmatpush.msrb.mxu1 %v808_v63  ;;  %v1580_v15 = vrot.slane %v1579_v35, 4  ;;  %v1604_v5 = vrot.slane %v1603_v10, 4  ;;  %v1596_v41 = vrot.slane %v1595_v19, 4  ;;  %v1612_v55 = vrot.slane %v1611_v23, 4 }
 0x2e8   : > { %2001 = vmatpush.msrb.mxu0 %v4225_v62  ;;  %2242 = vmatpush.msra.mxu2 %v808_v63  ;;  %v1589_v58 = vadd.f32 %v1588_v17, %v1587_v59 }
 0x2e9   : > { %v4175_v50 = vpop.f32.mrf.mxu3  ;;  %v1581_v3 = vadd.f32 %v1580_v15, %v1579_v35  ;;  %v1605_v2 = vadd.f32 %v1604_v5, %v1603_v10  ;;  %v1597_v22 = vadd.f32 %v1596_v41, %v1595_v19  ;;  %v1613_v61 = vadd.f32 %v1612_v55, %v1611_v23  ;;  %v1733_v54 = vpop.f32.mrf.mxu2 }
 0x2ea   : > { %v1590_v33 = vrot.slane %v1589_v58, 2  ;;  %v1744_v18 = vrot.slane %v1733_v54, 4 }
 0x2eb   : > { %v1582_v53 = vrot.slane %v1581_v3, 2  ;;  %v1606_v45 = vrot.slane %v1605_v2, 2  ;;  %v1598_v49 = vrot.slane %v1597_v22, 2  ;;  %v1614_v7 = vrot.slane %v1613_v61, 2 }
 0x2ec   : > { %v1591_v38 = vadd.f32 %v1590_v33, %v1589_v58 }
 0x2ed   : > { %v1583_v13 = vadd.f32 %v1582_v53, %v1581_v3  ;;  %v1607_v14 = vadd.f32 %v1606_v45, %v1605_v2  ;;  %v1599_v31 = vadd.f32 %v1598_v49, %v1597_v22  ;;  %v1615_v59 = vadd.f32 %v1614_v7, %v1613_v61  ;;  %v781_v45 = vld [vmem:[%s5289_s8] sm:$0x1f] }
 0x2ee   : > { %v1592_v10 = vrot.slane %v1591_v38, 1 }
 0x2ef   : > { %v1584_v23 = vrot.slane %v1583_v13, 1  ;;  %v1608_v17 = vrot.slane %v1607_v14, 1  ;;  %v1600_v15 = vrot.slane %v1599_v31, 1  ;;  %v1616_v5 = vrot.slane %v1615_v59, 1 }
 0x2f0   : > { %v1593_v58 = vadd.f32 %v1592_v10, %v1591_v38  ;;  %v620_v38 = vld [vmem:[%s5286_s5] sm:$0xff] }
 0x2f1   : > { %v1673_v27 = vpop.f32.mrf.mxu3  ;;  %v1585_v3 = vadd.f32 %v1584_v23, %v1583_v13  ;;  %v1609_v2 = vadd.f32 %v1608_v17, %v1607_v14  ;;  %v1601_v22 = vadd.f32 %v1600_v15, %v1599_v31  ;;  %v621_v31 = vld [vmem:[%s5286_s5 + $0x8] sm:$0xff]  ;;  %v622_v13 = vld [vmem:[%s5286_s5 + $0x10] sm:$0xff] }
 0x2f2   : > { %v1741_v25 = vrot.slane %v1673_v27, 7 }
 0x2f4   : > { %v1746_v33 = vsel %vm1745_vm2, %v4175_v50, %v1741_v25  ;;  %v1617_v50 = vadd.f32 %v1616_v5, %v1615_v59 }
 0x2f9   : > { %v1693_v47 = vpop.f32.mrf.mxu3 }
 0x2fa   : > { %v1742_v63 = vrot.slane %v1693_v47, 6 }
 0x2fc   : > { %v1748_v27 = vsel %vm1747_vm3, %v1746_v33, %v1742_v63 }
 0x301   : > { %v1713_v35 = vpop.f32.mrf.mxu3 }
 0x302   : > { %v1743_v19 = vrot.slane %v1713_v35, 5 }
 0x304   : > { %v1750_v54 = vsel %vm1749_vm4, %v1743_v19, %v1744_v18 }
 0x305   : > { %v1752_v41 = vsel %vm1751_vm5, %v1748_v27, %v1750_v54  ;;  %v700_v54 = vld [vmem:[%s5287_s6] sm:$0x1f] }
 0x306   : > { %v1754_v55 = vmul.f32 %v1752_v41, %v781_v45 }
 0x308   : > { %v1756_v61 = vperm.slane %v1754_v55, 0  ;;  %v1757_v47 = vperm.slane %v1754_v55, 1  ;;  %v1758_v53 = vperm.slane %v1754_v55, 2  ;;  %v1759_v25 = vperm.slane %v1754_v55, 3 }
 0x309   : > { %v1760_v49 = vperm.slane %v1754_v55, 4 }
 0x30a   : > { %v1766_v7 = vadd.f32 %v1756_v61, %v1585_v3  ;;  %v1767_v35 = vadd.f32 %v1757_v47, %v1593_v58  ;;  %v1768_v11 = vadd.f32 %v1758_v53, %v1601_v22  ;;  %v4236_v63 = vadd.f32 %v1759_v25, %v1609_v2  ;;  %v625_v3 = vld [vmem:[%s5286_s5 + $0x28] sm:$0xff]  ;;  %v626_v2 = vld [vmem:[%s5286_s5 + $0x30] sm:$0xff]  ;;  %v627_v61 = vld [vmem:[%s5286_s5 + $0x38] sm:$0xff] }
 0x30b   : > { %v4238_v18 = vadd.f32 %v1760_v49, %v1617_v50  ;;  %v630_v50 = vld [vmem:[%s5286_s5 + $0x50] sm:$0xff]  ;;  %v631_v49 = vld [vmem:[%s5286_s5 + $0x58] sm:$0xff] }
 0x30c   : > { %v4249_v14 = vperm.slane %v1766_v7, 0  ;;  %v4251_v59 = vperm.slane %v1767_v35, 0  ;;  %v4253_v10 = vperm.slane %v1768_v11, 0  ;;  %v2186_v19 = vrot.slane %v1767_v35, 7 }
 0x30d   : > { %v2187_v23 = vrot.slane %v1768_v11, 6  ;;  %v2188_v17 = vrot.slane %v4236_v63, 5  ;;  %v2189_v15 = vrot.slane %v4238_v18, 4 }
 0x30e   : > { %v1776_v33 = vmul.f32 %v4249_v14, %v620_v38  ;;  %v1777_v45 = vmul.f32 %v4251_v59, %v621_v31  ;;  %v1778_v27 = vmul.f32 %v4253_v10, %v622_v13  ;;  %v2190_v5 = vsel %vm1745_vm2, %v1766_v7, %v2186_v19  ;;  %v636_v38 = vld [vmem:[%s5286_s5 + $0x80] sm:$0xff] }
 0x30f   : > { %v2191_v41 = vsel %vm1747_vm3, %v2190_v5, %v2187_v23  ;;  %v2192_v11 = vsel %vm1749_vm4, %v2188_v17, %v2189_v15  ;;  %v1781_v47 = vmul.f32 %v4249_v14, %v625_v3  ;;  %v1782_v53 = vmul.f32 %v4251_v59, %v626_v2  ;;  %v640_v13 = vld [vmem:[%s5286_s5 + $0xa0] sm:$0xff]  ;;  %v645_v23 = vld [vmem:[%s5286_s5 + $0xc8] sm:$0xff] }
 0x310   : > { %1872 = vmatmul.f32.vlgmr.msra.gmra.mxu3 %v1776_v33  ;;  %1937 = vmatmul.f32.vlgmr.msrb.gmra.mxu1 %v1777_v45  ;;  %v2193_v55 = vsel %vm1751_vm5, %v2191_v41, %v2192_v11  ;;  %v1783_v25 = vmul.f32 %v4253_v10, %v627_v61  ;;  %v1796_v19 = vmul.f32 %v4249_v14, %v640_v13  ;;  %v4348_v33 = vpop.f32.mrf.mxu0  ;;  %v650_v45 = vld [vmem:[%s5286_s5 + $0xf0] sm:$0xff]  ;;  %v656_v3 = vld [vmem:[%s5286_s5 + $0x120] sm:$0xff]  ;;  %v657_v2 = vld [vmem:[%s5286_s5 + $0x128] sm:$0xff] }
 0x311   : > { %2002 = vmatmul.f32.vlgmr.msrb.gmra.mxu0 %v1778_v27  ;;  %v4267_v58 = vmul.f32 %v2193_v55, %v700_v54  ;;  %v652_v27 = vld [vmem:[%s5286_s5 + $0x100] sm:$0xff]  ;;  %v1806_v54 = vmul.f32 %v4249_v14, %v650_v45  ;;  %v655_v55 = vld [vmem:[%s5286_s5 + $0x118] sm:$0xff]  ;;  %v1812_v61 = vmul.f32 %v4251_v59, %v656_v3  ;;  %v4483_v45 = vld [vmem:[%s5291_s10 + $0x1c8] sm:$0xff] }
 0x312   : > { %v1808_v41 = vmul.f32 %v4253_v10, %v652_v27  ;;  %v4433_v13 = vld [vmem:[%s5291_s10 + $0x1e0] sm:$0xff] }
 0x313   : > { %v2197_v22 = vperm.slane %v4267_v58, 0  ;;  %v2198_v7 = vperm.slane %v4267_v58, 1  ;;  %v2199_v17 = vperm.slane %v4267_v58, 2  ;;  %v672_v27 = vld [vmem:[%s5286_s5 + $0x1a0] sm:$0xff] }
 0x314   : > { %v4508_v3 = vld [vmem:[%s5291_s10 + $0x240] sm:$0xff] }
 0x315   : > { %2223 = vmatmul.f32.vlgmr.msrb.gmra.mxu2 %v2197_v22  ;;  %v1811_v22 = vmul.f32 %v4249_v14, %v655_v55  ;;  %v1828_v55 = vmul.f32 %v4253_v10, %v672_v27  ;;  %v680_v27 = vld [vmem:[%s5286_s5 + $0x1e0] sm:$0xff] }
 0x316   : > { %2247 = vmatpush.msrb.mxu2 %v4073_v43  ;;  %v632_v43 = vld [vmem:[%s5286_s5 + $0x60] sm:$0xff] }
 0x317   : > { %v1788_v35 = vmul.f32 %v4253_v10, %v632_v43  ;;  %v662_v43 = vld [vmem:[%s5286_s5 + $0x150] sm:$0xff] }
 0x318   : > { %1875 = vmatmul.f32.gmra.mxu3 %v1781_v47  ;;  %1940 = vmatmul.f32.gmra.mxu1 %v1782_v53  ;;  %v4362_v11 = vpop.f32.mrf.mxu0  ;;  %v1813_v47 = vmul.f32 %v4253_v10, %v657_v2  ;;  %v4379_v53 = vld [vmem:[%s5291_s10 + $0x278] sm:$0xff] }
 0x319   : > { %2248 = vmatpush.msrb.mxu2 %v4085_v21  ;;  %2005 = vmatmul.f32.gmra.mxu0 %v1783_v25  ;;  %v1786_v21 = vmul.f32 %v4249_v14, %v630_v50  ;;  %v4384_v25 = vld [vmem:[%s5291_s10 + $0x1f8] sm:$0xff]  ;;  %v660_v50 = vld [vmem:[%s5286_s5 + $0x140] sm:$0xff] }
 0x31a   : > { %2116 = vmatpush.msra.mxu3 %v4379_v53  ;;  %2051 = vmatpush.msra.mxu1 %v4384_v25 }
 0x31b   : > { %2249 = vmatpush.msrb.mxu2 %v4094_v39  ;;  %v1787_v39 = vmul.f32 %v4251_v59, %v631_v49  ;;  %v661_v49 = vld [vmem:[%s5286_s5 + $0x148] sm:$0xff] }
 0x31d   : > { %2250 = vmatpush.msrb.mxu2 %v4102_v57  ;;  %v635_v57 = vld [vmem:[%s5286_s5 + $0x78] sm:$0xff] }
 0x31e   : > { %2243 = vmatmul.f32.vlgmr.msra.gmra.mxu2 %v2198_v7  ;;  %v1791_v31 = vmul.f32 %v4249_v14, %v635_v57  ;;  %v4405_v57 = vld [vmem:[%s5291_s10 + $0x270] sm:$0xff] }
 0x31f   : > { %2251 = vmatpush.msrb.mxu2 %v4111_v26  ;;  %v637_v26 = vld [vmem:[%s5286_s5 + $0x88] sm:$0xff]  ;;  %2117 = vmatpush.msra.mxu3 %v4405_v57 }
 0x320   : > { %1878 = vmatmul.f32.gmra.mxu3 %v1786_v21  ;;  %1943 = vmatmul.f32.gmra.mxu1 %v1787_v39  ;;  %v4397_v7 = vpop.f32.mrf.mxu0  ;;  %v1816_v21 = vmul.f32 %v4249_v14, %v660_v50  ;;  %v1817_v39 = vmul.f32 %v4251_v59, %v661_v49  ;;  %v675_v50 = vld [vmem:[%s5286_s5 + $0x1b8] sm:$0xff]  ;;  %v676_v49 = vld [vmem:[%s5286_s5 + $0x1c0] sm:$0xff] }
 0x321   : > { %2252 = vmatpush.msrb.mxu2 %v4118_v46  ;;  %2008 = vmatmul.f32.gmra.mxu0 %v1788_v35  ;;  %v1792_v46 = vmul.f32 %v4251_v59, %v636_v38  ;;  %v1818_v35 = vmul.f32 %v4253_v10, %v662_v43  ;;  %v4410_v38 = vld [vmem:[%s5291_s10 + $0x1f0] sm:$0xff] }
 0x322   : > { %2052 = vmatpush.msra.mxu1 %v4410_v38  ;;  %v4539_v43 = vld [vmem:[%s5291_s10 + $0x230] sm:$0xff] }
 0x323   : > { %2253 = vmatpush.msrb.mxu2 %v4128_v37  ;;  %v1793_v37 = vmul.f32 %v4253_v10, %v637_v26  ;;  %v4415_v26 = vld [vmem:[%s5291_s10 + $0x1e8] sm:$0xff] }
 0x324   : > { %2053 = vmatpush.msra.mxu1 %v4415_v26 }
 0x325   : > { %2254 = vmatpush.msrb.mxu2 %v4133_v30  ;;  %v641_v30 = vld [vmem:[%s5286_s5 + $0xa8] sm:$0xff] }
 0x326   : > { %2054 = vmatpush.msra.mxu1 %v4433_v13 }
 0x327   : > { %2255 = vmatpush.msrb.mxu2 %v4142_v34  ;;  %v642_v34 = vld [vmem:[%s5286_s5 + $0xb0] sm:$0xff] }
 0x328   : > { %1881 = vmatmul.f32.gmra.mxu3 %v1791_v31  ;;  %1946 = vmatmul.f32.gmra.mxu1 %v1792_v46  ;;  %v665_v31 = vld [vmem:[%s5286_s5 + $0x168] sm:$0xff] }
 0x329   : > { %2256 = vmatpush.msrb.mxu2 %v4149_v1  ;;  %2011 = vmatmul.f32.gmra.mxu0 %v1793_v37  ;;  %v1797_v1 = vmul.f32 %v4251_v59, %v641_v30  ;;  %v4425_v46 = vld [vmem:[%s5291_s10 + $0x268] sm:$0xff]  ;;  %v666_v37 = vld [vmem:[%s5286_s5 + $0x170] sm:$0xff]  ;;  %v4438_v30 = vld [vmem:[%s5291_s10 + $0x260] sm:$0xff] }
 0x32a   : > { %2118 = vmatpush.msra.mxu3 %v4425_v46 }
 0x32b   : > { %2257 = vmatpush.msrb.mxu2 %v4159_v29  ;;  %v1798_v29 = vmul.f32 %v4253_v10, %v642_v34  ;;  %v667_v34 = vld [vmem:[%s5286_s5 + $0x178] sm:$0xff] }
 0x32c   : > { %2119 = vmatpush.msra.mxu3 %v4438_v30 }
 0x32d   : > { %2258 = vmatpush.msrb.mxu2 %v4173_v4  ;;  %v646_v4 = vld [vmem:[%s5286_s5 + $0xd0] sm:$0xff] }
 0x32f   : > { %2259 = vmatpush.msrb.mxu2 %v4185_v42  ;;  %v647_v42 = vld [vmem:[%s5286_s5 + $0xd8] sm:$0xff] }
 0x330   : > { %1884 = vmatmul.f32.gmra.mxu3 %v1796_v19  ;;  %1949 = vmatmul.f32.gmra.mxu1 %v1797_v1  ;;  %v1803_v15 = vmul.f32 %v4253_v10, %v647_v42  ;;  %v1821_v19 = vmul.f32 %v4249_v14, %v665_v31  ;;  %v1822_v1 = vmul.f32 %v4251_v59, %v666_v37  ;;  %v4465_v42 = vld [vmem:[%s5291_s10 + $0x1d0] sm:$0xff]  ;;  %v4557_v37 = vld [vmem:[%s5291_s10 + $0x228] sm:$0xff] }
 0x331   : > { %2260 = vmatpush.msrb.mxu2 %v4202_v8  ;;  %2014 = vmatmul.f32.gmra.mxu0 %v1798_v29  ;;  %v1801_v8 = vmul.f32 %v4249_v14, %v645_v23  ;;  %v4449_v29 = vpop.f32.mrf.mxu0  ;;  %v1823_v23 = vmul.f32 %v4253_v10, %v667_v34  ;;  %v1832_v31 = vmul.f32 %v4251_v59, %v676_v49 }
 0x332   : > { %v1836_v49 = vmul.f32 %v4249_v14, %v680_v27  ;;  %v4625_v27 = vld [vmem:[%s5291_s10 + $0x180] sm:$0xff] }
 0x333   : > { %2261 = vmatpush.msrb.mxu2 %v4215_v51  ;;  %v1802_v51 = vmul.f32 %v4251_v59, %v646_v4  ;;  %v4455_v4 = vld [vmem:[%s5291_s10 + $0x1d8] sm:$0xff] }
 0x334   : > { %2055 = vmatpush.msra.mxu1 %v4455_v4 }
 0x335   : > { %2262 = vmatpush.msrb.mxu2 %v4225_v62  ;;  %v651_v62 = vld [vmem:[%s5286_s5 + $0xf8] sm:$0xff] }
 0x336   : > { %2263 = vmatmul.f32.vlgmr.msrb.gmra.mxu2 %v2199_v17  ;;  %v1807_v5 = vmul.f32 %v4251_v59, %v651_v62  ;;  %v4460_v17 = vld [vmem:[%s5291_s10 + $0x258] sm:$0xff]  ;;  %v4488_v62 = vld [vmem:[%s5291_s10 + $0x248] sm:$0xff]  ;;  %2056 = vmatpush.msra.mxu1 %v4465_v42 }
 0x337   : > { %2120 = vmatpush.msra.mxu3 %v4460_v17 }
 0x338   : > { %1887 = vmatmul.f32.gmra.mxu3 %v1801_v8  ;;  %1952 = vmatmul.f32.gmra.mxu1 %v1802_v51  ;;  %v670_v8 = vld [vmem:[%s5286_s5 + $0x190] sm:$0xff] }
 0x339   : > { %2017 = vmatmul.f32.gmra.mxu0 %v1803_v15  ;;  %v4475_v51 = vld [vmem:[%s5291_s10 + $0x250] sm:$0xff]  ;;  %v671_v15 = vld [vmem:[%s5286_s5 + $0x198] sm:$0xff]  ;;  %2057 = vmatpush.msra.mxu1 %v4483_v45  ;;  %v4510_v2 = vpop.f32.mrf.mxu0 }
 0x33a   : > { %2121 = vmatpush.msra.mxu3 %v4475_v51 }
 0x33c   : > { %2122 = vmatpush.msra.mxu3 %v4488_v62 }
 0x33e   : > { %2123 = vmatpush.msra.mxu3 %v4508_v3 }
 0x340   : > { %1890 = vmatmul.f32.gmra.mxu3 %v1806_v54  ;;  %1955 = vmatmul.f32.gmra.mxu1 %v1807_v5  ;;  %v1826_v54 = vmul.f32 %v4249_v14, %v670_v8  ;;  %v1827_v5 = vmul.f32 %v4251_v59, %v671_v15  ;;  %v4581_v8 = vld [vmem:[%s5291_s10 + $0x218] sm:$0xff] }
 0x341   : > { %2020 = vmatmul.f32.gmra.mxu0 %v1808_v41  ;;  %v4502_v41 = vld [vmem:[%s5291_s10 + $0x1c0] sm:$0xff]  ;;  %v4583_v15 = vpop.f32.mrf.mxu0 }
 0x342   : > { %2058 = vmatpush.msra.mxu1 %v4502_v41 }
 0x348   : > { %1893 = vmatmul.f32.gmra.mxu3 %v1811_v22  ;;  %1958 = vmatmul.f32.gmra.mxu1 %v1812_v61  ;;  %v4516_v22 = vld [vmem:[%s5291_s10 + $0x1b8] sm:$0xff] }
 0x349   : > { %2023 = vmatmul.f32.gmra.mxu0 %v1813_v47  ;;  %v4521_v61 = vld [vmem:[%s5291_s10 + $0x238] sm:$0xff]  ;;  %v4527_v47 = vld [vmem:[%s5291_s10 + $0x1b0] sm:$0xff]  ;;  %2059 = vmatpush.msra.mxu1 %v4516_v22 }
 0x34a   : > { %2124 = vmatpush.msra.mxu3 %v4521_v61 }
 0x34b   : > { %2060 = vmatpush.msra.mxu1 %v4527_v47 }
 0x34c   : > { %2125 = vmatpush.msra.mxu3 %v4539_v43 }
 0x34e   : > { %2126 = vmatpush.msra.mxu3 %v4557_v37 }
 0x350   : > { %1896 = vmatmul.f32.gmra.mxu3 %v1816_v21  ;;  %1961 = vmatmul.f32.gmra.mxu1 %v1817_v39  ;;  %v677_v21 = vld [vmem:[%s5286_s5 + $0x1c8] sm:$0xff] }
 0x351   : > { %2026 = vmatmul.f32.gmra.mxu0 %v1818_v35  ;;  %v4548_v39 = vld [vmem:[%s5291_s10 + $0x1a8] sm:$0xff]  ;;  %v1831_v35 = vmul.f32 %v4249_v14, %v675_v50  ;;  %v1833_v34 = vmul.f32 %v4253_v10, %v677_v21  ;;  %v4604_v50 = vld [vmem:[%s5291_s10 + $0x210] sm:$0xff] }
 0x352   : > { %2061 = vmatpush.msra.mxu1 %v4548_v39 }
 0x358   : > { %1899 = vmatmul.f32.gmra.mxu3 %v1821_v19  ;;  %1964 = vmatmul.f32.gmra.mxu1 %v1822_v1  ;;  %v4564_v19 = vld [vmem:[%s5291_s10 + $0x1a0] sm:$0xff] }
 0x359   : > { %2029 = vmatmul.f32.gmra.mxu0 %v1823_v23  ;;  %v4569_v1 = vld [vmem:[%s5291_s10 + $0x220] sm:$0xff]  ;;  %v4575_v23 = vld [vmem:[%s5291_s10 + $0x198] sm:$0xff]  ;;  %2062 = vmatpush.msra.mxu1 %v4564_v19 }
 0x35a   : > { %2127 = vmatpush.msra.mxu3 %v4569_v1 }
 0x35b   : > { %2063 = vmatpush.msra.mxu1 %v4575_v23 }
 0x35c   : > { %2128 = vmatpush.msra.mxu3 %v4581_v8 }
 0x35e   : > { %2129 = vmatpush.msra.mxu3 %v4604_v50 }
 0x360   : > { %1902 = vmatmul.f32.gmra.mxu3 %v1826_v54  ;;  %1967 = vmatmul.f32.gmra.mxu1 %v1827_v5  ;;  %v681_v54 = vld [vmem:[%s5286_s5 + $0x1e8] sm:$0xff]  ;;  %v4595_v5 = vld [vmem:[%s5291_s10 + $0x190] sm:$0xff] }
 0x361   : > { %2032 = vmatmul.f32.gmra.mxu0 %v1828_v55  ;;  %v682_v55 = vld [vmem:[%s5286_s5 + $0x1f0] sm:$0xff]  ;;  %v1837_v21 = vmul.f32 %v4251_v59, %v681_v54  ;;  %2064 = vmatpush.msra.mxu1 %v4595_v5  ;;  %v856_v54 = vld [vmem:[%s5291_s10 + $0x200] sm:$0xff] }
 0x368   : > { %1905 = vmatmul.f32.gmra.mxu3 %v1831_v35  ;;  %1970 = vmatmul.f32.gmra.mxu1 %v1832_v31  ;;  %v4613_v35 = vld [vmem:[%s5291_s10 + $0x188] sm:$0xff]  ;;  %v1838_v31 = vmul.f32 %v4253_v10, %v682_v55 }
 0x369   : > { %2035 = vmatmul.f32.gmra.mxu0 %v1833_v34  ;;  %v4620_v34 = vld [vmem:[%s5291_s10 + $0x208] sm:$0xff]  ;;  %2065 = vmatpush.msra.mxu1 %v4613_v35 }
 0x36a   : > { %2130 = vmatpush.msra.mxu3 %v4620_v34  ;;  %v685_v55 = vld [vmem:[%s5286_s5 + $0x208] sm:$0xff] }
 0x36b   : > { %2066 = vmatpush.msra.mxu1 %v4625_v27  ;;  %v1841_v6 = vmul.f32 %v4249_v14, %v685_v55 }
 0x36c   : > { %2131 = vmatpush.msra.mxu3 %v856_v54 }
 0x36d   : > { %2287 = vmatpush.msrb.mxu1 %v4379_v53  ;;  %v691_v53 = vld [vmem:[%s5286_s5 + $0x238] sm:$0xff] }
 0x36f   : > { %2288 = vmatpush.msrb.mxu1 %v4405_v57  ;;  %v692_v57 = vld [vmem:[%s5286_s5 + $0x240] sm:$0xff] }
 0x370   : > { %1908 = vmatmul.f32.gmra.mxu3 %v1836_v49  ;;  %1973 = vmatmul.f32.gmra.mxu1 %v1837_v21  ;;  %v686_v49 = vld [vmem:[%s5286_s5 + $0x210] sm:$0xff]  ;;  %v687_v21 = vld [vmem:[%s5286_s5 + $0x218] sm:$0xff] }
 0x371   : > { %2038 = vmatmul.f32.gmra.mxu0 %v1838_v31  ;;  %v4643_v31 = vpop.f32.mrf.mxu0  ;;  %v1842_v0 = vmul.f32 %v4251_v59, %v686_v49  ;;  %v1843_v60 = vmul.f32 %v4253_v10, %v687_v21  ;;  %2289 = vmatpush.msrb.mxu1 %v4425_v46  ;;  %v1848_v46 = vmul.f32 %v4253_v10, %v692_v57 }
 0x373   : > { %2290 = vmatpush.msrb.mxu1 %v4438_v30  ;;  %v695_v30 = vld [vmem:[%s5286_s5 + $0x258] sm:$0xff] }
 0x375   : > { %2291 = vmatpush.msrb.mxu1 %v4460_v17  ;;  %v697_v17 = vld [vmem:[%s5286_s5 + $0x268] sm:$0xff] }
 0x376   : > { %v1853_v55 = vmul.f32 %v4253_v10, %v697_v17 }
 0x377   : > { %2292 = vmatpush.msrb.mxu1 %v4475_v51  ;;  %v1851_v51 = vmul.f32 %v4249_v14, %v695_v30 }
 0x378   : > { %1911 = vmatmul.f32.gmra.mxu3 %v1841_v6  ;;  %1976 = vmatmul.f32.gmra.mxu1 %v1842_v0  ;;  %v1847_v0 = vmul.f32 %v4251_v59, %v691_v53 }
 0x379   : > { %2041 = vmatmul.f32.gmra.mxu0 %v1843_v60  ;;  %v1846_v60 = vmul.f32 %v4249_v14, %v690_v56  ;;  %v4663_v6 = vpop.f32.mrf.mxu0  ;;  %2293 = vmatpush.msrb.mxu1 %v4488_v62  ;;  %v696_v56 = vld [vmem:[%s5286_s5 + $0x260] sm:$0xff]  ;;  %v623_v14 = vld [vmem:[%s5286_s5 + $0x18] sm:$0xff] }
 0x37a   : > { %5355 = vst [vmem:[#allocation39_spill] sm:$0xff] %v4663_v6  ;;  %v1852_v62 = vmul.f32 %v4251_v59, %v696_v56  ;;  %v624_v59 = vld [vmem:[%s5286_s5 + $0x20] sm:$0xff] }
 0x37b   : > { %2294 = vmatpush.msrb.mxu1 %v4508_v3  ;;  %v4687_v3 = vperm.slane %v4236_v63, 0 }
 0x37d   : > { %2295 = vmatpush.msrb.mxu1 %v4521_v61  ;;  %v4690_v61 = vperm.slane %v4238_v18, 0 }
 0x37f   : > { %2296 = vmatpush.msrb.mxu1 %v4539_v43  ;;  %v1779_v43 = vmul.f32 %v4687_v3, %v623_v14  ;;  %v1780_v63 = vmul.f32 %v4690_v61, %v624_v59 }
 0x380   : > { %1914 = vmatmul.f32.gmra.mxu3 %v1846_v60  ;;  %1979 = vmatmul.f32.gmra.mxu1 %v1847_v0 }
 0x381   : > { %2044 = vmatmul.f32.gmra.mxu0 %v1848_v46  ;;  %v4683_v49 = vpop.f32.mrf.mxu0  ;;  %2297 = vmatpush.msrb.mxu1 %v4557_v37  ;;  %v628_v37 = vld [vmem:[%s5286_s5 + $0x40] sm:$0xff] }
 0x382   : > { %5356 = vst [vmem:[#allocation40_spill] sm:$0xff] %v4683_v49 }
 0x383   : > { %2298 = vmatpush.msrb.mxu1 %v4569_v1  ;;  %v629_v1 = vld [vmem:[%s5286_s5 + $0x48] sm:$0xff] }
 0x385   : > { %2299 = vmatpush.msrb.mxu1 %v4581_v8 }
 0x387   : > { %2300 = vmatpush.msrb.mxu1 %v4604_v50 }
 0x388   : > { %1917 = vmatmul.f32.gmra.mxu3 %v1851_v51  ;;  %1982 = vmatmul.f32.gmra.mxu1 %v1852_v62 }
 0x389   : > { %2047 = vmatmul.f32.gmra.mxu0 %v1853_v55  ;;  %2301 = vmatpush.msrb.mxu1 %v4620_v34  ;;  %v1785_v34 = vmul.f32 %v4690_v61, %v629_v1  ;;  %v4732_v57 = vpop.f32.mrf.mxu0  ;;  %v648_v55 = vld [vmem:[%s5286_s5 + $0xe0] sm:$0xff] }
 0x38a   : > { %5357 = vst [vmem:[#allocation41_spill] sm:$0xff] %v4732_v57 }
 0x38b   : > { %2302 = vmatpush.msrb.mxu1 %v856_v54  ;;  %v634_v54 = vld [vmem:[%s5286_s5 + $0x70] sm:$0xff] }
 0x38d   : > { %v1938_v10 = vpop.f32.mrf.mxu1 }
 0x390   : > { %2067 = vmatmul.f32.vlgmr.msra.gmra.mxu1 %v1779_v43  ;;  %2132 = vmatmul.f32.vlgmr.msra.gmra.mxu3 %v1780_v63  ;;  %v653_v63 = vld [vmem:[%s5286_s5 + $0x108] sm:$0xff] }
 0x391   : > { %2267 = vmatpush.msra.mxu3 %v4384_v25  ;;  %v1784_v25 = vmul.f32 %v4687_v3, %v628_v37  ;;  %v4749_v30 = vpop.f32.mrf.mxu0 }
 0x392   : > { %5358 = vst [vmem:[#allocation42_spill] sm:$0xff] %v4749_v30 }
 0x393   : > { %v1873_v18 = vpop.f32.mrf.mxu3  ;;  %2268 = vmatpush.msra.mxu3 %v4410_v38  ;;  %v633_v38 = vld [vmem:[%s5286_s5 + $0x68] sm:$0xff] }
 0x394   : > { %v4712_v8 = vadd.f32 %v1938_v10, %v1873_v18  ;;  %v1804_v10 = vmul.f32 %v4687_v3, %v648_v55  ;;  %v654_v18 = vld [vmem:[%s5286_s5 + $0x110] sm:$0xff] }
 0x395   : > { %v1941_v50 = vpop.f32.mrf.mxu1  ;;  %2269 = vmatpush.msra.mxu3 %v4415_v26 }
 0x397   : > { %2270 = vmatpush.msra.mxu3 %v4433_v13  ;;  %v1789_v13 = vmul.f32 %v4687_v3, %v633_v38  ;;  %v658_v38 = vld [vmem:[%s5286_s5 + $0x130] sm:$0xff] }
 0x398   : > { %2070 = vmatmul.f32.gmra.mxu1 %v1784_v25  ;;  %2135 = vmatmul.f32.gmra.mxu3 %v1785_v34  ;;  %v1810_v25 = vmul.f32 %v4690_v61, %v654_v18 }
 0x399   : > { %2271 = vmatpush.msra.mxu3 %v4455_v4  ;;  %v1790_v4 = vmul.f32 %v4690_v61, %v634_v54  ;;  %v659_v54 = vld [vmem:[%s5286_s5 + $0x138] sm:$0xff] }
 0x39b   : > { %v1876_v21 = vpop.f32.mrf.mxu3  ;;  %2272 = vmatpush.msra.mxu3 %v4465_v42  ;;  %v638_v42 = vld [vmem:[%s5286_s5 + $0x90] sm:$0xff] }
 0x39c   : > { %v4726_v26 = vadd.f32 %v1941_v50, %v1876_v21  ;;  %v1794_v46 = vmul.f32 %v4687_v3, %v638_v42  ;;  %v1809_v50 = vmul.f32 %v4687_v3, %v653_v63  ;;  %v674_v63 = vld [vmem:[%s5286_s5 + $0x1b0] sm:$0xff] }
 0x39d   : > { %v1944_v53 = vpop.f32.mrf.mxu1  ;;  %2273 = vmatpush.msra.mxu3 %v4483_v45  ;;  %v639_v45 = vld [vmem:[%s5286_s5 + $0x98] sm:$0xff] }
 0x39f   : > { %2274 = vmatpush.msra.mxu3 %v4502_v41 }
 0x3a0   : > { %2073 = vmatmul.f32.gmra.mxu1 %v1789_v13  ;;  %2138 = vmatmul.f32.gmra.mxu3 %v1790_v4  ;;  %v1814_v4 = vmul.f32 %v4687_v3, %v658_v38 }
 0x3a1   : > { %2275 = vmatpush.msra.mxu3 %v4516_v22  ;;  %v1795_v22 = vmul.f32 %v4690_v61, %v639_v45 }
 0x3a3   : > { %v1879_v60 = vpop.f32.mrf.mxu3  ;;  %2276 = vmatpush.msra.mxu3 %v4527_v47  ;;  %v643_v47 = vld [vmem:[%s5286_s5 + $0xb8] sm:$0xff] }
 0x3a4   : > { %v4742_v0 = vadd.f32 %v1944_v53, %v1879_v60  ;;  %v1815_v60 = vmul.f32 %v4690_v61, %v659_v54  ;;  %v678_v54 = vld [vmem:[%s5286_s5 + $0x1d0] sm:$0xff] }
 0x3a5   : > { %v1947_v41 = vpop.f32.mrf.mxu1  ;;  %2277 = vmatpush.msra.mxu3 %v4548_v39  ;;  %v644_v39 = vld [vmem:[%s5286_s5 + $0xc0] sm:$0xff] }
 0x3a6   : > { %v1800_v51 = vmul.f32 %v4690_v61, %v644_v39 }
 0x3a7   : > { %2278 = vmatpush.msra.mxu3 %v4564_v19 }
 0x3a8   : > { %2076 = vmatmul.f32.gmra.mxu1 %v1794_v46  ;;  %2141 = vmatmul.f32.gmra.mxu3 %v1795_v22  ;;  %v664_v46 = vld [vmem:[%s5286_s5 + $0x160] sm:$0xff] }
 0x3a9   : > { %2279 = vmatpush.msra.mxu3 %v4575_v23  ;;  %v1799_v23 = vmul.f32 %v4687_v3, %v643_v47  ;;  %v1820_v39 = vmul.f32 %v4690_v61, %v664_v46 }
 0x3ab   : > { %v1882_v56 = vpop.f32.mrf.mxu3  ;;  %2280 = vmatpush.msra.mxu3 %v4595_v5  ;;  %v649_v5 = vld [vmem:[%s5286_s5 + $0xe8] sm:$0xff] }
 0x3ac   : > { %v4758_v17 = vadd.f32 %v1947_v41, %v1882_v56  ;;  %v663_v41 = vld [vmem:[%s5286_s5 + $0x158] sm:$0xff] }
 0x3ad   : > { %v1950_v19 = vpop.f32.mrf.mxu1  ;;  %2281 = vmatpush.msra.mxu3 %v4613_v35  ;;  %v4772_v35 = vpop.f32.mrf.mxu0  ;;  %v1819_v47 = vmul.f32 %v4687_v3, %v663_v41 }
 0x3ae   : > { %5359 = vst [vmem:[#allocation43_spill] sm:$0xff] %v4772_v35 }
 0x3af   : > { %2282 = vmatpush.msra.mxu3 %v4625_v27  ;;  %v1805_v27 = vmul.f32 %v4690_v61, %v649_v5 }
 0x3b0   : > { %2079 = vmatmul.f32.gmra.mxu1 %v1799_v23  ;;  %2144 = vmatmul.f32.gmra.mxu3 %v1800_v51  ;;  %v668_v51 = vld [vmem:[%s5286_s5 + $0x180] sm:$0xff] }
 0x3b3   : > { %v1885_v62 = vpop.f32.mrf.mxu3 }
 0x3b4   : > { %v4770_v14 = vadd.f32 %v1950_v19, %v1885_v62  ;;  %v669_v62 = vld [vmem:[%s5286_s5 + $0x188] sm:$0xff] }
 0x3b5   : > { %v1953_v59 = vpop.f32.mrf.mxu1  ;;  %v4786_v34 = vpop.f32.mrf.mxu0 }
 0x3b6   : > { %5360 = vst [vmem:[#allocation44_spill] sm:$0xff] %v4786_v34 }
 0x3b8   : > { %2082 = vmatmul.f32.gmra.mxu1 %v1804_v10  ;;  %2147 = vmatmul.f32.gmra.mxu3 %v1805_v27  ;;  %v1825_v10 = vmul.f32 %v4690_v61, %v669_v62 }
 0x3bb   : > { %v1888_v43 = vpop.f32.mrf.mxu3 }
 0x3bc   : > { %v4782_v37 = vadd.f32 %v1953_v59, %v1888_v43  ;;  %v1824_v59 = vmul.f32 %v4687_v3, %v668_v51  ;;  %v673_v43 = vld [vmem:[%s5286_s5 + $0x1a8] sm:$0xff] }
 0x3bd   : > { %v1956_v1 = vpop.f32.mrf.mxu1  ;;  %v4798_v42 = vpop.f32.mrf.mxu0 }
 0x3be   : > { %5361 = vst [vmem:[#allocation45_spill] sm:$0xff] %v4798_v42 }
 0x3c0   : > { %2085 = vmatmul.f32.gmra.mxu1 %v1809_v50  ;;  %2150 = vmatmul.f32.gmra.mxu3 %v1810_v25  ;;  %v1829_v25 = vmul.f32 %v4687_v3, %v673_v43  ;;  %v689_v43 = vld [vmem:[%s5286_s5 + $0x228] sm:$0xff] }
 0x3c3   : > { %v1891_v21 = vpop.f32.mrf.mxu3 }
 0x3c4   : > { %v4794_v53 = vadd.f32 %v1956_v1, %v1891_v21  ;;  %v1830_v21 = vmul.f32 %v4690_v61, %v674_v63 }
 0x3c5   : > { %v1959_v13 = vpop.f32.mrf.mxu1  ;;  %v4810_v19 = vpop.f32.mrf.mxu0 }
 0x3c6   : > { %5362 = vst [vmem:[#allocation46_spill] sm:$0xff] %v4810_v19 }
 0x3c8   : > { %2088 = vmatmul.f32.gmra.mxu1 %v1814_v4  ;;  %2153 = vmatmul.f32.gmra.mxu3 %v1815_v60 }
 0x3cb   : > { %v1894_v45 = vpop.f32.mrf.mxu3 }
 0x3cc   : > { %v4806_v22 = vadd.f32 %v1959_v13, %v1894_v45  ;;  %v679_v13 = vld [vmem:[%s5286_s5 + $0x1d8] sm:$0xff]  ;;  %v1834_v45 = vmul.f32 %v4687_v3, %v678_v54 }
 0x3cd   : > { %v1962_v56 = vpop.f32.mrf.mxu1  ;;  %v4830_v1 = vpop.f32.mrf.mxu0  ;;  %v1835_v41 = vmul.f32 %v4690_v61, %v679_v13  ;;  %v693_v13 = vld [vmem:[%s5286_s5 + $0x248] sm:$0xff] }
 0x3ce   : > { %5363 = vst [vmem:[#allocation47_spill] sm:$0xff] %v4830_v1 }
 0x3d0   : > { %2091 = vmatmul.f32.gmra.mxu1 %v1819_v47  ;;  %2156 = vmatmul.f32.gmra.mxu3 %v1820_v39  ;;  %v683_v47 = vld [vmem:[%s5286_s5 + $0x1f8] sm:$0xff]  ;;  %v684_v39 = vld [vmem:[%s5286_s5 + $0x200] sm:$0xff] }
 0x3d1   : > { %v1839_v62 = vmul.f32 %v4687_v3, %v683_v47 }
 0x3d3   : > { %v1897_v23 = vpop.f32.mrf.mxu3 }
 0x3d4   : > { %v4818_v55 = vadd.f32 %v1962_v56, %v1897_v23 }
 0x3d5   : > { %v1965_v5 = vpop.f32.mrf.mxu1  ;;  %v4844_v46 = vpop.f32.mrf.mxu0 }
 0x3d6   : > { %5364 = vst [vmem:[#allocation48_spill] sm:$0xff] %v4844_v46 }
 0x3d8   : > { %2094 = vmatmul.f32.gmra.mxu1 %v1824_v59  ;;  %2159 = vmatmul.f32.gmra.mxu3 %v1825_v10 }
 0x3db   : > { %v1900_v27 = vpop.f32.mrf.mxu3 }
 0x3dc   : > { %v4828_v18 = vadd.f32 %v1965_v5, %v1900_v27  ;;  %v1840_v5 = vmul.f32 %v4690_v61, %v684_v39  ;;  %v688_v27 = vld [vmem:[%s5286_s5 + $0x220] sm:$0xff] }
 0x3dd   : > { %v1968_v50 = vpop.f32.mrf.mxu1  ;;  %v2003_v59 = vpop.f32.mrf.mxu0 }
 0x3e0   : > { %2097 = vmatmul.f32.gmra.mxu1 %v1829_v25  ;;  %2162 = vmatmul.f32.gmra.mxu3 %v1830_v21  ;;  %v1844_v25 = vmul.f32 %v4687_v3, %v688_v27  ;;  %v1845_v21 = vmul.f32 %v4690_v61, %v689_v43 }
 0x3e3   : > { %v1903_v38 = vpop.f32.mrf.mxu3 }
 0x3e4   : > { %v4840_v4 = vadd.f32 %v1968_v50, %v1903_v38 }
 0x3e5   : > { %v1971_v60 = vpop.f32.mrf.mxu1  ;;  %v2006_v38 = vpop.f32.mrf.mxu0 }
 0x3e8   : > { %2100 = vmatmul.f32.gmra.mxu1 %v1834_v45  ;;  %2165 = vmatmul.f32.gmra.mxu3 %v1835_v41 }
 0x3eb   : > { %v1906_v56 = vpop.f32.mrf.mxu3 }
 0x3ec   : > { %v4852_v23 = vadd.f32 %v1971_v60, %v1906_v56  ;;  %v694_v60 = vld [vmem:[%s5286_s5 + $0x250] sm:$0xff]  ;;  %v1849_v56 = vmul.f32 %v4687_v3, %v693_v13 }
 0x3ed   : > { %v1974_v51 = vpop.f32.mrf.mxu1  ;;  %v1850_v47 = vmul.f32 %v4690_v61, %v694_v60 }
 0x3f0   : > { %2103 = vmatmul.f32.gmra.mxu1 %v1839_v62  ;;  %2168 = vmatmul.f32.gmra.mxu3 %v1840_v5  ;;  %v699_v62 = vld [vmem:[%s5286_s5 + $0x278] sm:$0xff] }
 0x3f3   : > { %v1909_v10 = vpop.f32.mrf.mxu3 }
 0x3f4   : > { %v4862_v63 = vadd.f32 %v1974_v51, %v1909_v10  ;;  %v698_v51 = vld [vmem:[%s5286_s5 + $0x270] sm:$0xff]  ;;  %v2009_v10 = vpop.f32.mrf.mxu0 }
 0x3f5   : > { %v1977_v50 = vpop.f32.mrf.mxu1  ;;  %v1854_v43 = vmul.f32 %v4687_v3, %v698_v51 }
 0x3f8   : > { %2106 = vmatmul.f32.gmra.mxu1 %v1844_v25  ;;  %2171 = vmatmul.f32.gmra.mxu3 %v1845_v21 }
 0x3fb   : > { %v1912_v54 = vpop.f32.mrf.mxu3 }
 0x3fc   : > { %v4872_v45 = vadd.f32 %v1977_v50, %v1912_v54  ;;  %v1855_v50 = vmul.f32 %v4690_v61, %v699_v62  ;;  %v2004_v54 = vadd.f32 %v2003_v59, %v4712_v8  ;;  %v2007_v61 = vadd.f32 %v2006_v38, %v4726_v26 }
 0x3fd   : > { %v1980_v41 = vpop.f32.mrf.mxu1  ;;  %v2010_v8 = vadd.f32 %v2009_v10, %v4742_v0 }
 0x400   : > { %2109 = vmatmul.f32.gmra.mxu1 %v1849_v56  ;;  %2174 = vmatmul.f32.gmra.mxu3 %v1850_v47  ;;  %v2200_v56 = vperm.slane %v4267_v58, 3  ;;  %v2012_v47 = vpop.f32.mrf.mxu0 }
 0x403   : > { %v1915_v39 = vpop.f32.mrf.mxu3 }
 0x404   : > { %v4882_v5 = vadd.f32 %v1980_v41, %v1915_v39  ;;  %v2201_v41 = vperm.slane %v4267_v58, 4 }
 0x405   : > { %v1983_v27 = vpop.f32.mrf.mxu1 }
 0x408   : > { %2112 = vmatmul.f32.gmra.mxu1 %v1854_v43  ;;  %2177 = vmatmul.f32.gmra.mxu3 %v1855_v50 }
 0x40b   : > { %v1918_v25 = vpop.f32.mrf.mxu3 }
 0x40c   : > { %v4886_v21 = vadd.f32 %v1983_v27, %v1918_v25  ;;  %v2015_v27 = vpop.f32.mrf.mxu0 }
 0x40d   : > { %v2068_v13 = vpop.f32.mrf.mxu1  ;;  %v2016_v38 = vadd.f32 %v2015_v27, %v4770_v14 }
 0x40e   : > { %v2069_v60 = vadd.f32 %v2068_v13, %v2004_v54 }
 0x410   : > { %2283 = vmatmul.f32.vlgmr.msra.gmra.mxu3 %v2200_v56  ;;  %2303 = vmatmul.f32.vlgmr.msrb.gmra.mxu1 %v2201_v41  ;;  %v2013_v56 = vadd.f32 %v2012_v47, %v4758_v17 }
 0x413   : > { %v2133_v39 = vpop.f32.mrf.mxu3 }
 0x414   : > { %v4891_v3 = vadd.f32 %v2133_v39, %v2069_v60  ;;  %v2018_v54 = vpop.f32.mrf.mxu0 }
 0x415   : > { %v2071_v51 = vpop.f32.mrf.mxu1  ;;  %v2019_v10 = vadd.f32 %v2018_v54, %v4782_v37 }
 0x416   : > { %v2072_v62 = vadd.f32 %v2071_v51, %v2007_v61 }
 0x41b   : > { %v2136_v43 = vpop.f32.mrf.mxu3 }
 0x41c   : > { %v4894_v50 = vadd.f32 %v2136_v43, %v2072_v62  ;;  %v2021_v61 = vpop.f32.mrf.mxu0 }
 0x41d   : > { %v2074_v59 = vpop.f32.mrf.mxu1  ;;  %v2022_v47 = vadd.f32 %v2021_v61, %v4794_v53 }
 0x41e   : > { %v2075_v25 = vadd.f32 %v2074_v59, %v2010_v8 }
 0x423   : > { %v2139_v58 = vpop.f32.mrf.mxu3 }
 0x424   : > { %v4897_v13 = vadd.f32 %v2139_v58, %v2075_v25  ;;  %v2024_v25 = vpop.f32.mrf.mxu0 }
 0x425   : > { %v2077_v60 = vpop.f32.mrf.mxu1 }
 0x426   : > { %v2078_v41 = vadd.f32 %v2077_v60, %v2013_v56 }
 0x42b   : > { %v2142_v39 = vpop.f32.mrf.mxu3 }
 0x42c   : > { %v4900_v26 = vadd.f32 %v2142_v39, %v2078_v41  ;;  %v2027_v41 = vpop.f32.mrf.mxu0  ;;  %v2025_v39 = vadd.f32 %v2024_v25, %v4806_v22  ;;  %v873_v25 = vld [vmem:[%s5292_s11 + $0x8] sm:$0xf] }
 0x42d   : > { %v2080_v51 = vpop.f32.mrf.mxu1  ;;  %2949 = vmatpush.msk.msra.mxu0 %vm977_vm0, %v873_v25  ;;  %v872_v25 = vld [vmem:[%s5292_s11] sm:$0xff] }
 0x42e   : > { %v2081_v62 = vadd.f32 %v2080_v51, %v2016_v38 }
 0x42f   : > { %2442 = vmatpush.msra.mxu0 %v872_v25 }
 0x430   : > { %2950 = vmatmul.msk.f32.vlgmr.msra.gmra.mxu0 %vm880_vm1, %v3149_v9 }
 0x433   : > { %v2145_v43 = vpop.f32.mrf.mxu3 }
 0x434   : > { %v4903_v0 = vadd.f32 %v2145_v43, %v2081_v62  ;;  %v2030_v62 = vpop.f32.mrf.mxu0  ;;  %v2028_v43 = vadd.f32 %v2027_v41, %v4818_v55 }
 0x435   : > { %v2083_v8 = vpop.f32.mrf.mxu1 }
 0x436   : > { %v2084_v59 = vadd.f32 %v2083_v8, %v2019_v10 }
 0x438   : > { %2951 = vmatmul.msk.f32.gmra.mxu0 %vm880_vm1, %v3156_v12 }
 0x43b   : > { %v2148_v58 = vpop.f32.mrf.mxu3 }
 0x43c   : > { %v4906_v17 = vadd.f32 %v2148_v58, %v2084_v59  ;;  %v2033_v53 = vpop.f32.mrf.mxu0 }
 0x43d   : > { %v2086_v56 = vpop.f32.mrf.mxu1 }
 0x43e   : > { %v2087_v60 = vadd.f32 %v2086_v56, %v2022_v47 }
 0x440   : > { %2952 = vmatmul.msk.f32.gmra.mxu0 %vm880_vm1, %v3164_v16 }
 0x443   : > { %v2151_v14 = vpop.f32.mrf.mxu3 }
 0x444   : > { %v4909_v27 = vadd.f32 %v2151_v14, %v2087_v60  ;;  %v2036_v46 = vpop.f32.mrf.mxu0 }
 0x445   : > { %v2089_v38 = vpop.f32.mrf.mxu1 }
 0x446   : > { %v2090_v51 = vadd.f32 %v2089_v38, %v2025_v39 }
 0x448   : > { %2953 = vmatmul.msk.f32.gmra.mxu0 %vm880_vm1, %v3172_v20 }
 0x44b   : > { %v2154_v37 = vpop.f32.mrf.mxu3 }
 0x44c   : > { %v2155_v54 = vadd.f32 %v2154_v37, %v2090_v51  ;;  %v2039_v1 = vpop.f32.mrf.mxu0 }
 0x44d   : > { %v2092_v10 = vpop.f32.mrf.mxu1  ;;  %v2040_v49 = vadd.f32 %v2039_v1, %v4862_v63 }
 0x44e   : > { %v2093_v8 = vadd.f32 %v2092_v10, %v2028_v43 }
 0x450   : > { %2954 = vmatmul.msk.f32.gmra.mxu0 %vm880_vm1, %v3180_v24 }
 0x453   : > { %v2157_v59 = vpop.f32.mrf.mxu3 }
 0x454   : > { %v2158_v58 = vadd.f32 %v2157_v59, %v2093_v8  ;;  %v2042_v55 = vpop.f32.mrf.mxu0 }
 0x455   : > { %v2095_v61 = vpop.f32.mrf.mxu1  ;;  %v2043_v30 = vadd.f32 %v2042_v55, %v4872_v45  ;;  %v2031_v45 = vadd.f32 %v2030_v62, %v4828_v18  ;;  %v5378_v55 = vld [vmem:[#allocation8_spill] sm:$0xff] }
 0x458   : > { %2955 = vmatmul.msk.f32.gmra.mxu0 %vm880_vm1, %v3188_v28 }
 0x45b   : > { %v2160_v47 = vpop.f32.mrf.mxu3 }
 0x45c   : > { %v2045_v37 = vpop.f32.mrf.mxu0 }
 0x45d   : > { %v2098_v56 = vpop.f32.mrf.mxu1  ;;  %v2046_v42 = vadd.f32 %v2045_v37, %v4882_v5  ;;  %v5379_v37 = vld [vmem:[#allocation46_spill] sm:$0xff] }
 0x460   : > { %2956 = vmatmul.msk.f32.gmra.mxu0 %vm880_vm1, %v3196_v32 }
 0x463   : > { %v2163_v60 = vpop.f32.mrf.mxu3 }
 0x464   : > { %v2048_v8 = vpop.f32.mrf.mxu0 }
 0x465   : > { %v2101_v14 = vpop.f32.mrf.mxu1  ;;  %v2049_v19 = vadd.f32 %v2048_v8, %v4886_v21 }
 0x468   : > { %2957 = vmatmul.msk.f32.gmra.mxu0 %vm880_vm1, %v3204_v36  ;;  %v5365_v36 = vld [vmem:[#allocation39_spill] sm:$0xff] }
 0x46b   : > { %v2166_v22 = vpop.f32.mrf.mxu3 }
 0x46d   : > { %v2104_v39 = vpop.f32.mrf.mxu1 }
 0x46e   : > { %v2105_v5 = vadd.f32 %v2104_v39, %v2040_v49 }
 0x470   : > { %2958 = vmatmul.msk.f32.gmra.mxu0 %vm880_vm1, %v3212_v40  ;;  %v5367_v40 = vld [vmem:[#allocation40_spill] sm:$0xff] }
 0x473   : > { %v2169_v41 = vpop.f32.mrf.mxu3 }
 0x475   : > { %v2107_v38 = vpop.f32.mrf.mxu1 }
 0x476   : > { %v2108_v48 = vadd.f32 %v2107_v38, %v2043_v30 }
 0x478   : > { %2959 = vmatmul.msk.f32.gmra.mxu0 %vm880_vm1, %v3220_v44  ;;  %v5369_v44 = vld [vmem:[#allocation41_spill] sm:$0xff] }
 0x47b   : > { %v2172_v51 = vpop.f32.mrf.mxu3 }
 0x47c   : > { %v2173_v21 = vadd.f32 %v2172_v51, %v2108_v48  ;;  %v3024_v48 = vld [vmem:[%s5285_s4] sm:$0x3] }
 0x47d   : > { %v2110_v43 = vpop.f32.mrf.mxu1 }
 0x47e   : > { %v2111_v57 = vadd.f32 %v2110_v43, %v2046_v42  ;;  %v2170_v42 = vadd.f32 %v2169_v41, %v2105_v5  ;;  %v2224_v41 = vpop.f32.mrf.mxu2 }
 0x483   : > { %v2175_v10 = vpop.f32.mrf.mxu3 }
 0x484   : > { %v2176_v6 = vadd.f32 %v2175_v10, %v2111_v57  ;;  %v5380_v10 = vld [vmem:[#allocation9_spill] sm:$0xff] }
 0x485   : > { %v2113_v59 = vpop.f32.mrf.mxu1 }
 0x486   : > { %v2114_v34 = vadd.f32 %v2113_v59, %v2049_v19  ;;  %v2037_v19 = vadd.f32 %v2036_v46, %v4852_v23  ;;  %v5366_v23 = vld [vmem:[#allocation2_spill] sm:$0xff]  ;;  %v2244_v59 = vpop.f32.mrf.mxu2 }
 0x487   : > { %2960 = vmatmul.msk.f32.gmra.mxu0 %vm880_vm1, %v5366_v23 }
 0x48b   : > { %v2178_v35 = vpop.f32.mrf.mxu3 }
 0x48c   : > { %v2179_v52 = vadd.f32 %v2178_v35, %v2114_v34  ;;  %v2034_v35 = vadd.f32 %v2033_v53, %v4840_v4  ;;  %v2102_v34 = vadd.f32 %v2101_v14, %v2037_v19  ;;  %v5374_v53 = vld [vmem:[#allocation6_spill] sm:$0xff]  ;;  %v5381_v19 = vld [vmem:[#allocation47_spill] sm:$0xff] }
 0x48e   : > { %2308 = vmatpush.msra.mxu2 %v2179_v52  ;;  %v2099_v1 = vadd.f32 %v2098_v56, %v2034_v35  ;;  %v2167_v30 = vadd.f32 %v2166_v22, %v2102_v34  ;;  %v2096_v52 = vadd.f32 %v2095_v61, %v2031_v45  ;;  %v5377_v22 = vld [vmem:[#allocation45_spill] sm:$0xff]  ;;  %v2264_v34 = vpop.f32.mrf.mxu2  ;;  %v2245_v45 = vadd.f32 %v2244_v59, %v2224_v41  ;;  %v5392_v59 = vld [vmem:[#allocation15_spill] sm:$0xff] }
 0x490   : > { %2309 = vmatpush.msra.mxu2 %v2176_v6  ;;  %v2164_v57 = vadd.f32 %v2163_v60, %v2099_v1  ;;  %v2161_v9 = vadd.f32 %v2160_v47, %v2096_v52  ;;  %v4939_v6 = vperm.slane %v3024_v48, 0  ;;  %v5375_v47 = vld [vmem:[#allocation44_spill] sm:$0xff]  ;;  %v5376_v60 = vld [vmem:[#allocation7_spill] sm:$0xff] }
 0x491   : > { %v5383_v52 = vld [vmem:[#allocation48_spill] sm:$0xff]  ;;  %v5384_v48 = vld [vmem:[#allocation11_spill] sm:$0xff] }
 0x492   : > { %2310 = vmatpush.msra.mxu2 %v2173_v21  ;;  %v1002_v12 = vadd.f32 %v4348_v33, %v4939_v6  ;;  %v1005_v49 = vadd.f32 %v4362_v11, %v4939_v6  ;;  %v1008_v33 = vadd.f32 %v4397_v7, %v4939_v6  ;;  %v1011_v4 = vadd.f32 %v4449_v29, %v4939_v6  ;;  %v5382_v21 = vld [vmem:[#allocation10_spill] sm:$0xff] }
 0x493   : > { %v1014_v24 = vadd.f32 %v4510_v2, %v4939_v6  ;;  %v1017_v28 = vadd.f32 %v4583_v15, %v4939_v6  ;;  %v1020_v32 = vadd.f32 %v4643_v31, %v4939_v6  ;;  %v1023_v46 = vadd.f32 %v5365_v36, %v4939_v6  ;;  %v2284_v1 = vpop.f32.mrf.mxu3 }
 0x494   : > { %2311 = vmatpush.msra.mxu2 %v2170_v42  ;;  %v1210_v16 = vmax.f32 %v1002_v12, 0.0  ;;  %v1212_v18 = vmax.f32 %v1005_v49, 0.0  ;;  %v1214_v20 = vmax.f32 %v1008_v33, 0.0  ;;  %v1216_v11 = vmax.f32 %v1011_v4, 0.0  ;;  %v5016_v33 = vld [vmem:[%s5293_s12] ss:$0 sm:$0xff] }
 0x495   : > { %v1218_v7 = vmax.f32 %v1014_v24, 0.0  ;;  %v1220_v29 = vmax.f32 %v1017_v28, 0.0  ;;  %v1222_v2 = vmax.f32 %v1020_v32, 0.0  ;;  %v1224_v15 = vmax.f32 %v1023_v46, 0.0  ;;  %v5387_v46 = vld [vmem:[#allocation25_spill] sm:$0xff] }
 0x496   : > { %2312 = vmatpush.msra.mxu2 %v2167_v30  ;;  %v1026_v63 = vadd.f32 %v5367_v40, %v4939_v6  ;;  %v1038_v56 = vadd.f32 %v5375_v47, %v4939_v6  ;;  %v1041_v39 = vadd.f32 %v5377_v22, %v4939_v6  ;;  %v1044_v43 = vadd.f32 %v5379_v37, %v4939_v6  ;;  %v5388_v40 = vld [vmem:[#allocation13_spill] sm:$0xff]  ;;  %v5390_v47 = vld [vmem:[#allocation14_spill] sm:$0xff]  ;;  %v5391_v37 = vld [vmem:[#allocation27_spill] sm:$0xff] }
 0x497   : > { %v1047_v5 = vadd.f32 %v5381_v19, %v4939_v6  ;;  %v2265_v30 = vadd.f32 %v2264_v34, %v2245_v45  ;;  %v1056_v23 = vadd.f32 %v5387_v46, %v4939_v6  ;;  %v5396_v46 = vld [vmem:[#allocation17_spill] sm:$0xff] }
 0x498   : > { %2313 = vmatpush.msra.mxu2 %v2164_v57  ;;  %v1226_v31 = vmax.f32 %v1026_v63, 0.0  ;;  %v1234_v14 = vmax.f32 %v1038_v56, 0.0  ;;  %v1236_v51 = vmax.f32 %v1041_v39, 0.0  ;;  %v1238_v25 = vmax.f32 %v1044_v43, 0.0 }
 0x499   : > { %v1240_v42 = vmax.f32 %v1047_v5, 0.0  ;;  %v1050_v57 = vadd.f32 %v5383_v52, %v4939_v6  ;;  %v1062_v43 = vadd.f32 %v5391_v37, %v4939_v6 }
 0x49a   : > { %2314 = vmatpush.msra.mxu2 %v2161_v9  ;;  %v2285_v9 = vadd.f32 %v2284_v1, %v2265_v30  ;;  %v5393_v30 = vld [vmem:[#allocation28_spill] sm:$0xff] }
 0x49b   : > { %v1242_v49 = vmax.f32 %v1050_v57, 0.0  ;;  %v1065_v52 = vadd.f32 %v5393_v30, %v4939_v6 }
 0x49c   : > { %2315 = vmatpush.msra.mxu2 %v2158_v58 }
 0x49e   : > { %2316 = vmatpush.msra.mxu2 %v2155_v54  ;;  %v5373_v54 = vld [vmem:[#allocation43_spill] sm:$0xff] }
 0x49f   : > { %v1035_v58 = vadd.f32 %v5373_v54, %v4939_v6 }
 0x4a0   : > { %2317 = vmatpush.msra.mxu2 %v4909_v27  ;;  %v5372_v27 = vld [vmem:[#allocation5_spill] sm:$0xff] }
 0x4a1   : > { %v1232_v61 = vmax.f32 %v1035_v58, 0.0 }
 0x4a2   : > { %2318 = vmatpush.msra.mxu2 %v4906_v17 }
 0x4a4   : > { %2319 = vmatpush.msra.mxu2 %v4903_v0  ;;  %v5371_v0 = vld [vmem:[#allocation42_spill] sm:$0xff] }
 0x4a5   : > { %v1032_v17 = vadd.f32 %v5371_v0, %v4939_v6 }
 0x4a6   : > { %2320 = vmatpush.msra.mxu2 %v4900_v26 }
 0x4a7   : > { %v1230_v62 = vmax.f32 %v1032_v17, 0.0 }
 0x4a8   : > { %2321 = vmatpush.msra.mxu2 %v4897_v13  ;;  %v5370_v13 = vld [vmem:[#allocation4_spill] sm:$0xff] }
 0x4aa   : > { %2322 = vmatpush.msra.mxu2 %v4894_v50  ;;  %v1029_v50 = vadd.f32 %v5369_v44, %v4939_v6  ;;  %v1246_v44 = vmax.f32 %v1056_v23, 0.0 }
 0x4ac   : > { %2323 = vmatpush.msra.mxu2 %v4891_v3  ;;  %v5368_v3 = vld [vmem:[#allocation3_spill] sm:$0xff]  ;;  %v1228_v26 = vmax.f32 %v1029_v50, 0.0 }
 0x4ad   : > { %2324 = vmatmul.f32.vlgmr.msra.gmra.mxu2 %v1210_v16  ;;  %2961 = vmatmul.msk.f32.gmra.mxu0 %vm880_vm1, %v5368_v3  ;;  %v2444_v38 = vpop.f32.mrf.mxu0  ;;  %v2304_v16 = vpop.f32.mrf.mxu1 }
 0x4ae   : > { %v2445_v24 = vadd.f32 %v5016_v33, %v2444_v38 }
 0x4b5   : > { %2327 = vmatmul.f32.gmra.mxu2 %v1212_v18  ;;  %2962 = vmatmul.msk.f32.gmra.mxu0 %vm880_vm1, %v5370_v13  ;;  %v2447_v8 = vpop.f32.mrf.mxu0  ;;  %v2305_v18 = vadd.f32 %v2304_v16, %v2285_v9 }
 0x4bd   : > { %2330 = vmatmul.f32.gmra.mxu2 %v1214_v20  ;;  %2963 = vmatmul.msk.f32.gmra.mxu0 %vm880_vm1, %v5372_v27  ;;  %v2450_v35 = vpop.f32.mrf.mxu0  ;;  %v5385_v20 = vld [vmem:[#allocation24_spill] sm:$0xff] }
 0x4be   : > { %v1053_v4 = vadd.f32 %v5385_v20, %v4939_v6  ;;  %v1252_v20 = vmax.f32 %v1065_v52, 0.0 }
 0x4c5   : > { %2333 = vmatmul.f32.gmra.mxu2 %v1216_v11  ;;  %2964 = vmatmul.msk.f32.gmra.mxu0 %vm880_vm1, %v5374_v53  ;;  %v2453_v12 = vpop.f32.mrf.mxu0  ;;  %v5020_v11 = vperm.slane %v2305_v18, 0 }
 0x4cd   : > { %2336 = vmatmul.f32.gmra.mxu2 %v1218_v7  ;;  %2965 = vmatmul.msk.f32.gmra.mxu0 %vm880_vm1, %v5376_v60  ;;  %v5386_v7 = vld [vmem:[#allocation12_spill] sm:$0xff]  ;;  %v2456_v32 = vpop.f32.mrf.mxu0 }
 0x4ce   : > { %v2457_v9 = vadd.f32 %v5016_v33, %v2456_v32 }
 0x4d5   : > { %2339 = vmatmul.f32.gmra.mxu2 %v1220_v29  ;;  %2966 = vmatmul.msk.f32.gmra.mxu0 %vm880_vm1, %v5378_v55 }
 0x4dd   : > { %2342 = vmatmul.f32.gmra.mxu2 %v1222_v2  ;;  %2967 = vmatmul.msk.f32.gmra.mxu0 %vm880_vm1, %v5380_v10  ;;  %v1244_v2 = vmax.f32 %v1053_v4, 0.0 }
 0x4e5   : > { %2345 = vmatmul.f32.gmra.mxu2 %v1224_v15  ;;  %2968 = vmatmul.msk.f32.gmra.mxu0 %vm880_vm1, %v5382_v21  ;;  %v2448_v15 = vadd.f32 %v5016_v33, %v2447_v8  ;;  %v2454_v8 = vadd.f32 %v5016_v33, %v2453_v12 }
 0x4ed   : > { %2348 = vmatmul.f32.gmra.mxu2 %v1226_v31  ;;  %2969 = vmatmul.msk.f32.gmra.mxu0 %vm880_vm1, %v5384_v48  ;;  %v2459_v31 = vpop.f32.mrf.mxu0  ;;  %v5394_v48 = vld [vmem:[#allocation16_spill] sm:$0xff] }
 0x4f5   : > { %2351 = vmatmul.f32.gmra.mxu2 %v1228_v26  ;;  %2970 = vmatmul.msk.f32.gmra.mxu0 %vm880_vm1, %v5386_v7  ;;  %v2462_v22 = vpop.f32.mrf.mxu0 }
 0x4fd   : > { %2354 = vmatmul.f32.gmra.mxu2 %v1230_v62  ;;  %2971 = vmatmul.msk.f32.gmra.mxu0 %vm880_vm1, %v5388_v40  ;;  %v5389_v62 = vld [vmem:[#allocation26_spill] sm:$0xff]  ;;  %v2465_v21 = vpop.f32.mrf.mxu0 }
 0x4fe   : > { %v1059_v54 = vadd.f32 %v5389_v62, %v4939_v6  ;;  %v5398_v62 = vld [vmem:[#allocation18_spill] sm:$0xff] }
 0x500   : > { %v1248_v39 = vmax.f32 %v1059_v54, 0.0 }
 0x505   : > { %2357 = vmatmul.f32.gmra.mxu2 %v1232_v61  ;;  %v2451_v61 = vadd.f32 %v5016_v33, %v2450_v35  ;;  %2972 = vmatmul.msk.f32.gmra.mxu0 %vm880_vm1, %v5390_v47  ;;  %v1250_v35 = vmax.f32 %v1062_v43, 0.0  ;;  %v2468_v18 = vpop.f32.mrf.mxu0 }
 0x50d   : > { %2360 = vmatmul.f32.gmra.mxu2 %v1234_v14  ;;  %2973 = vmatmul.msk.f32.gmra.mxu0 %vm880_vm1, %v5392_v59 }
 0x515   : > { %2363 = vmatmul.f32.gmra.mxu2 %v1236_v51  ;;  %2974 = vmatmul.msk.f32.gmra.mxu0 %vm880_vm1, %v5394_v48 }
 0x51d   : > { %2366 = vmatmul.f32.gmra.mxu2 %v1238_v25  ;;  %2975 = vmatmul.msk.f32.gmra.mxu0 %vm880_vm1, %v5396_v46 }
 0x525   : > { %2369 = vmatmul.f32.gmra.mxu2 %v1240_v42  ;;  %2976 = vmatmul.msk.f32.gmra.mxu0 %vm880_vm1, %v5398_v62 }
 0x52d   : > { %2372 = vmatmul.f32.gmra.mxu2 %v1242_v49 }
 0x530   : > { %v2325_v28 = vpop.f32.mrf.mxu2 }
 0x531   : > { %v2326_v29 = vadd.f32 %v2325_v28, %v5020_v11 }
 0x533   : > { %v2540_v36 = vadd.f32 %v2445_v24, %v2326_v29  ;;  %v5395_v29 = vld [vmem:[#allocation29_spill] sm:$0xff] }
 0x534   : > { %v1068_v32 = vadd.f32 %v5395_v29, %v4939_v6 }
 0x535   : > { %2572 = vst.msk [vmem:[%s5031_s27] sm:$0xff] %vm880_vm1, %v2540_v36  ;;  %2375 = vmatmul.f32.gmra.mxu2 %v1244_v2  ;;  %v2673_v50 = vmul.f32 %v2540_v36, %v2540_v36  ;;  %v2604_v26 = vsel %vm880_vm1, %v2540_v36, 0.0  ;;  %v2460_v36 = vadd.f32 %v5016_v33, %v2459_v31  ;;  %v5397_v31 = vld [vmem:[#allocation30_spill] sm:$0xff] }
 0x537   : > { %v2705_v58 = vsel %vm880_vm1, %v2673_v50, 0.0 }
 0x538   : > { %v2328_v63 = vpop.f32.mrf.mxu2 }
 0x539   : > { %v2329_v3 = vadd.f32 %v2328_v63, %v5020_v11  ;;  %v2471_v63 = vpop.f32.mrf.mxu0 }
 0x53b   : > { %v2541_v13 = vadd.f32 %v2448_v15, %v2329_v3  ;;  %v1254_v3 = vmax.f32 %v1068_v32, 0.0 }
 0x53d   : > { %2573 = vst.msk [vmem:[%s5031_s27 + $0x8] sm:$0xff] %vm880_vm1, %v2541_v13  ;;  %v2605_v0 = vsel %vm880_vm1, %v2541_v13, 0.0  ;;  %v2674_v17 = vmul.f32 %v2541_v13, %v2541_v13  ;;  %2378 = vmatmul.f32.gmra.mxu2 %v1246_v44 }
 0x53e   : > { %v2606_v27 = vadd.f32 %v2605_v0, %v2604_v26  ;;  %v1071_v0 = vadd.f32 %v5397_v31, %v4939_v6 }
 0x53f   : > { %v2706_v53 = vsel %vm880_vm1, %v2674_v17, 0.0 }
 0x540   : > { %v2707_v56 = vadd.f32 %v2706_v53, %v2705_v58  ;;  %v2331_v60 = vpop.f32.mrf.mxu2  ;;  %v1256_v47 = vmax.f32 %v1071_v0, 0.0 }
 0x541   : > { %v2332_v14 = vadd.f32 %v2331_v60, %v5020_v11 }
 0x543   : > { %v2542_v55 = vadd.f32 %v2451_v61, %v2332_v14  ;;  %v2474_v61 = vpop.f32.mrf.mxu0 }
 0x545   : > { %2574 = vst.msk [vmem:[%s5031_s27 + $0x10] sm:$0xff] %vm880_vm1, %v2542_v55  ;;  %v2607_v41 = vsel %vm880_vm1, %v2542_v55, 0.0  ;;  %v2675_v38 = vmul.f32 %v2542_v55, %v2542_v55  ;;  %2381 = vmatmul.f32.gmra.mxu2 %v1248_v39 }
 0x546   : > { %v2608_v51 = vadd.f32 %v2607_v41, %v2606_v27  ;;  %v2463_v27 = vadd.f32 %v5016_v33, %v2462_v22  ;;  %v5399_v22 = vld [vmem:[#allocation31_spill] sm:$0xff] }
 0x547   : > { %v2708_v10 = vsel %vm880_vm1, %v2675_v38, 0.0  ;;  %v1074_v55 = vadd.f32 %v5399_v22, %v4939_v6  ;;  %v2466_v38 = vadd.f32 %v5016_v33, %v2465_v21  ;;  %v5401_v21 = vld [vmem:[#allocation32_spill] sm:$0xff] }
 0x548   : > { %v2709_v25 = vadd.f32 %v2708_v10, %v2707_v56  ;;  %v2334_v19 = vpop.f32.mrf.mxu2 }
 0x549   : > { %v2335_v5 = vadd.f32 %v2334_v19, %v5020_v11  ;;  %v1258_v59 = vmax.f32 %v1074_v55, 0.0 }
 0x54b   : > { %v2543_v34 = vadd.f32 %v2454_v8, %v2335_v5  ;;  %v2477_v8 = vpop.f32.mrf.mxu0 }
 0x54d   : > { %2575 = vst.msk [vmem:[%s5031_s27 + $0x18] sm:$0xff] %vm880_vm1, %v2543_v34  ;;  %v2609_v42 = vsel %vm880_vm1, %v2543_v34, 0.0  ;;  %v2676_v45 = vmul.f32 %v2543_v34, %v2543_v34  ;;  %2384 = vmatmul.f32.gmra.mxu2 %v1250_v35  ;;  %v1077_v34 = vadd.f32 %v5401_v21, %v4939_v6 }
 0x54e   : > { %v2610_v1 = vadd.f32 %v2609_v42, %v2608_v51  ;;  %v5400_v51 = vld [vmem:[#allocation19_spill] sm:$0xff] }
 0x54f   : > { %v2710_v57 = vsel %vm880_vm1, %v2676_v45, 0.0  ;;  %2977 = vmatmul.msk.f32.gmra.mxu0 %vm880_vm1, %v5400_v51  ;;  %v2469_v45 = vadd.f32 %v5016_v33, %v2468_v18  ;;  %v1260_v48 = vmax.f32 %v1077_v34, 0.0  ;;  %v5403_v18 = vld [vmem:[#allocation33_spill] sm:$0xff] }
 0x550   : > { %v2711_v12 = vadd.f32 %v2710_v57, %v2709_v25  ;;  %v2337_v16 = vpop.f32.mrf.mxu2 }
 0x551   : > { %v2338_v49 = vadd.f32 %v2337_v16, %v5020_v11 }
 0x553   : > { %v2544_v4 = vadd.f32 %v2457_v9, %v2338_v49  ;;  %v2480_v9 = vpop.f32.mrf.mxu0 }
 0x555   : > { %2576 = vst.msk [vmem:[%s5031_s27 + $0x20] sm:$0xff] %vm880_vm1, %v2544_v4  ;;  %v2611_v24 = vsel %vm880_vm1, %v2544_v4, 0.0  ;;  %v2677_v7 = vmul.f32 %v2544_v4, %v2544_v4  ;;  %2387 = vmatmul.f32.gmra.mxu2 %v1252_v20  ;;  %v1080_v4 = vadd.f32 %v5403_v18, %v4939_v6 }
 0x556   : > { %v2612_v28 = vadd.f32 %v2611_v24, %v2610_v1  ;;  %v5402_v1 = vld [vmem:[#allocation23_spill] sm:$0xff] }
 0x557   : > { %v2712_v2 = vsel %vm880_vm1, %v2677_v7, 0.0  ;;  %2978 = vmatmul.msk.f32.gmra.mxu0 %vm880_vm1, %v5402_v1  ;;  %v2472_v7 = vadd.f32 %v5016_v33, %v2471_v63  ;;  %v1262_v46 = vmax.f32 %v1080_v4, 0.0  ;;  %v5405_v63 = vld [vmem:[#allocation34_spill] sm:$0xff] }
 0x558   : > { %v2713_v23 = vadd.f32 %v2712_v2, %v2711_v12  ;;  %v2340_v15 = vpop.f32.mrf.mxu2 }
 0x559   : > { %v2341_v40 = vadd.f32 %v2340_v15, %v5020_v11 }
 0x55b   : > { %v2545_v44 = vadd.f32 %v2460_v36, %v2341_v40  ;;  %v2483_v36 = vpop.f32.mrf.mxu0 }
 0x55d   : > { %2577 = vst.msk [vmem:[%s5031_s27 + $0x28] sm:$0xff] %vm880_vm1, %v2545_v44  ;;  %v2613_v50 = vsel %vm880_vm1, %v2545_v44, 0.0  ;;  %v2678_v13 = vmul.f32 %v2545_v44, %v2545_v44  ;;  %2390 = vmatmul.f32.gmra.mxu2 %v1254_v3  ;;  %v1083_v44 = vadd.f32 %v5405_v63, %v4939_v6 }
 0x55e   : > { %v2614_v26 = vadd.f32 %v2613_v50, %v2612_v28  ;;  %v5404_v28 = vld [vmem:[#allocation22_spill] sm:$0xff] }
 0x55f   : > { %v2714_v17 = vsel %vm880_vm1, %v2678_v13, 0.0  ;;  %2979 = vmatmul.msk.f32.gmra.mxu0 %vm880_vm1, %v5404_v28  ;;  %v2475_v13 = vadd.f32 %v5016_v33, %v2474_v61  ;;  %v1264_v62 = vmax.f32 %v1083_v44, 0.0  ;;  %v5407_v61 = vld [vmem:[#allocation35_spill] sm:$0xff] }
 0x560   : > { %v2715_v54 = vadd.f32 %v2714_v17, %v2713_v23  ;;  %v2343_v58 = vpop.f32.mrf.mxu2 }
 0x561   : > { %v2344_v53 = vadd.f32 %v2343_v58, %v5020_v11 }
 0x563   : > { %v2546_v56 = vadd.f32 %v2463_v27, %v2344_v53  ;;  %v2486_v27 = vpop.f32.mrf.mxu0 }
 0x565   : > { %2578 = vst.msk [vmem:[%s5031_s27 + $0x30] sm:$0xff] %vm880_vm1, %v2546_v56  ;;  %v2615_v60 = vsel %vm880_vm1, %v2546_v56, 0.0  ;;  %v2679_v14 = vmul.f32 %v2546_v56, %v2546_v56  ;;  %2393 = vmatmul.f32.gmra.mxu2 %v1256_v47  ;;  %v1086_v56 = vadd.f32 %v5407_v61, %v4939_v6 }
 0x566   : > { %v2616_v39 = vadd.f32 %v2615_v60, %v2614_v26  ;;  %v5406_v26 = vld [vmem:[#allocation21_spill] sm:$0xff] }
 0x567   : > { %v2716_v41 = vsel %vm880_vm1, %v2679_v14, 0.0  ;;  %2980 = vmatmul.msk.f32.gmra.mxu0 %vm880_vm1, %v5406_v26  ;;  %v2478_v14 = vadd.f32 %v5016_v33, %v2477_v8  ;;  %v1266_v51 = vmax.f32 %v1086_v56, 0.0  ;;  %v5409_v8 = vld [vmem:[#allocation36_spill] sm:$0xff] }
 0x568   : > { %v2717_v37 = vadd.f32 %v2716_v41, %v2715_v54  ;;  %v2346_v43 = vpop.f32.mrf.mxu2 }
 0x569   : > { %v2347_v10 = vadd.f32 %v2346_v43, %v5020_v11 }
 0x56b   : > { %v2547_v25 = vadd.f32 %v2466_v38, %v2347_v10  ;;  %v2489_v38 = vpop.f32.mrf.mxu0 }
 0x56d   : > { %2579 = vst.msk [vmem:[%s5031_s27 + $0x38] sm:$0xff] %vm880_vm1, %v2547_v25  ;;  %v2617_v19 = vsel %vm880_vm1, %v2547_v25, 0.0  ;;  %v2680_v5 = vmul.f32 %v2547_v25, %v2547_v25  ;;  %2396 = vmatmul.f32.gmra.mxu2 %v1258_v59  ;;  %v1089_v25 = vadd.f32 %v5409_v8, %v4939_v6 }
 0x56e   : > { %v2618_v35 = vadd.f32 %v2617_v19, %v2616_v39  ;;  %v5408_v39 = vld [vmem:[#allocation20_spill] sm:$0xff] }
 0x56f   : > { %v2718_v42 = vsel %vm880_vm1, %v2680_v5, 0.0  ;;  %2981 = vmatmul.msk.f32.gmra.mxu0 %vm880_vm1, %v5408_v39  ;;  %v2481_v5 = vadd.f32 %v5016_v33, %v2480_v9 }
 0x570   : > { %v2719_v30 = vadd.f32 %v2718_v42, %v2717_v37  ;;  %v2349_v52 = vpop.f32.mrf.mxu2 }
 0x571   : > { %v2350_v57 = vadd.f32 %v2349_v52, %v5020_v11 }
 0x573   : > { %v2548_v12 = vadd.f32 %v2469_v45, %v2350_v57  ;;  %v2492_v42 = vpop.f32.mrf.mxu0  ;;  %v1268_v45 = vmax.f32 %v1089_v25, 0.0 }
 0x575   : > { %2580 = vst.msk [vmem:[%s5031_s27 + $0x40] sm:$0xff] %vm880_vm1, %v2548_v12  ;;  %v2619_v16 = vsel %vm880_vm1, %v2548_v12, 0.0  ;;  %v2681_v49 = vmul.f32 %v2548_v12, %v2548_v12  ;;  %2399 = vmatmul.f32.gmra.mxu2 %v1260_v48  ;;  %v5410_v48 = vld [vmem:[#allocation37_spill] sm:$0xff] }
 0x576   : > { %v2620_v20 = vadd.f32 %v2619_v16, %v2618_v35  ;;  %v1092_v12 = vadd.f32 %v5410_v48, %v4939_v6  ;;  %v2484_v16 = vadd.f32 %v5016_v33, %v2483_v36 }
 0x577   : > { %v2720_v24 = vsel %vm880_vm1, %v2681_v49, 0.0 }
 0x578   : > { %v2721_v29 = vadd.f32 %v2720_v24, %v2719_v30  ;;  %v2352_v32 = vpop.f32.mrf.mxu2  ;;  %v1270_v24 = vmax.f32 %v1092_v12, 0.0 }
 0x579   : > { %v2353_v2 = vadd.f32 %v2352_v32, %v5020_v11 }
 0x57b   : > { %v2549_v23 = vadd.f32 %v2472_v7, %v2353_v2  ;;  %v2495_v4 = vpop.f32.mrf.mxu0  ;;  %v5411_v2 = vld [vmem:[#allocation38_spill] sm:$0xff] }
 0x57d   : > { %2581 = vst.msk [vmem:[%s5031_s27 + $0x48] sm:$0xff] %vm880_vm1, %v2549_v23  ;;  %v2621_v15 = vsel %vm880_vm1, %v2549_v23, 0.0  ;;  %v2682_v40 = vmul.f32 %v2549_v23, %v2549_v23  ;;  %2402 = vmatmul.f32.gmra.mxu2 %v1262_v46  ;;  %v1095_v46 = vadd.f32 %v5411_v2, %v4939_v6  ;;  %v2487_v23 = vadd.f32 %v5016_v33, %v2486_v27 }
 0x57e   : > { %v2622_v3 = vadd.f32 %v2621_v15, %v2620_v20 }
 0x57f   : > { %v2722_v50 = vsel %vm880_vm1, %v2682_v40, 0.0  ;;  %v1272_v44 = vmax.f32 %v1095_v46, 0.0 }
 0x580   : > { %v2723_v31 = vadd.f32 %v2722_v50, %v2721_v29  ;;  %v2355_v0 = vpop.f32.mrf.mxu2 }
 0x581   : > { %v2356_v17 = vadd.f32 %v2355_v0, %v5020_v11  ;;  %v2490_v0 = vadd.f32 %v5016_v33, %v2489_v38 }
 0x583   : > { %v2550_v54 = vadd.f32 %v2475_v13, %v2356_v17  ;;  %v2498_v63 = vpop.f32.mrf.mxu0 }
 0x585   : > { %2582 = vst.msk [vmem:[%s5031_s27 + $0x50] sm:$0xff] %vm880_vm1, %v2550_v54  ;;  %v2623_v58 = vsel %vm880_vm1, %v2550_v54, 0.0  ;;  %v2683_v53 = vmul.f32 %v2550_v54, %v2550_v54  ;;  %2405 = vmatmul.f32.gmra.mxu2 %v1264_v62 }
 0x586   : > { %v2624_v47 = vadd.f32 %v2623_v58, %v2622_v3 }
 0x587   : > { %v2724_v60 = vsel %vm880_vm1, %v2683_v53, 0.0 }
 0x588   : > { %v2725_v22 = vadd.f32 %v2724_v60, %v2723_v31  ;;  %v2358_v55 = vpop.f32.mrf.mxu2  ;;  %v2493_v60 = vadd.f32 %v5016_v33, %v2492_v42  ;;  %v2499_v42 = vadd.f32 %v5016_v33, %v2498_v63 }
 0x589   : > { %v2359_v41 = vadd.f32 %v2358_v55, %v5020_v11 }
 0x58b   : > { %v2551_v37 = vadd.f32 %v2478_v14, %v2359_v41  ;;  %v2501_v58 = vpop.f32.mrf.mxu0 }
 0x58d   : > { %2583 = vst.msk [vmem:[%s5031_s27 + $0x58] sm:$0xff] %vm880_vm1, %v2551_v37  ;;  %v2625_v43 = vsel %vm880_vm1, %v2551_v37, 0.0  ;;  %v2684_v10 = vmul.f32 %v2551_v37, %v2551_v37  ;;  %2408 = vmatmul.f32.gmra.mxu2 %v1266_v51 }
 0x58e   : > { %v2626_v59 = vadd.f32 %v2625_v43, %v2624_v47 }
 0x58f   : > { %v2726_v19 = vsel %vm880_vm1, %v2684_v10, 0.0  ;;  %v2496_v10 = vadd.f32 %v5016_v33, %v2495_v4 }
 0x590   : > { %v2727_v35 = vadd.f32 %v2726_v19, %v2725_v22  ;;  %v2361_v21 = vpop.f32.mrf.mxu2 }
 0x591   : > { %v2362_v34 = vadd.f32 %v2361_v21, %v5020_v11 }
 0x593   : > { %v2552_v1 = vadd.f32 %v2481_v5, %v2362_v34  ;;  %v2504_v37 = vpop.f32.mrf.mxu0 }
 0x594   : > { %v2505_v46 = vadd.f32 %v5016_v33, %v2504_v37 }
 0x595   : > { %2584 = vst.msk [vmem:[%s5031_s27 + $0x60] sm:$0xff] %vm880_vm1, %v2552_v1  ;;  %v2627_v30 = vsel %vm880_vm1, %v2552_v1, 0.0  ;;  %v2685_v52 = vmul.f32 %v2552_v1, %v2552_v1  ;;  %2411 = vmatmul.f32.gmra.mxu2 %v1268_v45 }
 0x596   : > { %v2628_v57 = vadd.f32 %v2627_v30, %v2626_v59 }
 0x597   : > { %v2728_v9 = vsel %vm880_vm1, %v2685_v52, 0.0 }
 0x598   : > { %v2729_v49 = vadd.f32 %v2728_v9, %v2727_v35  ;;  %v2364_v20 = vpop.f32.mrf.mxu2 }
 0x599   : > { %v2365_v18 = vadd.f32 %v2364_v20, %v5020_v11 }
 0x59b   : > { %v2553_v7 = vadd.f32 %v2484_v16, %v2365_v18  ;;  %v2507_v30 = vpop.f32.mrf.mxu0 }
 0x59d   : > { %2585 = vst.msk [vmem:[%s5031_s27 + $0x68] sm:$0xff] %vm880_vm1, %v2553_v7  ;;  %v2629_v28 = vsel %vm880_vm1, %v2553_v7, 0.0  ;;  %v2686_v29 = vmul.f32 %v2553_v7, %v2553_v7  ;;  %2414 = vmatmul.f32.gmra.mxu2 %v1270_v24 }
 0x59e   : > { %v2630_v32 = vadd.f32 %v2629_v28, %v2628_v57 }
 0x59f   : > { %v2730_v36 = vsel %vm880_vm1, %v2686_v29, 0.0 }
 0x5a0   : > { %v2731_v15 = vadd.f32 %v2730_v36, %v2729_v49  ;;  %v2367_v40 = vpop.f32.mrf.mxu2  ;;  %v2502_v49 = vadd.f32 %v5016_v33, %v2501_v58 }
 0x5a1   : > { %v2368_v3 = vadd.f32 %v2367_v40, %v5020_v11 }
 0x5a3   : > { %v2554_v50 = vadd.f32 %v2487_v23, %v2368_v3  ;;  %v2510_v24 = vpop.f32.mrf.mxu0 }
 0x5a5   : > { %2586 = vst.msk [vmem:[%s5031_s27 + $0x70] sm:$0xff] %vm880_vm1, %v2554_v50  ;;  %v2631_v13 = vsel %vm880_vm1, %v2554_v50, 0.0  ;;  %v2687_v26 = vmul.f32 %v2554_v50, %v2554_v50  ;;  %2417 = vmatmul.f32.gmra.mxu2 %v1272_v44 }
 0x5a6   : > { %v2632_v31 = vadd.f32 %v2631_v13, %v2630_v32 }
 0x5a7   : > { %v2732_v6 = vsel %vm880_vm1, %v2687_v26, 0.0  ;;  %v2508_v26 = vadd.f32 %v5016_v33, %v2507_v30 }
 0x5a8   : > { %v2733_v17 = vadd.f32 %v2732_v6, %v2731_v15  ;;  %v2370_v27 = vpop.f32.mrf.mxu2 }
 0x5a9   : > { %v2371_v62 = vadd.f32 %v2370_v27, %v5020_v11 }
 0x5ab   : > { %v2555_v54 = vadd.f32 %v2490_v0, %v2371_v62  ;;  %v2513_v3 = vpop.f32.mrf.mxu0  ;;  %v2511_v62 = vadd.f32 %v5016_v33, %v2510_v24 }
 0x5ad   : > { %2587 = vst.msk [vmem:[%s5031_s27 + $0x78] sm:$0xff] %vm880_vm1, %v2555_v54  ;;  %v2633_v53 = vsel %vm880_vm1, %v2555_v54, 0.0  ;;  %v2688_v47 = vmul.f32 %v2555_v54, %v2555_v54 }
 0x5ae   : > { %v2634_v61 = vadd.f32 %v2633_v53, %v2632_v31 }
 0x5af   : > { %v2734_v56 = vsel %vm880_vm1, %v2688_v47, 0.0  ;;  %v2514_v47 = vadd.f32 %v5016_v33, %v2513_v3 }
 0x5b0   : > { %v2735_v14 = vadd.f32 %v2734_v56, %v2733_v17  ;;  %v2373_v39 = vpop.f32.mrf.mxu2 }
 0x5b1   : > { %v2374_v22 = vadd.f32 %v2373_v39, %v5020_v11 }
 0x5b3   : > { %v2556_v55 = vadd.f32 %v2493_v60, %v2374_v22  ;;  %v2516_v27 = vpop.f32.mrf.mxu0 }
 0x5b4   : > { %v2517_v39 = vadd.f32 %v5016_v33, %v2516_v27 }
 0x5b5   : > { %2588 = vst.msk [vmem:[%s5031_s27 + $0x80] sm:$0xff] %vm880_vm1, %v2556_v55  ;;  %v2635_v41 = vsel %vm880_vm1, %v2556_v55, 0.0  ;;  %v2689_v38 = vmul.f32 %v2556_v55, %v2556_v55 }
 0x5b6   : > { %v2636_v51 = vadd.f32 %v2635_v41, %v2634_v61 }
 0x5b7   : > { %v2736_v43 = vsel %vm880_vm1, %v2689_v38, 0.0 }
 0x5b8   : > { %v2737_v59 = vadd.f32 %v2736_v43, %v2735_v14  ;;  %v2376_v8 = vpop.f32.mrf.mxu2 }
 0x5b9   : > { %v2377_v25 = vadd.f32 %v2376_v8, %v5020_v11 }
 0x5bb   : > { %v2557_v19 = vadd.f32 %v2496_v10, %v2377_v25  ;;  %v2519_v56 = vpop.f32.mrf.mxu0 }
 0x5bd   : > { %2589 = vst.msk [vmem:[%s5031_s27 + $0x88] sm:$0xff] %vm880_vm1, %v2557_v19  ;;  %v2637_v5 = vsel %vm880_vm1, %v2557_v19, 0.0  ;;  %v2690_v35 = vmul.f32 %v2557_v19, %v2557_v19 }
 0x5be   : > { %v2638_v21 = vadd.f32 %v2637_v5, %v2636_v51  ;;  %v2520_v51 = vadd.f32 %v5016_v33, %v2519_v56 }
 0x5bf   : > { %v2738_v34 = vsel %vm880_vm1, %v2690_v35, 0.0 }
 0x5c0   : > { %v2739_v45 = vadd.f32 %v2738_v34, %v2737_v59  ;;  %v2379_v1 = vpop.f32.mrf.mxu2 }
 0x5c1   : > { %v2380_v52 = vadd.f32 %v2379_v1, %v5020_v11 }
 0x5c3   : > { %v2558_v57 = vadd.f32 %v2499_v42, %v2380_v52  ;;  %v2522_v41 = vpop.f32.mrf.mxu0 }
 0x5c4   : > { %v2523_v8 = vadd.f32 %v5016_v33, %v2522_v41 }
 0x5c5   : > { %2590 = vst.msk [vmem:[%s5031_s27 + $0x90] sm:$0xff] %vm880_vm1, %v2558_v57  ;;  %v2639_v48 = vsel %vm880_vm1, %v2558_v57, 0.0  ;;  %v2691_v12 = vmul.f32 %v2558_v57, %v2558_v57 }
 0x5c6   : > { %v2640_v9 = vadd.f32 %v2639_v48, %v2638_v21 }
 0x5c7   : > { %v2740_v16 = vsel %vm880_vm1, %v2691_v12, 0.0 }
 0x5c8   : > { %v2741_v20 = vadd.f32 %v2740_v16, %v2739_v45  ;;  %v2382_v18 = vpop.f32.mrf.mxu2 }
 0x5c9   : > { %v2383_v4 = vadd.f32 %v2382_v18, %v5020_v11 }
 0x5cb   : > { %v2559_v7 = vadd.f32 %v2502_v49, %v2383_v4 }
 0x5cc   : > { %v2525_v59 = vpop.f32.mrf.mxu0 }
 0x5cd   : > { %2591 = vst.msk [vmem:[%s5031_s27 + $0x98] sm:$0xff] %vm880_vm1, %v2559_v7  ;;  %v2641_v28 = vsel %vm880_vm1, %v2559_v7, 0.0  ;;  %v2692_v29 = vmul.f32 %v2559_v7, %v2559_v7  ;;  %v2526_v21 = vadd.f32 %v5016_v33, %v2525_v59 }
 0x5ce   : > { %v2642_v32 = vadd.f32 %v2641_v28, %v2640_v9 }
 0x5cf   : > { %v2742_v2 = vsel %vm880_vm1, %v2692_v29, 0.0 }
 0x5d0   : > { %v2743_v36 = vadd.f32 %v2742_v2, %v2741_v20  ;;  %v2385_v23 = vpop.f32.mrf.mxu2 }
 0x5d1   : > { %v2386_v15 = vadd.f32 %v2385_v23, %v5020_v11 }
 0x5d3   : > { %v2560_v40 = vadd.f32 %v2505_v46, %v2386_v15 }
 0x5d4   : > { %v2528_v35 = vpop.f32.mrf.mxu0 }
 0x5d5   : > { %2592 = vst.msk [vmem:[%s5031_s27 + $0xa0] sm:$0xff] %vm880_vm1, %v2560_v40  ;;  %v2643_v63 = vsel %vm880_vm1, %v2560_v40, 0.0  ;;  %v2693_v44 = vmul.f32 %v2560_v40, %v2560_v40  ;;  %v2529_v1 = vadd.f32 %v5016_v33, %v2528_v35 }
 0x5d6   : > { %v2644_v50 = vadd.f32 %v2643_v63, %v2642_v32 }
 0x5d7   : > { %v2744_v13 = vsel %vm880_vm1, %v2693_v44, 0.0 }
 0x5d8   : > { %v2745_v31 = vadd.f32 %v2744_v13, %v2743_v36  ;;  %v2388_v6 = vpop.f32.mrf.mxu2 }
 0x5d9   : > { %v2389_v0 = vadd.f32 %v2388_v6, %v5020_v11 }
 0x5db   : > { %v2561_v17 = vadd.f32 %v2508_v26, %v2389_v0 }
 0x5dc   : > { %v2531_v52 = vpop.f32.mrf.mxu0 }
 0x5dd   : > { %2593 = vst.msk [vmem:[%s5031_s27 + $0xa8] sm:$0xff] %vm880_vm1, %v2561_v17  ;;  %v2694_v12 = vmul.f32 %v2561_v17, %v2561_v17  ;;  %v2645_v9 = vsel %vm880_vm1, %v2561_v17, 0.0  ;;  %v2532_v49 = vadd.f32 %v5016_v33, %v2531_v52 }
 0x5de   : > { %v2646_v28 = vadd.f32 %v2645_v9, %v2644_v50 }
 0x5df   : > { %v2746_v18 = vsel %vm880_vm1, %v2694_v12, 0.0 }
 0x5e0   : > { %v2391_v54 = vpop.f32.mrf.mxu2  ;;  %v2747_v23 = vadd.f32 %v2746_v18, %v2745_v31 }
 0x5e1   : > { %v2392_v58 = vadd.f32 %v2391_v54, %v5020_v11 }
 0x5e3   : > { %v2562_v53 = vadd.f32 %v2511_v62, %v2392_v58 }
 0x5e4   : > { %v2534_v29 = vpop.f32.mrf.mxu0 }
 0x5e5   : > { %2594 = vst.msk [vmem:[%s5031_s27 + $0xb0] sm:$0xff] %vm880_vm1, %v2562_v53  ;;  %v2695_v16 = vmul.f32 %v2562_v53, %v2562_v53  ;;  %v2647_v4 = vsel %vm880_vm1, %v2562_v53, 0.0  ;;  %v2535_v0 = vadd.f32 %v5016_v33, %v2534_v29 }
 0x5e6   : > { %v2648_v15 = vadd.f32 %v2647_v4, %v2646_v28 }
 0x5e7   : > { %v2748_v32 = vsel %vm880_vm1, %v2695_v16, 0.0 }
 0x5e8   : > { %v2394_v61 = vpop.f32.mrf.mxu2  ;;  %v2749_v44 = vadd.f32 %v2748_v32, %v2747_v23 }
 0x5e9   : > { %v2395_v60 = vadd.f32 %v2394_v61, %v5020_v11 }
 0x5eb   : > { %v2563_v14 = vadd.f32 %v2514_v47, %v2395_v60 }
 0x5ec   : > { %v2537_v41 = vpop.f32.mrf.mxu0 }
 0x5ed   : > { %2595 = vst.msk [vmem:[%s5031_s27 + $0xb8] sm:$0xff] %vm880_vm1, %v2563_v14  ;;  %v2696_v24 = vmul.f32 %v2563_v14, %v2563_v14  ;;  %v2649_v2 = vsel %vm880_vm1, %v2563_v14, 0.0 }
 0x5ee   : > { %v2650_v13 = vadd.f32 %v2649_v2, %v2648_v15 }
 0x5ef   : > { %v2750_v40 = vsel %vm880_vm1, %v2696_v24, 0.0 }
 0x5f0   : > { %v2397_v22 = vpop.f32.mrf.mxu2  ;;  %v2751_v17 = vadd.f32 %v2750_v40, %v2749_v44 }
 0x5f1   : > { %v2398_v55 = vadd.f32 %v2397_v22, %v5020_v11 }
 0x5f3   : > { %v2564_v38 = vadd.f32 %v2517_v39, %v2398_v55 }
 0x5f5   : > { %2596 = vst.msk [vmem:[%s5031_s27 + $0xc0] sm:$0xff] %vm880_vm1, %v2564_v38  ;;  %v2697_v46 = vmul.f32 %v2564_v38, %v2564_v38  ;;  %v2651_v3 = vsel %vm880_vm1, %v2564_v38, 0.0 }
 0x5f6   : > { %v2652_v27 = vadd.f32 %v2651_v3, %v2650_v13 }
 0x5f7   : > { %v2752_v50 = vsel %vm880_vm1, %v2697_v46, 0.0 }
 0x5f8   : > { %v2400_v37 = vpop.f32.mrf.mxu2  ;;  %v2753_v47 = vadd.f32 %v2752_v50, %v2751_v17 }
 0x5f9   : > { %v2401_v43 = vadd.f32 %v2400_v37, %v5020_v11 }
 0x5fb   : > { %v2565_v10 = vadd.f32 %v2520_v51, %v2401_v43 }
 0x5fd   : > { %2597 = vst.msk [vmem:[%s5031_s27 + $0xc8] sm:$0xff] %vm880_vm1, %v2565_v10  ;;  %v2698_v63 = vmul.f32 %v2565_v10, %v2565_v10  ;;  %v2653_v26 = vsel %vm880_vm1, %v2565_v10, 0.0 }
 0x5fe   : > { %v2654_v61 = vadd.f32 %v2653_v26, %v2652_v27 }
 0x5ff   : > { %v2754_v62 = vsel %vm880_vm1, %v2698_v63, 0.0 }
 0x600   : > { %v2403_v25 = vpop.f32.mrf.mxu2  ;;  %v2755_v22 = vadd.f32 %v2754_v62, %v2753_v47 }
 0x601   : > { %v2404_v19 = vadd.f32 %v2403_v25, %v5020_v11 }
 0x603   : > { %v2566_v5 = vadd.f32 %v2523_v8, %v2404_v19  ;;  %v2538_v19 = vadd.f32 %v5016_v33, %v2537_v41 }
 0x605   : > { %2598 = vst.msk [vmem:[%s5031_s27 + $0xd0] sm:$0xff] %vm880_vm1, %v2566_v5  ;;  %v2699_v6 = vmul.f32 %v2566_v5, %v2566_v5  ;;  %v2655_v54 = vsel %vm880_vm1, %v2566_v5, 0.0 }
 0x606   : > { %v2656_v55 = vadd.f32 %v2655_v54, %v2654_v61 }
 0x607   : > { %v2756_v56 = vsel %vm880_vm1, %v2699_v6, 0.0 }
 0x608   : > { %v2406_v34 = vpop.f32.mrf.mxu2  ;;  %v2757_v43 = vadd.f32 %v2756_v56, %v2755_v22 }
 0x609   : > { %v2407_v42 = vadd.f32 %v2406_v34, %v5020_v11 }
 0x60b   : > { %v2567_v45 = vadd.f32 %v2526_v21, %v2407_v42 }
 0x60d   : > { %2599 = vst.msk [vmem:[%s5031_s27 + $0xd8] sm:$0xff] %vm880_vm1, %v2567_v45  ;;  %v2700_v58 = vmul.f32 %v2567_v45, %v2567_v45  ;;  %v2657_v60 = vsel %vm880_vm1, %v2567_v45, 0.0 }
 0x60e   : > { %v2658_v10 = vadd.f32 %v2657_v60, %v2656_v55 }
 0x60f   : > { %v2758_v38 = vsel %vm880_vm1, %v2700_v58, 0.0 }
 0x610   : > { %v2409_v30 = vpop.f32.mrf.mxu2  ;;  %v2759_v5 = vadd.f32 %v2758_v38, %v2757_v43 }
 0x611   : > { %v2410_v57 = vadd.f32 %v2409_v30, %v5020_v11 }
 0x613   : > { %v2568_v48 = vadd.f32 %v2529_v1, %v2410_v57 }
 0x615   : > { %2600 = vst.msk [vmem:[%s5031_s27 + $0xe0] sm:$0xff] %vm880_vm1, %v2568_v48  ;;  %v2701_v14 = vmul.f32 %v2568_v48, %v2568_v48  ;;  %v2659_v51 = vsel %vm880_vm1, %v2568_v48, 0.0 }
 0x616   : > { %v2660_v35 = vadd.f32 %v2659_v51, %v2658_v10 }
 0x617   : > { %v2760_v59 = vsel %vm880_vm1, %v2701_v14, 0.0 }
 0x618   : > { %v2412_v20 = vpop.f32.mrf.mxu2  ;;  %v2761_v1 = vadd.f32 %v2760_v59, %v2759_v5 }
 0x619   : > { %v2413_v7 = vadd.f32 %v2412_v20, %v5020_v11 }
 0x61b   : > { %v2569_v36 = vadd.f32 %v2532_v49, %v2413_v7 }
 0x61d   : > { %2601 = vst.msk [vmem:[%s5031_s27 + $0xe8] sm:$0xff] %vm880_vm1, %v2569_v36  ;;  %v2702_v37 = vmul.f32 %v2569_v36, %v2569_v36  ;;  %v2661_v8 = vsel %vm880_vm1, %v2569_v36, 0.0 }
 0x61e   : > { %v2662_v30 = vadd.f32 %v2661_v8, %v2660_v35 }
 0x61f   : > { %v2762_v34 = vsel %vm880_vm1, %v2702_v37, 0.0 }
 0x620   : > { %v2415_v31 = vpop.f32.mrf.mxu2  ;;  %v2763_v48 = vadd.f32 %v2762_v34, %v2761_v1 }
 0x621   : > { %v2416_v53 = vadd.f32 %v2415_v31, %v5020_v11 }
 0x623   : > { %v2570_v39 = vadd.f32 %v2535_v0, %v2416_v53 }
 0x625   : > { %2602 = vst.msk [vmem:[%s5031_s27 + $0xf0] sm:$0xff] %vm880_vm1, %v2570_v39  ;;  %v2703_v25 = vmul.f32 %v2570_v39, %v2570_v39  ;;  %v2663_v42 = vsel %vm880_vm1, %v2570_v39, 0.0 }
 0x626   : > { %v2664_v12 = vadd.f32 %v2663_v42, %v2662_v30 }
 0x627   : > { %v2764_v52 = vsel %vm880_vm1, %v2703_v25, 0.0 }
 0x628   : > { %v2418_v21 = vpop.f32.mrf.mxu2  ;;  %v2765_v16 = vadd.f32 %v2764_v52, %v2763_v48 }
 0x629   : > { %v2419_v45 = vadd.f32 %v2418_v21, %v5020_v11 }
 0x62b   : > { %v2571_v57 = vadd.f32 %v2538_v19, %v2419_v45 }
 0x62d   : > { %2603 = vst.msk [vmem:[%s5031_s27 + $0xf8] sm:$0xff] %vm880_vm1, %v2571_v57  ;;  %v2665_v33 = vsel %vm880_vm1, %v2571_v57, 0.0  ;;  %v2704_v9 = vmul.f32 %v2571_v57, %v2571_v57 }
 0x62e   : > { %v2666_v49 = vadd.f32 %v2665_v33, %v2664_v12 }
 0x62f   : > { %v2766_v20 = vsel %vm880_vm1, %v2704_v9, 0.0 }
 0x630   : > { %v2667_v18 = vrot.slane %v2666_v49, 4  ;;  %v2767_v4 = vadd.f32 %v2766_v20, %v2765_v16 }
 0x632   : > { %v2668_v11 = vadd.f32 %v2667_v18, %v2666_v49  ;;  %v2768_v24 = vrot.slane %v2767_v4, 4 }
 0x634   : > { %v2669_v7 = vrot.slane %v2668_v11, 2  ;;  %v2769_v28 = vadd.f32 %v2768_v24, %v2767_v4 }
 0x636   : > { %v2670_v29 = vadd.f32 %v2669_v7, %v2668_v11  ;;  %v2770_v32 = vrot.slane %v2769_v28, 2 }
 0x638   : > { %v2671_v2 = vrot.slane %v2670_v29, 1  ;;  %v2771_v46 = vadd.f32 %v2770_v32, %v2769_v28 }
 0x63a   : > { %v2772_v36 = vrot.slane %v2771_v46, 1  ;;  %v2672_v23 = vadd.f32 %v2671_v2, %v2670_v29 }
 0x63c   : > { %v2773_v15 = vadd.f32 %v2772_v36, %v2771_v46 }
 0x63e   : > { %v2774_v40 = vsel %vm1745_vm2, %v2672_v23, %v2773_v15 }
 0x63f   : > { %2776 = vst.msk [vmem:[%s478_s16] sm:$0x3] %vm2775_vm6, %v2774_v40 }
 0x640 PF: > { %s25_s29 = sadd.s32 1, %s3031_s29  }
 0x641   : > { %p22_p4 = scmp.ge.s32.totalorder %s25_s29, 4  }
 0x643   :  { %24 = sbr.rel (!%p22_p4) target bundleno = 1 (0x1), region = 114 }

// kernel: net2d_forward.5
= control target key start
LH: loop header
LB: loop body
LE: loop exit
PB: predicated region body
PF: predicated region fallthrough
CT: control target
= control target key end

     0   :  { %s3292_s29 = smov 0   ;;  %s5384_s0 = inlined_call_operand.vmem [shape: f32[2,256,12], index: 0, kind: input, shape index: {}]   ;;  %s5385_s1 = inlined_call_operand.vmem [shape: f32[12,12], index: 1, kind: input, shape index: {}]   ;;  %s5386_s2 = inlined_call_operand.vmem [shape: f32[1,12], index: 2, kind: input, shape index: {}]   ;;  %s5387_s3 = inlined_call_operand.vmem [shape: f32[12,256], index: 3, kind: input, shape index: {}]   ;;  %s5388_s4 = inlined_call_operand.vmem [shape: f32[1,256], index: 4, kind: input, shape index: {}]   ;;  %s5389_s5 = inlined_call_operand.vmem [shape: f32[128,640], index: 5, kind: input, shape index: {}]   ;;  %s5390_s6 = inlined_call_operand.vmem [shape: f32[1,640], index: 6, kind: input, shape index: {}]   ;;  %s5391_s7 = inlined_call_operand.vmem [shape: f32[128,640], index: 7, kind: input, shape index: {}]   ;;  %s5392_s8 = inlined_call_operand.vmem [shape: f32[1,640], index: 8, kind: input, shape index: {}]   ;;  %s5393_s9 = inlined_call_operand.vmem [shape: f32[12,640], index: 9, kind: input, shape index: {}]   ;;  %s5394_s10 = inlined_call_operand.vmem [shape: f32[640,12], index: 10, kind: input, shape index: {}]   ;;  %s5395_s11 = inlined_call_operand.vmem [shape: f32[12,12], index: 11, kind: input, shape index: {}]   ;;  %s5396_s12 = inlined_call_operand.vmem [shape: f32[1,12], index: 12, kind: input, shape index: {}]   ;;  %s5397_s13 = inlined_call_operand.vmem [shape: f32[2,256,12], index: 13, kind: output, shape index: {0}]   ;;  %s5398_s14 = inlined_call_operand.vmem [shape: f32[2,2,12], index: 14, kind: output, shape index: {1}]  }
   0x1 LB: > { %s2977_s30 = sadd.s32 4294967295, %s3215_s29   ;;  %p2981_p0 = scmp.ge.s32.totalorder %s3215_s29, 1  ;;  %s3215_s29 = sphi %s3292_s29, %s25_s29  }
   0x2   : > { %p415_p1 = scmp.lt.s32.totalorder %s3215_s29, 3 }
   0x4   : > { %p416_p2 = pnand %p2981_p0, %p415_p1 }
   0x6   : > { %419 = sbr.rel (%p416_p2) target bundleno = 1883 (0x75b), region = 72 }
   0xb   : > { %v512_v0 = vld [vmem:[%s5385_s1 + $0x8] sm:$0xf]  ;;  %vm614_vm0 = vcmask 1043456   ;;  %v511_v1 = vld [vmem:[%s5385_s1] sm:$0xff]  ;;  %p465_p3 = scmp.lt.s32.totalorder %s2977_s30, 1  ;;  %vm517_vm1 = vcmask 97280  }
   0xc   : > { %2987 = vmatpush.msk.msra.mxu0 %vm614_vm0, %v512_v0  ;;  %v733_v14 = vld [vmem:[%s5387_s3 + $0x10] sm:$0xf]  ;;  %v734_v15 = vld [vmem:[%s5387_s3 + $0x18] sm:$0xf]  ;;  %v731_v17 = vld [vmem:[%s5387_s3] sm:$0xff]  ;;  %vm1859_vm2 = vcmask 1040384  }
   0xd   : > { %s5463_s30 = smov (!%p465_p3, %s2977_s30), 1  ;;  %3020 = vmatpush.msk.msra.mxu1 %vm614_vm0, %v733_v14  ;;  %3053 = vmatpush.msk.msra.mxu2 %vm614_vm0, %v734_v15  ;;  %v732_v18 = vld [vmem:[%s5387_s3 + $0x8] sm:$0xff]  ;;  %v3366_v22 = vld [vmem:[%s5386_s2] ss:$0 sm:$0xff]  ;;  %vm1861_vm3 = vcmask 1041408   ;;  %vm1863_vm4 = vcmask 1043459  }
   0xe   : > { %633 = vmatpush.msra.mxu0 %v511_v1  ;;  %s3131_s19 = sshll.u32 %s5463_s30, 8  ;;  %vm1865_vm5 = vcmask 1042432   ;;  %vm2889_vm6 = vcmask 91136  }
   0xf   : > { %s3315_s22 = scalar_lea.vmem %s5384_s0, %s3131_s19  ;;  %1113 = vmatpush.msra.mxu1 %v731_v17  ;;  %1226 = vmatpush.msra.mxu2 %v732_v18  ;;  %s5126_s17 = scalar_lea.vmem %s5397_s13, %s3131_s19 }
  0x10   : > { %v479_v2 = vld [vmem:[%s3315_s22] sm:$0xff]  ;;  %v480_v3 = vld [vmem:[%s3315_s22 + $0x8] sm:$0xff]  ;;  %v481_v4 = vld [vmem:[%s3315_s22 + $0x10] sm:$0xff]  ;;  %s2986_s19 = sshll.u32 %s5463_s30, 1 }
  0x11   : > { %2988 = vmatmul.msk.f32.vlgmr.msra.gmra.mxu0 %vm517_vm1, %v479_v2  ;;  %v482_v5 = vld [vmem:[%s3315_s22 + $0x18] sm:$0xff]  ;;  %v483_v6 = vld [vmem:[%s3315_s22 + $0x20] sm:$0xff]  ;;  %v484_v7 = vld [vmem:[%s3315_s22 + $0x28] sm:$0xff]  ;;  %s478_s21 = scalar_lea.vmem %s5398_s14, %s2986_s19 }
  0x12   : > { %v485_v8 = vld [vmem:[%s3315_s22 + $0x30] sm:$0xff]  ;;  %v486_v9 = vld [vmem:[%s3315_s22 + $0x38] sm:$0xff]  ;;  %v487_v10 = vld [vmem:[%s3315_s22 + $0x40] sm:$0xff] }
  0x13   : > { %v488_v11 = vld [vmem:[%s3315_s22 + $0x48] sm:$0xff]  ;;  %v489_v12 = vld [vmem:[%s3315_s22 + $0x50] sm:$0xff]  ;;  %v490_v13 = vld [vmem:[%s3315_s22 + $0x58] sm:$0xff] }
  0x14   : > { %v491_v16 = vld [vmem:[%s3315_s22 + $0x60] sm:$0xff]  ;;  %v492_v19 = vld [vmem:[%s3315_s22 + $0x68] sm:$0xff]  ;;  %v493_v20 = vld [vmem:[%s3315_s22 + $0x70] sm:$0xff] }
  0x15   : > { %v494_v21 = vld [vmem:[%s3315_s22 + $0x78] sm:$0xff]  ;;  %v495_v24 = vld [vmem:[%s3315_s22 + $0x80] sm:$0xff]  ;;  %v496_v27 = vld [vmem:[%s3315_s22 + $0x88] sm:$0xff] }
  0x16   : > { %v497_v30 = vld [vmem:[%s3315_s22 + $0x90] sm:$0xff]  ;;  %v498_v33 = vld [vmem:[%s3315_s22 + $0x98] sm:$0xff]  ;;  %v499_v36 = vld [vmem:[%s3315_s22 + $0xa0] sm:$0xff] }
  0x17   : > { %v500_v39 = vld [vmem:[%s3315_s22 + $0xa8] sm:$0xff]  ;;  %v501_v42 = vld [vmem:[%s3315_s22 + $0xb0] sm:$0xff]  ;;  %v502_v45 = vld [vmem:[%s3315_s22 + $0xb8] sm:$0xff] }
  0x18   : > { %v503_v48 = vld [vmem:[%s3315_s22 + $0xc0] sm:$0xff]  ;;  %v504_v51 = vld [vmem:[%s3315_s22 + $0xc8] sm:$0xff]  ;;  %v505_v54 = vld [vmem:[%s3315_s22 + $0xd0] sm:$0xff] }
  0x19   : > { %2989 = vmatmul.msk.f32.gmra.mxu0 %vm517_vm1, %v480_v3  ;;  %v506_v57 = vld [vmem:[%s3315_s22 + $0xd8] sm:$0xff]  ;;  %v507_v60 = vld [vmem:[%s3315_s22 + $0xe0] sm:$0xff]  ;;  %v508_v63 = vld [vmem:[%s3315_s22 + $0xe8] sm:$0xff] }
  0x1a   : > { %v509_v2 = vld [vmem:[%s3315_s22 + $0xf0] sm:$0xff] }
  0x21   : > { %2990 = vmatmul.msk.f32.gmra.mxu0 %vm517_vm1, %v481_v4 }
  0x29   : > { %2991 = vmatmul.msk.f32.gmra.mxu0 %vm517_vm1, %v482_v5  ;;  %v510_v5 = vld [vmem:[%s3315_s22 + $0xf8] sm:$0xff] }
  0x31   : > { %2992 = vmatmul.msk.f32.gmra.mxu0 %vm517_vm1, %v483_v6 }
  0x39   : > { %2993 = vmatmul.msk.f32.gmra.mxu0 %vm517_vm1, %v484_v7 }
  0x41   : > { %2994 = vmatmul.msk.f32.gmra.mxu0 %vm517_vm1, %v485_v8 }
  0x49   : > { %2995 = vmatmul.msk.f32.gmra.mxu0 %vm517_vm1, %v486_v9 }
  0x51   : > { %2996 = vmatmul.msk.f32.gmra.mxu0 %vm517_vm1, %v487_v10 }
  0x59   : > { %2997 = vmatmul.msk.f32.gmra.mxu0 %vm517_vm1, %v488_v11 }
  0x61   : > { %2998 = vmatmul.msk.f32.gmra.mxu0 %vm517_vm1, %v489_v12 }
  0x69   : > { %2999 = vmatmul.msk.f32.gmra.mxu0 %vm517_vm1, %v490_v13 }
  0x71   : > { %3000 = vmatmul.msk.f32.gmra.mxu0 %vm517_vm1, %v491_v16 }
  0x79   : > { %3001 = vmatmul.msk.f32.gmra.mxu0 %vm517_vm1, %v492_v19 }
  0x81   : > { %3002 = vmatmul.msk.f32.gmra.mxu0 %vm517_vm1, %v493_v20 }
  0x89   : > { %3003 = vmatmul.msk.f32.gmra.mxu0 %vm517_vm1, %v494_v21 }
  0x8e   : > { %v635_v23 = vpop.f32.mrf.mxu0 }
  0x8f   : > { %v3370_v25 = vadd.f32 %v3366_v22, %v635_v23 }
  0x91   : > { %3004 = vmatmul.msk.f32.gmra.mxu0 %vm517_vm1, %v495_v24  ;;  %3021 = vmatmul.msk.f32.vlgmr.msra.gmra.mxu1 %vm517_vm1, %v3370_v25 }
  0x92   : > { %3054 = vmatmul.msk.f32.vlgmr.msra.gmra.mxu2 %vm517_vm1, %v3370_v25 }
  0x96   : > { %v638_v26 = vpop.f32.mrf.mxu0 }
  0x97   : > { %v3379_v28 = vadd.f32 %v3366_v22, %v638_v26 }
  0x99   : > { %3005 = vmatmul.msk.f32.gmra.mxu0 %vm517_vm1, %v496_v27  ;;  %3022 = vmatmul.msk.f32.gmra.mxu1 %vm517_vm1, %v3379_v28 }
  0x9a   : > { %3055 = vmatmul.msk.f32.gmra.mxu2 %vm517_vm1, %v3379_v28 }
  0x9e   : > { %v641_v29 = vpop.f32.mrf.mxu0 }
  0x9f   : > { %v3388_v31 = vadd.f32 %v3366_v22, %v641_v29 }
  0xa1   : > { %3006 = vmatmul.msk.f32.gmra.mxu0 %vm517_vm1, %v497_v30  ;;  %3023 = vmatmul.msk.f32.gmra.mxu1 %vm517_vm1, %v3388_v31 }
  0xa2   : > { %3056 = vmatmul.msk.f32.gmra.mxu2 %vm517_vm1, %v3388_v31 }
  0xa6   : > { %v644_v32 = vpop.f32.mrf.mxu0 }
  0xa7   : > { %v3397_v34 = vadd.f32 %v3366_v22, %v644_v32 }
  0xa9   : > { %3007 = vmatmul.msk.f32.gmra.mxu0 %vm517_vm1, %v498_v33  ;;  %3024 = vmatmul.msk.f32.gmra.mxu1 %vm517_vm1, %v3397_v34 }
  0xaa   : > { %3057 = vmatmul.msk.f32.gmra.mxu2 %vm517_vm1, %v3397_v34 }
  0xae   : > { %v647_v35 = vpop.f32.mrf.mxu0 }
  0xaf   : > { %v3406_v37 = vadd.f32 %v3366_v22, %v647_v35 }
  0xb1   : > { %3008 = vmatmul.msk.f32.gmra.mxu0 %vm517_vm1, %v499_v36  ;;  %3025 = vmatmul.msk.f32.gmra.mxu1 %vm517_vm1, %v3406_v37 }
  0xb2   : > { %3058 = vmatmul.msk.f32.gmra.mxu2 %vm517_vm1, %v3406_v37 }
  0xb6   : > { %v650_v38 = vpop.f32.mrf.mxu0 }
  0xb7   : > { %v3415_v40 = vadd.f32 %v3366_v22, %v650_v38 }
  0xb9   : > { %3009 = vmatmul.msk.f32.gmra.mxu0 %vm517_vm1, %v500_v39  ;;  %3026 = vmatmul.msk.f32.gmra.mxu1 %vm517_vm1, %v3415_v40 }
  0xba   : > { %3059 = vmatmul.msk.f32.gmra.mxu2 %vm517_vm1, %v3415_v40 }
  0xbe   : > { %v653_v41 = vpop.f32.mrf.mxu0 }
  0xbf   : > { %v3424_v43 = vadd.f32 %v3366_v22, %v653_v41 }
  0xc1   : > { %3010 = vmatmul.msk.f32.gmra.mxu0 %vm517_vm1, %v501_v42  ;;  %3027 = vmatmul.msk.f32.gmra.mxu1 %vm517_vm1, %v3424_v43 }
  0xc2   : > { %3060 = vmatmul.msk.f32.gmra.mxu2 %vm517_vm1, %v3424_v43 }
  0xc6   : > { %v656_v44 = vpop.f32.mrf.mxu0 }
  0xc7   : > { %v3433_v46 = vadd.f32 %v3366_v22, %v656_v44 }
  0xc9   : > { %3011 = vmatmul.msk.f32.gmra.mxu0 %vm517_vm1, %v502_v45  ;;  %3028 = vmatmul.msk.f32.gmra.mxu1 %vm517_vm1, %v3433_v46 }
  0xca   : > { %3061 = vmatmul.msk.f32.gmra.mxu2 %vm517_vm1, %v3433_v46 }
  0xce   : > { %v659_v47 = vpop.f32.mrf.mxu0 }
  0xcf   : > { %v3442_v49 = vadd.f32 %v3366_v22, %v659_v47 }
  0xd1   : > { %3012 = vmatmul.msk.f32.gmra.mxu0 %vm517_vm1, %v503_v48  ;;  %3029 = vmatmul.msk.f32.gmra.mxu1 %vm517_vm1, %v3442_v49  ;;  %v1614_v48 = vsel %vm517_vm1, %v3379_v28, 0.0 }
  0xd2   : > { %3062 = vmatmul.msk.f32.gmra.mxu2 %vm517_vm1, %v3442_v49 }
  0xd6   : > { %v662_v50 = vpop.f32.mrf.mxu0 }
  0xd7   : > { %v3451_v52 = vadd.f32 %v3366_v22, %v662_v50  ;;  %v1613_v50 = vsel %vm517_vm1, %v3370_v25, 0.0 }
  0xd9   : > { %3013 = vmatmul.msk.f32.gmra.mxu0 %vm517_vm1, %v504_v51  ;;  %3030 = vmatmul.msk.f32.gmra.mxu1 %vm517_vm1, %v3451_v52  ;;  %v1616_v51 = vsel %vm517_vm1, %v3388_v31, 0.0 }
  0xda   : > { %3063 = vmatmul.msk.f32.gmra.mxu2 %vm517_vm1, %v3451_v52 }
  0xde   : > { %v665_v53 = vpop.f32.mrf.mxu0 }
  0xdf   : > { %v3460_v55 = vadd.f32 %v3366_v22, %v665_v53 }
  0xe1   : > { %3014 = vmatmul.msk.f32.gmra.mxu0 %vm517_vm1, %v505_v54  ;;  %3031 = vmatmul.msk.f32.gmra.mxu1 %vm517_vm1, %v3460_v55 }
  0xe2   : > { %3064 = vmatmul.msk.f32.gmra.mxu2 %vm517_vm1, %v3460_v55 }
  0xe6   : > { %v668_v56 = vpop.f32.mrf.mxu0 }
  0xe7   : > { %v3469_v58 = vadd.f32 %v3366_v22, %v668_v56  ;;  %v1615_v56 = vadd.f32 %v1614_v48, %v1613_v50 }
  0xe9   : > { %3015 = vmatmul.msk.f32.gmra.mxu0 %vm517_vm1, %v506_v57  ;;  %3032 = vmatmul.msk.f32.gmra.mxu1 %vm517_vm1, %v3469_v58  ;;  %v1634_v50 = vsel %vm517_vm1, %v3469_v58, 0.0 }
  0xea   : > { %3065 = vmatmul.msk.f32.gmra.mxu2 %vm517_vm1, %v3469_v58 }
  0xee   : > { %v671_v59 = vpop.f32.mrf.mxu0 }
  0xef   : > { %v3478_v61 = vadd.f32 %v3366_v22, %v671_v59  ;;  %v1618_v59 = vsel %vm517_vm1, %v3397_v34, 0.0 }
  0xf1   : > { %3016 = vmatmul.msk.f32.gmra.mxu0 %vm517_vm1, %v507_v60  ;;  %3033 = vmatmul.msk.f32.gmra.mxu1 %vm517_vm1, %v3478_v61 }
  0xf2   : > { %3066 = vmatmul.msk.f32.gmra.mxu2 %vm517_vm1, %v3478_v61 }
  0xf6   : > { %v674_v62 = vpop.f32.mrf.mxu0 }
  0xf7   : > { %v3487_v0 = vadd.f32 %v3366_v22, %v674_v62  ;;  %v1617_v62 = vadd.f32 %v1616_v51, %v1615_v56 }
  0xf9   : > { %3017 = vmatmul.msk.f32.gmra.mxu0 %vm517_vm1, %v508_v63  ;;  %3034 = vmatmul.msk.f32.gmra.mxu1 %vm517_vm1, %v3487_v0  ;;  %v1620_v63 = vsel %vm517_vm1, %v3406_v37, 0.0 }
  0xfa   : > { %3067 = vmatmul.msk.f32.gmra.mxu2 %vm517_vm1, %v3487_v0 }
  0xfe   : > { %v677_v1 = vpop.f32.mrf.mxu0 }
  0xff   : > { %v3496_v3 = vadd.f32 %v3366_v22, %v677_v1 }
 0x101   : > { %3018 = vmatmul.msk.f32.gmra.mxu0 %vm517_vm1, %v509_v2  ;;  %3035 = vmatmul.msk.f32.gmra.mxu1 %vm517_vm1, %v3496_v3  ;;  %v1619_v2 = vadd.f32 %v1618_v59, %v1617_v62 }
 0x102   : > { %3068 = vmatmul.msk.f32.gmra.mxu2 %vm517_vm1, %v3496_v3 }
 0x106   : > { %v680_v4 = vpop.f32.mrf.mxu0 }
 0x107   : > { %v3505_v6 = vadd.f32 %v3366_v22, %v680_v4  ;;  %v1622_v4 = vsel %vm517_vm1, %v3415_v40, 0.0 }
 0x109   : > { %3019 = vmatmul.msk.f32.gmra.mxu0 %vm517_vm1, %v510_v5  ;;  %3036 = vmatmul.msk.f32.gmra.mxu1 %vm517_vm1, %v3505_v6  ;;  %v1621_v5 = vadd.f32 %v1620_v63, %v1619_v2 }
 0x10a   : > { %3069 = vmatmul.msk.f32.gmra.mxu2 %vm517_vm1, %v3505_v6 }
 0x10e   : > { %v683_v7 = vpop.f32.mrf.mxu0  ;;  %v3587_v41 = vpop.f32.mrf.mxu1 }
 0x10f   : > { %v3513_v8 = vadd.f32 %v3366_v22, %v683_v7  ;;  %5412 = vst [vmem:[#allocation4_spill] sm:$0xff] %v3587_v41  ;;  %v1624_v7 = vsel %vm517_vm1, %v3424_v43, 0.0 }
 0x111   : > { %3037 = vmatmul.msk.f32.gmra.mxu1 %vm517_vm1, %v3513_v8  ;;  %v3163_v9 = vpack.i.bf16 %v3513_v8, %v3370_v25 }
 0x112   : > { %3070 = vmatmul.msk.f32.gmra.mxu2 %vm517_vm1, %v3513_v8 }
 0x113   : > { %3164 = vxpose.xlu0.b32.start [1/16] (narrow) %v3163_v9, 16 }
 0x115   : > { %v3521_v10 = vpop.f32.mrf.mxu2 }
 0x116   : > { %v686_v11 = vpop.f32.mrf.mxu0  ;;  %v3606_v53 = vpop.f32.mrf.mxu1 }
 0x117   : > { %v3524_v12 = vadd.f32 %v3366_v22, %v686_v11  ;;  %5414 = vst [vmem:[#allocation6_spill] sm:$0xff] %v3606_v53  ;;  %v1623_v11 = vadd.f32 %v1622_v4, %v1621_v5  ;;  %v1640_v4 = vsel %vm517_vm1, %v3496_v3, 0.0 }
 0x119   : > { %3038 = vmatmul.msk.f32.gmra.mxu1 %vm517_vm1, %v3524_v12  ;;  %v3165_v13 = vpack.i.bf16 %v3524_v12, %v3379_v28 }
 0x11a   : > { %3071 = vmatmul.msk.f32.gmra.mxu2 %vm517_vm1, %v3524_v12 }
 0x11b   : > { %3166 = vxpose.xlu0.b32.cont [2/16] (narrow) %v3165_v13, 16 }
 0x11d   : > { %v3532_v14 = vpop.f32.mrf.mxu2 }
 0x11e   : > { %v689_v15 = vpop.f32.mrf.mxu0 }
 0x11f   : > { %v3535_v16 = vadd.f32 %v3366_v22, %v689_v15  ;;  %v1626_v15 = vsel %vm517_vm1, %v3433_v46, 0.0 }
 0x121   : > { %3039 = vmatmul.msk.f32.gmra.mxu1 %vm517_vm1, %v3535_v16  ;;  %v3167_v17 = vpack.i.bf16 %v3535_v16, %v3388_v31 }
 0x122   : > { %3072 = vmatmul.msk.f32.gmra.mxu2 %vm517_vm1, %v3535_v16 }
 0x123   : > { %3168 = vxpose.xlu0.b32.cont [3/16] (narrow) %v3167_v17, 16  ;;  %v3631_v17 = vpop.f32.mrf.mxu1 }
 0x124   : > { %5416 = vst [vmem:[#allocation8_spill] sm:$0xff] %v3631_v17 }
 0x125   : > { %v3543_v18 = vpop.f32.mrf.mxu2 }
 0x126   : > { %v692_v19 = vpop.f32.mrf.mxu0 }
 0x127   : > { %v3546_v20 = vadd.f32 %v3366_v22, %v692_v19 }
 0x129   : > { %3040 = vmatmul.msk.f32.gmra.mxu1 %vm517_vm1, %v3546_v20  ;;  %v3169_v21 = vpack.i.bf16 %v3546_v20, %v3397_v34 }
 0x12a   : > { %3073 = vmatmul.msk.f32.gmra.mxu2 %vm517_vm1, %v3546_v20 }
 0x12b   : > { %3170 = vxpose.xlu0.b32.cont [4/16] (narrow) %v3169_v21, 16  ;;  %v1625_v21 = vadd.f32 %v1624_v7, %v1623_v11  ;;  %v3657_v59 = vpop.f32.mrf.mxu1 }
 0x12c   : > { %5419 = vst [vmem:[#allocation11_spill] sm:$0xff] %v3657_v59 }
 0x12d   : > { %v3554_v23 = vpop.f32.mrf.mxu2 }
 0x12e   : > { %v695_v24 = vpop.f32.mrf.mxu0 }
 0x12f   : > { %v3557_v26 = vadd.f32 %v3366_v22, %v695_v24  ;;  %v1628_v24 = vsel %vm517_vm1, %v3442_v49, 0.0 }
 0x131   : > { %3041 = vmatmul.msk.f32.gmra.mxu1 %vm517_vm1, %v3557_v26  ;;  %v3171_v27 = vpack.i.bf16 %v3557_v26, %v3406_v37 }
 0x132   : > { %3074 = vmatmul.msk.f32.gmra.mxu2 %vm517_vm1, %v3557_v26 }
 0x133   : > { %3172 = vxpose.xlu0.b32.cont [5/16] (narrow) %v3171_v27, 16 }
 0x135   : > { %v3565_v29 = vpop.f32.mrf.mxu2 }
 0x136   : > { %v698_v30 = vpop.f32.mrf.mxu0 }
 0x137   : > { %v3568_v32 = vadd.f32 %v3366_v22, %v698_v30  ;;  %v1627_v30 = vadd.f32 %v1626_v15, %v1625_v21 }
 0x139   : > { %5410 = vst [vmem:[#allocation2_spill] sm:$0xff] %v3568_v32  ;;  %3042 = vmatmul.msk.f32.gmra.mxu1 %vm517_vm1, %v3568_v32  ;;  %v3173_v33 = vpack.i.bf16 %v3568_v32, %v3415_v40 }
 0x13a   : > { %3075 = vmatmul.msk.f32.gmra.mxu2 %vm517_vm1, %v3568_v32 }
 0x13b   : > { %3174 = vxpose.xlu0.b32.cont [6/16] (narrow) %v3173_v33, 16  ;;  %v1630_v33 = vsel %vm517_vm1, %v3451_v52, 0.0 }
 0x13d   : > { %v3576_v35 = vpop.f32.mrf.mxu2 }
 0x13e   : > { %v701_v36 = vpop.f32.mrf.mxu0 }
 0x13f   : > { %v3579_v38 = vadd.f32 %v3366_v22, %v701_v36  ;;  %v1629_v36 = vadd.f32 %v1628_v24, %v1627_v30  ;;  %v1644_v24 = vsel %vm517_vm1, %v3513_v8, 0.0 }
 0x141   : > { %5411 = vst [vmem:[#allocation3_spill] sm:$0xff] %v3579_v38  ;;  %3043 = vmatmul.msk.f32.gmra.mxu1 %vm517_vm1, %v3579_v38  ;;  %v3175_v39 = vpack.i.bf16 %v3579_v38, %v3424_v43 }
 0x142   : > { %3076 = vmatmul.msk.f32.gmra.mxu2 %vm517_vm1, %v3579_v38 }
 0x143   : > { %3176 = vxpose.xlu0.b32.cont [7/16] (narrow) %v3175_v39, 16  ;;  %v1632_v39 = vsel %vm517_vm1, %v3460_v55, 0.0 }
 0x145   : > { %v3589_v42 = vpop.f32.mrf.mxu2 }
 0x146   : > { %v704_v44 = vpop.f32.mrf.mxu0 }
 0x147   : > { %v3592_v45 = vadd.f32 %v3366_v22, %v704_v44 }
 0x149   : > { %5413 = vst [vmem:[#allocation5_spill] sm:$0xff] %v3592_v45  ;;  %3044 = vmatmul.msk.f32.gmra.mxu1 %vm517_vm1, %v3592_v45  ;;  %v3177_v47 = vpack.i.bf16 %v3592_v45, %v3433_v46 }
 0x14a   : > { %3077 = vmatmul.msk.f32.gmra.mxu2 %vm517_vm1, %v3592_v45 }
 0x14b   : > { %3178 = vxpose.xlu0.b32.cont [8/16] (narrow) %v3177_v47, 16  ;;  %v1631_v47 = vadd.f32 %v1630_v33, %v1629_v36  ;;  %v1646_v33 = vsel %vm517_vm1, %v3524_v12, 0.0  ;;  %v3686_v36 = vpop.f32.mrf.mxu1 }
 0x14c   : > { %5421 = vst [vmem:[#allocation13_spill] sm:$0xff] %v3686_v36 }
 0x14d   : > { %v3608_v54 = vpop.f32.mrf.mxu2  ;;  %v1633_v56 = vadd.f32 %v1632_v39, %v1631_v47  ;;  %v1648_v47 = vsel %vm517_vm1, %v3535_v16, 0.0 }
 0x14e   : > { %v707_v57 = vpop.f32.mrf.mxu0 }
 0x14f   : > { %v3613_v60 = vadd.f32 %v3366_v22, %v707_v57  ;;  %v1636_v57 = vsel %vm517_vm1, %v3478_v61, 0.0  ;;  %v1635_v63 = vadd.f32 %v1634_v50, %v1633_v56 }
 0x151   : > { %5415 = vst [vmem:[#allocation7_spill] sm:$0xff] %v3613_v60  ;;  %3045 = vmatmul.msk.f32.gmra.mxu1 %vm517_vm1, %v3613_v60  ;;  %v3179_v1 = vpack.i.bf16 %v3613_v60, %v3442_v49  ;;  %v1637_v2 = vadd.f32 %v1636_v57, %v1635_v63  ;;  %v1650_v57 = vsel %vm517_vm1, %v3546_v20, 0.0 }
 0x152   : > { %3078 = vmatmul.msk.f32.gmra.mxu2 %vm517_vm1, %v3613_v60 }
 0x153   : > { %3180 = vxpose.xlu0.b32.cont [9/16] (narrow) %v3179_v1, 16  ;;  %v1638_v1 = vsel %vm517_vm1, %v3487_v0, 0.0 }
 0x154   : > { %v1639_v7 = vadd.f32 %v1638_v1, %v1637_v2  ;;  %v1652_v1 = vsel %vm517_vm1, %v3557_v26, 0.0 }
 0x155   : > { %v3627_v9 = vpop.f32.mrf.mxu2 }
 0x156   : > { %v710_v13 = vpop.f32.mrf.mxu0  ;;  %v1641_v21 = vadd.f32 %v1640_v4, %v1639_v7  ;;  %v1654_v7 = vsel %vm517_vm1, %v3568_v32, 0.0 }
 0x157   : > { %v3634_v19 = vadd.f32 %v3366_v22, %v710_v13  ;;  %v1642_v13 = vsel %vm517_vm1, %v3505_v6, 0.0 }
 0x158   : > { %v1643_v30 = vadd.f32 %v1642_v13, %v1641_v21  ;;  %v3707_v13 = vpop.f32.mrf.mxu1  ;;  %v1656_v21 = vsel %vm517_vm1, %v3579_v38, 0.0 }
 0x159   : > { %5417 = vst [vmem:[#allocation9_spill] sm:$0xff] %v3634_v19  ;;  %3046 = vmatmul.msk.f32.gmra.mxu1 %vm517_vm1, %v3634_v19  ;;  %v3181_v27 = vpack.i.bf16 %v3634_v19, %v3451_v52 }
 0x15a   : > { %3079 = vmatmul.msk.f32.gmra.mxu2 %vm517_vm1, %v3634_v19  ;;  %v1645_v39 = vadd.f32 %v1644_v24, %v1643_v30  ;;  %5423 = vst [vmem:[#allocation15_spill] sm:$0xff] %v3707_v13 }
 0x15b   : > { %3182 = vxpose.xlu0.b32.cont [10/16] (narrow) %v3181_v27, 16 }
 0x15c   : > { %v1647_v50 = vadd.f32 %v1646_v33, %v1645_v39  ;;  %v1658_v39 = vsel %vm517_vm1, %v3592_v45, 0.0 }
 0x15d   : > { %v3648_v44 = vpop.f32.mrf.mxu2 }
 0x15e   : > { %v713_v48 = vpop.f32.mrf.mxu0  ;;  %v1649_v63 = vadd.f32 %v1648_v47, %v1647_v50  ;;  %v901_v50 = vld [vmem:[%s5393_s9 + $0x18] sm:$0xff] }
 0x15f   : > { %v3653_v51 = vadd.f32 %v3366_v22, %v713_v48 }
 0x160   : > { %v1651_v4 = vadd.f32 %v1650_v57, %v1649_v63  ;;  %v1660_v57 = vsel %vm517_vm1, %v3613_v60, 0.0 }
 0x161   : > { %5418 = vst [vmem:[#allocation10_spill] sm:$0xff] %v3653_v51  ;;  %3047 = vmatmul.msk.f32.gmra.mxu1 %vm517_vm1, %v3653_v51  ;;  %v3183_v62 = vpack.i.bf16 %v3653_v51, %v3460_v55 }
 0x162   : > { %3080 = vmatmul.msk.f32.gmra.mxu2 %vm517_vm1, %v3653_v51 }
 0x163   : > { %3184 = vxpose.xlu0.b32.cont [11/16] (narrow) %v3183_v62, 16 }
 0x165   : > { %v3669_v5 = vpop.f32.mrf.mxu2 }
 0x166   : > { %v716_v11 = vpop.f32.mrf.mxu0 }
 0x167   : > { %v3674_v15 = vadd.f32 %v3366_v22, %v716_v11  ;;  %v1653_v11 = vadd.f32 %v1652_v1, %v1651_v4 }
 0x169   : > { %5420 = vst [vmem:[#allocation12_spill] sm:$0xff] %v3674_v15  ;;  %3048 = vmatmul.msk.f32.gmra.mxu1 %vm517_vm1, %v3674_v15  ;;  %v3185_v27 = vpack.i.bf16 %v3674_v15, %v3469_v58  ;;  %v1655_v30 = vadd.f32 %v1654_v7, %v1653_v11  ;;  %v1664_v7 = vsel %vm517_vm1, %v3653_v51, 0.0 }
 0x16a   : > { %3081 = vmatmul.msk.f32.gmra.mxu2 %vm517_vm1, %v3674_v15 }
 0x16b   : > { %3186 = vxpose.xlu0.b32.cont [12/16] (narrow) %v3185_v27, 16  ;;  %v3714_v27 = vld [vmem:[%s5393_s9 + $0x40] sm:$0xf] }
 0x16c   : > { %3092 = vmatpush.msk.msrb.mxu0 %vm614_vm0, %v3714_v27 }
 0x16d   : > { %v3690_v48 = vpop.f32.mrf.mxu2 }
 0x16e   : > { %v719_v56 = vpop.f32.mrf.mxu0  ;;  %1825 = vmatpush.msrb.mxu0 %v901_v50  ;;  %v1666_v50 = vsel %vm517_vm1, %v3674_v15, 0.0 }
 0x16f   : > { %v3695_v62 = vadd.f32 %v3366_v22, %v719_v56  ;;  %v1657_v56 = vadd.f32 %v1656_v21, %v1655_v30 }
 0x171   : > { %5422 = vst [vmem:[#allocation14_spill] sm:$0xff] %v3695_v62  ;;  %3049 = vmatmul.msk.f32.gmra.mxu1 %vm517_vm1, %v3695_v62  ;;  %v3187_v2 = vpack.i.bf16 %v3695_v62, %v3478_v61  ;;  %v1659_v1 = vadd.f32 %v1658_v39, %v1657_v56  ;;  %v1668_v13 = vsel %vm517_vm1, %v3695_v62, 0.0 }
 0x172   : > { %3082 = vmatmul.msk.f32.gmra.mxu2 %vm517_vm1, %v3695_v62 }
 0x173   : > { %3188 = vxpose.xlu0.b32.cont [13/16] (narrow) %v3187_v2, 16  ;;  %v1662_v2 = vsel %vm517_vm1, %v3634_v19, 0.0  ;;  %v1661_v4 = vadd.f32 %v1660_v57, %v1659_v1  ;;  %v953_v19 = vld [vmem:[%s5394_s10 + $0x168] sm:$0xff] }
 0x175   : > { %v1264_v24 = vpop.f32.mrf.mxu2  ;;  %v1663_v21 = vadd.f32 %v1662_v2, %v1661_v4 }
 0x176   : > { %v722_v33 = vpop.f32.mrf.mxu0 }
 0x177   : > { %v3721_v47 = vadd.f32 %v3366_v22, %v722_v33  ;;  %v3738_v33 = vpop.f32.mrf.mxu1  ;;  %v1665_v56 = vadd.f32 %v1664_v7, %v1663_v21 }
 0x178   : > { %5425 = vst [vmem:[#allocation17_spill] sm:$0xff] %v3738_v33 }
 0x179   : > { %5424 = vst [vmem:[#allocation16_spill] sm:$0xff] %v3721_v47  ;;  %3050 = vmatmul.msk.f32.gmra.mxu1 %vm517_vm1, %v3721_v47  ;;  %v3189_v63 = vpack.i.bf16 %v3721_v47, %v3487_v0  ;;  %v1670_v1 = vsel %vm517_vm1, %v3721_v47, 0.0 }
 0x17a   : > { %3083 = vmatmul.msk.f32.gmra.mxu2 %vm517_vm1, %v3721_v47  ;;  %v4352_v47 = vld [vmem:[%s5394_s10 + $0x88] sm:$0xff] }
 0x17b   : > { %3190 = vxpose.xlu0.b32.cont [14/16] (narrow) %v3189_v63, 16  ;;  %v1667_v63 = vadd.f32 %v1666_v50, %v1665_v56 }
 0x17d   : > { %v1267_v11 = vpop.f32.mrf.mxu2  ;;  %v1669_v2 = vadd.f32 %v1668_v13, %v1667_v63 }
 0x17e   : > { %v725_v30 = vpop.f32.mrf.mxu0 }
 0x17f   : > { %v3743_v39 = vadd.f32 %v3366_v22, %v725_v30  ;;  %v1671_v21 = vadd.f32 %v1670_v1, %v1669_v2  ;;  %v3760_v59 = vpop.f32.mrf.mxu1 }
 0x180   : > { %5428 = vst [vmem:[#allocation20_spill] sm:$0xff] %v3760_v59 }
 0x181   : > { %5426 = vst [vmem:[#allocation18_spill] sm:$0xff] %v3743_v39  ;;  %3051 = vmatmul.msk.f32.gmra.mxu1 %vm517_vm1, %v3743_v39  ;;  %v3191_v57 = vpack.i.bf16 %v3743_v39, %v3496_v3  ;;  %v1672_v4 = vsel %vm517_vm1, %v3743_v39, 0.0 }
 0x182   : > { %3084 = vmatmul.msk.f32.gmra.mxu2 %vm517_vm1, %v3743_v39  ;;  %v1673_v36 = vadd.f32 %v1672_v4, %v1671_v21 }
 0x183   : > { %3192 = vxpose.xlu0.b32.cont [15/16] (narrow) %v3191_v57, 16 }
 0x185   : > { %v1270_v7 = vpop.f32.mrf.mxu2 }
 0x186   : > { %v728_v30 = vpop.f32.mrf.mxu0 }
 0x187   : > { %v3758_v33 = vadd.f32 %v3366_v22, %v728_v30  ;;  %v735_v22 = vld [vmem:[%s5388_s4] sm:$0x3]  ;;  %v4422_v32 = vpop.f32.mrf.mxu1 }
 0x188   : > { %v3773_v57 = vperm.slane %v735_v22, 1 }
 0x189   : > { %5427 = vst [vmem:[#allocation19_spill] sm:$0xff] %v3758_v33  ;;  %v1674_v50 = vsel %vm517_vm1, %v3758_v33, 0.0  ;;  %3052 = vmatmul.msk.f32.gmra.mxu1 %vm517_vm1, %v3758_v33  ;;  %v3193_v13 = vpack.i.bf16 %v3758_v33, %v3505_v6 }
 0x18a   : > { %v1675_v56 = vadd.f32 %v1674_v50, %v1673_v36  ;;  %3085 = vmatmul.msk.f32.gmra.mxu2 %vm517_vm1, %v3758_v33  ;;  %v1271_v2 = vadd.f32 %v1270_v7, %v3773_v57  ;;  %v1268_v30 = vadd.f32 %v1267_v11, %v3773_v57  ;;  %v1265_v59 = vadd.f32 %v1264_v24, %v3773_v57 }
 0x18b   : > { %3194 = vxpose.xlu0.b32.end [16/16] (narrow) %v3193_v13, 16  ;;  %v1262_v13 = vadd.f32 %v3690_v48, %v3773_v57  ;;  %v1259_v7 = vadd.f32 %v3669_v5, %v3773_v57  ;;  %v1256_v24 = vadd.f32 %v3648_v44, %v3773_v57  ;;  %v1250_v5 = vadd.f32 %v3608_v54, %v3773_v57 }
 0x18c   : > { %v1676_v63 = vrot.slane %v1675_v56, 4  ;;  %v1353_v17 = vmax.f32 %v1271_v2, 0.0  ;;  %v1351_v22 = vmax.f32 %v1268_v30, 0.0  ;;  %v1349_v11 = vmax.f32 %v1265_v59, 0.0 }
 0x18d   : > { %v1273_v1 = vpop.f32.mrf.mxu2  ;;  %v1347_v48 = vmax.f32 %v1262_v13, 0.0  ;;  %v1343_v59 = vmax.f32 %v1256_v24, 0.0  ;;  %v1339_v2 = vmax.f32 %v1250_v5, 0.0  ;;  %v1238_v54 = vadd.f32 %v3554_v23, %v3773_v57 }
 0x18e   : > { %v1274_v4 = vadd.f32 %v1273_v1, %v3773_v57  ;;  %v1677_v21 = vadd.f32 %v1676_v63, %v1675_v56  ;;  %v1345_v63 = vmax.f32 %v1259_v7, 0.0  ;;  %v1244_v1 = vadd.f32 %v3576_v35, %v3773_v57 }
 0x18f   : > { %v1232_v35 = vadd.f32 %v3532_v14, %v3773_v57 }
 0x190   : > { %v1355_v36 = vmax.f32 %v1274_v4, 0.0  ;;  %v1678_v50 = vrot.slane %v1677_v21, 2 }
 0x191   : > { %v1327_v23 = vmax.f32 %v1232_v35, 0.0 }
 0x192   : > { %1452 = vmatpush.msra.mxu3 %v1355_v36  ;;  %v1679_v53 = vadd.f32 %v1678_v50, %v1677_v21  ;;  %v1335_v21 = vmax.f32 %v1244_v1, 0.0  ;;  %v1331_v50 = vmax.f32 %v1238_v54, 0.0 }
 0x194   : > { %1453 = vmatpush.msra.mxu3 %v1353_v17  ;;  %v1680_v41 = vrot.slane %v1679_v53, 1  ;;  %v1253_v17 = vadd.f32 %v3627_v9, %v3773_v57  ;;  %v1241_v9 = vadd.f32 %v3565_v29, %v3773_v57  ;;  %v1229_v29 = vadd.f32 %v3521_v10, %v3773_v57 }
 0x195   : > { %v3781_v33 = vpop.f32.mrf.mxu2 }
 0x196   : > { %1454 = vmatpush.msra.mxu3 %v1351_v22  ;;  %v3785_v56 = vadd.f32 %v1680_v41, %v1679_v53  ;;  %v1247_v53 = vadd.f32 %v3589_v42, %v3773_v57  ;;  %v1341_v44 = vmax.f32 %v1253_v17, 0.0  ;;  %v1235_v42 = vadd.f32 %v3543_v18, %v3773_v57 }
 0x197   : > { %v1333_v36 = vmax.f32 %v1241_v9, 0.0  ;;  %v1325_v7 = vmax.f32 %v1229_v29, 0.0 }
 0x198   : > { %1455 = vmatpush.msra.mxu3 %v1349_v11  ;;  %3093 = vmatmul.msk.f32.vlgmr.msrb.gmra.mxu0 %vm517_vm1, %v3785_v56  ;;  %v1337_v4 = vmax.f32 %v1247_v53, 0.0  ;;  %v1329_v13 = vmax.f32 %v1235_v42, 0.0 }
 0x19a   : > { %1456 = vmatpush.msra.mxu3 %v1347_v48 }
 0x19c   : > { %1457 = vmatpush.msra.mxu3 %v1345_v63 }
 0x19d   : > { %v3795_v41 = vpop.f32.mrf.mxu2 }
 0x19e   : > { %1458 = vmatpush.msra.mxu3 %v1343_v59 }
 0x1a0   : > { %1459 = vmatpush.msra.mxu3 %v1341_v44 }
 0x1a2   : > { %1460 = vmatpush.msra.mxu3 %v1339_v2 }
 0x1a4   : > { %1461 = vmatpush.msra.mxu3 %v1337_v4 }
 0x1a5   : > { %v3805_v30 = vpop.f32.mrf.mxu2 }
 0x1a6   : > { %1462 = vmatpush.msra.mxu3 %v1335_v21 }
 0x1a8   : > { %1463 = vmatpush.msra.mxu3 %v1333_v36 }
 0x1aa   : > { %1464 = vmatpush.msra.mxu3 %v1331_v50 }
 0x1ac   : > { %1465 = vmatpush.msra.mxu3 %v1329_v13 }
 0x1ad   : > { %v1285_v22 = vpop.f32.mrf.mxu2 }
 0x1ae   : > { %1466 = vmatpush.msra.mxu3 %v1327_v23 }
 0x1b0   : > { %1467 = vmatpush.msra.mxu3 %v1325_v7 }
 0x1b5   : > { %v1288_v11 = vpop.f32.mrf.mxu2 }
 0x1b7   : > { %v3195_v53 = vpop.trf.xlu0 }
 0x1b8   : > { %v3196_v10 = vunpack.i.l.bf16 %v3195_v53 }
 0x1ba   : > { %1468 = vmatmul.f32.vlgmr.msra.gmra.mxu3 %v3196_v10 }
 0x1bd   : > { %v1291_v18 = vpop.f32.mrf.mxu2 }
 0x1bf   : > { %v3813_v1 = vpop.trf.xlu0 }
 0x1c0   : > { %v3201_v9 = vunpack.i.l.bf16 %v3813_v1 }
 0x1c2   : > { %1471 = vmatmul.f32.gmra.mxu3 %v3201_v9 }
 0x1c5   : > { %v1294_v24 = vpop.f32.mrf.mxu2 }
 0x1cd   : > { %v1297_v48 = vpop.f32.mrf.mxu2 }
 0x1d5   : > { %v1300_v17 = vpop.f32.mrf.mxu2 }
 0x1d6   : > { %v1301_v9 = vadd.f32 %v1300_v17, %v3773_v57  ;;  %v1286_v17 = vadd.f32 %v1285_v22, %v3773_v57 }
 0x1dd   : > { %v1303_v63 = vpop.f32.mrf.mxu2 }
 0x1de   : > { %v1304_v10 = vadd.f32 %v1303_v63, %v3773_v57  ;;  %v1289_v63 = vadd.f32 %v1288_v11, %v3773_v57 }
 0x1e5   : > { %v1306_v14 = vpop.f32.mrf.mxu2 }
 0x1e6   : > { %v1307_v23 = vadd.f32 %v1306_v14, %v3773_v57  ;;  %v1292_v14 = vadd.f32 %v1291_v18, %v3773_v57  ;;  %v1363_v18 = vmax.f32 %v1286_v17, 0.0  ;;  %v878_v17 = vld [vmem:[%s5391_s7 + $0x1e8] sm:$0xff] }
 0x1ed   : > { %v1309_v5 = vpop.f32.mrf.mxu2 }
 0x1ee   : > { %v1310_v29 = vadd.f32 %v1309_v5, %v3773_v57  ;;  %v1295_v5 = vadd.f32 %v1294_v24, %v3773_v57  ;;  %v1280_v24 = vadd.f32 %v3795_v41, %v3773_v57  ;;  %v887_v41 = vld [vmem:[%s5391_s7 + $0x230] sm:$0xff] }
 0x1f5   : > { %v1312_v59 = vpop.f32.mrf.mxu2 }
 0x1f6   : > { %v1313_v35 = vadd.f32 %v1312_v59, %v3773_v57  ;;  %v1298_v59 = vadd.f32 %v1297_v48, %v3773_v57  ;;  %v1283_v48 = vadd.f32 %v3805_v30, %v3773_v57  ;;  %v892_v30 = vld [vmem:[%s5391_s7 + $0x258] sm:$0xff] }
 0x1f8   : > { %v1381_v7 = vmax.f32 %v1313_v35, 0.0  ;;  %v1365_v35 = vmax.f32 %v1289_v63, 0.0  ;;  %v1361_v11 = vmax.f32 %v1283_v48, 0.0  ;;  %v888_v63 = vld [vmem:[%s5391_s7 + $0x238] sm:$0xff] }
 0x1f9   : > { %v868_v48 = vld [vmem:[%s5391_s7 + $0x198] sm:$0xff] }
 0x1fd   : > { %v1315_v44 = vpop.f32.mrf.mxu2 }
 0x1fe   : > { %v1316_v42 = vadd.f32 %v1315_v44, %v3773_v57  ;;  %v1377_v44 = vmax.f32 %v1307_v23, 0.0  ;;  %v872_v23 = vld [vmem:[%s5391_s7 + $0x1b8] sm:$0xff] }
 0x200   : > { %v1383_v13 = vmax.f32 %v1316_v42, 0.0  ;;  %v1369_v42 = vmax.f32 %v1295_v5, 0.0  ;;  %v827_v5 = vld [vmem:[%s5391_s7 + $0x50] sm:$0xff] }
 0x205   : > { %v1318_v2 = vpop.f32.mrf.mxu2 }
 0x206   : > { %v1319_v54 = vadd.f32 %v1318_v2, %v3773_v57  ;;  %v1379_v2 = vmax.f32 %v1310_v29, 0.0  ;;  %v1359_v29 = vmax.f32 %v1280_v24, 0.0  ;;  %v858_v24 = vld [vmem:[%s5391_s7 + $0x148] sm:$0xff] }
 0x208   : > { %v1385_v50 = vmax.f32 %v1319_v54, 0.0  ;;  %v1373_v54 = vmax.f32 %v1301_v9, 0.0  ;;  %v847_v9 = vld [vmem:[%s5391_s7 + $0xf0] sm:$0xff] }
 0x20d   : > { %v1321_v4 = vpop.f32.mrf.mxu2 }
 0x20e   : > { %v1322_v21 = vadd.f32 %v1321_v4, %v3773_v57  ;;  %v1375_v4 = vmax.f32 %v1304_v10, 0.0  ;;  %v862_v10 = vld [vmem:[%s5391_s7 + $0x168] sm:$0xff] }
 0x210   : > { %v1387_v36 = vmax.f32 %v1322_v21, 0.0  ;;  %v1371_v21 = vmax.f32 %v1298_v59, 0.0  ;;  %v837_v59 = vld [vmem:[%s5391_s7 + $0xa0] sm:$0xff] }
 0x212   : > { %1475 = vmatpush.msrb.mxu3 %v1387_v36  ;;  %v1367_v36 = vmax.f32 %v1292_v14, 0.0  ;;  %v817_v14 = vld [vmem:[%s5391_s7] sm:$0xff] }
 0x214   : > { %1476 = vmatpush.msrb.mxu3 %v1385_v50  ;;  %v1277_v50 = vadd.f32 %v3781_v33, %v3773_v57  ;;  %v882_v33 = vld [vmem:[%s5391_s7 + $0x208] sm:$0xff]  ;;  %v877_v57 = vld [vmem:[%s5391_s7 + $0x1e0] sm:$0xff] }
 0x216   : > { %1477 = vmatpush.msrb.mxu3 %v1383_v13  ;;  %v1357_v22 = vmax.f32 %v1277_v50, 0.0  ;;  %v3199_v13 = vunpack.i.h.bf16 %v3195_v53  ;;  %v3204_v53 = vunpack.i.h.bf16 %v3813_v1  ;;  %v857_v1 = vld [vmem:[%s5391_s7 + $0x140] sm:$0xff]  ;;  %v848_v50 = vld [vmem:[%s5391_s7 + $0xf8] sm:$0xff] }
 0x218   : > { %1478 = vmatpush.msrb.mxu3 %v1381_v7  ;;  %v867_v7 = vld [vmem:[%s5391_s7 + $0x190] sm:$0xff] }
 0x21a   : > { %1479 = vmatpush.msrb.mxu3 %v1379_v2  ;;  %v852_v2 = vld [vmem:[%s5391_s7 + $0x118] sm:$0xff] }
 0x21c   : > { %1480 = vmatpush.msrb.mxu3 %v1377_v44  ;;  %v842_v44 = vld [vmem:[%s5391_s7 + $0xc8] sm:$0xff] }
 0x21e   : > { %1481 = vmatpush.msrb.mxu3 %v1375_v4  ;;  %v832_v4 = vld [vmem:[%s5391_s7 + $0x78] sm:$0xff] }
 0x220   : > { %1482 = vmatpush.msrb.mxu3 %v1373_v54  ;;  %v822_v54 = vld [vmem:[%s5391_s7 + $0x28] sm:$0xff] }
 0x222   : > { %1483 = vmatpush.msrb.mxu3 %v1371_v21  ;;  %v893_v21 = vld [vmem:[%s5391_s7 + $0x260] sm:$0xff] }
 0x224   : > { %1484 = vmatpush.msrb.mxu3 %v1369_v42  ;;  %v883_v42 = vld [vmem:[%s5391_s7 + $0x210] sm:$0xff] }
 0x226   : > { %1485 = vmatpush.msrb.mxu3 %v1367_v36  ;;  %v873_v36 = vld [vmem:[%s5391_s7 + $0x1c0] sm:$0xff] }
 0x228   : > { %1486 = vmatpush.msrb.mxu3 %v1365_v35  ;;  %v863_v35 = vld [vmem:[%s5391_s7 + $0x170] sm:$0xff] }
 0x22a   : > { %1487 = vmatpush.msrb.mxu3 %v1363_v18  ;;  %v853_v18 = vld [vmem:[%s5391_s7 + $0x120] sm:$0xff] }
 0x22c   : > { %1488 = vmatpush.msrb.mxu3 %v1361_v11  ;;  %v843_v11 = vld [vmem:[%s5391_s7 + $0xd0] sm:$0xff] }
 0x22e   : > { %1489 = vmatpush.msrb.mxu3 %v1359_v29  ;;  %v838_v29 = vld [vmem:[%s5391_s7 + $0xa8] sm:$0xff] }
 0x230   : > { %1490 = vmatpush.msrb.mxu3 %v1357_v22  ;;  %v833_v22 = vld [vmem:[%s5391_s7 + $0x80] sm:$0xff] }
 0x231   : > { %1491 = vmatmul.f32.vlgmr.msrb.gmra.mxu3 %v3199_v13  ;;  %v828_v13 = vld [vmem:[%s5391_s7 + $0x58] sm:$0xff] }
 0x232   : > { %1498 = vmatpush.msra.mxu3 %v892_v30  ;;  %v823_v30 = vld [vmem:[%s5391_s7 + $0x30] sm:$0xff] }
 0x234   : > { %1499 = vmatpush.msra.mxu3 %v887_v41  ;;  %v818_v41 = vld [vmem:[%s5391_s7 + $0x8] sm:$0xff] }
 0x236   : > { %1500 = vmatpush.msra.mxu3 %v882_v33 }
 0x238   : > { %1501 = vmatpush.msra.mxu3 %v877_v57 }
 0x239   : > { %1494 = vmatmul.f32.gmra.mxu3 %v3204_v53  ;;  %v3935_v53 = vld [vmem:[%s5394_s10 + $0x78] sm:$0xff] }
 0x23a   : > { %1502 = vmatpush.msra.mxu3 %v872_v23  ;;  %1970 = vmatpush.msrb.mxu2 %v3935_v53 }
 0x23c   : > { %1503 = vmatpush.msra.mxu3 %v867_v7 }
 0x23d   : > { %v1469_v33 = vpop.f32.mrf.mxu3 }
 0x23e   : > { %1504 = vmatpush.msra.mxu3 %v862_v10  ;;  %v894_v10 = vld [vmem:[%s5391_s7 + $0x268] sm:$0xff] }
 0x240   : > { %1505 = vmatpush.msra.mxu3 %v857_v1  ;;  %v889_v1 = vld [vmem:[%s5391_s7 + $0x240] sm:$0xff] }
 0x242   : > { %1506 = vmatpush.msra.mxu3 %v852_v2  ;;  %v884_v2 = vld [vmem:[%s5391_s7 + $0x218] sm:$0xff] }
 0x244   : > { %1507 = vmatpush.msra.mxu3 %v847_v9  ;;  %v879_v9 = vld [vmem:[%s5391_s7 + $0x1f0] sm:$0xff] }
 0x245   : > { %v1472_v57 = vpop.f32.mrf.mxu3 }
 0x246   : > { %1508 = vmatpush.msra.mxu3 %v842_v44 }
 0x248   : > { %1509 = vmatpush.msra.mxu3 %v837_v59 }
 0x24a   : > { %1510 = vmatpush.msra.mxu3 %v832_v4  ;;  %v874_v4 = vld [vmem:[%s5391_s7 + $0x1c8] sm:$0xff] }
 0x24c   : > { %1511 = vmatpush.msra.mxu3 %v827_v5  ;;  %v869_v5 = vld [vmem:[%s5391_s7 + $0x1a0] sm:$0xff] }
 0x24e   : > { %1512 = vmatpush.msra.mxu3 %v822_v54  ;;  %v3965_v54 = vld [vmem:[%s5394_s10 + $0x70] sm:$0xff] }
 0x24f   : > { %1971 = vmatpush.msrb.mxu2 %v3965_v54 }
 0x250   : > { %1513 = vmatpush.msra.mxu3 %v817_v14  ;;  %v864_v14 = vld [vmem:[%s5391_s7 + $0x178] sm:$0xff] }
 0x252   : > { %1521 = vmatpush.msrb.mxu3 %v893_v21  ;;  %v859_v21 = vld [vmem:[%s5391_s7 + $0x150] sm:$0xff] }
 0x254   : > { %1522 = vmatpush.msrb.mxu3 %v888_v63  ;;  %v854_v63 = vld [vmem:[%s5391_s7 + $0x128] sm:$0xff] }
 0x256   : > { %1523 = vmatpush.msrb.mxu3 %v883_v42  ;;  %v849_v42 = vld [vmem:[%s5391_s7 + $0x100] sm:$0xff] }
 0x258   : > { %1524 = vmatpush.msrb.mxu3 %v878_v17  ;;  %v844_v17 = vld [vmem:[%s5391_s7 + $0xd8] sm:$0xff] }
 0x25a   : > { %1525 = vmatpush.msrb.mxu3 %v873_v36  ;;  %v839_v36 = vld [vmem:[%s5391_s7 + $0xb0] sm:$0xff] }
 0x25c   : > { %1526 = vmatpush.msrb.mxu3 %v868_v48  ;;  %v834_v48 = vld [vmem:[%s5391_s7 + $0x88] sm:$0xff] }
 0x25e   : > { %1527 = vmatpush.msrb.mxu3 %v863_v35  ;;  %v829_v35 = vld [vmem:[%s5391_s7 + $0x60] sm:$0xff] }
 0x260   : > { %1528 = vmatpush.msrb.mxu3 %v858_v24  ;;  %v3997_v24 = vld [vmem:[%s5394_s10 + $0x68] sm:$0xff] }
 0x261   : > { %1972 = vmatpush.msrb.mxu2 %v3997_v24 }
 0x262   : > { %1529 = vmatpush.msrb.mxu3 %v853_v18  ;;  %v824_v18 = vld [vmem:[%s5391_s7 + $0x38] sm:$0xff] }
 0x264   : > { %1530 = vmatpush.msrb.mxu3 %v848_v50  ;;  %v819_v50 = vld [vmem:[%s5391_s7 + $0x10] sm:$0xff] }
 0x266   : > { %1531 = vmatpush.msrb.mxu3 %v843_v11  ;;  %v895_v11 = vld [vmem:[%s5391_s7 + $0x270] sm:$0xff] }
 0x268   : > { %1532 = vmatpush.msrb.mxu3 %v838_v29  ;;  %v890_v29 = vld [vmem:[%s5391_s7 + $0x248] sm:$0xff] }
 0x26a   : > { %1533 = vmatpush.msrb.mxu3 %v833_v22  ;;  %v885_v22 = vld [vmem:[%s5391_s7 + $0x220] sm:$0xff] }
 0x26c   : > { %1534 = vmatpush.msrb.mxu3 %v828_v13  ;;  %v880_v13 = vld [vmem:[%s5391_s7 + $0x1f8] sm:$0xff] }
 0x26e   : > { %1535 = vmatpush.msrb.mxu3 %v823_v30  ;;  %v875_v30 = vld [vmem:[%s5391_s7 + $0x1d0] sm:$0xff] }
 0x270   : > { %1536 = vmatpush.msrb.mxu3 %v818_v41  ;;  %v870_v41 = vld [vmem:[%s5391_s7 + $0x1a8] sm:$0xff] }
 0x2b4   : > { %v1492_v23 = vpop.f32.mrf.mxu3 }
 0x2b5   : > { %v3938_v7 = vadd.f32 %v1492_v23, %v1469_v33  ;;  %v4028_v33 = vld [vmem:[%s5394_s10 + $0x60] sm:$0xff]  ;;  %v860_v23 = vld [vmem:[%s5391_s7 + $0x158] sm:$0xff] }
 0x2b6   : > { %1973 = vmatpush.msrb.mxu2 %v4028_v33 }
 0x2b7   : > { %1514 = vmatmul.f32.vlgmr.msra.gmra.mxu3 %v3938_v7 }
 0x2b8   : > { %1544 = vmatpush.msra.mxu3 %v894_v10  ;;  %v855_v10 = vld [vmem:[%s5391_s7 + $0x130] sm:$0xff] }
 0x2ba   : > { %1545 = vmatpush.msra.mxu3 %v889_v1  ;;  %v850_v1 = vld [vmem:[%s5391_s7 + $0x108] sm:$0xff] }
 0x2bc   : > { %1546 = vmatpush.msra.mxu3 %v884_v2  ;;  %v1495_v44 = vpop.f32.mrf.mxu3  ;;  %v845_v2 = vld [vmem:[%s5391_s7 + $0xe0] sm:$0xff] }
 0x2bd   : > { %v3953_v59 = vadd.f32 %v1495_v44, %v1472_v57  ;;  %v865_v57 = vld [vmem:[%s5391_s7 + $0x180] sm:$0xff]  ;;  %v835_v44 = vld [vmem:[%s5391_s7 + $0x90] sm:$0xff] }
 0x2be   : > { %1547 = vmatpush.msra.mxu3 %v879_v9  ;;  %v840_v9 = vld [vmem:[%s5391_s7 + $0xb8] sm:$0xff] }
 0x2bf   : > { %1517 = vmatmul.f32.gmra.mxu3 %v3953_v59 }
 0x2c0   : > { %1548 = vmatpush.msra.mxu3 %v874_v4  ;;  %v830_v4 = vld [vmem:[%s5391_s7 + $0x68] sm:$0xff] }
 0x2c2   : > { %1549 = vmatpush.msra.mxu3 %v869_v5  ;;  %v4059_v5 = vld [vmem:[%s5394_s10 + $0x58] sm:$0xff] }
 0x2c3   : > { %1974 = vmatpush.msrb.mxu2 %v4059_v5 }
 0x2c4   : > { %1550 = vmatpush.msra.mxu3 %v864_v14  ;;  %v825_v14 = vld [vmem:[%s5391_s7 + $0x40] sm:$0xff] }
 0x2c6   : > { %1551 = vmatpush.msra.mxu3 %v859_v21  ;;  %v820_v21 = vld [vmem:[%s5391_s7 + $0x18] sm:$0xff] }
 0x2c7   : > { %1537 = vmatmul.f32.vlgmr.msrb.gmra.mxu3 %v3938_v7 }
 0x2c8   : > { %1552 = vmatpush.msra.mxu3 %v854_v63  ;;  %v896_v63 = vld [vmem:[%s5391_s7 + $0x278] sm:$0xff] }
 0x2ca   : > { %1553 = vmatpush.msra.mxu3 %v849_v42  ;;  %v891_v42 = vld [vmem:[%s5391_s7 + $0x250] sm:$0xff] }
 0x2cc   : > { %1554 = vmatpush.msra.mxu3 %v844_v17  ;;  %v886_v17 = vld [vmem:[%s5391_s7 + $0x228] sm:$0xff] }
 0x2ce   : > { %1555 = vmatpush.msra.mxu3 %v839_v36  ;;  %v881_v36 = vld [vmem:[%s5391_s7 + $0x200] sm:$0xff] }
 0x2cf   : > { %1540 = vmatmul.f32.gmra.mxu3 %v3953_v59 }
 0x2d0   : > { %1556 = vmatpush.msra.mxu3 %v834_v48  ;;  %v876_v48 = vld [vmem:[%s5391_s7 + $0x1d8] sm:$0xff] }
 0x2d2   : > { %1557 = vmatpush.msra.mxu3 %v829_v35  ;;  %v871_v35 = vld [vmem:[%s5391_s7 + $0x1b0] sm:$0xff] }
 0x2d4   : > { %1558 = vmatpush.msra.mxu3 %v824_v18  ;;  %v918_v18 = vld [vmem:[%s5394_s10 + $0x50] sm:$0xff] }
 0x2d5   : > { %1975 = vmatpush.msrb.mxu2 %v918_v18 }
 0x2d6   : > { %1559 = vmatpush.msra.mxu3 %v819_v50  ;;  %v866_v50 = vld [vmem:[%s5391_s7 + $0x188] sm:$0xff] }
 0x2d7   : > { %1560 = vmatmul.f32.vlgmr.msra.gmra.mxu3 %v3938_v7 }
 0x2d8   : > { %1567 = vmatpush.msrb.mxu3 %v895_v11  ;;  %v861_v11 = vld [vmem:[%s5391_s7 + $0x160] sm:$0xff] }
 0x2da   : > { %1568 = vmatpush.msrb.mxu3 %v890_v29  ;;  %v856_v29 = vld [vmem:[%s5391_s7 + $0x138] sm:$0xff] }
 0x2dc   : > { %1569 = vmatpush.msrb.mxu3 %v885_v22  ;;  %v851_v22 = vld [vmem:[%s5391_s7 + $0x110] sm:$0xff] }
 0x2de   : > { %1570 = vmatpush.msrb.mxu3 %v880_v13  ;;  %v846_v13 = vld [vmem:[%s5391_s7 + $0xe8] sm:$0xff] }
 0x2df   : > { %1563 = vmatmul.f32.gmra.mxu3 %v3953_v59 }
 0x2e0   : > { %1571 = vmatpush.msrb.mxu3 %v875_v30  ;;  %v841_v30 = vld [vmem:[%s5391_s7 + $0xc0] sm:$0xff] }
 0x2e2   : > { %1572 = vmatpush.msrb.mxu3 %v870_v41  ;;  %v836_v41 = vld [vmem:[%s5391_s7 + $0x98] sm:$0xff] }
 0x2e4   : > { %1573 = vmatpush.msrb.mxu3 %v865_v57  ;;  %v831_v57 = vld [vmem:[%s5391_s7 + $0x70] sm:$0xff] }
 0x2e6   : > { %1574 = vmatpush.msrb.mxu3 %v860_v23  ;;  %v917_v23 = vld [vmem:[%s5394_s10 + $0x48] sm:$0xff] }
 0x2e7   : > { %1976 = vmatpush.msrb.mxu2 %v917_v23 }
 0x2e8   : > { %1575 = vmatpush.msrb.mxu3 %v855_v10  ;;  %v826_v10 = vld [vmem:[%s5391_s7 + $0x48] sm:$0xff] }
 0x2ea   : > { %1576 = vmatpush.msrb.mxu3 %v850_v1  ;;  %v821_v1 = vld [vmem:[%s5391_s7 + $0x20] sm:$0xff] }
 0x2ec   : > { %1577 = vmatpush.msrb.mxu3 %v845_v2  ;;  %v903_v2 = vld [vmem:[%s5393_s9 + $0x28] sm:$0xf] }
 0x2ee   : > { %1578 = vmatpush.msrb.mxu3 %v840_v9  ;;  %v898_v9 = vld [vmem:[%s5393_s9] sm:$0xff] }
 0x2f0   : > { %1579 = vmatpush.msrb.mxu3 %v835_v44  ;;  %v904_v44 = vld [vmem:[%s5393_s9 + $0x30] sm:$0xf] }
 0x2f2   : > { %1580 = vmatpush.msrb.mxu3 %v830_v4  ;;  %v899_v4 = vld [vmem:[%s5393_s9 + $0x8] sm:$0xff] }
 0x2f4   : > { %1581 = vmatpush.msrb.mxu3 %v825_v14  ;;  %v905_v14 = vld [vmem:[%s5393_s9 + $0x38] sm:$0xf] }
 0x2f6   : > { %1582 = vmatpush.msrb.mxu3 %v820_v21  ;;  %v900_v21 = vld [vmem:[%s5393_s9 + $0x10] sm:$0xff] }
 0x2f7   : > { %1583 = vmatmul.f32.vlgmr.msrb.gmra.mxu3 %v3938_v7 }
 0x2f8   : > { %1590 = vmatpush.msra.mxu3 %v896_v63  ;;  %v4162_v63 = vld [vmem:[%s5393_s9 + $0x20] sm:$0xff] }
 0x2fa   : > { %1591 = vmatpush.msra.mxu3 %v891_v42  ;;  %v915_v42 = vld [vmem:[%s5394_s10 + $0x38] sm:$0xff] }
 0x2fc   : > { %1592 = vmatpush.msra.mxu3 %v886_v17 }
 0x2fe   : > { %1593 = vmatpush.msra.mxu3 %v881_v36 }
 0x2ff   : > { %1586 = vmatmul.f32.gmra.mxu3 %v3953_v59 }
 0x300   : > { %1594 = vmatpush.msra.mxu3 %v876_v48  ;;  %v914_v48 = vld [vmem:[%s5394_s10 + $0x30] sm:$0xff] }
 0x302   : > { %1595 = vmatpush.msra.mxu3 %v871_v35 }
 0x304   : > { %1596 = vmatpush.msra.mxu3 %v866_v50 }
 0x306   : > { %1597 = vmatpush.msra.mxu3 %v861_v11 }
 0x308   : > { %1598 = vmatpush.msra.mxu3 %v856_v29 }
 0x30a   : > { %1599 = vmatpush.msra.mxu3 %v851_v22  ;;  %v912_v22 = vld [vmem:[%s5394_s10 + $0x20] sm:$0xff] }
 0x30c   : > { %1600 = vmatpush.msra.mxu3 %v846_v13 }
 0x30e   : > { %1601 = vmatpush.msra.mxu3 %v841_v30 }
 0x310   : > { %1602 = vmatpush.msra.mxu3 %v836_v41 }
 0x312   : > { %1603 = vmatpush.msra.mxu3 %v831_v57 }
 0x314   : > { %1604 = vmatpush.msra.mxu3 %v826_v10 }
 0x316   : > { %1605 = vmatpush.msra.mxu3 %v821_v1  ;;  %v911_v1 = vld [vmem:[%s5394_s10 + $0x18] sm:$0xff] }
 0x317   : > { %1606 = vmatmul.f32.vlgmr.msra.gmra.mxu3 %v3938_v7  ;;  %v916_v7 = vld [vmem:[%s5394_s10 + $0x40] sm:$0xff] }
 0x318   : > { %3086 = vmatpush.msk.msrb.mxu3 %vm614_vm0, %v903_v2  ;;  %1977 = vmatpush.msrb.mxu2 %v916_v7 }
 0x31a   : > { %1765 = vmatpush.msrb.mxu3 %v898_v9  ;;  %1978 = vmatpush.msrb.mxu2 %v915_v42 }
 0x31c   : > { %3088 = vmatpush.msk.msra.mxu3 %vm614_vm0, %v904_v44  ;;  %1979 = vmatpush.msrb.mxu2 %v914_v48 }
 0x31e   : > { %1785 = vmatpush.msra.mxu3 %v899_v4 }
 0x31f   : > { %1609 = vmatmul.f32.gmra.mxu3 %v3953_v59  ;;  %v4155_v59 = vld [vmem:[%s5393_s9 + $0x48] sm:$0xf] }
 0x327   : > { %3087 = vmatmul.msk.f32.vlgmr.msrb.gmra.mxu3 %vm517_vm1, %v3785_v56 }
 0x328   : > { %3090 = vmatpush.msk.msrb.mxu3 %vm614_vm0, %v905_v14 }
 0x32a   : > { %1805 = vmatpush.msrb.mxu3 %v900_v21 }
 0x32f   : > { %3089 = vmatmul.msk.f32.vlgmr.msra.gmra.mxu3 %vm517_vm1, %v3785_v56 }
 0x330   : > { %3094 = vmatpush.msk.msra.mxu3 %vm614_vm0, %v4155_v59 }
 0x332   : > { %1845 = vmatpush.msra.mxu3 %v4162_v63 }
 0x337   : > { %3091 = vmatmul.msk.f32.vlgmr.msrb.gmra.mxu3 %vm517_vm1, %v3785_v56 }
 0x338   : > { %2321 = vmatpush.msrb.mxu3 %v3935_v53 }
 0x33a   : > { %2322 = vmatpush.msrb.mxu3 %v3965_v54  ;;  %v1515_v17 = vpop.f32.mrf.mxu3 }
 0x33b   : > { %v1682_v53 = vmul.f32 %v1515_v17, %v898_v9  ;;  %v4229_v17 = vld [vmem:[%s5394_s10 + $0xe8] sm:$0xff] }
 0x33c   : > { %2323 = vmatpush.msrb.mxu3 %v3997_v24 }
 0x33e   : > { %2324 = vmatpush.msrb.mxu3 %v4028_v33 }
 0x33f   : > { %3095 = vmatmul.msk.f32.vlgmr.msra.gmra.mxu3 %vm517_vm1, %v3785_v56 }
 0x340   : > { %2325 = vmatpush.msrb.mxu3 %v4059_v5 }
 0x342   : > { %2326 = vmatpush.msrb.mxu3 %v918_v18  ;;  %v1518_v36 = vpop.f32.mrf.mxu3  ;;  %v913_v18 = vld [vmem:[%s5394_s10 + $0x28] sm:$0xff] }
 0x343   : > { %v1687_v35 = vmul.f32 %v1518_v36, %v903_v2  ;;  %1980 = vmatpush.msrb.mxu2 %v913_v18  ;;  %v910_v2 = vld [vmem:[%s5394_s10 + $0x10] sm:$0xff]  ;;  %v969_v36 = vld [vmem:[%s5394_s10 + $0x1e8] sm:$0xff] }
 0x344   : > { %2327 = vmatpush.msrb.mxu3 %v917_v23 }
 0x345   : > { %v1692_v54 = vsel %vm614_vm0, %v1687_v35, 0.0  ;;  %1981 = vmatpush.msrb.mxu2 %v912_v22  ;;  %v968_v35 = vld [vmem:[%s5394_s10 + $0x1e0] sm:$0xff] }
 0x346   : > { %2328 = vmatpush.msrb.mxu3 %v916_v7  ;;  %v4183_v24 = vadd.f32 %v1692_v54, %v1682_v53  ;;  %v4247_v53 = vld [vmem:[%s5394_s10 + $0xd8] sm:$0xff] }
 0x347   : > { %1982 = vmatpush.msrb.mxu2 %v911_v1  ;;  %v967_v54 = vld [vmem:[%s5394_s10 + $0x1d8] sm:$0xff] }
 0x348   : > { %2329 = vmatpush.msrb.mxu3 %v915_v42  ;;  %v970_v42 = vld [vmem:[%s5394_s10 + $0x1f0] sm:$0xff] }
 0x349   : > { %1983 = vmatpush.msrb.mxu2 %v910_v2 }
 0x34a   : > { %2330 = vmatpush.msrb.mxu3 %v914_v48  ;;  %v1538_v56 = vpop.f32.mrf.mxu3  ;;  %v4237_v48 = vld [vmem:[%s5394_s10 + $0xe0] sm:$0xff] }
 0x34b   : > { %v1683_v50 = vmul.f32 %v1538_v56, %v899_v4  ;;  %v971_v4 = vld [vmem:[%s5394_s10 + $0x1f8] sm:$0xff] }
 0x34c   : > { %2331 = vmatpush.msrb.mxu3 %v913_v18  ;;  %2165 = vmatpush.msrb.mxu1 %v971_v4  ;;  %v4267_v18 = vld [vmem:[%s5394_s10 + $0xc8] sm:$0xff] }
 0x34e   : > { %2332 = vmatpush.msrb.mxu3 %v912_v22  ;;  %2166 = vmatpush.msrb.mxu1 %v970_v42  ;;  %v4279_v22 = vld [vmem:[%s5394_s10 + $0xc0] sm:$0xff] }
 0x350   : > { %2333 = vmatpush.msrb.mxu3 %v911_v1  ;;  %2167 = vmatpush.msrb.mxu1 %v969_v36  ;;  %v962_v1 = vld [vmem:[%s5394_s10 + $0x1b0] sm:$0xff] }
 0x352   : > { %v1541_v33 = vpop.f32.mrf.mxu3  ;;  %2334 = vmatpush.msrb.mxu3 %v910_v2  ;;  %2168 = vmatpush.msrb.mxu1 %v968_v35  ;;  %v4306_v2 = vld [vmem:[%s5394_s10 + $0xa8] sm:$0xff] }
 0x353   : > { %v1688_v5 = vmul.f32 %v1541_v33, %v904_v44  ;;  %v4208_v44 = vld [vmem:[%s5394_s10 + $0xf8] sm:$0xff]  ;;  %v4258_v33 = vld [vmem:[%s5394_s10 + $0xd0] sm:$0xff] }
 0x354   : > { %2035 = vmatpush.msra.mxu0 %v4208_v44  ;;  %2169 = vmatpush.msrb.mxu1 %v967_v54 }
 0x355   : > { %v1700_v11 = vsel %vm614_vm0, %v1688_v5, 0.0  ;;  %v966_v5 = vld [vmem:[%s5394_s10 + $0x1d0] sm:$0xff] }
 0x356   : > { %v4189_v29 = vadd.f32 %v1700_v11, %v1683_v50  ;;  %2170 = vmatpush.msrb.mxu1 %v966_v5  ;;  %v965_v50 = vld [vmem:[%s5394_s10 + $0x1c8] sm:$0xff]  ;;  %v908_v11 = vld [vmem:[%s5394_s10] sm:$0xff] }
 0x358   : > { %2171 = vmatpush.msrb.mxu1 %v965_v50 }
 0x35a   : > { %v1561_v13 = vpop.f32.mrf.mxu3 }
 0x35b   : > { %v1684_v57 = vmul.f32 %v1561_v13, %v900_v21  ;;  %v4220_v21 = vld [vmem:[%s5394_s10 + $0xf0] sm:$0xff]  ;;  %v964_v13 = vld [vmem:[%s5394_s10 + $0x1c0] sm:$0xff] }
 0x35c   : > { %2036 = vmatpush.msra.mxu0 %v4220_v21  ;;  %2172 = vmatpush.msrb.mxu1 %v964_v13 }
 0x35e   : > { %2037 = vmatpush.msra.mxu0 %v4229_v17 }
 0x360   : > { %2038 = vmatpush.msra.mxu0 %v4237_v48 }
 0x362   : > { %v1564_v30 = vpop.f32.mrf.mxu3  ;;  %2039 = vmatpush.msra.mxu0 %v4247_v53 }
 0x363   : > { %v1689_v41 = vmul.f32 %v1564_v30, %v905_v14  ;;  %v909_v14 = vld [vmem:[%s5394_s10 + $0x8] sm:$0xff] }
 0x364   : > { %1984 = vmatpush.msrb.mxu2 %v909_v14  ;;  %2335 = vmatpush.msrb.mxu3 %v909_v14 }
 0x365   : > { %v1708_v23 = vsel %vm614_vm0, %v1689_v41, 0.0  ;;  %2040 = vmatpush.msra.mxu0 %v4258_v33  ;;  %v4288_v41 = vld [vmem:[%s5394_s10 + $0xb8] sm:$0xff] }
 0x366   : > { %v4195_v10 = vadd.f32 %v1708_v23, %v1684_v57  ;;  %2336 = vmatpush.msrb.mxu3 %v908_v11  ;;  %1985 = vmatpush.msrb.mxu2 %v908_v11  ;;  %v963_v57 = vld [vmem:[%s5394_s10 + $0x1b8] sm:$0xff]  ;;  %v4297_v23 = vld [vmem:[%s5394_s10 + $0xb0] sm:$0xff] }
 0x367   : > { %2041 = vmatpush.msra.mxu0 %v4267_v18  ;;  %2173 = vmatpush.msrb.mxu1 %v963_v57 }
 0x368   : > { %2381 = vmatpush.msra.mxu3 %v971_v4  ;;  %3133 = vmatpush.msra.mxu2 %v971_v4  ;;  %v961_v4 = vld [vmem:[%s5394_s10 + $0x1a8] sm:$0xff] }
 0x369   : > { %2042 = vmatpush.msra.mxu0 %v4279_v22  ;;  %2174 = vmatpush.msrb.mxu1 %v962_v1 }
 0x36a   : > { %2382 = vmatpush.msra.mxu3 %v970_v42  ;;  %3134 = vmatpush.msra.mxu2 %v970_v42  ;;  %v4316_v42 = vld [vmem:[%s5394_s10 + $0xa0] sm:$0xff] }
 0x36b   : > { %2043 = vmatpush.msra.mxu0 %v4288_v41  ;;  %2175 = vmatpush.msrb.mxu1 %v961_v4 }
 0x36c   : > { %2383 = vmatpush.msra.mxu3 %v969_v36  ;;  %3135 = vmatpush.msra.mxu2 %v969_v36  ;;  %v960_v36 = vld [vmem:[%s5394_s10 + $0x1a0] sm:$0xff] }
 0x36d   : > { %2044 = vmatpush.msra.mxu0 %v4297_v23  ;;  %2176 = vmatpush.msrb.mxu1 %v960_v36 }
 0x36e   : > { %2384 = vmatpush.msra.mxu3 %v968_v35  ;;  %3136 = vmatpush.msra.mxu2 %v968_v35 }
 0x36f   : > { %2045 = vmatpush.msra.mxu0 %v4306_v2 }
 0x370   : > { %2385 = vmatpush.msra.mxu3 %v967_v54  ;;  %3137 = vmatpush.msra.mxu2 %v967_v54 }
 0x371   : > { %2046 = vmatpush.msra.mxu0 %v4316_v42 }
 0x372   : > { %2386 = vmatpush.msra.mxu3 %v966_v5  ;;  %3138 = vmatpush.msra.mxu2 %v966_v5  ;;  %v3207_v5 = vld [vmem:[%s5393_s9 + $0x18] sm:$0xff] }
 0x374   : > { %2387 = vmatpush.msra.mxu3 %v965_v50  ;;  %3139 = vmatpush.msra.mxu2 %v965_v50  ;;  %v957_v50 = vld [vmem:[%s5394_s10 + $0x188] sm:$0xff] }
 0x376   : > { %2388 = vmatpush.msra.mxu3 %v964_v13  ;;  %3140 = vmatpush.msra.mxu2 %v964_v13 }
 0x378   : > { %2389 = vmatpush.msra.mxu3 %v963_v57  ;;  %3141 = vmatpush.msra.mxu2 %v963_v57  ;;  %v1702_v57 = vrot.slane %v4189_v29, 4 }
 0x37a   : > { %v4203_v9 = vpop.f32.mrf.mxu3  ;;  %2390 = vmatpush.msra.mxu3 %v962_v1  ;;  %3142 = vmatpush.msra.mxu2 %v962_v1  ;;  %v952_v1 = vld [vmem:[%s5394_s10 + $0x160] sm:$0xff]  ;;  %v1703_v60 = vadd.f32 %v1702_v57, %v4189_v29  ;;  %v950_v29 = vld [vmem:[%s5394_s10 + $0x150] sm:$0xff]  ;;  %v1827_v57 = vpop.f32.mrf.mxu0 }
 0x37b   : > { %v1685_v39 = vmul.f32 %v3207_v5, %v4203_v9  ;;  %v956_v5 = vld [vmem:[%s5394_s10 + $0x180] sm:$0xff] }
 0x37c   : > { %2391 = vmatpush.msra.mxu3 %v961_v4  ;;  %3143 = vmatpush.msra.mxu2 %v961_v4 }
 0x37e   : > { %2392 = vmatpush.msra.mxu3 %v960_v36  ;;  %3144 = vmatpush.msra.mxu2 %v960_v36 }
 0x382   : > { %v1587_v7 = vpop.f32.mrf.mxu3 }
 0x383   : > { %v1690_v14 = vmul.f32 %v1587_v7, %v3714_v27  ;;  %v4328_v27 = vld [vmem:[%s5394_s10 + $0x98] sm:$0xff] }
 0x384   : > { %v959_v7 = vld [vmem:[%s5394_s10 + $0x198] sm:$0xff]  ;;  %2047 = vmatpush.msra.mxu0 %v4328_v27 }
 0x385   : > { %2177 = vmatpush.msrb.mxu1 %v959_v7  ;;  %v1716_v54 = vsel %vm614_vm0, %v1690_v14, 0.0  ;;  %2393 = vmatpush.msra.mxu3 %v959_v7 }
 0x386   : > { %v1717_v62 = vadd.f32 %v1716_v54, %v1685_v39  ;;  %v1694_v39 = vrot.slane %v4183_v24, 4  ;;  %v1710_v54 = vrot.slane %v4195_v10, 4  ;;  %3145 = vmatpush.msra.mxu2 %v959_v7 }
 0x388   : > { %v1695_v51 = vadd.f32 %v1694_v39, %v4183_v24 }
 0x38a   : > { %v1696_v45 = vrot.slane %v1695_v51, 2 }
 0x38c   : > { %v1697_v7 = vadd.f32 %v1696_v45, %v1695_v51  ;;  %v947_v45 = vld [vmem:[%s5394_s10 + $0x138] sm:$0xff]  ;;  %v1857_v51 = vrot.slane %v1827_v57, 5 }
 0x39a   : > { %v4252_v56 = vpop.f32.mrf.mxu3 }
 0x39b   : > { %v1686_v9 = vmul.f32 %v4252_v56, %v4162_v63  ;;  %v955_v63 = vld [vmem:[%s5394_s10 + $0x178] sm:$0xff]  ;;  %v954_v56 = vld [vmem:[%s5394_s10 + $0x170] sm:$0xff] }
 0x3a2   : > { %v1610_v30 = vpop.f32.mrf.mxu3 }
 0x3a3   : > { %v1691_v35 = vmul.f32 %v1610_v30, %v4155_v59  ;;  %v4338_v59 = vld [vmem:[%s5394_s10 + $0x90] sm:$0xff] }
 0x3a4   : > { %v958_v30 = vld [vmem:[%s5394_s10 + $0x190] sm:$0xff]  ;;  %2048 = vmatpush.msra.mxu0 %v4338_v59 }
 0x3a5   : > { %2178 = vmatpush.msrb.mxu1 %v958_v30  ;;  %v1724_v14 = vsel %vm614_vm0, %v1691_v35, 0.0  ;;  %v4363_v35 = vld [vmem:[%s5394_s10 + $0x80] sm:$0xff]  ;;  %2394 = vmatpush.msra.mxu3 %v958_v30 }
 0x3a6   : > { %2049 = vmatpush.msra.mxu0 %v4352_v47  ;;  %v1725_v15 = vadd.f32 %v1724_v14, %v1686_v9  ;;  %v1718_v14 = vrot.slane %v1717_v62, 4  ;;  %3146 = vmatpush.msra.mxu2 %v958_v30  ;;  %v948_v30 = vld [vmem:[%s5394_s10 + $0x140] sm:$0xff] }
 0x3a7   : > { %2179 = vmatpush.msrb.mxu1 %v957_v50  ;;  %2395 = vmatpush.msra.mxu3 %v957_v50 }
 0x3a8   : > { %2050 = vmatpush.msra.mxu0 %v4363_v35  ;;  %v1726_v9 = vrot.slane %v1725_v15, 4  ;;  %v1719_v4 = vadd.f32 %v1718_v14, %v1717_v62  ;;  %v1704_v62 = vrot.slane %v1703_v60, 2  ;;  %3147 = vmatpush.msra.mxu2 %v957_v50 }
 0x3a9   : > { %2180 = vmatpush.msrb.mxu1 %v956_v5  ;;  %2396 = vmatpush.msra.mxu3 %v956_v5 }
 0x3aa   : > { %v4321_v11 = vpop.f32.mrf.mxu3  ;;  %2100 = vmatpush.msrb.mxu0 %v955_v63  ;;  %v1727_v24 = vadd.f32 %v1726_v9, %v1725_v15  ;;  %v949_v15 = vld [vmem:[%s5394_s10 + $0x148] sm:$0xff]  ;;  %3148 = vmatpush.msra.mxu2 %v956_v5 }
 0x3ab   : > { %2361 = vmatpush.msra.mxu1 %v955_v63  ;;  %v1711_v63 = vadd.f32 %v1710_v54, %v4195_v10  ;;  %v1705_v54 = vadd.f32 %v1704_v62, %v1703_v60  ;;  %v1698_v60 = vrot.slane %v1697_v7, 1  ;;  %v897_v62 = vld [vmem:[%s5392_s8] sm:$0x1f] }
 0x3ac   : > { %2101 = vmatpush.msrb.mxu0 %v954_v56  ;;  %v1728_v36 = vrot.slane %v1727_v24, 2 }
 0x3ad   : > { %2362 = vmatpush.msra.mxu1 %v954_v56  ;;  %v951_v56 = vld [vmem:[%s5394_s10 + $0x158] sm:$0xff]  ;;  %v1712_v10 = vrot.slane %v1711_v63, 2 }
 0x3ae   : > { %2102 = vmatpush.msrb.mxu0 %v953_v19 }
 0x3af   : > { %2363 = vmatpush.msra.mxu1 %v953_v19  ;;  %v1720_v19 = vrot.slane %v1719_v4, 2  ;;  %v1713_v14 = vadd.f32 %v1712_v10, %v1711_v63  ;;  %v1706_v63 = vrot.slane %v1705_v54, 1 }
 0x3b0   : > { %2103 = vmatpush.msrb.mxu0 %v952_v1 }
 0x3b1   : > { %2364 = vmatpush.msra.mxu1 %v952_v1  ;;  %v1721_v9 = vadd.f32 %v1720_v19, %v1719_v4  ;;  %v1714_v4 = vrot.slane %v1713_v14, 1 }
 0x3b2   : > { %v4368_v13 = vpop.f32.mrf.mxu3  ;;  %2104 = vmatpush.msrb.mxu0 %v951_v56 }
 0x3b3   : > { %2365 = vmatpush.msra.mxu1 %v951_v56  ;;  %v1855_v1 = vrot.slane %v4368_v13, 7  ;;  %v1729_v56 = vadd.f32 %v1728_v36, %v1727_v24  ;;  %v946_v13 = vld [vmem:[%s5394_s10 + $0x130] sm:$0xff]  ;;  %v1722_v24 = vrot.slane %v1721_v9, 1 }
 0x3b4   : > { %2105 = vmatpush.msrb.mxu0 %v950_v29 }
 0x3b5   : > { %2366 = vmatpush.msra.mxu1 %v950_v29  ;;  %v1730_v36 = vrot.slane %v1729_v56, 1 }
 0x3b6   : > { %2106 = vmatpush.msrb.mxu0 %v949_v15 }
 0x3b7   : > { %2367 = vmatpush.msra.mxu1 %v949_v15  ;;  %v945_v15 = vld [vmem:[%s5394_s10 + $0x128] sm:$0xff] }
 0x3b8   : > { %2107 = vmatpush.msrb.mxu0 %v948_v30 }
 0x3b9   : > { %2368 = vmatpush.msra.mxu1 %v948_v30 }
 0x3ba   : > { %v1807_v39 = vpop.f32.mrf.mxu3  ;;  %2108 = vmatpush.msrb.mxu0 %v947_v45 }
 0x3bb   : > { %v1856_v50 = vrot.slane %v1807_v39, 6  ;;  %v1860_v39 = vsel %vm1859_vm2, %v4321_v11, %v1855_v1  ;;  %2369 = vmatpush.msra.mxu1 %v947_v45  ;;  %v1699_v11 = vadd.f32 %v1698_v60, %v1697_v7  ;;  %v944_v1 = vld [vmem:[%s5394_s10 + $0x120] sm:$0xff]  ;;  %v1715_v45 = vadd.f32 %v1714_v4, %v1713_v14  ;;  %v943_v7 = vld [vmem:[%s5394_s10 + $0x118] sm:$0xff]  ;;  %v737_v4 = vld [vmem:[%s5389_s5 + $0x8] sm:$0xff] }
 0x3bc   : > { %2109 = vmatpush.msrb.mxu0 %v946_v13 }
 0x3bd   : > { %v1862_v10 = vsel %vm1861_vm3, %v1860_v39, %v1856_v50  ;;  %2370 = vmatpush.msra.mxu1 %v946_v13  ;;  %v1723_v50 = vadd.f32 %v1722_v24, %v1721_v9  ;;  %v942_v13 = vld [vmem:[%s5394_s10 + $0x110] sm:$0xff]  ;;  %v739_v24 = vld [vmem:[%s5389_s5 + $0x18] sm:$0xff] }
 0x3be   : > { %2110 = vmatpush.msrb.mxu0 %v945_v15 }
 0x3bf   : > { %2371 = vmatpush.msra.mxu1 %v945_v15 }
 0x3c0   : > { %2111 = vmatpush.msrb.mxu0 %v944_v1 }
 0x3c1   : > { %2372 = vmatpush.msra.mxu1 %v944_v1 }
 0x3c2   : > { %v1847_v29 = vpop.f32.mrf.mxu3  ;;  %2112 = vmatpush.msrb.mxu0 %v943_v7 }
 0x3c3   : > { %v1858_v5 = vrot.slane %v1847_v29, 4  ;;  %v1707_v29 = vadd.f32 %v1706_v63, %v1705_v54  ;;  %2373 = vmatpush.msra.mxu1 %v943_v7 }
 0x3c4   : > { %2113 = vmatpush.msrb.mxu0 %v942_v13 }
 0x3c5   : > { %v1864_v19 = vsel %vm1863_vm4, %v1857_v51, %v1858_v5  ;;  %2374 = vmatpush.msra.mxu1 %v942_v13  ;;  %v742_v13 = vld [vmem:[%s5389_s5 + $0x30] sm:$0xff] }
 0x3c6   : > { %v1866_v30 = vsel %vm1865_vm5, %v1862_v10, %v1864_v19  ;;  %v1731_v10 = vadd.f32 %v1730_v36, %v1729_v56  ;;  %v736_v56 = vld [vmem:[%s5389_s5] sm:$0xff]  ;;  %v941_v36 = vld [vmem:[%s5394_s10 + $0x108] sm:$0xff] }
 0x3c7   : > { %v1868_v57 = vmul.f32 %v1866_v30, %v897_v62  ;;  %2375 = vmatpush.msra.mxu1 %v941_v36  ;;  %2114 = vmatpush.msrb.mxu0 %v941_v36  ;;  %v988_v36 = vld [vmem:[%s5395_s11] sm:$0xff] }
 0x3c9   : > { %v1870_v51 = vperm.slane %v1868_v57, 0  ;;  %v1871_v5 = vperm.slane %v1868_v57, 1  ;;  %v1872_v39 = vperm.slane %v1868_v57, 2  ;;  %v1873_v38 = vperm.slane %v1868_v57, 3 }
 0x3ca   : > { %v1874_v19 = vperm.slane %v1868_v57, 4 }
 0x3cb   : > { %v1880_v60 = vadd.f32 %v1870_v51, %v1699_v11  ;;  %v1881_v54 = vadd.f32 %v1871_v5, %v1707_v29  ;;  %v4427_v14 = vadd.f32 %v1872_v39, %v1715_v45  ;;  %v1883_v9 = vadd.f32 %v1873_v38, %v1723_v50  ;;  %v816_v51 = vld [vmem:[%s5390_s6] sm:$0x1f] }
 0x3cc   : > { %v4432_v63 = vadd.f32 %v1874_v19, %v1731_v10  ;;  %v940_v39 = vld [vmem:[%s5394_s10 + $0x100] sm:$0xff] }
 0x3cd   : > { %v4443_v38 = vperm.slane %v1880_v60, 0  ;;  %v4445_v62 = vperm.slane %v1881_v54, 0  ;;  %v4447_v15 = vperm.slane %v1883_v9, 0  ;;  %v2300_v30 = vrot.slane %v1881_v54, 7  ;;  %2376 = vmatpush.msra.mxu1 %v940_v39  ;;  %2115 = vmatpush.msrb.mxu0 %v940_v39 }
 0x3ce   : > { %v2301_v11 = vrot.slane %v4427_v14, 6  ;;  %v2302_v57 = vrot.slane %v1883_v9, 5  ;;  %v2303_v1 = vrot.slane %v4432_v63, 4  ;;  %v4469_v9 = vpop.f32.mrf.mxu1 }
 0x3cf   : > { %v1890_v29 = vmul.f32 %v4443_v38, %v736_v56  ;;  %v1891_v45 = vmul.f32 %v4445_v62, %v737_v4  ;;  %v1893_v50 = vmul.f32 %v4447_v15, %v739_v24  ;;  %v2304_v5 = vsel %vm1859_vm2, %v1880_v60, %v2300_v30  ;;  %v741_v60 = vld [vmem:[%s5389_s5 + $0x28] sm:$0xff]  ;;  %v744_v4 = vld [vmem:[%s5389_s5 + $0x40] sm:$0xff] }
 0x3d0   : > { %v2305_v10 = vsel %vm1861_vm3, %v2304_v5, %v2301_v11  ;;  %v2306_v19 = vsel %vm1863_vm4, %v2302_v57, %v2303_v1  ;;  %v989_v24 = vld [vmem:[%s5395_s11 + $0x8] sm:$0xf]  ;;  %v1895_v30 = vmul.f32 %v4443_v38, %v741_v60  ;;  %v1896_v11 = vmul.f32 %v4445_v62, %v742_v13  ;;  %v746_v1 = vld [vmem:[%s5389_s5 + $0x50] sm:$0xff] }
 0x3d1   : > { %1986 = vmatmul.f32.vlgmr.msrb.gmra.mxu2 %v1890_v29  ;;  %2051 = vmatmul.f32.vlgmr.msra.gmra.mxu0 %v1891_v45  ;;  %v2307_v7 = vsel %vm1865_vm5, %v2305_v10, %v2306_v19  ;;  %v1898_v57 = vmul.f32 %v4447_v15, %v744_v4  ;;  %v747_v29 = vld [vmem:[%s5389_s5 + $0x58] sm:$0xff]  ;;  %v752_v10 = vld [vmem:[%s5389_s5 + $0x80] sm:$0xff]  ;;  %v754_v19 = vld [vmem:[%s5389_s5 + $0x90] sm:$0xff] }
 0x3d2   : > { %2181 = vmatmul.f32.vlgmr.msrb.gmra.mxu1 %v1893_v50  ;;  %v4467_v54 = vmul.f32 %v2307_v7, %v816_v51  ;;  %2341 = vmatpush.msra.mxu0 %v4208_v44  ;;  %v749_v50 = vld [vmem:[%s5389_s5 + $0x68] sm:$0xff]  ;;  %v1900_v44 = vmul.f32 %v4443_v38, %v746_v1  ;;  %v1901_v5 = vmul.f32 %v4445_v62, %v747_v29  ;;  %v776_v4 = vld [vmem:[%s5389_s5 + $0x140] sm:$0xff]  ;;  %v786_v1 = vld [vmem:[%s5389_s5 + $0x190] sm:$0xff] }
 0x3d3   : > { %v1903_v39 = vmul.f32 %v4447_v15, %v749_v50  ;;  %v1908_v60 = vmul.f32 %v4447_v15, %v754_v19  ;;  %v787_v29 = vld [vmem:[%s5389_s5 + $0x198] sm:$0xff] }
 0x3d4   : > { %v2311_v56 = vperm.slane %v4467_v54, 0  ;;  %v2314_v45 = vperm.slane %v4467_v54, 3  ;;  %2342 = vmatpush.msra.mxu0 %v4220_v21  ;;  %v751_v21 = vld [vmem:[%s5389_s5 + $0x78] sm:$0xff] }
 0x3d5   : > { %v791_v50 = vld [vmem:[%s5389_s5 + $0x1b8] sm:$0xff] }
 0x3d6   : > { %2337 = vmatmul.f32.vlgmr.msrb.gmra.mxu3 %v2311_v56  ;;  %v4503_v51 = vpop.f32.mrf.mxu1  ;;  %2343 = vmatpush.msra.mxu0 %v4229_v17  ;;  %v1905_v17 = vmul.f32 %v4443_v38, %v751_v21  ;;  %v797_v21 = vld [vmem:[%s5389_s5 + $0x1e8] sm:$0xff]  ;;  %v987_v19 = vld [vmem:[%s5394_s10 + $0x278] sm:$0xff] }
 0x3d7   : > { %3096 = vmatpush.msk.msrb.mxu3 %vm614_vm0, %v989_v24  ;;  %v777_v24 = vld [vmem:[%s5389_s5 + $0x148] sm:$0xff]  ;;  %2230 = vmatpush.msrb.mxu2 %v987_v19 }
 0x3d8   : > { %2344 = vmatpush.msra.mxu0 %v4237_v48  ;;  %v1906_v48 = vmul.f32 %v4445_v62, %v752_v10 }
 0x3d9   : > { %1989 = vmatmul.f32.gmra.mxu2 %v1895_v30  ;;  %2054 = vmatmul.f32.gmra.mxu0 %v1896_v11  ;;  %v1930_v30 = vmul.f32 %v4443_v38, %v776_v4  ;;  %v781_v11 = vld [vmem:[%s5389_s5 + $0x168] sm:$0xff] }
 0x3da   : > { %2184 = vmatmul.f32.gmra.mxu1 %v1898_v57  ;;  %2556 = vmatpush.msrb.mxu3 %v988_v36  ;;  %v782_v36 = vld [vmem:[%s5389_s5 + $0x170] sm:$0xff]  ;;  %v1935_v57 = vmul.f32 %v4443_v38, %v781_v11 }
 0x3db   : > { %2345 = vmatpush.msra.mxu0 %v4247_v53  ;;  %v756_v53 = vld [vmem:[%s5389_s5 + $0xa0] sm:$0xff] }
 0x3dd   : > { %2346 = vmatpush.msra.mxu0 %v4258_v33  ;;  %v1910_v33 = vmul.f32 %v4443_v38, %v756_v53  ;;  %v986_v53 = vld [vmem:[%s5394_s10 + $0x270] sm:$0xff] }
 0x3de   : > { %2397 = vmatmul.f32.vlgmr.msra.gmra.mxu3 %v2314_v45  ;;  %v4525_v7 = vpop.f32.mrf.mxu1  ;;  %v1940_v45 = vmul.f32 %v4443_v38, %v786_v1  ;;  %2231 = vmatpush.msrb.mxu2 %v986_v53 }
 0x3df   : > { %2347 = vmatpush.msra.mxu0 %v4267_v18 }
 0x3e1   : > { %1992 = vmatmul.f32.gmra.mxu2 %v1900_v44  ;;  %2057 = vmatmul.f32.gmra.mxu0 %v1901_v5  ;;  %v792_v44 = vld [vmem:[%s5389_s5 + $0x1c0] sm:$0xff]  ;;  %v1945_v5 = vmul.f32 %v4443_v38, %v791_v50  ;;  %v753_v50 = vld [vmem:[%s5389_s5 + $0x88] sm:$0xff] }
 0x3e2   : > { %2187 = vmatmul.f32.gmra.mxu1 %v1903_v39  ;;  %2348 = vmatpush.msra.mxu0 %v4279_v22  ;;  %v2313_v22 = vperm.slane %v4467_v54, 2  ;;  %v796_v39 = vld [vmem:[%s5389_s5 + $0x1e0] sm:$0xff] }
 0x3e3   : > { %v1950_v10 = vmul.f32 %v4443_v38, %v796_v39 }
 0x3e4   : > { %2349 = vmatpush.msra.mxu0 %v4288_v41  ;;  %v761_v41 = vld [vmem:[%s5389_s5 + $0xc8] sm:$0xff] }
 0x3e6   : > { %3097 = vmatmul.msk.f32.vlgmr.msrb.gmra.mxu3 %vm517_vm1, %v3370_v25  ;;  %v757_v25 = vld [vmem:[%s5389_s5 + $0xa8] sm:$0xff]  ;;  %2350 = vmatpush.msra.mxu0 %v4297_v23  ;;  %v4544_v13 = vpop.f32.mrf.mxu1  ;;  %v1915_v23 = vmul.f32 %v4443_v38, %v761_v41  ;;  %v984_v41 = vld [vmem:[%s5394_s10 + $0x260] sm:$0xff] }
 0x3e7   : > { %v1911_v18 = vmul.f32 %v4445_v62, %v757_v25  ;;  %v806_v25 = vld [vmem:[%s5389_s5 + $0x230] sm:$0xff] }
 0x3e8   : > { %2351 = vmatpush.msra.mxu0 %v4306_v2 }
 0x3e9   : > { %1995 = vmatmul.f32.gmra.mxu2 %v1905_v17  ;;  %2060 = vmatmul.f32.gmra.mxu0 %v1906_v48  ;;  %v801_v17 = vld [vmem:[%s5389_s5 + $0x208] sm:$0xff]  ;;  %v802_v48 = vld [vmem:[%s5389_s5 + $0x210] sm:$0xff] }
 0x3ea   : > { %2190 = vmatmul.f32.gmra.mxu1 %v1908_v60  ;;  %2352 = vmatpush.msra.mxu0 %v4316_v42  ;;  %v766_v42 = vld [vmem:[%s5389_s5 + $0xf0] sm:$0xff]  ;;  %v1956_v60 = vmul.f32 %v4445_v62, %v802_v48 }
 0x3ec   : > { %2353 = vmatpush.msra.mxu0 %v4328_v27  ;;  %v767_v27 = vld [vmem:[%s5389_s5 + $0xf8] sm:$0xff] }
 0x3ee   : > { %3098 = vmatmul.msk.f32.gmra.mxu3 %vm517_vm1, %v3379_v28  ;;  %v762_v28 = vld [vmem:[%s5389_s5 + $0xd0] sm:$0xff]  ;;  %2354 = vmatpush.msra.mxu0 %v4338_v59  ;;  %v1921_v59 = vmul.f32 %v4445_v62, %v767_v27  ;;  %v4677_v27 = vperm.slane %v4427_v14, 0 }
 0x3ef   : > { %v1916_v2 = vmul.f32 %v4445_v62, %v762_v28  ;;  %v811_v28 = vld [vmem:[%s5389_s5 + $0x258] sm:$0xff]  ;;  %v982_v14 = vld [vmem:[%s5394_s10 + $0x250] sm:$0xff] }
 0x3f0   : > { %2355 = vmatpush.msra.mxu0 %v4352_v47  ;;  %v771_v47 = vld [vmem:[%s5389_s5 + $0x118] sm:$0xff] }
 0x3f1   : > { %1998 = vmatmul.f32.gmra.mxu2 %v1910_v33  ;;  %2063 = vmatmul.f32.gmra.mxu0 %v1911_v18  ;;  %v1925_v56 = vmul.f32 %v4443_v38, %v771_v47  ;;  %v807_v33 = vld [vmem:[%s5389_s5 + $0x238] sm:$0xff]  ;;  %v1960_v18 = vmul.f32 %v4443_v38, %v806_v25  ;;  %v976_v25 = vld [vmem:[%s5394_s10 + $0x220] sm:$0xff] }
 0x3f2   : > { %2377 = vmatmul.f32.vlgmr.msra.gmra.mxu1 %v2313_v22  ;;  %2356 = vmatpush.msra.mxu0 %v4363_v35  ;;  %v772_v35 = vld [vmem:[%s5389_s5 + $0x120] sm:$0xff]  ;;  %v1961_v22 = vmul.f32 %v4445_v62, %v807_v33 }
 0x3f6   : > { %3099 = vmatmul.msk.f32.gmra.mxu3 %vm517_vm1, %v3388_v31  ;;  %v1920_v31 = vmul.f32 %v4443_v38, %v766_v42  ;;  %v983_v42 = vld [vmem:[%s5394_s10 + $0x258] sm:$0xff] }
 0x3f9   : > { %2001 = vmatmul.f32.gmra.mxu2 %v1915_v23  ;;  %2066 = vmatmul.f32.gmra.mxu0 %v1916_v2  ;;  %v812_v23 = vld [vmem:[%s5389_s5 + $0x260] sm:$0xff] }
 0x3fa   : > { %v1966_v2 = vmul.f32 %v4445_v62, %v812_v23  ;;  %v975_v23 = vld [vmem:[%s5394_s10 + $0x218] sm:$0xff] }
 0x3fe   : > { %3100 = vmatmul.msk.f32.gmra.mxu3 %vm517_vm1, %v3397_v34  ;;  %v1926_v34 = vmul.f32 %v4445_v62, %v772_v35  ;;  %v743_v35 = vld [vmem:[%s5389_s5 + $0x38] sm:$0xff] }
 0x401   : > { %2004 = vmatmul.f32.gmra.mxu2 %v1920_v31  ;;  %2069 = vmatmul.f32.gmra.mxu0 %v1921_v59  ;;  %v738_v31 = vld [vmem:[%s5389_s5 + $0x10] sm:$0xff] }
 0x406   : > { %3101 = vmatmul.msk.f32.gmra.mxu3 %vm517_vm1, %v3406_v37  ;;  %v1931_v37 = vmul.f32 %v4445_v62, %v777_v24  ;;  %v1897_v24 = vmul.f32 %v4677_v27, %v743_v35  ;;  %v773_v35 = vld [vmem:[%s5389_s5 + $0x128] sm:$0xff] }
 0x409   : > { %2007 = vmatmul.f32.gmra.mxu2 %v1925_v56  ;;  %2072 = vmatmul.f32.gmra.mxu0 %v1926_v34  ;;  %v981_v34 = vld [vmem:[%s5394_s10 + $0x248] sm:$0xff] }
 0x40e   : > { %3102 = vmatmul.msk.f32.gmra.mxu3 %vm517_vm1, %v3415_v40  ;;  %v1936_v40 = vmul.f32 %v4445_v62, %v782_v36  ;;  %v748_v36 = vld [vmem:[%s5389_s5 + $0x60] sm:$0xff] }
 0x40f   : > { %v1902_v1 = vmul.f32 %v4677_v27, %v748_v36 }
 0x411   : > { %2010 = vmatmul.f32.gmra.mxu2 %v1930_v30  ;;  %2075 = vmatmul.f32.gmra.mxu0 %v1931_v37  ;;  %v980_v37 = vld [vmem:[%s5394_s10 + $0x240] sm:$0xff] }
 0x416   : > { %3103 = vmatmul.msk.f32.gmra.mxu3 %vm517_vm1, %v3424_v43  ;;  %v1941_v43 = vmul.f32 %v4445_v62, %v787_v29 }
 0x419   : > { %2013 = vmatmul.f32.gmra.mxu2 %v1935_v57  ;;  %2078 = vmatmul.f32.gmra.mxu0 %v1936_v40 }
 0x41e   : > { %3104 = vmatmul.msk.f32.gmra.mxu3 %vm517_vm1, %v3433_v46  ;;  %v1946_v46 = vmul.f32 %v4445_v62, %v792_v44 }
 0x421   : > { %2016 = vmatmul.f32.gmra.mxu2 %v1940_v45  ;;  %2081 = vmatmul.f32.gmra.mxu0 %v1941_v43  ;;  %v979_v45 = vld [vmem:[%s5394_s10 + $0x238] sm:$0xff] }
 0x426   : > { %3105 = vmatmul.msk.f32.gmra.mxu3 %vm517_vm1, %v3442_v49  ;;  %v1951_v49 = vmul.f32 %v4445_v62, %v797_v21  ;;  %v1892_v62 = vmul.f32 %v4677_v27, %v738_v31  ;;  %v978_v21 = vld [vmem:[%s5394_s10 + $0x230] sm:$0xff] }
 0x429   : > { %2019 = vmatmul.f32.gmra.mxu2 %v1945_v5  ;;  %2084 = vmatmul.f32.gmra.mxu0 %v1946_v46  ;;  %v1907_v46 = vmul.f32 %v4677_v27, %v753_v50 }
 0x42e   : > { %3106 = vmatmul.msk.f32.gmra.mxu3 %vm517_vm1, %v3451_v52  ;;  %v1955_v52 = vmul.f32 %v4443_v38, %v801_v17  ;;  %v977_v17 = vld [vmem:[%s5394_s10 + $0x228] sm:$0xff] }
 0x431   : > { %2022 = vmatmul.f32.gmra.mxu2 %v1950_v10  ;;  %2087 = vmatmul.f32.gmra.mxu0 %v1951_v49  ;;  %v758_v49 = vld [vmem:[%s5389_s5 + $0xb0] sm:$0xff] }
 0x436   : > { %3107 = vmatmul.msk.f32.gmra.mxu3 %vm517_vm1, %v3460_v55  ;;  %v985_v55 = vld [vmem:[%s5394_s10 + $0x268] sm:$0xff] }
 0x437   : > { %2232 = vmatpush.msrb.mxu2 %v985_v55 }
 0x439   : > { %2025 = vmatmul.f32.gmra.mxu2 %v1955_v52  ;;  %2090 = vmatmul.f32.gmra.mxu0 %v1956_v60  ;;  %v1912_v52 = vmul.f32 %v4677_v27, %v758_v49  ;;  %v5430_v49 = vld [vmem:[#allocation3_spill] sm:$0xff] }
 0x43a   : > { %2233 = vmatpush.msrb.mxu2 %v984_v41 }
 0x43c   : > { %2234 = vmatpush.msrb.mxu2 %v983_v42 }
 0x43e   : > { %3108 = vmatmul.msk.f32.gmra.mxu3 %vm517_vm1, %v3469_v58  ;;  %v1965_v58 = vmul.f32 %v4443_v38, %v811_v28  ;;  %2235 = vmatpush.msrb.mxu2 %v982_v14 }
 0x440   : > { %2236 = vmatpush.msrb.mxu2 %v981_v34 }
 0x441   : > { %2028 = vmatmul.f32.gmra.mxu2 %v1960_v18  ;;  %2093 = vmatmul.f32.gmra.mxu0 %v1961_v22 }
 0x442   : > { %2237 = vmatpush.msrb.mxu2 %v980_v37 }
 0x444   : > { %2238 = vmatpush.msrb.mxu2 %v979_v45 }
 0x446   : > { %3109 = vmatmul.msk.f32.gmra.mxu3 %vm517_vm1, %v3478_v61  ;;  %v759_v61 = vld [vmem:[%s5389_s5 + $0xb8] sm:$0xff]  ;;  %2239 = vmatpush.msrb.mxu2 %v978_v21 }
 0x447   : > { %v1913_v59 = vmul.f32 %v4447_v15, %v759_v61 }
 0x448   : > { %2240 = vmatpush.msrb.mxu2 %v977_v17 }
 0x449   : > { %2031 = vmatmul.f32.gmra.mxu2 %v1965_v58  ;;  %2096 = vmatmul.f32.gmra.mxu0 %v1966_v2 }
 0x44a   : > { %2241 = vmatpush.msrb.mxu2 %v976_v25 }
 0x44c   : > { %2242 = vmatpush.msrb.mxu2 %v975_v23 }
 0x44e   : > { %v2052_v38 = vpop.f32.mrf.mxu0  ;;  %3110 = vmatmul.msk.f32.gmra.mxu3 %vm517_vm1, %v3487_v0  ;;  %v764_v0 = vld [vmem:[%s5389_s5 + $0xe0] sm:$0xff] }
 0x44f   : > { %v1918_v30 = vmul.f32 %v4447_v15, %v764_v0 }
 0x451   : > { %2116 = vmatmul.f32.vlgmr.msrb.gmra.mxu0 %v1892_v62  ;;  %2193 = vmatmul.f32.vlgmr.msra.gmra.mxu2 %v1913_v59  ;;  %v974_v59 = vld [vmem:[%s5394_s10 + $0x210] sm:$0xff] }
 0x452   : > { %2401 = vmatpush.msrb.mxu0 %v987_v19  ;;  %2243 = vmatpush.msrb.mxu2 %v974_v59 }
 0x454   : > { %v1987_v47 = vpop.f32.mrf.mxu2  ;;  %2402 = vmatpush.msrb.mxu0 %v986_v53  ;;  %v4755_v53 = vpop.f32.mrf.mxu1 }
 0x455   : > { %v4698_v56 = vadd.f32 %v2052_v38, %v1987_v47 }
 0x456   : > { %v2055_v4 = vpop.f32.mrf.mxu0  ;;  %2403 = vmatpush.msrb.mxu0 %v985_v55  ;;  %3111 = vmatmul.msk.f32.gmra.mxu3 %vm517_vm1, %v3496_v3  ;;  %v769_v3 = vld [vmem:[%s5389_s5 + $0x108] sm:$0xff]  ;;  %v763_v55 = vld [vmem:[%s5389_s5 + $0xd8] sm:$0xff] }
 0x457   : > { %v1923_v29 = vmul.f32 %v4447_v15, %v769_v3  ;;  %v778_v3 = vld [vmem:[%s5389_s5 + $0x150] sm:$0xff] }
 0x458   : > { %2404 = vmatpush.msrb.mxu0 %v984_v41  ;;  %v1917_v41 = vmul.f32 %v4677_v27, %v763_v55  ;;  %v1932_v50 = vmul.f32 %v4677_v27, %v778_v3  ;;  %v5433_v3 = vld [vmem:[#allocation9_spill] sm:$0xff] }
 0x459   : > { %2119 = vmatmul.f32.gmra.mxu0 %v1897_v24  ;;  %2196 = vmatmul.f32.gmra.mxu2 %v1918_v30  ;;  %v4800_v0 = vpop.f32.mrf.mxu3  ;;  %v1927_v30 = vmul.f32 %v4677_v27, %v773_v35 }
 0x45a   : > { %2405 = vmatpush.msrb.mxu0 %v983_v42  ;;  %v768_v42 = vld [vmem:[%s5389_s5 + $0x100] sm:$0xff] }
 0x45b   : > { %v1922_v38 = vmul.f32 %v4677_v27, %v768_v42 }
 0x45c   : > { %v1990_v11 = vpop.f32.mrf.mxu2  ;;  %2406 = vmatpush.msrb.mxu0 %v982_v14  ;;  %v4775_v58 = vpop.f32.mrf.mxu1 }
 0x45d   : > { %v4716_v57 = vadd.f32 %v2055_v4, %v1990_v11  ;;  %v973_v4 = vld [vmem:[%s5394_s10 + $0x208] sm:$0xff]  ;;  %v972_v11 = vld [vmem:[%s5394_s10 + $0x200] sm:$0xff] }
 0x45e   : > { %v2058_v40 = vpop.f32.mrf.mxu0  ;;  %2407 = vmatpush.msrb.mxu0 %v981_v34  ;;  %3112 = vmatmul.msk.f32.gmra.mxu3 %vm517_vm1, %v3505_v6  ;;  %v774_v6 = vld [vmem:[%s5389_s5 + $0x130] sm:$0xff] }
 0x45f   : > { %v1928_v39 = vmul.f32 %v4447_v15, %v774_v6  ;;  %2244 = vmatpush.msrb.mxu2 %v973_v4 }
 0x460   : > { %2408 = vmatpush.msrb.mxu0 %v980_v37 }
 0x461   : > { %2122 = vmatmul.f32.gmra.mxu0 %v1902_v1  ;;  %2199 = vmatmul.f32.gmra.mxu2 %v1923_v29 }
 0x462   : > { %2409 = vmatpush.msrb.mxu0 %v979_v45  ;;  %2245 = vmatpush.msrb.mxu2 %v972_v11  ;;  %v4824_v45 = vpop.f32.mrf.mxu3 }
 0x464   : > { %v1993_v43 = vpop.f32.mrf.mxu2  ;;  %2410 = vmatpush.msrb.mxu0 %v978_v21  ;;  %v4792_v14 = vpop.f32.mrf.mxu1 }
 0x465   : > { %v4731_v44 = vadd.f32 %v2058_v40, %v1993_v43  ;;  %v799_v40 = vld [vmem:[%s5389_s5 + $0x1f8] sm:$0xff]  ;;  %v5429_v43 = vld [vmem:[#allocation2_spill] sm:$0xff] }
 0x466   : > { %v2061_v5 = vpop.f32.mrf.mxu0  ;;  %3113 = vmatmul.msk.f32.gmra.mxu3 %vm517_vm1, %v3513_v8  ;;  %v779_v8 = vld [vmem:[%s5389_s5 + $0x158] sm:$0xff]  ;;  %2411 = vmatpush.msrb.mxu0 %v977_v17  ;;  %v1953_v6 = vmul.f32 %v4447_v15, %v799_v40 }
 0x467   : > { %v1933_v60 = vmul.f32 %v4447_v15, %v779_v8 }
 0x468   : > { %2412 = vmatpush.msrb.mxu0 %v976_v25  ;;  %v788_v25 = vld [vmem:[%s5389_s5 + $0x1a0] sm:$0xff] }
 0x469   : > { %2125 = vmatmul.f32.gmra.mxu0 %v1907_v46  ;;  %2202 = vmatmul.f32.gmra.mxu2 %v1928_v39  ;;  %v783_v46 = vld [vmem:[%s5389_s5 + $0x178] sm:$0xff]  ;;  %v804_v39 = vld [vmem:[%s5389_s5 + $0x220] sm:$0xff] }
 0x46a   : > { %2413 = vmatpush.msrb.mxu0 %v975_v23  ;;  %v1937_v8 = vmul.f32 %v4677_v27, %v783_v46  ;;  %v1958_v17 = vmul.f32 %v4447_v15, %v804_v39 }
 0x46c   : > { %v1996_v10 = vpop.f32.mrf.mxu2  ;;  %2414 = vmatpush.msrb.mxu0 %v974_v59  ;;  %v4822_v1 = vpop.f32.mrf.mxu1  ;;  %v5432_v59 = vld [vmem:[#allocation7_spill] sm:$0xff] }
 0x46d   : > { %v4746_v19 = vadd.f32 %v2061_v5, %v1996_v10 }
 0x46e   : > { %v2064_v48 = vpop.f32.mrf.mxu0  ;;  %3114 = vmatmul.msk.f32.gmra.mxu3 %vm517_vm1, %v3524_v12  ;;  %v784_v12 = vld [vmem:[%s5389_s5 + $0x180] sm:$0xff]  ;;  %2415 = vmatpush.msrb.mxu0 %v973_v4 }
 0x46f   : > { %v1938_v28 = vmul.f32 %v4447_v15, %v784_v12 }
 0x470   : > { %2416 = vmatpush.msrb.mxu0 %v972_v11 }
 0x471   : > { %2128 = vmatmul.f32.gmra.mxu0 %v1912_v52  ;;  %2205 = vmatmul.f32.gmra.mxu2 %v1933_v60  ;;  %v4844_v52 = vpop.f32.mrf.mxu3 }
 0x474   : > { %v1999_v33 = vpop.f32.mrf.mxu2 }
 0x475   : > { %v4766_v18 = vadd.f32 %v2064_v48, %v1999_v33  ;;  %v4842_v48 = vpop.f32.mrf.mxu1  ;;  %v809_v33 = vld [vmem:[%s5389_s5 + $0x248] sm:$0xff] }
 0x476   : > { %v2067_v22 = vpop.f32.mrf.mxu0  ;;  %3115 = vmatmul.msk.f32.gmra.mxu3 %vm517_vm1, %v3535_v16  ;;  %v789_v16 = vld [vmem:[%s5389_s5 + $0x1a8] sm:$0xff] }
 0x477   : > { %v1943_v62 = vmul.f32 %v4447_v15, %v789_v16  ;;  %v793_v16 = vld [vmem:[%s5389_s5 + $0x1c8] sm:$0xff] }
 0x479   : > { %2131 = vmatmul.f32.gmra.mxu0 %v1917_v41  ;;  %2208 = vmatmul.f32.gmra.mxu2 %v1938_v28  ;;  %v1942_v41 = vmul.f32 %v4677_v27, %v788_v25  ;;  %v1963_v28 = vmul.f32 %v4447_v15, %v809_v33  ;;  %v750_v25 = vld [vmem:[%s5389_s5 + $0x70] sm:$0xff] }
 0x47c   : > { %v2002_v2 = vpop.f32.mrf.mxu2 }
 0x47d   : > { %v4783_v31 = vadd.f32 %v2067_v22, %v2002_v2  ;;  %v5431_v22 = vld [vmem:[#allocation5_spill] sm:$0xff]  ;;  %v4858_v23 = vpop.f32.mrf.mxu1  ;;  %v4860_v2 = vpop.f32.mrf.mxu3 }
 0x47e   : > { %v2070_v61 = vpop.f32.mrf.mxu0  ;;  %3116 = vmatmul.msk.f32.gmra.mxu3 %vm517_vm1, %v3546_v20  ;;  %v794_v20 = vld [vmem:[%s5389_s5 + $0x1d0] sm:$0xff] }
 0x47f   : > { %v1948_v37 = vmul.f32 %v4447_v15, %v794_v20  ;;  %v4875_v20 = vperm.slane %v4432_v63, 0 }
 0x481   : > { %2134 = vmatmul.f32.gmra.mxu0 %v1922_v38  ;;  %2211 = vmatmul.f32.gmra.mxu2 %v1943_v62 }
 0x484   : > { %v2005_v47 = vpop.f32.mrf.mxu2 }
 0x485   : > { %v4802_v34 = vadd.f32 %v2070_v61, %v2005_v47  ;;  %v814_v61 = vld [vmem:[%s5389_s5 + $0x270] sm:$0xff]  ;;  %v1947_v47 = vmul.f32 %v4677_v27, %v793_v16  ;;  %v4877_v4 = vpop.f32.mrf.mxu1  ;;  %v4885_v11 = vpop.f32.mrf.mxu3 }
 0x486   : > { %v2073_v24 = vpop.f32.mrf.mxu0  ;;  %3117 = vmatmul.msk.f32.gmra.mxu3 %vm517_vm1, %v3557_v26  ;;  %v1968_v35 = vmul.f32 %v4447_v15, %v814_v61 }
 0x489   : > { %2137 = vmatmul.f32.gmra.mxu0 %v1927_v30  ;;  %2214 = vmatmul.f32.gmra.mxu2 %v1948_v37  ;;  %v798_v30 = vld [vmem:[%s5389_s5 + $0x1f0] sm:$0xff]  ;;  %v740_v37 = vld [vmem:[%s5389_s5 + $0x20] sm:$0xff] }
 0x48a   : > { %v1952_v63 = vmul.f32 %v4677_v27, %v798_v30  ;;  %v1894_v40 = vmul.f32 %v4875_v20, %v740_v37 }
 0x48c   : > { %v2008_v36 = vpop.f32.mrf.mxu2 }
 0x48d   : > { %v4820_v26 = vadd.f32 %v2073_v24, %v2008_v36  ;;  %v4903_v39 = vpop.f32.mrf.mxu3 }
 0x48e   : > { %v2076_v29 = vpop.f32.mrf.mxu0  ;;  %3118 = vmatmul.msk.f32.gmra.mxu3 %vm517_vm1, %v5429_v43  ;;  %v803_v43 = vld [vmem:[%s5389_s5 + $0x218] sm:$0xff] }
 0x491   : > { %2140 = vmatmul.f32.gmra.mxu0 %v1932_v50  ;;  %2217 = vmatmul.f32.gmra.mxu2 %v1953_v6  ;;  %v745_v50 = vld [vmem:[%s5389_s5 + $0x48] sm:$0xff] }
 0x494   : > { %v2011_v5 = vpop.f32.mrf.mxu2 }
 0x495   : > { %v4836_v21 = vadd.f32 %v2076_v29, %v2011_v5  ;;  %v4901_v5 = vpop.f32.mrf.mxu1  ;;  %v4923_v16 = vpop.f32.mrf.mxu3 }
 0x496   : > { %v2079_v10 = vpop.f32.mrf.mxu0  ;;  %3119 = vmatmul.msk.f32.gmra.mxu3 %vm517_vm1, %v5430_v49  ;;  %v1957_v49 = vmul.f32 %v4677_v27, %v803_v43 }
 0x499   : > { %2143 = vmatmul.f32.gmra.mxu0 %v1937_v8  ;;  %2220 = vmatmul.f32.gmra.mxu2 %v1958_v17  ;;  %v1899_v8 = vmul.f32 %v4875_v20, %v745_v50 }
 0x49c   : > { %v2014_v60 = vpop.f32.mrf.mxu2 }
 0x49d   : > { %v4852_v55 = vadd.f32 %v2079_v10, %v2014_v60  ;;  %v5434_v10 = vld [vmem:[#allocation10_spill] sm:$0xff] }
 0x49e   : > { %v2082_v12 = vpop.f32.mrf.mxu0  ;;  %3120 = vmatmul.msk.f32.gmra.mxu3 %vm517_vm1, %v5431_v22  ;;  %v808_v60 = vld [vmem:[%s5389_s5 + $0x240] sm:$0xff]  ;;  %v5435_v22 = vld [vmem:[#allocation12_spill] sm:$0xff] }
 0x4a1   : > { %2146 = vmatmul.f32.gmra.mxu0 %v1942_v41  ;;  %2223 = vmatmul.f32.gmra.mxu2 %v1963_v28  ;;  %v1962_v41 = vmul.f32 %v4677_v27, %v808_v60  ;;  %v1904_v28 = vmul.f32 %v4875_v20, %v750_v25 }
 0x4a4   : > { %v2017_v42 = vpop.f32.mrf.mxu2 }
 0x4a5   : > { %v4868_v38 = vadd.f32 %v2082_v12, %v2017_v42  ;;  %v4921_v42 = vpop.f32.mrf.mxu1 }
 0x4a6   : > { %v2085_v62 = vpop.f32.mrf.mxu0  ;;  %3121 = vmatmul.msk.f32.gmra.mxu3 %vm517_vm1, %v5432_v59  ;;  %v755_v59 = vld [vmem:[%s5389_s5 + $0x98] sm:$0xff] }
 0x4a7   : > { %v1909_v37 = vmul.f32 %v4875_v20, %v755_v59 }
 0x4a9   : > { %2149 = vmatmul.f32.gmra.mxu0 %v1947_v47  ;;  %2226 = vmatmul.f32.gmra.mxu2 %v1968_v35 }
 0x4ac   : > { %v2020_v24 = vpop.f32.mrf.mxu2 }
 0x4ad   : > { %v4887_v36 = vadd.f32 %v2085_v62, %v2020_v24  ;;  %v813_v62 = vld [vmem:[%s5389_s5 + $0x268] sm:$0xff]  ;;  %v5436_v24 = vld [vmem:[#allocation14_spill] sm:$0xff] }
 0x4ae   : > { %v2088_v15 = vpop.f32.mrf.mxu0  ;;  %3122 = vmatmul.msk.f32.gmra.mxu3 %vm517_vm1, %v5433_v3  ;;  %v1967_v30 = vmul.f32 %v4677_v27, %v813_v62  ;;  %v4939_v3 = vpop.f32.mrf.mxu3  ;;  %v5437_v27 = vld [vmem:[#allocation16_spill] sm:$0xff] }
 0x4b1   : > { %2152 = vmatmul.f32.gmra.mxu0 %v1952_v63  ;;  %2246 = vmatmul.f32.vlgmr.msrb.gmra.mxu2 %v1894_v40  ;;  %v760_v40 = vld [vmem:[%s5389_s5 + $0xc0] sm:$0xff] }
 0x4b4   : > { %v2023_v29 = vpop.f32.mrf.mxu2 }
 0x4b5   : > { %v4899_v6 = vadd.f32 %v2088_v15, %v2023_v29  ;;  %v4937_v15 = vpop.f32.mrf.mxu1 }
 0x4b6   : > { %v2091_v46 = vpop.f32.mrf.mxu0  ;;  %3123 = vmatmul.msk.f32.gmra.mxu3 %vm517_vm1, %v5434_v10  ;;  %v2312_v10 = vperm.slane %v4467_v54, 1  ;;  %v4958_v60 = vpop.f32.mrf.mxu3 }
 0x4b9   : > { %2155 = vmatmul.f32.gmra.mxu0 %v1957_v49  ;;  %2249 = vmatmul.f32.gmra.mxu2 %v1899_v8 }
 0x4bc   : > { %v2026_v17 = vpop.f32.mrf.mxu2 }
 0x4bd   : > { %v4915_v33 = vadd.f32 %v2091_v46, %v2026_v17  ;;  %v1914_v46 = vmul.f32 %v4875_v20, %v760_v40  ;;  %v4953_v49 = vpop.f32.mrf.mxu1  ;;  %v765_v17 = vld [vmem:[%s5389_s5 + $0xe8] sm:$0xff] }
 0x4be   : > { %v2094_v12 = vpop.f32.mrf.mxu0  ;;  %3124 = vmatmul.msk.f32.gmra.mxu3 %vm517_vm1, %v5435_v22  ;;  %v1919_v22 = vmul.f32 %v4875_v20, %v765_v17 }
 0x4c1   : > { %2158 = vmatmul.f32.gmra.mxu0 %v1962_v41  ;;  %2252 = vmatmul.f32.gmra.mxu2 %v1904_v28  ;;  %v2315_v41 = vperm.slane %v4467_v54, 4 }
 0x4c4   : > { %v2029_v61 = vpop.f32.mrf.mxu2 }
 0x4c5   : > { %v4931_v47 = vadd.f32 %v2094_v12, %v2029_v61  ;;  %v5438_v12 = vld [vmem:[#allocation18_spill] sm:$0xff]  ;;  %v770_v61 = vld [vmem:[%s5389_s5 + $0x110] sm:$0xff]  ;;  %v4970_v62 = vpop.f32.mrf.mxu1 }
 0x4c6   : > { %v2097_v35 = vpop.f32.mrf.mxu0  ;;  %3125 = vmatmul.msk.f32.gmra.mxu3 %vm517_vm1, %v5436_v24  ;;  %v5439_v24 = vld [vmem:[#allocation19_spill] sm:$0xff]  ;;  %v1924_v54 = vmul.f32 %v4875_v20, %v770_v61 }
 0x4c9   : > { %2161 = vmatmul.f32.gmra.mxu0 %v1967_v30  ;;  %2255 = vmatmul.f32.gmra.mxu2 %v1909_v37  ;;  %v775_v37 = vld [vmem:[%s5389_s5 + $0x138] sm:$0xff] }
 0x4cc   : > { %v2032_v63 = vpop.f32.mrf.mxu2 }
 0x4cd   : > { %v4944_v29 = vadd.f32 %v2097_v35, %v2032_v63  ;;  %v4972_v35 = vpop.f32.mrf.mxu3 }
 0x4ce   : > { %v2117_v43 = vpop.f32.mrf.mxu0  ;;  %3126 = vmatmul.msk.f32.gmra.mxu3 %vm517_vm1, %v5437_v27  ;;  %v4987_v27 = vpop.f32.mrf.mxu1 }
 0x4cf   : > { %v4947_v50 = vadd.f32 %v2117_v43, %v4698_v56  ;;  %v1929_v43 = vmul.f32 %v4875_v20, %v775_v37  ;;  %5440 = vst [vmem:[#allocation2_spill] sm:$0xff] %v4987_v27 }
 0x4d1   : > { %2258 = vmatmul.f32.gmra.mxu2 %v1914_v46  ;;  %2357 = vmatmul.f32.vlgmr.msra.gmra.mxu0 %v2312_v10  ;;  %v780_v46 = vld [vmem:[%s5389_s5 + $0x160] sm:$0xff] }
 0x4d4   : > { %v2194_v8 = vpop.f32.mrf.mxu2 }
 0x4d6   : > { %v2120_v56 = vpop.f32.mrf.mxu0  ;;  %3127 = vmatmul.msk.f32.gmra.mxu3 %vm517_vm1, %v5438_v12 }
 0x4d7   : > { %v4961_v25 = vadd.f32 %v2120_v56, %v4716_v57  ;;  %v1934_v56 = vmul.f32 %v4875_v20, %v780_v46 }
 0x4d9   : > { %2261 = vmatmul.f32.gmra.mxu2 %v1919_v22  ;;  %2417 = vmatmul.f32.vlgmr.msrb.gmra.mxu0 %v2315_v41  ;;  %v785_v41 = vld [vmem:[%s5389_s5 + $0x188] sm:$0xff] }
 0x4dc   : > { %v2197_v28 = vpop.f32.mrf.mxu2 }
 0x4de   : > { %v2123_v59 = vpop.f32.mrf.mxu0  ;;  %3128 = vmatmul.msk.f32.gmra.mxu3 %vm517_vm1, %v5439_v24  ;;  %v1939_v24 = vmul.f32 %v4875_v20, %v785_v41 }
 0x4df   : > { %v4975_v57 = vadd.f32 %v2123_v59, %v4731_v44 }
 0x4e1   : > { %2264 = vmatmul.f32.gmra.mxu2 %v1924_v54 }
 0x4e4   : > { %v2200_v30 = vpop.f32.mrf.mxu2 }
 0x4e6   : > { %v2126_v63 = vpop.f32.mrf.mxu0 }
 0x4e7   : > { %v4984_v40 = vadd.f32 %v2126_v63, %v4746_v19  ;;  %v4996_v19 = vpop.f32.mrf.mxu1 }
 0x4e8   : > { %5441 = vst [vmem:[#allocation3_spill] sm:$0xff] %v4996_v19 }
 0x4e9   : > { %2267 = vmatmul.f32.gmra.mxu2 %v1929_v43 }
 0x4ec   : > { %v2203_v44 = vpop.f32.mrf.mxu2 }
 0x4ee   : > { %v2129_v10 = vpop.f32.mrf.mxu0 }
 0x4ef   : > { %v2130_v17 = vadd.f32 %v2129_v10, %v4766_v18  ;;  %v5005_v18 = vpop.f32.mrf.mxu1 }
 0x4f0   : > { %5442 = vst [vmem:[#allocation5_spill] sm:$0xff] %v5005_v18 }
 0x4f1   : > { %2270 = vmatmul.f32.gmra.mxu2 %v1934_v56  ;;  %v4994_v12 = vadd.f32 %v2194_v8, %v2130_v17  ;;  %v790_v8 = vld [vmem:[%s5389_s5 + $0x1b0] sm:$0xff] }
 0x4f2   : > { %v1944_v46 = vmul.f32 %v4875_v20, %v790_v8 }
 0x4f4   : > { %v2206_v22 = vpop.f32.mrf.mxu2 }
 0x4f6   : > { %v2132_v61 = vpop.f32.mrf.mxu0 }
 0x4f7   : > { %v2133_v59 = vadd.f32 %v2132_v61, %v4783_v31  ;;  %v5017_v17 = vpop.f32.mrf.mxu1 }
 0x4f8   : > { %5443 = vst [vmem:[#allocation7_spill] sm:$0xff] %v5017_v17 }
 0x4f9   : > { %2273 = vmatmul.f32.gmra.mxu2 %v1939_v24  ;;  %v5003_v54 = vadd.f32 %v2197_v28, %v2133_v59  ;;  %v795_v28 = vld [vmem:[%s5389_s5 + $0x1d8] sm:$0xff] }
 0x4fa   : > { %v1949_v61 = vmul.f32 %v4875_v20, %v795_v28 }
 0x4fc   : > { %v2209_v37 = vpop.f32.mrf.mxu2 }
 0x4fe   : > { %v2135_v63 = vpop.f32.mrf.mxu0 }
 0x4ff   : > { %v2136_v43 = vadd.f32 %v2135_v63, %v4802_v34 }
 0x501   : > { %2276 = vmatmul.f32.gmra.mxu2 %v1944_v46  ;;  %v5012_v10 = vadd.f32 %v2200_v30, %v2136_v43  ;;  %v800_v30 = vld [vmem:[%s5389_s5 + $0x200] sm:$0xff]  ;;  %v5028_v43 = vpop.f32.mrf.mxu1 }
 0x502   : > { %v1954_v63 = vmul.f32 %v4875_v20, %v800_v30  ;;  %5444 = vst [vmem:[#allocation9_spill] sm:$0xff] %v5028_v43 }
 0x504   : > { %v2212_v31 = vpop.f32.mrf.mxu2 }
 0x506   : > { %v2138_v56 = vpop.f32.mrf.mxu0 }
 0x507   : > { %v2139_v41 = vadd.f32 %v2138_v56, %v4820_v26 }
 0x509   : > { %2279 = vmatmul.f32.gmra.mxu2 %v1949_v61  ;;  %v5021_v59 = vadd.f32 %v2203_v44, %v2139_v41  ;;  %v805_v44 = vld [vmem:[%s5389_s5 + $0x228] sm:$0xff] }
 0x50a   : > { %v1959_v41 = vmul.f32 %v4875_v20, %v805_v44 }
 0x50c   : > { %v2215_v34 = vpop.f32.mrf.mxu2 }
 0x50e   : > { %v2141_v24 = vpop.f32.mrf.mxu0 }
 0x50f   : > { %v2142_v8 = vadd.f32 %v2141_v24, %v4836_v21  ;;  %v5037_v21 = vpop.f32.mrf.mxu1 }
 0x510   : > { %5445 = vst [vmem:[#allocation10_spill] sm:$0xff] %v5037_v21 }
 0x511   : > { %2282 = vmatmul.f32.gmra.mxu2 %v1954_v63  ;;  %v2207_v46 = vadd.f32 %v2206_v22, %v2142_v8  ;;  %v810_v22 = vld [vmem:[%s5389_s5 + $0x250] sm:$0xff] }
 0x512   : > { %v1964_v63 = vmul.f32 %v4875_v20, %v810_v22 }
 0x514   : > { %v2218_v26 = vpop.f32.mrf.mxu2 }
 0x516   : > { %v2144_v28 = vpop.f32.mrf.mxu0 }
 0x517   : > { %v2145_v56 = vadd.f32 %v2144_v28, %v4852_v55  ;;  %v5046_v55 = vpop.f32.mrf.mxu1 }
 0x518   : > { %5446 = vst [vmem:[#allocation12_spill] sm:$0xff] %v5046_v55 }
 0x519   : > { %2285 = vmatmul.f32.gmra.mxu2 %v1959_v41  ;;  %v5035_v61 = vadd.f32 %v2209_v37, %v2145_v56  ;;  %v815_v37 = vld [vmem:[%s5389_s5 + $0x278] sm:$0xff] }
 0x51a   : > { %v1969_v41 = vmul.f32 %v4875_v20, %v815_v37 }
 0x51c   : > { %v2221_v30 = vpop.f32.mrf.mxu2 }
 0x51e   : > { %v2147_v24 = vpop.f32.mrf.mxu0 }
 0x51f   : > { %v2148_v8 = vadd.f32 %v2147_v24, %v4868_v38  ;;  %v2182_v38 = vpop.f32.mrf.mxu1 }
 0x521   : > { %2288 = vmatmul.f32.gmra.mxu2 %v1964_v63  ;;  %v5044_v43 = vadd.f32 %v2212_v31, %v2148_v8  ;;  %v2183_v63 = vadd.f32 %v2182_v38, %v4947_v50 }
 0x524   : > { %v2224_v44 = vpop.f32.mrf.mxu2 }
 0x526   : > { %v2150_v28 = vpop.f32.mrf.mxu0 }
 0x527   : > { %v2151_v56 = vadd.f32 %v2150_v28, %v4887_v36  ;;  %v2185_v18 = vpop.f32.mrf.mxu1 }
 0x528   : > { %v2186_v20 = vadd.f32 %v2185_v18, %v4961_v25 }
 0x529   : > { %2291 = vmatmul.f32.gmra.mxu2 %v1969_v41  ;;  %v2216_v21 = vadd.f32 %v2215_v34, %v2151_v56 }
 0x52c   : > { %v2227_v24 = vpop.f32.mrf.mxu2 }
 0x52e   : > { %v2153_v22 = vpop.f32.mrf.mxu0 }
 0x52f   : > { %v2154_v31 = vadd.f32 %v2153_v22, %v4899_v6  ;;  %v2188_v41 = vpop.f32.mrf.mxu1 }
 0x531   : > { %v2219_v8 = vadd.f32 %v2218_v26, %v2154_v31  ;;  %v2189_v26 = vadd.f32 %v2188_v41, %v4975_v57 }
 0x534   : > { %v2247_v55 = vpop.f32.mrf.mxu2 }
 0x535   : > { %v5055_v17 = vadd.f32 %v2247_v55, %v2183_v63 }
 0x536   : > { %v2156_v19 = vpop.f32.mrf.mxu0 }
 0x537   : > { %v2157_v27 = vadd.f32 %v2156_v19, %v4915_v33  ;;  %v2191_v63 = vpop.f32.mrf.mxu1 }
 0x538   : > { %v2192_v33 = vadd.f32 %v2191_v63, %v4984_v40 }
 0x539   : > { %v2222_v36 = vadd.f32 %v2221_v30, %v2157_v27 }
 0x53c   : > { %v2250_v37 = vpop.f32.mrf.mxu2 }
 0x53d   : > { %v2251_v34 = vadd.f32 %v2250_v37, %v2186_v20 }
 0x53e   : > { %v2159_v28 = vpop.f32.mrf.mxu0 }
 0x53f   : > { %v2160_v56 = vadd.f32 %v2159_v28, %v4931_v47 }
 0x541   : > { %v2225_v6 = vadd.f32 %v2224_v44, %v2160_v56 }
 0x544   : > { %v2253_v50 = vpop.f32.mrf.mxu2 }
 0x545   : > { %v2254_v38 = vadd.f32 %v2253_v50, %v2189_v26 }
 0x546   : > { %v2162_v55 = vpop.f32.mrf.mxu0 }
 0x547   : > { %v2163_v22 = vadd.f32 %v2162_v55, %v4944_v29 }
 0x549   : > { %v2228_v31 = vadd.f32 %v2227_v24, %v2163_v22 }
 0x54c   : > { %v2256_v27 = vpop.f32.mrf.mxu2 }
 0x54d   : > { %v2257_v25 = vadd.f32 %v2256_v27, %v2192_v33  ;;  %v5449_v27 = vld [vmem:[#allocation8_spill] sm:$0xff] }
 0x554   : > { %v2259_v19 = vpop.f32.mrf.mxu2 }
 0x555   : > { %v2260_v18 = vadd.f32 %v2259_v19, %v4994_v12 }
 0x55c   : > { %v2262_v30 = vpop.f32.mrf.mxu2 }
 0x55d   : > { %v2263_v47 = vadd.f32 %v2262_v30, %v5003_v54 }
 0x564   : > { %v2265_v44 = vpop.f32.mrf.mxu2 }
 0x565   : > { %v2266_v57 = vadd.f32 %v2265_v44, %v5012_v10  ;;  %v5452_v44 = vld [vmem:[#allocation15_spill] sm:$0xff] }
 0x56c   : > { %v2268_v20 = vpop.f32.mrf.mxu2 }
 0x56d   : > { %v2269_v37 = vadd.f32 %v2268_v20, %v5021_v59 }
 0x574   : > { %v2271_v28 = vpop.f32.mrf.mxu2 }
 0x575   : > { %v2272_v29 = vadd.f32 %v2271_v28, %v2207_v46 }
 0x57c   : > { %v2274_v24 = vpop.f32.mrf.mxu2 }
 0x57d   : > { %v2275_v46 = vadd.f32 %v2274_v24, %v5035_v61  ;;  %v5454_v24 = vld [vmem:[#allocation20_spill] sm:$0xff] }
 0x584   : > { %v2277_v56 = vpop.f32.mrf.mxu2 }
 0x585   : > { %v2278_v59 = vadd.f32 %v2277_v56, %v5044_v43 }
 0x58c   : > { %v2280_v41 = vpop.f32.mrf.mxu2 }
 0x58d   : > { %v2281_v10 = vadd.f32 %v2280_v41, %v2216_v21  ;;  %v5447_v21 = vld [vmem:[#allocation4_spill] sm:$0xff] }
 0x594   : > { %v2283_v40 = vpop.f32.mrf.mxu2 }
 0x595   : > { %v2284_v54 = vadd.f32 %v2283_v40, %v2219_v8  ;;  %v5448_v8 = vld [vmem:[#allocation6_spill] sm:$0xff] }
 0x59c   : > { %v2286_v26 = vpop.f32.mrf.mxu2 }
 0x59d   : > { %v2287_v63 = vadd.f32 %v2286_v26, %v2222_v36  ;;  %v3208_v36 = vld [vmem:[%s5388_s4] sm:$0x3] }
 0x5a4   : > { %v2289_v50 = vpop.f32.mrf.mxu2 }
 0x5a5   : > { %v2290_v12 = vadd.f32 %v2289_v50, %v2225_v6  ;;  %v5072_v6 = vperm.slane %v3208_v36, 0 }
 0x5a7   : > { %v1116_v43 = vadd.f32 %v5447_v21, %v5072_v6  ;;  %v1122_v19 = vadd.f32 %v5449_v27, %v5072_v6  ;;  %v1137_v56 = vadd.f32 %v5454_v24, %v5072_v6  ;;  %v1140_v40 = vadd.f32 %v4422_v32, %v5072_v6 }
 0x5a8   : > { %v1143_v50 = vadd.f32 %v4469_v9, %v5072_v6  ;;  %v1152_v32 = vadd.f32 %v4544_v13, %v5072_v6  ;;  %v1155_v9 = vadd.f32 %v4755_v53, %v5072_v6  ;;  %v1161_v13 = vadd.f32 %v4792_v14, %v5072_v6 }
 0x5a9   : > { %v1324_v61 = vmax.f32 %v1116_v43, 0.0  ;;  %v1328_v30 = vmax.f32 %v1122_v19, 0.0  ;;  %v1338_v41 = vmax.f32 %v1137_v56, 0.0  ;;  %v1340_v26 = vmax.f32 %v1140_v40, 0.0 }
 0x5ac   : > { %v2292_v55 = vpop.f32.mrf.mxu2 }
 0x5ad   : > { %v2293_v22 = vadd.f32 %v2292_v55, %v2228_v31  ;;  %v1119_v31 = vadd.f32 %v5448_v8, %v5072_v6  ;;  %v1342_v55 = vmax.f32 %v1143_v50, 0.0  ;;  %v1354_v8 = vmax.f32 %v1161_v13, 0.0 }
 0x5af   : > { %2422 = vmatpush.msrb.mxu1 %v2293_v22  ;;  %v1326_v33 = vmax.f32 %v1119_v31, 0.0  ;;  %v1146_v22 = vadd.f32 %v4503_v51, %v5072_v6  ;;  %v1158_v51 = vadd.f32 %v4775_v58, %v5072_v6  ;;  %v1164_v58 = vadd.f32 %v4822_v1, %v5072_v6 }
 0x5b1   : > { %2423 = vmatpush.msrb.mxu1 %v2290_v12  ;;  %v1344_v12 = vmax.f32 %v1146_v22, 0.0  ;;  %v1352_v36 = vmax.f32 %v1158_v51, 0.0  ;;  %v1356_v19 = vmax.f32 %v1164_v58, 0.0 }
 0x5b3   : > { %2424 = vmatpush.msrb.mxu1 %v2287_v63  ;;  %v1149_v63 = vadd.f32 %v4525_v7, %v5072_v6  ;;  %v2378_v7 = vpop.f32.mrf.mxu1 }
 0x5b5   : > { %2425 = vmatpush.msrb.mxu1 %v2284_v54  ;;  %v1346_v54 = vmax.f32 %v1149_v63, 0.0 }
 0x5b7   : > { %2426 = vmatpush.msrb.mxu1 %v2281_v10  ;;  %v1348_v10 = vmax.f32 %v1152_v32, 0.0 }
 0x5b9   : > { %2427 = vmatpush.msrb.mxu1 %v2278_v59  ;;  %v1350_v59 = vmax.f32 %v1155_v9, 0.0 }
 0x5bb   : > { %2428 = vmatpush.msrb.mxu1 %v2275_v46  ;;  %v2358_v46 = vpop.f32.mrf.mxu0 }
 0x5bc   : > { %v2359_v21 = vadd.f32 %v2358_v46, %v4800_v0  ;;  %v5114_v0 = vld [vmem:[%s5396_s12] ss:$0 sm:$0xff] }
 0x5bd   : > { %2429 = vmatpush.msrb.mxu1 %v2272_v29  ;;  %v2559_v14 = vadd.f32 %v5114_v0, %v4844_v52  ;;  %v2562_v52 = vadd.f32 %v5114_v0, %v4860_v2 }
 0x5be   : > { %v2379_v43 = vadd.f32 %v2378_v7, %v2359_v21 }
 0x5bf   : > { %2430 = vmatpush.msrb.mxu1 %v2269_v37  ;;  %v5453_v37 = vld [vmem:[#allocation17_spill] sm:$0xff] }
 0x5c0   : > { %v1134_v28 = vadd.f32 %v5453_v37, %v5072_v6  ;;  %v2399_v53 = vadd.f32 %v4824_v45, %v2379_v43  ;;  %v1167_v45 = vadd.f32 %v4842_v48, %v5072_v6  ;;  %v2571_v43 = vadd.f32 %v5114_v0, %v4923_v16 }
 0x5c1   : > { %2431 = vmatpush.msrb.mxu1 %v2266_v57  ;;  %v1131_v57 = vadd.f32 %v5452_v44, %v5072_v6 }
 0x5c2   : > { %v1336_v29 = vmax.f32 %v1134_v28, 0.0  ;;  %v5143_v28 = vpop.f32.mrf.mxu3 }
 0x5c3   : > { %2432 = vmatpush.msrb.mxu1 %v2263_v47  ;;  %v1334_v20 = vmax.f32 %v1131_v57, 0.0 }
 0x5c5   : > { %2433 = vmatpush.msrb.mxu1 %v2260_v18 }
 0x5c7   : > { %2434 = vmatpush.msrb.mxu1 %v2257_v25  ;;  %v5450_v25 = vld [vmem:[#allocation11_spill] sm:$0xff] }
 0x5c8   : > { %v1125_v18 = vadd.f32 %v5450_v25, %v5072_v6 }
 0x5c9   : > { %2435 = vmatpush.msrb.mxu1 %v2254_v38 }
 0x5ca   : > { %v1330_v47 = vmax.f32 %v1125_v18, 0.0  ;;  %v1358_v18 = vmax.f32 %v1167_v45, 0.0  ;;  %v5157_v9 = vpop.f32.mrf.mxu3 }
 0x5cb   : > { %2436 = vmatpush.msrb.mxu1 %v2251_v34  ;;  %v5451_v34 = vld [vmem:[#allocation13_spill] sm:$0xff] }
 0x5cc   : > { %v1128_v38 = vadd.f32 %v5451_v34, %v5072_v6 }
 0x5cd   : > { %2437 = vmatpush.msrb.mxu1 %v5055_v17 }
 0x5ce   : > { %2438 = vmatmul.f32.vlgmr.msrb.gmra.mxu1 %v1324_v61  ;;  %v1332_v17 = vmax.f32 %v1128_v38, 0.0  ;;  %v2418_v61 = vpop.f32.mrf.mxu0 }
 0x5cf   : > { %v2419_v31 = vadd.f32 %v2418_v61, %v2399_v53  ;;  %v1179_v53 = vadd.f32 %v4921_v42, %v5072_v6  ;;  %v1182_v42 = vadd.f32 %v4937_v15, %v5072_v6  ;;  %v1185_v15 = vadd.f32 %v4953_v49, %v5072_v6 }
 0x5d0   : > { %v1188_v49 = vadd.f32 %v4970_v62, %v5072_v6  ;;  %v5455_v62 = vld [vmem:[#allocation2_spill] sm:$0xff] }
 0x5d6   : > { %2441 = vmatmul.f32.gmra.mxu1 %v1326_v33  ;;  %v5116_v33 = vperm.slane %v2419_v31, 0 }
 0x5de   : > { %2444 = vmatmul.f32.gmra.mxu1 %v1328_v30 }
 0x5e6   : > { %2447 = vmatmul.f32.gmra.mxu1 %v1330_v47 }
 0x5ee   : > { %2450 = vmatmul.f32.gmra.mxu1 %v1332_v17  ;;  %v1170_v17 = vadd.f32 %v4858_v23, %v5072_v6  ;;  %v2565_v23 = vadd.f32 %v5114_v0, %v4885_v11  ;;  %v2568_v11 = vadd.f32 %v5114_v0, %v4903_v39 }
 0x5f0   : > { %v1360_v56 = vmax.f32 %v1170_v17, 0.0 }
 0x5f6   : > { %2453 = vmatmul.f32.gmra.mxu1 %v1334_v20 }
 0x5fe   : > { %2456 = vmatmul.f32.gmra.mxu1 %v1336_v29 }
 0x606   : > { %2459 = vmatmul.f32.gmra.mxu1 %v1338_v41 }
 0x60e   : > { %2462 = vmatmul.f32.gmra.mxu1 %v1340_v26  ;;  %v1173_v26 = vadd.f32 %v4877_v4, %v5072_v6  ;;  %v1176_v4 = vadd.f32 %v4901_v5, %v5072_v6  ;;  %v5168_v5 = vpop.f32.mrf.mxu3 }
 0x610   : > { %v1362_v32 = vmax.f32 %v1173_v26, 0.0  ;;  %v1364_v13 = vmax.f32 %v1176_v4, 0.0 }
 0x616   : > { %2465 = vmatmul.f32.gmra.mxu1 %v1342_v55 }
 0x61e   : > { %2468 = vmatmul.f32.gmra.mxu1 %v1344_v12 }
 0x626   : > { %2471 = vmatmul.f32.gmra.mxu1 %v1346_v54 }
 0x62e   : > { %2474 = vmatmul.f32.gmra.mxu1 %v1348_v10 }
 0x636   : > { %2477 = vmatmul.f32.gmra.mxu1 %v1350_v59 }
 0x63e   : > { %2480 = vmatmul.f32.gmra.mxu1 %v1352_v36 }
 0x646   : > { %2483 = vmatmul.f32.gmra.mxu1 %v1354_v8 }
 0x64b   : > { %v2439_v27 = vpop.f32.mrf.mxu1 }
 0x64c   : > { %v2440_v30 = vadd.f32 %v2439_v27, %v5116_v33 }
 0x64e   : > { %v2654_v1 = vadd.f32 %v2559_v14, %v2440_v30  ;;  %2486 = vmatmul.f32.gmra.mxu1 %v1356_v19  ;;  %v1366_v30 = vmax.f32 %v1179_v53, 0.0 }
 0x650   : > { %2686 = vst.msk [vmem:[%s5126_s17] sm:$0xff] %vm517_vm1, %v2654_v1  ;;  %v2787_v34 = vmul.f32 %v2654_v1, %v2654_v1  ;;  %v2718_v44 = vsel %vm517_vm1, %v2654_v1, 0.0  ;;  %v2574_v1 = vadd.f32 %v5114_v0, %v4939_v3 }
 0x652   : > { %v2819_v37 = vsel %vm517_vm1, %v2787_v34, 0.0 }
 0x653   : > { %v2442_v25 = vpop.f32.mrf.mxu1 }
 0x654   : > { %v2443_v47 = vadd.f32 %v2442_v25, %v5116_v33 }
 0x656   : > { %v2655_v38 = vadd.f32 %v2562_v52, %v2443_v47  ;;  %2489 = vmatmul.f32.gmra.mxu1 %v1358_v18  ;;  %v5184_v47 = vpop.f32.mrf.mxu3 }
 0x658   : > { %2687 = vst.msk [vmem:[%s5126_s17 + $0x8] sm:$0xff] %vm517_vm1, %v2655_v38  ;;  %v2719_v48 = vsel %vm517_vm1, %v2655_v38, 0.0  ;;  %v2788_v57 = vmul.f32 %v2655_v38, %v2655_v38 }
 0x659   : > { %v2720_v20 = vadd.f32 %v2719_v48, %v2718_v44  ;;  %v1368_v44 = vmax.f32 %v1182_v42, 0.0  ;;  %v2577_v48 = vadd.f32 %v5114_v0, %v4958_v60 }
 0x65a   : > { %v2820_v2 = vsel %vm517_vm1, %v2788_v57, 0.0 }
 0x65b   : > { %v2821_v29 = vadd.f32 %v2820_v2, %v2819_v37  ;;  %v2445_v24 = vpop.f32.mrf.mxu1 }
 0x65c   : > { %v2446_v41 = vadd.f32 %v2445_v24, %v5116_v33 }
 0x65e   : > { %v2656_v40 = vadd.f32 %v2565_v23, %v2446_v41  ;;  %2492 = vmatmul.f32.gmra.mxu1 %v1360_v56  ;;  %v5196_v56 = vpop.f32.mrf.mxu3  ;;  %v1370_v41 = vmax.f32 %v1185_v15, 0.0 }
 0x660   : > { %2688 = vst.msk [vmem:[%s5126_s17 + $0x10] sm:$0xff] %vm517_vm1, %v2656_v40  ;;  %v2721_v50 = vsel %vm517_vm1, %v2656_v40, 0.0  ;;  %v2789_v55 = vmul.f32 %v2656_v40, %v2656_v40  ;;  %v2580_v40 = vadd.f32 %v5114_v0, %v4972_v35  ;;  %v2583_v35 = vadd.f32 %v5114_v0, %v5143_v28 }
 0x661   : > { %v2722_v22 = vadd.f32 %v2721_v50, %v2720_v20 }
 0x662   : > { %v2822_v12 = vsel %vm517_vm1, %v2789_v55, 0.0 }
 0x663   : > { %v2823_v63 = vadd.f32 %v2822_v12, %v2821_v29  ;;  %v2448_v54 = vpop.f32.mrf.mxu1 }
 0x664   : > { %v2449_v10 = vadd.f32 %v2448_v54, %v5116_v33 }
 0x666   : > { %v2657_v59 = vadd.f32 %v2568_v11, %v2449_v10  ;;  %2495 = vmatmul.f32.gmra.mxu1 %v1362_v32  ;;  %v1372_v11 = vmax.f32 %v1188_v49, 0.0  ;;  %v2595_v49 = vadd.f32 %v5114_v0, %v5196_v56 }
 0x668   : > { %2689 = vst.msk [vmem:[%s5126_s17 + $0x18] sm:$0xff] %vm517_vm1, %v2657_v59  ;;  %v2723_v51 = vsel %vm517_vm1, %v2657_v59, 0.0  ;;  %v2790_v46 = vmul.f32 %v2657_v59, %v2657_v59  ;;  %v5210_v59 = vpop.f32.mrf.mxu3 }
 0x669   : > { %v2724_v36 = vadd.f32 %v2723_v51, %v2722_v22  ;;  %v1191_v51 = vadd.f32 %v5455_v62, %v5072_v6  ;;  %v2598_v56 = vadd.f32 %v5114_v0, %v5210_v59 }
 0x66a   : > { %v2824_v21 = vsel %vm517_vm1, %v2790_v46, 0.0 }
 0x66b   : > { %v2825_v7 = vadd.f32 %v2824_v21, %v2823_v63  ;;  %v2451_v39 = vpop.f32.mrf.mxu1 }
 0x66c   : > { %v2452_v61 = vadd.f32 %v2451_v39, %v5116_v33 }
 0x66e   : > { %v2658_v8 = vadd.f32 %v2571_v43, %v2452_v61  ;;  %2498 = vmatmul.f32.gmra.mxu1 %v1364_v13  ;;  %v1374_v13 = vmax.f32 %v1191_v51, 0.0  ;;  %v2586_v43 = vadd.f32 %v5114_v0, %v5157_v9 }
 0x670   : > { %2690 = vst.msk [vmem:[%s5126_s17 + $0x20] sm:$0xff] %vm517_vm1, %v2658_v8  ;;  %v2725_v31 = vsel %vm517_vm1, %v2658_v8, 0.0  ;;  %v2791_v58 = vmul.f32 %v2658_v8, %v2658_v8  ;;  %v5221_v53 = vpop.f32.mrf.mxu3 }
 0x671   : > { %v2726_v27 = vadd.f32 %v2725_v31, %v2724_v36  ;;  %v5456_v31 = vld [vmem:[#allocation3_spill] sm:$0xff] }
 0x672   : > { %v2826_v19 = vsel %vm517_vm1, %v2791_v58, 0.0  ;;  %v1194_v58 = vadd.f32 %v5456_v31, %v5072_v6  ;;  %v2601_v31 = vadd.f32 %v5114_v0, %v5221_v53 }
 0x673   : > { %v2827_v14 = vadd.f32 %v2826_v19, %v2825_v7  ;;  %v2454_v16 = vpop.f32.mrf.mxu1 }
 0x674   : > { %v2455_v45 = vadd.f32 %v2454_v16, %v5116_v33 }
 0x676   : > { %v2659_v25 = vadd.f32 %v2574_v1, %v2455_v45  ;;  %2501 = vmatmul.f32.gmra.mxu1 %v1366_v30  ;;  %v1376_v1 = vmax.f32 %v1194_v58, 0.0  ;;  %v2589_v45 = vadd.f32 %v5114_v0, %v5168_v5 }
 0x678   : > { %2691 = vst.msk [vmem:[%s5126_s17 + $0x28] sm:$0xff] %vm517_vm1, %v2659_v25  ;;  %v2727_v18 = vsel %vm517_vm1, %v2659_v25, 0.0  ;;  %v2792_v52 = vmul.f32 %v2659_v25, %v2659_v25 }
 0x679   : > { %v2728_v34 = vadd.f32 %v2727_v18, %v2726_v27  ;;  %v5457_v18 = vld [vmem:[#allocation5_spill] sm:$0xff] }
 0x67a   : > { %v2828_v38 = vsel %vm517_vm1, %v2792_v52, 0.0  ;;  %v1197_v52 = vadd.f32 %v5457_v18, %v5072_v6 }
 0x67b   : > { %v2829_v17 = vadd.f32 %v2828_v38, %v2827_v14  ;;  %v2457_v3 = vpop.f32.mrf.mxu1 }
 0x67c   : > { %v2458_v57 = vadd.f32 %v2457_v3, %v5116_v33  ;;  %v1378_v5 = vmax.f32 %v1197_v52, 0.0 }
 0x67e   : > { %v2660_v20 = vadd.f32 %v2577_v48, %v2458_v57  ;;  %2504 = vmatmul.f32.gmra.mxu1 %v1368_v44 }
 0x680   : > { %2692 = vst.msk [vmem:[%s5126_s17 + $0x30] sm:$0xff] %vm517_vm1, %v2660_v20  ;;  %v2729_v37 = vsel %vm517_vm1, %v2660_v20, 0.0  ;;  %v2793_v2 = vmul.f32 %v2660_v20, %v2660_v20  ;;  %v2592_v20 = vadd.f32 %v5114_v0, %v5184_v47 }
 0x681   : > { %v2730_v29 = vadd.f32 %v2729_v37, %v2728_v34 }
 0x682   : > { %v2830_v24 = vsel %vm517_vm1, %v2793_v2, 0.0  ;;  %v5458_v2 = vld [vmem:[#allocation7_spill] sm:$0xff] }
 0x683   : > { %v2831_v23 = vadd.f32 %v2830_v24, %v2829_v17  ;;  %v2460_v60 = vpop.f32.mrf.mxu1  ;;  %v2603_v17 = vpop.f32.mrf.mxu3 }
 0x684   : > { %v2461_v26 = vadd.f32 %v2460_v60, %v5116_v33  ;;  %v2604_v18 = vadd.f32 %v5114_v0, %v2603_v17 }
 0x686   : > { %v2661_v50 = vadd.f32 %v2580_v40, %v2461_v26  ;;  %2507 = vmatmul.f32.gmra.mxu1 %v1370_v41 }
 0x688   : > { %2693 = vst.msk [vmem:[%s5126_s17 + $0x38] sm:$0xff] %vm517_vm1, %v2661_v50  ;;  %v2731_v55 = vsel %vm517_vm1, %v2661_v50, 0.0  ;;  %v2794_v22 = vmul.f32 %v2661_v50, %v2661_v50 }
 0x689   : > { %v2732_v12 = vadd.f32 %v2731_v55, %v2730_v29  ;;  %v1200_v29 = vadd.f32 %v5458_v2, %v5072_v6 }
 0x68a   : > { %v2832_v63 = vsel %vm517_vm1, %v2794_v22, 0.0 }
 0x68b   : > { %v2833_v54 = vadd.f32 %v2832_v63, %v2831_v23  ;;  %v2463_v32 = vpop.f32.mrf.mxu1  ;;  %v2606_v40 = vpop.f32.mrf.mxu3  ;;  %v1380_v47 = vmax.f32 %v1200_v29, 0.0 }
 0x68c   : > { %v2464_v10 = vadd.f32 %v2463_v32, %v5116_v33 }
 0x68e   : > { %v2662_v4 = vadd.f32 %v2583_v35, %v2464_v10  ;;  %2510 = vmatmul.f32.gmra.mxu1 %v1372_v11 }
 0x690   : > { %2694 = vst.msk [vmem:[%s5126_s17 + $0x40] sm:$0xff] %vm517_vm1, %v2662_v4  ;;  %v2733_v46 = vsel %vm517_vm1, %v2662_v4, 0.0  ;;  %v2795_v36 = vmul.f32 %v2662_v4, %v2662_v4 }
 0x691   : > { %v2734_v21 = vadd.f32 %v2733_v46, %v2732_v12  ;;  %v5459_v12 = vld [vmem:[#allocation9_spill] sm:$0xff] }
 0x692   : > { %v2834_v7 = vsel %vm517_vm1, %v2795_v36, 0.0  ;;  %v1203_v63 = vadd.f32 %v5459_v12, %v5072_v6 }
 0x693   : > { %v2835_v39 = vadd.f32 %v2834_v7, %v2833_v54  ;;  %v2466_v28 = vpop.f32.mrf.mxu1  ;;  %v2609_v46 = vpop.f32.mrf.mxu3 }
 0x694   : > { %v2467_v61 = vadd.f32 %v2466_v28, %v5116_v33  ;;  %v1382_v62 = vmax.f32 %v1203_v63, 0.0 }
 0x696   : > { %v2663_v8 = vadd.f32 %v2586_v43, %v2467_v61  ;;  %2513 = vmatmul.f32.gmra.mxu1 %v1374_v13 }
 0x698   : > { %2695 = vst.msk [vmem:[%s5126_s17 + $0x48] sm:$0xff] %vm517_vm1, %v2663_v8  ;;  %v2735_v27 = vsel %vm517_vm1, %v2663_v8, 0.0  ;;  %v2796_v19 = vmul.f32 %v2663_v8, %v2663_v8 }
 0x699   : > { %v2736_v14 = vadd.f32 %v2735_v27, %v2734_v21  ;;  %v5460_v21 = vld [vmem:[#allocation10_spill] sm:$0xff] }
 0x69a   : > { %v2836_v16 = vsel %vm517_vm1, %v2796_v19, 0.0  ;;  %v1206_v7 = vadd.f32 %v5460_v21, %v5072_v6 }
 0x69b   : > { %v2837_v30 = vadd.f32 %v2836_v16, %v2835_v39  ;;  %v2469_v9 = vpop.f32.mrf.mxu1  ;;  %v2612_v19 = vpop.f32.mrf.mxu3 }
 0x69c   : > { %v2470_v25 = vadd.f32 %v2469_v9, %v5116_v33  ;;  %v1384_v59 = vmax.f32 %v1206_v7, 0.0 }
 0x69e   : > { %v2664_v42 = vadd.f32 %v2589_v45, %v2470_v25  ;;  %2516 = vmatmul.f32.gmra.mxu1 %v1376_v1 }
 0x6a0   : > { %2696 = vst.msk [vmem:[%s5126_s17 + $0x50] sm:$0xff] %vm517_vm1, %v2664_v42  ;;  %v2737_v34 = vsel %vm517_vm1, %v2664_v42, 0.0  ;;  %v2797_v38 = vmul.f32 %v2664_v42, %v2664_v42 }
 0x6a1   : > { %v2738_v3 = vadd.f32 %v2737_v34, %v2736_v14  ;;  %v5461_v14 = vld [vmem:[#allocation12_spill] sm:$0xff] }
 0x6a2   : > { %v2838_v44 = vsel %vm517_vm1, %v2797_v38, 0.0  ;;  %v1209_v16 = vadd.f32 %v5461_v14, %v5072_v6 }
 0x6a3   : > { %v2839_v48 = vadd.f32 %v2838_v44, %v2837_v30  ;;  %v2472_v57 = vpop.f32.mrf.mxu1 }
 0x6a4   : > { %v2473_v15 = vadd.f32 %v2472_v57, %v5116_v33  ;;  %v1386_v53 = vmax.f32 %v1209_v16, 0.0 }
 0x6a6   : > { %v2665_v37 = vadd.f32 %v2592_v20, %v2473_v15  ;;  %2519 = vmatmul.f32.gmra.mxu1 %v1378_v5  ;;  %v2607_v20 = vadd.f32 %v5114_v0, %v2606_v40 }
 0x6a8   : > { %2697 = vst.msk [vmem:[%s5126_s17 + $0x58] sm:$0xff] %vm517_vm1, %v2665_v37  ;;  %v2739_v24 = vsel %vm517_vm1, %v2665_v37, 0.0  ;;  %v2798_v23 = vmul.f32 %v2665_v37, %v2665_v37 }
 0x6a9   : > { %v2740_v60 = vadd.f32 %v2739_v24, %v2738_v3  ;;  %v2615_v3 = vpop.f32.mrf.mxu3 }
 0x6aa   : > { %v2840_v41 = vsel %vm517_vm1, %v2798_v23, 0.0 }
 0x6ab   : > { %v2841_v26 = vadd.f32 %v2840_v41, %v2839_v48  ;;  %v2475_v50 = vpop.f32.mrf.mxu1 }
 0x6ac   : > { %v2476_v55 = vadd.f32 %v2475_v50, %v5116_v33 }
 0x6ae   : > { %v2666_v22 = vadd.f32 %v2595_v49, %v2476_v55  ;;  %2522 = vmatmul.f32.gmra.mxu1 %v1380_v47 }
 0x6b0   : > { %2698 = vst.msk [vmem:[%s5126_s17 + $0x60] sm:$0xff] %vm517_vm1, %v2666_v22  ;;  %v2741_v54 = vsel %vm517_vm1, %v2666_v22, 0.0  ;;  %v2799_v32 = vmul.f32 %v2666_v22, %v2666_v22 }
 0x6b1   : > { %v2742_v11 = vadd.f32 %v2741_v54, %v2740_v60  ;;  %v2618_v23 = vpop.f32.mrf.mxu3  ;;  %v2613_v54 = vadd.f32 %v5114_v0, %v2612_v19 }
 0x6b2   : > { %v2842_v35 = vsel %vm517_vm1, %v2799_v32, 0.0 }
 0x6b3   : > { %v2843_v10 = vadd.f32 %v2842_v35, %v2841_v26  ;;  %v2478_v4 = vpop.f32.mrf.mxu1  ;;  %v2610_v26 = vadd.f32 %v5114_v0, %v2609_v46 }
 0x6b4   : > { %v2479_v51 = vadd.f32 %v2478_v4, %v5116_v33 }
 0x6b6   : > { %v2667_v36 = vadd.f32 %v2598_v56, %v2479_v51  ;;  %2525 = vmatmul.f32.gmra.mxu1 %v1382_v62 }
 0x6b8   : > { %2699 = vst.msk [vmem:[%s5126_s17 + $0x68] sm:$0xff] %vm517_vm1, %v2667_v36  ;;  %v2743_v39 = vsel %vm517_vm1, %v2667_v36, 0.0  ;;  %v2800_v28 = vmul.f32 %v2667_v36, %v2667_v36  ;;  %v2616_v36 = vadd.f32 %v5114_v0, %v2615_v3 }
 0x6b9   : > { %v2744_v13 = vadd.f32 %v2743_v39, %v2742_v11  ;;  %v2621_v11 = vpop.f32.mrf.mxu3 }
 0x6ba   : > { %v2844_v43 = vsel %vm517_vm1, %v2800_v28, 0.0 }
 0x6bb   : > { %v2845_v61 = vadd.f32 %v2844_v43, %v2843_v10  ;;  %v2481_v8 = vpop.f32.mrf.mxu1 }
 0x6bc   : > { %v2482_v58 = vadd.f32 %v2481_v8, %v5116_v33 }
 0x6be   : > { %v2668_v27 = vadd.f32 %v2601_v31, %v2482_v58  ;;  %2528 = vmatmul.f32.gmra.mxu1 %v1384_v59  ;;  %v2619_v31 = vadd.f32 %v5114_v0, %v2618_v23 }
 0x6c0   : > { %2700 = vst.msk [vmem:[%s5126_s17 + $0x70] sm:$0xff] %vm517_vm1, %v2668_v27  ;;  %v2745_v30 = vsel %vm517_vm1, %v2668_v27, 0.0  ;;  %v2801_v9 = vmul.f32 %v2668_v27, %v2668_v27 }
 0x6c1   : > { %v2746_v1 = vadd.f32 %v2745_v30, %v2744_v13  ;;  %v2624_v39 = vpop.f32.mrf.mxu3 }
 0x6c2   : > { %v2846_v45 = vsel %vm517_vm1, %v2801_v9, 0.0 }
 0x6c3   : > { %v2847_v25 = vadd.f32 %v2846_v45, %v2845_v61  ;;  %v2484_v42 = vpop.f32.mrf.mxu1 }
 0x6c4   : > { %v2485_v52 = vadd.f32 %v2484_v42, %v5116_v33 }
 0x6c6   : > { %v2669_v34 = vadd.f32 %v2604_v18, %v2485_v52  ;;  %2531 = vmatmul.f32.gmra.mxu1 %v1386_v53 }
 0x6c8   : > { %2701 = vst.msk [vmem:[%s5126_s17 + $0x78] sm:$0xff] %vm517_vm1, %v2669_v34  ;;  %v2747_v6 = vsel %vm517_vm1, %v2669_v34, 0.0  ;;  %v2802_v38 = vmul.f32 %v2669_v34, %v2669_v34  ;;  %v2625_v34 = vadd.f32 %v5114_v0, %v2624_v39 }
 0x6c9   : > { %v2748_v44 = vadd.f32 %v2747_v6, %v2746_v1  ;;  %v2627_v16 = vpop.f32.mrf.mxu3 }
 0x6ca   : > { %v2848_v48 = vsel %vm517_vm1, %v2802_v38, 0.0 }
 0x6cb   : > { %v2849_v57 = vadd.f32 %v2848_v48, %v2847_v25  ;;  %v2487_v5 = vpop.f32.mrf.mxu1  ;;  %v2622_v25 = vadd.f32 %v5114_v0, %v2621_v11 }
 0x6cc   : > { %v2488_v17 = vadd.f32 %v2487_v5, %v5116_v33 }
 0x6ce   : > { %v2670_v15 = vadd.f32 %v2607_v20, %v2488_v17 }
 0x6d0   : > { %2702 = vst.msk [vmem:[%s5126_s17 + $0x80] sm:$0xff] %vm517_vm1, %v2670_v15  ;;  %v2749_v37 = vsel %vm517_vm1, %v2670_v15, 0.0  ;;  %v2803_v2 = vmul.f32 %v2670_v15, %v2670_v15 }
 0x6d1   : > { %v2750_v29 = vadd.f32 %v2749_v37, %v2748_v44  ;;  %v2630_v18 = vpop.f32.mrf.mxu3  ;;  %v2628_v44 = vadd.f32 %v5114_v0, %v2627_v16 }
 0x6d2   : > { %v2850_v24 = vsel %vm517_vm1, %v2803_v2, 0.0  ;;  %v2631_v17 = vadd.f32 %v5114_v0, %v2630_v18 }
 0x6d3   : > { %v2851_v60 = vadd.f32 %v2850_v24, %v2849_v57  ;;  %v2490_v41 = vpop.f32.mrf.mxu1 }
 0x6d4   : > { %v2491_v50 = vadd.f32 %v2490_v41, %v5116_v33 }
 0x6d6   : > { %v2671_v40 = vadd.f32 %v2610_v26, %v2491_v50 }
 0x6d8   : > { %2703 = vst.msk [vmem:[%s5126_s17 + $0x88] sm:$0xff] %vm517_vm1, %v2671_v40  ;;  %v2751_v47 = vsel %vm517_vm1, %v2671_v40, 0.0  ;;  %v2804_v49 = vmul.f32 %v2671_v40, %v2671_v40 }
 0x6d9   : > { %v2752_v55 = vadd.f32 %v2751_v47, %v2750_v29  ;;  %v2633_v57 = vpop.f32.mrf.mxu3 }
 0x6da   : > { %v2852_v22 = vsel %vm517_vm1, %v2804_v49, 0.0  ;;  %v2634_v24 = vadd.f32 %v5114_v0, %v2633_v57 }
 0x6db   : > { %v2853_v12 = vadd.f32 %v2852_v22, %v2851_v60  ;;  %v2493_v63 = vpop.f32.mrf.mxu1 }
 0x6dc   : > { %v2494_v32 = vadd.f32 %v2493_v63, %v5116_v33 }
 0x6de   : > { %v2672_v35 = vadd.f32 %v2613_v54, %v2494_v32 }
 0x6e0   : > { %2704 = vst.msk [vmem:[%s5126_s17 + $0x90] sm:$0xff] %vm517_vm1, %v2672_v35  ;;  %v2753_v10 = vsel %vm517_vm1, %v2672_v35, 0.0  ;;  %v2805_v4 = vmul.f32 %v2672_v35, %v2672_v35 }
 0x6e1   : > { %v2754_v62 = vadd.f32 %v2753_v10, %v2752_v55  ;;  %v2636_v2 = vpop.f32.mrf.mxu3 }
 0x6e2   : > { %v2854_v56 = vsel %vm517_vm1, %v2805_v4, 0.0  ;;  %v2637_v50 = vadd.f32 %v5114_v0, %v2636_v2 }
 0x6e3   : > { %v2855_v51 = vadd.f32 %v2854_v56, %v2853_v12  ;;  %v2496_v46 = vpop.f32.mrf.mxu1 }
 0x6e4   : > { %v2497_v21 = vadd.f32 %v2496_v46, %v5116_v33 }
 0x6e6   : > { %v2673_v7 = vadd.f32 %v2616_v36, %v2497_v21 }
 0x6e8   : > { %2705 = vst.msk [vmem:[%s5126_s17 + $0x98] sm:$0xff] %vm517_vm1, %v2673_v7  ;;  %v2755_v28 = vsel %vm517_vm1, %v2673_v7, 0.0  ;;  %v2806_v13 = vmul.f32 %v2673_v7, %v2673_v7 }
 0x6e9   : > { %v2756_v43 = vadd.f32 %v2755_v28, %v2754_v62  ;;  %v2639_v41 = vpop.f32.mrf.mxu3 }
 0x6ea   : > { %v2856_v61 = vsel %vm517_vm1, %v2806_v13, 0.0  ;;  %v2640_v22 = vadd.f32 %v5114_v0, %v2639_v41 }
 0x6eb   : > { %v2857_v8 = vadd.f32 %v2856_v61, %v2855_v51  ;;  %v2499_v59 = vpop.f32.mrf.mxu1 }
 0x6ec   : > { %v2500_v58 = vadd.f32 %v2499_v59, %v5116_v33 }
 0x6ee   : > { %v2674_v27 = vadd.f32 %v2619_v31, %v2500_v58 }
 0x6f0   : > { %2706 = vst.msk [vmem:[%s5126_s17 + $0xa0] sm:$0xff] %vm517_vm1, %v2674_v27  ;;  %v2757_v19 = vsel %vm517_vm1, %v2674_v27, 0.0  ;;  %v2807_v14 = vmul.f32 %v2674_v27, %v2674_v27 }
 0x6f1   : > { %v2758_v30 = vadd.f32 %v2757_v19, %v2756_v43  ;;  %v2642_v49 = vpop.f32.mrf.mxu3 }
 0x6f2   : > { %v2858_v9 = vsel %vm517_vm1, %v2807_v14, 0.0  ;;  %v2643_v32 = vadd.f32 %v5114_v0, %v2642_v49 }
 0x6f3   : > { %v2859_v1 = vadd.f32 %v2858_v9, %v2857_v8  ;;  %v2502_v45 = vpop.f32.mrf.mxu1 }
 0x6f4   : > { %v2503_v42 = vadd.f32 %v2502_v45, %v5116_v33 }
 0x6f6   : > { %v2675_v53 = vadd.f32 %v2622_v25, %v2503_v42 }
 0x6f8   : > { %2707 = vst.msk [vmem:[%s5126_s17 + $0xa8] sm:$0xff] %vm517_vm1, %v2675_v53  ;;  %v2808_v4 = vmul.f32 %v2675_v53, %v2675_v53  ;;  %v2759_v62 = vsel %vm517_vm1, %v2675_v53, 0.0 }
 0x6f9   : > { %v2645_v35 = vpop.f32.mrf.mxu3  ;;  %v2760_v28 = vadd.f32 %v2759_v62, %v2758_v30 }
 0x6fa   : > { %v2646_v51 = vadd.f32 %v5114_v0, %v2645_v35  ;;  %v2860_v36 = vsel %vm517_vm1, %v2808_v4, 0.0 }
 0x6fb   : > { %v2505_v52 = vpop.f32.mrf.mxu1  ;;  %v2861_v31 = vadd.f32 %v2860_v36, %v2859_v1 }
 0x6fc   : > { %v2506_v6 = vadd.f32 %v2505_v52, %v5116_v33 }
 0x6fe   : > { %v2676_v38 = vadd.f32 %v2625_v34, %v2506_v6 }
 0x700   : > { %2708 = vst.msk [vmem:[%s5126_s17 + $0xb0] sm:$0xff] %vm517_vm1, %v2676_v38  ;;  %v2809_v56 = vmul.f32 %v2676_v38, %v2676_v38  ;;  %v2761_v21 = vsel %vm517_vm1, %v2676_v38, 0.0 }
 0x701   : > { %v2648_v59 = vpop.f32.mrf.mxu3  ;;  %v2762_v58 = vadd.f32 %v2761_v21, %v2760_v28 }
 0x702   : > { %v2862_v13 = vsel %vm517_vm1, %v2809_v56, 0.0  ;;  %v2649_v42 = vadd.f32 %v5114_v0, %v2648_v59 }
 0x703   : > { %v2508_v3 = vpop.f32.mrf.mxu1  ;;  %v2863_v16 = vadd.f32 %v2862_v13, %v2861_v31 }
 0x704   : > { %v2509_v48 = vadd.f32 %v2508_v3, %v5116_v33 }
 0x706   : > { %v2677_v5 = vadd.f32 %v2628_v44, %v2509_v48 }
 0x708   : > { %2709 = vst.msk [vmem:[%s5126_s17 + $0xb8] sm:$0xff] %vm517_vm1, %v2677_v5  ;;  %v2810_v7 = vmul.f32 %v2677_v5, %v2677_v5  ;;  %v2763_v43 = vsel %vm517_vm1, %v2677_v5, 0.0 }
 0x709   : > { %v2764_v9 = vadd.f32 %v2763_v43, %v2762_v58 }
 0x70a   : > { %v2864_v27 = vsel %vm517_vm1, %v2810_v7, 0.0 }
 0x70b   : > { %v2511_v20 = vpop.f32.mrf.mxu1  ;;  %v2865_v53 = vadd.f32 %v2864_v27, %v2863_v16 }
 0x70c   : > { %v2512_v15 = vadd.f32 %v2511_v20, %v5116_v33 }
 0x70e   : > { %v2678_v37 = vadd.f32 %v2631_v17, %v2512_v15 }
 0x710   : > { %2710 = vst.msk [vmem:[%s5126_s17 + $0xc0] sm:$0xff] %vm517_vm1, %v2678_v37  ;;  %v2811_v61 = vmul.f32 %v2678_v37, %v2678_v37  ;;  %v2765_v19 = vsel %vm517_vm1, %v2678_v37, 0.0 }
 0x711   : > { %v2766_v18 = vadd.f32 %v2765_v19, %v2764_v9 }
 0x712   : > { %v2866_v30 = vsel %vm517_vm1, %v2811_v61, 0.0 }
 0x713   : > { %v2514_v29 = vpop.f32.mrf.mxu1  ;;  %v2867_v3 = vadd.f32 %v2866_v30, %v2865_v53 }
 0x714   : > { %v2515_v23 = vadd.f32 %v2514_v29, %v5116_v33 }
 0x716   : > { %v2679_v60 = vadd.f32 %v2634_v24, %v2515_v23  ;;  %v2651_v24 = vpop.f32.mrf.mxu3 }
 0x718   : > { %2711 = vst.msk [vmem:[%s5126_s17 + $0xc8] sm:$0xff] %vm517_vm1, %v2679_v60  ;;  %v2812_v14 = vmul.f32 %v2679_v60, %v2679_v60  ;;  %v2767_v45 = vsel %vm517_vm1, %v2679_v60, 0.0 }
 0x719   : > { %v2768_v44 = vadd.f32 %v2767_v45, %v2766_v18 }
 0x71a   : > { %v2868_v52 = vsel %vm517_vm1, %v2812_v14, 0.0 }
 0x71b   : > { %v2517_v26 = vpop.f32.mrf.mxu1  ;;  %v2869_v17 = vadd.f32 %v2868_v52, %v2867_v3 }
 0x71c   : > { %v2518_v40 = vadd.f32 %v2517_v26, %v5116_v33 }
 0x71e   : > { %v2680_v47 = vadd.f32 %v2637_v50, %v2518_v40 }
 0x720   : > { %2712 = vst.msk [vmem:[%s5126_s17 + $0xd0] sm:$0xff] %vm517_vm1, %v2680_v47  ;;  %v2813_v25 = vmul.f32 %v2680_v47, %v2680_v47  ;;  %v2769_v34 = vsel %vm517_vm1, %v2680_v47, 0.0 }
 0x721   : > { %v2770_v15 = vadd.f32 %v2769_v34, %v2768_v44 }
 0x722   : > { %v2870_v48 = vsel %vm517_vm1, %v2813_v25, 0.0 }
 0x723   : > { %v2520_v55 = vpop.f32.mrf.mxu1  ;;  %v2871_v23 = vadd.f32 %v2870_v48, %v2869_v17 }
 0x724   : > { %v2521_v12 = vadd.f32 %v2520_v55, %v5116_v33  ;;  %v2652_v55 = vadd.f32 %v5114_v0, %v2651_v24 }
 0x726   : > { %v2681_v63 = vadd.f32 %v2640_v22, %v2521_v12 }
 0x728   : > { %2713 = vst.msk [vmem:[%s5126_s17 + $0xd8] sm:$0xff] %vm517_vm1, %v2681_v63  ;;  %v2814_v6 = vmul.f32 %v2681_v63, %v2681_v63  ;;  %v2771_v57 = vsel %vm517_vm1, %v2681_v63, 0.0 }
 0x729   : > { %v2772_v60 = vadd.f32 %v2771_v57, %v2770_v15 }
 0x72a   : > { %v2872_v37 = vsel %vm517_vm1, %v2814_v6, 0.0 }
 0x72b   : > { %v2523_v54 = vpop.f32.mrf.mxu1  ;;  %v2873_v40 = vadd.f32 %v2872_v37, %v2871_v23 }
 0x72c   : > { %v2524_v11 = vadd.f32 %v2523_v54, %v5116_v33 }
 0x72e   : > { %v2682_v10 = vadd.f32 %v2643_v32, %v2524_v11 }
 0x730   : > { %2714 = vst.msk [vmem:[%s5126_s17 + $0xe0] sm:$0xff] %vm517_vm1, %v2682_v10  ;;  %v2815_v5 = vmul.f32 %v2682_v10, %v2682_v10  ;;  %v2773_v2 = vsel %vm517_vm1, %v2682_v10, 0.0 }
 0x731   : > { %v2774_v47 = vadd.f32 %v2773_v2, %v2772_v60 }
 0x732   : > { %v2874_v41 = vsel %vm517_vm1, %v2815_v5, 0.0 }
 0x733   : > { %v2526_v46 = vpop.f32.mrf.mxu1  ;;  %v2875_v54 = vadd.f32 %v2874_v41, %v2873_v40 }
 0x734   : > { %v2527_v39 = vadd.f32 %v2526_v46, %v5116_v33 }
 0x736   : > { %v2683_v8 = vadd.f32 %v2646_v51, %v2527_v39 }
 0x738   : > { %2715 = vst.msk [vmem:[%s5126_s17 + $0xe8] sm:$0xff] %vm517_vm1, %v2683_v8  ;;  %v2816_v29 = vmul.f32 %v2683_v8, %v2683_v8  ;;  %v2775_v26 = vsel %vm517_vm1, %v2683_v8, 0.0 }
 0x739   : > { %v2776_v32 = vadd.f32 %v2775_v26, %v2774_v47 }
 0x73a   : > { %v2876_v22 = vsel %vm517_vm1, %v2816_v29, 0.0 }
 0x73b   : > { %v2529_v1 = vpop.f32.mrf.mxu1  ;;  %v2877_v10 = vadd.f32 %v2876_v22, %v2875_v54 }
 0x73c   : > { %v2530_v38 = vadd.f32 %v2529_v1, %v5116_v33 }
 0x73e   : > { %v2684_v20 = vadd.f32 %v2649_v42, %v2530_v38 }
 0x740   : > { %2716 = vst.msk [vmem:[%s5126_s17 + $0xf0] sm:$0xff] %vm517_vm1, %v2684_v20  ;;  %v2817_v50 = vmul.f32 %v2684_v20, %v2684_v20  ;;  %v2777_v12 = vsel %vm517_vm1, %v2684_v20, 0.0 }
 0x741   : > { %v2778_v4 = vadd.f32 %v2777_v12, %v2776_v32 }
 0x742   : > { %v2878_v11 = vsel %vm517_vm1, %v2817_v50, 0.0 }
 0x743   : > { %v2532_v49 = vpop.f32.mrf.mxu1  ;;  %v2879_v0 = vadd.f32 %v2878_v11, %v2877_v10 }
 0x744   : > { %v2533_v63 = vadd.f32 %v2532_v49, %v5116_v33 }
 0x746   : > { %v2685_v35 = vadd.f32 %v2652_v55, %v2533_v63 }
 0x748   : > { %2717 = vst.msk [vmem:[%s5126_s17 + $0xf8] sm:$0xff] %vm517_vm1, %v2685_v35  ;;  %v2779_v62 = vsel %vm517_vm1, %v2685_v35, 0.0  ;;  %v2818_v56 = vmul.f32 %v2685_v35, %v2685_v35 }
 0x749   : > { %v2780_v51 = vadd.f32 %v2779_v62, %v2778_v4 }
 0x74a   : > { %v2880_v46 = vsel %vm517_vm1, %v2818_v56, 0.0 }
 0x74b   : > { %v2781_v36 = vrot.slane %v2780_v51, 4  ;;  %v2881_v21 = vadd.f32 %v2880_v46, %v2879_v0 }
 0x74d   : > { %v2782_v33 = vadd.f32 %v2781_v36, %v2780_v51  ;;  %v2882_v7 = vrot.slane %v2881_v21, 4 }
 0x74f   : > { %v2783_v39 = vrot.slane %v2782_v33, 2  ;;  %v2883_v28 = vadd.f32 %v2882_v7, %v2881_v21 }
 0x751   : > { %v2784_v13 = vadd.f32 %v2783_v39, %v2782_v33  ;;  %v2884_v43 = vrot.slane %v2883_v28, 2 }
 0x753   : > { %v2785_v61 = vrot.slane %v2784_v13, 1  ;;  %v2885_v8 = vadd.f32 %v2884_v43, %v2883_v28 }
 0x755   : > { %v2886_v59 = vrot.slane %v2885_v8, 1  ;;  %v2786_v31 = vadd.f32 %v2785_v61, %v2784_v13 }
 0x757   : > { %v2887_v58 = vadd.f32 %v2886_v59, %v2885_v8 }
 0x759   : > { %v2888_v27 = vsel %vm1859_vm2, %v2786_v31, %v2887_v58 }
 0x75a   : > { %2890 = vst.msk [vmem:[%s478_s21] sm:$0x3] %vm2889_vm6, %v2888_v27 }
 0x75b PF: > { %s25_s29 = sadd.s32 1, %s3215_s29  }
 0x75c   : > { %p22_p4 = scmp.ge.s32.totalorder %s25_s29, 4  }
 0x75e   :  { %24 = sbr.rel (!%p22_p4) target bundleno = 1 (0x1), region = 114 }

</bundles_post_ra>
